<compile_context>
chip_gen: v7x
topology: tpu7x:2x2x1
jax: 0.10.0
libtpu: 0.0.40
codegen_flags: <defaults>
</compile_context>

<pallas_src>
import functools
import numpy as np

import jax
import jax.numpy as jnp
from jax.experimental import pallas as pl
from jax.experimental.pallas import tpu as pltpu

LN_EPS = 1e-5  # nn.LayerNorm default


def _gelu_tanh(x):
    # TODO(synk): nn.GELU default is the exact erf-based GELU; using the tanh
    # approximation since erf lowering in Mosaic is not guaranteed (~1e-3 difference).
    return 0.5 * x * (1.0 + jnp.tanh(0.7978845608028654 * (x + 0.044715 * x * x * x)))


# ------------------------- hardware-dependent config -------------------------

def _tpu_vmem_capacity():
    try:
        return int(pltpu.get_tpu_info().vmem_capacity_bytes)
    except Exception:
        return 64 * 1024 * 1024  # conservative (v7x-sized) fallback


_VMEM_CAP = _tpu_vmem_capacity()
_BIG_VMEM = _VMEM_CAP >= 100 * 1024 * 1024      # v5e / v6e: 128 MiB, v7x: 64 MiB
_VMEM_LIMIT = (96 if _BIG_VMEM else 48) * 1024 * 1024
_MAX_ATTN_ROWS = 2048 if _BIG_VMEM else 1024
_MAX_MLP_ROWS = 2048 if _BIG_VMEM else 1024
_MAX_HIDDEN_TILE = 4096 if _BIG_VMEM else 2048


@functools.lru_cache(maxsize=None)
def _mosaic_supports_head_transpose():
    """Probe whether Mosaic lowers the reshape + (1,0,2) transpose head split/merge."""
    def probe(x_ref, o_ref):
        t = jnp.transpose(x_ref[...].reshape(128, 6, 16), (1, 0, 2))   # (6,128,16)
        q = t[:2].reshape(2 * 8, 16, 16)                               # (16,16,16)
        c = jnp.transpose(q.reshape(2, 128, 16), (1, 0, 2)).reshape(128, 32)
        o_ref[...] = c
    try:
        x = jnp.zeros((128, 96), jnp.bfloat16)
        out = pl.pallas_call(
            probe, out_shape=jax.ShapeDtypeStruct((128, 32), jnp.bfloat16))(x)
        jax.block_until_ready(out)
        return True
    except Exception:
        return False


@functools.lru_cache(maxsize=None)
def _mosaic_supports_single_buffering():
    """Probe whether pipeline_mode=pl.Buffered(1) is accepted on constant operands."""
    def probe(x_ref, w_ref, o_ref):
        o_ref[...] = x_ref[...] + w_ref[...]
    try:
        x = jnp.zeros((16, 128), jnp.float32)
        w = jnp.zeros((1, 128), jnp.float32)
        out = pl.pallas_call(
            probe,
            out_shape=jax.ShapeDtypeStruct((16, 128), jnp.float32),
            grid=(2,),
            in_specs=[pl.BlockSpec((8, 128), lambda i: (i, 0)),
                      pl.BlockSpec((1, 128), lambda i: (0, 0),
                                   pipeline_mode=pl.Buffered(1))],
            out_specs=pl.BlockSpec((8, 128), lambda i: (i, 0)),
        )(x, w)
        jax.block_until_ready(out)
        return True
    except Exception:
        return False


def _const_mode():
    return pl.Buffered(1) if _mosaic_supports_single_buffering() else None


# ------------------------------ tile pickers --------------------------------

def _pick_wpg(num_windows, seq_n, batch, max_rows, min_steps=2):
    """Largest divisor of num_windows whose slab fits and keeps >=min_steps grid steps
    (so v7x's two TensorCores both get work on the 'parallel' axis)."""
    divs = [d for d in range(num_windows, 0, -1)
            if num_windows % d == 0 and d * seq_n <= max_rows and (d * seq_n) % 8 == 0]
    if not divs:
        # TODO(synk): window_size=7 (N=49) needs explicit padding of the window axis.
        return num_windows
    for d in divs:
        if (batch * num_windows) // d >= min_steps:
            return d
    return divs[0]


def _pick_row_tile(total_rows, max_tile, min_steps=2):
    cands = [c for c in (4096, 2048, 1024, 512, 256, 128, 64, 32, 16, 8)
             if c <= max_tile and total_rows % c == 0]
    for c in cands:
        if total_rows // c >= min_steps:
            return c
    return cands[0] if cands else total_rows


def _pick_hidden_tile(hidden, max_tile):
    if hidden <= max_tile:
        return hidden
    for c in range(max_tile - max_tile % 128, 127, -128):
        if hidden % c == 0:
            return c
    return hidden  # TODO(synk): hidden not a multiple of 128 would need padding


# ----------------------------- Pallas kernels ------------------------------

def _window_attn_kernel(x_ref, bias_ref, g_ref, b_ref, wqkv_ref, wproj_ref,
                        bproj_ref, o_ref, *, num_heads, head_dim, wpg, seq_n,
                        ngrp, n_bias_windows, use_transpose):
    """wpg windows per step: LN1 + QKV + batched MHSA (+bias/mask) + proj + residual."""
    C = num_heads * head_dim
    N = seq_n
    rows = wpg * N
    nhw = num_heads * wpg

    x = x_ref[...].astype(jnp.float32)                            # (rows, C)

    # ---- LayerNorm (norm1), f32 statistics ----
    mu = jnp.mean(x, axis=-1, keepdims=True)
    var = jnp.mean((x - mu) ** 2, axis=-1, keepdims=True)
    xn = (x - mu) * jax.lax.rsqrt(var + LN_EPS)
    xn = (xn * g_ref[...] + b_ref[...]).astype(jnp.bfloat16)

    # ---- QKV over the whole token slab (q-scale pre-folded into the weights) ----
    qkv = jnp.dot(xn, wqkv_ref[...],
                  preferred_element_type=jnp.float32).astype(jnp.bfloat16)  # (rows, 3C)

    # ---- split heads: one reshape + one transpose (no per-head lane slices) ----
    if use_transpose:
        t = jnp.transpose(qkv.reshape(rows, 3 * num_heads, head_dim), (1, 0, 2))
        t = t.reshape(3 * nhw, N, head_dim)
        q, k, v = t[:nhw], t[nhw:2 * nhw], t[2 * nhw:]
    else:  # fallback path if Mosaic rejects the (1,0,2) transpose
        def grab(col0):
            parts = [qkv[:, col0 + h * head_dim: col0 + (h + 1) * head_dim]
                     for h in range(num_heads)]
            return jnp.stack(parts, axis=0).reshape(nhw, N, head_dim)
        q, k, v = grab(0), grab(C), grab(2 * C)

    # ---- batched scores: every (head, window) pair in one MXU pass ----
    s = jnp.einsum('bqd,bkd->bqk', q, k,
                   preferred_element_type=jnp.float32)            # (nh*wpg, N, N)
    s = s.reshape(num_heads, wpg, N, N)

    # relative-position bias (+ shift mask), bf16 resident; broadcast over windows
    if n_bias_windows == 1 or ngrp == 1:
        bias = bias_ref[...].astype(jnp.float32)                  # (nh,1|wpg,N,N)
    else:
        grp = pl.program_id(0) % ngrp
        bias = bias_ref[:, pl.ds(grp * wpg, wpg)].astype(jnp.float32)
    s = s + bias

    # TODO(synk): softmax last dim is N (<128) -> lane-sparse VPU/EUP work; a lane-dense
    # (N, wpg*N) score layout would raise occupancy for production ws=7 shapes.
    m = jnp.max(s, axis=-1, keepdims=True)
    e = jnp.exp(s - m)
    p = e * pl.reciprocal(jnp.sum(e, axis=-1, keepdims=True), approx=True)
    p = p.reshape(nhw, N, N).astype(jnp.bfloat16)

    ctx = jnp.einsum('bqk,bkd->bqd', p, v,
                     preferred_element_type=jnp.float32)          # (nh*wpg, N, hd)
    ctx = ctx.astype(jnp.bfloat16)
    if use_transpose:
        ctx = jnp.transpose(ctx.reshape(num_heads, rows, head_dim), (1, 0, 2))
        ctx = ctx.reshape(rows, C)
    else:
        c3 = ctx.reshape(num_heads, rows, head_dim)
        ctx = jnp.concatenate([c3[h] for h in range(num_heads)], axis=-1)

    out = jnp.dot(ctx, wproj_ref[...],
                  preferred_element_type=jnp.float32) + bproj_ref[...]
    # fused first residual: shortcut == x_rows under the same roll/window permutation
    o_ref[...] = (x + out).astype(o_ref.dtype)


def _residual_mlp_kernel(y_ref, g_ref, b_ref, w1_ref, b1_ref, w2_ref, b2_ref,
                         o_ref, xn_sc, acc_sc):
    """Row tile of tokens, hidden axis tiled: out = y + fc2(gelu(fc1(LN(y))))."""
    k = pl.program_id(1)

    @pl.when(k == 0)
    def _():
        y = y_ref[...].astype(jnp.float32)
        mu = jnp.mean(y, axis=-1, keepdims=True)
        var = jnp.mean((y - mu) ** 2, axis=-1, keepdims=True)
        xn = (y - mu) * jax.lax.rsqrt(var + LN_EPS)
        xn_sc[...] = (xn * g_ref[...] + b_ref[...]).astype(jnp.bfloat16)
        acc_sc[...] = jnp.zeros_like(acc_sc)

    h = jnp.dot(xn_sc[...], w1_ref[...],
                preferred_element_type=jnp.float32) + b1_ref[...]
    h = _gelu_tanh(h)
    acc_sc[...] += jnp.dot(h.astype(jnp.bfloat16), w2_ref[...],
                           preferred_element_type=jnp.float32)

    @pl.when(k == pl.num_programs(1) - 1)
    def _():
        y = y_ref[...].astype(jnp.float32)
        o_ref[...] = (y + acc_sc[...] + b2_ref[...]).astype(o_ref.dtype)


# ----------------------------- Pallas wrappers -----------------------------

def window_attention_pallas(x_rows, attn_bias, gamma, beta, wqkv, wproj, bproj,
                            *, num_heads, seq_n, num_windows, batch):
    """x_rows: (B*nW*N, C) bf16 window-major token rows; attn_bias: (nh, nW|1, N, N)."""
    Rt, C = x_rows.shape
    head_dim = C // num_heads
    wpg = _pick_wpg(num_windows, seq_n, batch, _MAX_ATTN_ROWS)
    ngrp = num_windows // wpg
    rows = wpg * seq_n
    n_bias_windows = attn_bias.shape[1]
    kernel = functools.partial(
        _window_attn_kernel, num_heads=num_heads, head_dim=head_dim, wpg=wpg,
        seq_n=seq_n, ngrp=ngrp, n_bias_windows=n_bias_windows,
        use_transpose=_mosaic_supports_head_transpose())
    const = _const_mode()
    return pl.pallas_call(
        kernel,
        out_shape=jax.ShapeDtypeStruct((Rt, C), jnp.bfloat16),
        grid=(Rt // rows,),
        in_specs=[
            pl.BlockSpec((rows, C), lambda i: (i, 0)),
            # constant index_map: DMA'd once, single-buffered when supported
            pl.BlockSpec((num_heads, n_bias_windows, seq_n, seq_n),
                         lambda i: (0, 0, 0, 0), pipeline_mode=const),
            pl.BlockSpec((1, C), lambda i: (0, 0), pipeline_mode=const),
            pl.BlockSpec((1, C), lambda i: (0, 0), pipeline_mode=const),
            pl.BlockSpec((C, 3 * C), lambda i: (0, 0), pipeline_mode=const),
            pl.BlockSpec((C, C), lambda i: (0, 0), pipeline_mode=const),
            pl.BlockSpec((1, C), lambda i: (0, 0), pipeline_mode=const),
        ],
        out_specs=pl.BlockSpec((rows, C), lambda i: (i, 0)),
        compiler_params=pltpu.CompilerParams(
            dimension_semantics=("parallel",),
            vmem_limit_bytes=_VMEM_LIMIT),
    )(x_rows, attn_bias, gamma, beta, wqkv, wproj, bproj)


def residual_mlp_pallas(y, gamma, beta, w1, b1, w2, b2):
    """y: (R, C) bf16 (already includes the first residual). Returns (R, C) bf16."""
    R, C = y.shape
    hidden = w1.shape[1]
    TM = _pick_row_tile(R, _MAX_MLP_ROWS)
    TH = _pick_hidden_tile(hidden, _MAX_HIDDEN_TILE)
    n_k = hidden // TH
    const = _const_mode()
    wmode = const if n_k == 1 else None
    row_spec = pl.BlockSpec((TM, C), lambda i, k: (i, 0))
    return pl.pallas_call(
        _residual_mlp_kernel,
        out_shape=jax.ShapeDtypeStruct((R, C), jnp.bfloat16),
        grid=(R // TM, n_k),
        in_specs=[row_spec,
                  pl.BlockSpec((1, C), lambda i, k: (0, 0), pipeline_mode=const),
                  pl.BlockSpec((1, C), lambda i, k: (0, 0), pipeline_mode=const),
                  pl.BlockSpec((C, TH), lambda i, k: (0, k), pipeline_mode=wmode),
                  pl.BlockSpec((1, TH), lambda i, k: (0, k), pipeline_mode=wmode),
                  pl.BlockSpec((TH, C), lambda i, k: (k, 0), pipeline_mode=wmode),
                  pl.BlockSpec((1, C), lambda i, k: (0, 0), pipeline_mode=const)],
        out_specs=row_spec,
        scratch_shapes=[pltpu.VMEM((TM, C), jnp.bfloat16),
                        pltpu.VMEM((TM, C), jnp.float32)],
        compiler_params=pltpu.CompilerParams(
            dimension_semantics=("parallel", "arbitrary"),
            vmem_limit_bytes=_VMEM_LIMIT),
    )(y, gamma, beta, w1, b1, w2, b2)


# ------------------------------- JAX glue -----------------------------------

def window_partition_jax(x, ws):
    B, H, W, C = x.shape
    x = x.reshape(B, H // ws, ws, W // ws, ws, C)
    x = jnp.transpose(x, (0, 1, 3, 2, 4, 5))
    return x.reshape(-1, ws, ws, C)


def window_reverse_jax(windows, ws, H, W):
    B = windows.shape[0] // ((H // ws) * (W // ws))
    x = windows.reshape(B, H // ws, W // ws, ws, ws, -1)
    x = jnp.transpose(x, (0, 1, 3, 2, 4, 5))
    return x.reshape(B, H, W, -1)


def _relative_position_index(ws):
    coords = np.stack(np.meshgrid(np.arange(ws), np.arange(ws), indexing="ij"))
    coords_flatten = coords.reshape(2, -1)                              # (2, N)
    rel = coords_flatten[:, :, None] - coords_flatten[:, None, :]       # (2, N, N)
    rel = rel.transpose(1, 2, 0).astype(np.int64)
    rel[:, :, 0] += ws - 1
    rel[:, :, 1] += ws - 1
    rel[:, :, 0] *= 2 * ws - 1
    return rel.sum(-1)                                                  # (N, N)


def _attn_mask_np(H, W, ws, shift):
    N = ws * ws
    img_mask = np.zeros((1, H, W, 1), np.float32)
    slices = (slice(0, -ws), slice(-ws, -shift), slice(-shift, None))
    cnt = 0
    for hs in slices:
        for wsl in slices:
            img_mask[:, hs, wsl, :] = cnt
            cnt += 1
    mw = img_mask.reshape(1, H // ws, ws, W // ws, ws, 1)
    mw = mw.transpose(0, 1, 3, 2, 4, 5).reshape(-1, N)
    diff = mw[:, None, :] - mw[:, :, None]
    return np.where(diff != 0, -100.0, 0.0).astype(np.float32)


def init_basic_layer_params(key, dim, input_resolution, depth, num_heads,
                            window_size, mlp_ratio=4.0):
    H, W = input_resolution
    hidden = int(dim * mlp_ratio)
    head_dim = dim // num_heads
    scale = head_dim ** (-0.5)
    blocks = []
    for i in range(depth):
        ws = window_size
        shift = 0 if i % 2 == 0 else window_size // 2
        if min(input_resolution) <= window_size:
            shift = 0
            ws = min(input_resolution)
        N = ws * ws
        rpi = _relative_position_index(ws)

        k = jax.random.fold_in(key, i)
        ks = jax.random.split(k, 6)
        table = 0.02 * jax.random.normal(ks[0], ((2 * ws - 1) ** 2, num_heads), jnp.float32)
        rel_bias = table[rpi.reshape(-1)].reshape(N, N, num_heads)
        rel_bias = jnp.transpose(rel_bias, (2, 0, 1))                   # (nh, N, N)
        if shift > 0:
            mask = jnp.asarray(_attn_mask_np(H, W, ws, shift))          # (nW, N, N)
            attn_bias = rel_bias[:, None, :, :] + mask[None, :, :, :]   # (nh, nW, N, N)
        else:
            attn_bias = rel_bias[:, None, :, :]                         # (nh, 1, N, N)

        # QKV weight (in, 3*out) with the 1/sqrt(head_dim) scale folded into Q columns.
        wqkv = 0.02 * jax.random.normal(ks[1], (dim, 3 * dim), jnp.float32)
        col_scale = jnp.concatenate([jnp.full((dim,), scale, jnp.float32),
                                     jnp.ones((2 * dim,), jnp.float32)])
        wqkv = wqkv * col_scale[None, :]

        blocks.append(dict(
            window_size=ws, shift_size=shift,
            attn_bias=attn_bias.astype(jnp.bfloat16),
            g1=jnp.ones((1, dim), jnp.float32),
            b1=jnp.zeros((1, dim), jnp.float32),
            wqkv=wqkv.astype(jnp.bfloat16),
            wproj=(0.02 * jax.random.normal(ks[2], (dim, dim), jnp.float32)
                   ).astype(jnp.bfloat16),
            bproj=0.01 * jax.random.normal(ks[3], (1, dim), jnp.float32),
            g2=jnp.ones((1, dim), jnp.float32),
            b2=jnp.zeros((1, dim), jnp.float32),
            w1=(0.02 * jax.random.normal(ks[4], (dim, hidden), jnp.float32)
                ).astype(jnp.bfloat16),
            bb1=jnp.zeros((1, hidden), jnp.float32),
            w2=(0.02 * jax.random.normal(ks[5], (hidden, dim), jnp.float32)
                ).astype(jnp.bfloat16),
            bb2=jnp.zeros((1, dim), jnp.float32),
        ))
    return blocks


def swin_block_forward(x, p, *, input_resolution, num_heads):
    H, W = input_resolution
    B, L, C = x.shape
    ws, shift = p["window_size"], p["shift_size"]
    N = ws * ws
    nW = (H // ws) * (W // ws)

    x_img = x.reshape(B, H, W, C)
    if shift > 0:
        x_img = jnp.roll(x_img, shift=(-shift, -shift), axis=(1, 2))
    x_rows = window_partition_jax(x_img, ws).reshape(-1, C).astype(jnp.bfloat16)

    # LN1 + window-MHSA + proj + first residual fused in one kernel.
    y_rows = window_attention_pallas(
        x_rows, p["attn_bias"], p["g1"], p["b1"], p["wqkv"], p["wproj"], p["bproj"],
        num_heads=num_heads, seq_n=N, num_windows=nW, batch=B)          # bf16

    y_img = window_reverse_jax(y_rows.reshape(-1, ws, ws, C), ws, H, W)
    if shift > 0:
        y_img = jnp.roll(y_img, shift=(shift, shift), axis=(1, 2))
    y_flat = y_img.reshape(B * L, C)

    # TODO(synk): the window_reverse + roll round trip could be folded into the MLP
    # kernel's input index_map with scalar-prefetched row indices (PrefetchScalarGridSpec)
    # to save one (B,L,C) HBM read+write per block.
    out = residual_mlp_pallas(y_flat, p["g2"], p["b2"],
                              p["w1"], p["bb1"], p["w2"], p["bb2"])
    return out.reshape(B, L, C)


def basic_layer_forward(x, block_params, *, input_resolution, num_heads):
    orig_dtype = x.dtype
    y = x.astype(jnp.bfloat16)      # bf16 activation stream between kernels / blocks
    for p in block_params:
        y = swin_block_forward(y, p, input_resolution=input_resolution,
                               num_heads=num_heads)
    # downsample is None in this configuration (BasicLayer(downsample=None))
    return y.astype(orig_dtype)


# --------------------------- pure-JAX f32 reference --------------------------

def _reference_block(x, p, *, input_resolution, num_heads):
    H, W = input_resolution
    B, L, C = x.shape
    ws, shift = p["window_size"], p["shift_size"]
    N = ws * ws
    nW = (H // ws) * (W // ws)
    nh = num_heads
    hd = C // nh

    def ln(v, g, b):
        mu = v.mean(-1, keepdims=True)
        var = ((v - mu) ** 2).mean(-1, keepdims=True)
        return (v - mu) * jax.lax.rsqrt(var + LN_EPS) * g.reshape(-1) + b.reshape(-1)

    shortcut = x
    xi = ln(x, p["g1"], p["b1"]).reshape(B, H, W, C)
    if shift > 0:
        xi = jnp.roll(xi, (-shift, -shift), (1, 2))
    xw = window_partition_jax(xi, ws).reshape(-1, N, C)
    qkv = xw @ p["wqkv"].astype(jnp.float32)                          # scale folded in
    qkv = qkv.reshape(-1, N, 3, nh, hd).transpose(2, 0, 3, 1, 4)      # (3,B_,nh,N,hd)
    q, k, v = qkv[0], qkv[1], qkv[2]
    attn = jnp.einsum('bhqd,bhkd->bhqk', q, k)
    bias = jnp.broadcast_to(p["attn_bias"].astype(jnp.float32), (nh, nW, N, N))
    attn = attn.reshape(B, nW, nh, N, N) + bias.transpose(1, 0, 2, 3)[None]
    attn = jax.nn.softmax(attn, axis=-1).reshape(-1, nh, N, N)
    ctx = jnp.einsum('bhqk,bhkd->bhqd', attn, v)
    ctx = ctx.transpose(0, 2, 1, 3).reshape(-1, N, C)
    out = ctx @ p["wproj"].astype(jnp.float32) + p["bproj"].reshape(-1)
    out = window_reverse_jax(out.reshape(-1, ws, ws, C), ws, H, W)
    if shift > 0:
        out = jnp.roll(out, (shift, shift), (1, 2))
    y = shortcut + out.reshape(B, L, C)
    h = ln(y, p["g2"], p["b2"]) @ p["w1"].astype(jnp.float32) + p["bb1"].reshape(-1)
    h = _gelu_tanh(h)
    return y + h @ p["w2"].astype(jnp.float32) + p["bb2"].reshape(-1)


# --------------------------------- main -------------------------------------

if __name__ == "__main__":
    B = 2
    dim = 32
    H = W = 16
    depth = 2          # block 0: shift=0, block 1: shift=window_size//2
    num_heads = 2
    window_size = 4

    key = jax.random.PRNGKey(0)
    xkey, pkey = jax.random.split(key)
    x = jax.random.normal(xkey, (B, H * W, dim), jnp.float32)   # (B, L, C)

    params = init_basic_layer_params(pkey, dim, (H, W), depth, num_heads,
                                     window_size, mlp_ratio=4.0)

    out = basic_layer_forward(x, params, input_resolution=(H, W),
                              num_heads=num_heads)
    out = jax.block_until_ready(out)
    assert out.shape == (B, H * W, dim), out.shape
    assert bool(jnp.all(jnp.isfinite(out)))

    ref = x
    for p in params:
        ref = _reference_block(ref, p, input_resolution=(H, W), num_heads=num_heads)
    err = float(jnp.max(jnp.abs(out.astype(jnp.float32) - ref)))
    assert err < 0.15, f"max abs error vs f32 reference too large: {err}"
    print("KERNEL_OK")
</pallas_src>

<mosaic_0001>
module attributes {stable_mosaic.version = 11 : i64} {
  func.func @probe(%arg0: memref<128x96xbf16, #tpu.memory_space<vmem>>, %arg1: memref<128x32xbf16, #tpu.memory_space<vmem>>) attributes {dimension_semantics = [], scalar_prefetch = 0 : i64, scratch_operands = 0 : i64, tpu.core_type = #tpu.core_type<tc>} {
    %c0 = arith.constant 0 : index
    %c0_0 = arith.constant 0 : index
    %0 = vector.load %arg0[%c0, %c0_0] : memref<128x96xbf16, #tpu.memory_space<vmem>>, vector<128x96xbf16>
    %1 = vector.shape_cast %0 : vector<128x96xbf16> to vector<128x6x16xbf16>
    %2 = tpu.transpose %1, [1, 0, 2] : vector<128x6x16xbf16> -> vector<6x128x16xbf16>
    %3 = vector.extract_strided_slice %2 {offsets = [0, 0, 0], sizes = [2, 128, 16], strides = [1, 1, 1]} : vector<6x128x16xbf16> to vector<2x128x16xbf16>
    %4 = vector.shape_cast %3 : vector<2x128x16xbf16> to vector<16x16x16xbf16>
    %5 = vector.shape_cast %4 : vector<16x16x16xbf16> to vector<2x128x16xbf16>
    %6 = tpu.transpose %5, [1, 0, 2] : vector<2x128x16xbf16> -> vector<128x2x16xbf16>
    %7 = vector.shape_cast %6 : vector<128x2x16xbf16> to vector<128x32xbf16>
    %c0_1 = arith.constant 0 : index
    %c0_2 = arith.constant 0 : index
    %8 = vector.load %arg1[%c0_1, %c0_2] : memref<128x32xbf16, #tpu.memory_space<vmem>>, vector<128x32xbf16>
    tpu.vector_store %arg1[%c0_1, %c0_2], %7 {strides = array<i32>} : memref<128x32xbf16, #tpu.memory_space<vmem>>, vector<128x32xbf16>,
    return
  }
}

module attributes {stable_mosaic.version = 11 : i64} {
  func.func @probe(%arg0: i32, %arg1: memref<8x128xf32, #tpu.memory_space<vmem>>, %arg2: memref<1x128xf32, #tpu.memory_space<vmem>>, %arg3: memref<8x128xf32, #tpu.memory_space<vmem>>) attributes {dimension_semantics = [#tpu.dimension_semantics<arbitrary>], iteration_bounds = array<i64: 2>, scalar_prefetch = 0 : i64, scratch_operands = 0 : i64, tpu.core_type = #tpu.core_type<tc>, window_params = [{transform_indices = @transform_0, window_bounds = array<i64: 8, 128>}, {pipeline_mode = #tpu.pipeline_mode<synchronous>, transform_indices = @transform_1, window_bounds = array<i64: 1, 128>}, {transform_indices = @transform_2, window_bounds = array<i64: 8, 128>}]} {
    %c0 = arith.constant 0 : index
    %c0_0 = arith.constant 0 : index
    %0 = vector.load %arg1[%c0, %c0_0] : memref<8x128xf32, #tpu.memory_space<vmem>>, vector<8x128xf32>
    %c0_1 = arith.constant 0 : index
    %c0_2 = arith.constant 0 : index
    %1 = vector.load %arg2[%c0_1, %c0_2] : memref<1x128xf32, #tpu.memory_space<vmem>>, vector<1x128xf32>
    %2 = vector.broadcast %1 : vector<1x128xf32> to vector<8x128xf32>
    %3 = arith.addf %0, %2 : vector<8x128xf32>
    %c0_3 = arith.constant 0 : index
    %c0_4 = arith.constant 0 : index
    %4 = vector.load %arg3[%c0_3, %c0_4] : memref<8x128xf32, #tpu.memory_space<vmem>>, vector<8x128xf32>
    tpu.vector_store %arg3[%c0_3, %c0_4], %3 {strides = array<i32>} : memref<8x128xf32, #tpu.memory_space<vmem>>, vector<8x128xf32>,
    return
  }
  func.func @transform_0(%arg0: i32) -> (i32, i32) {
    %c0_i32 = arith.constant 0 : i32
    %c0_i32_0 = arith.constant 0 : i32
    return %arg0, %c0_i32 : i32, i32
  }
  func.func @transform_1(%arg0: i32) -> (i32, i32) {
    %c0_i32 = arith.constant 0 : i32
    %c0_i32_0 = arith.constant 0 : i32
    %c0_i32_1 = arith.constant 0 : i32
    return %c0_i32, %c0_i32_0 : i32, i32
  }
  func.func @transform_2(%arg0: i32) -> (i32, i32) {
    %c0_i32 = arith.constant 0 : i32
    %c0_i32_0 = arith.constant 0 : i32
    return %arg0, %c0_i32 : i32, i32
  }
}

module attributes {stable_mosaic.version = 11 : i64} {
  func.func @_window_attn_kernel(%arg0: i32, %arg1: memref<256x32xbf16, #tpu.memory_space<vmem>>, %arg2: memref<2x1x16x16xbf16, #tpu.memory_space<vmem>>, %arg3: memref<1x32xf32, #tpu.memory_space<vmem>>, %arg4: memref<1x32xf32, #tpu.memory_space<vmem>>, %arg5: memref<32x96xbf16, #tpu.memory_space<vmem>>, %arg6: memref<32x32xbf16, #tpu.memory_space<vmem>>, %arg7: memref<1x32xf32, #tpu.memory_space<vmem>>, %arg8: memref<256x32xbf16, #tpu.memory_space<vmem>>) attributes {dimension_semantics = [#tpu.dimension_semantics<parallel>], iteration_bounds = array<i64: 2>, scalar_prefetch = 0 : i64, scratch_operands = 0 : i64, tpu.core_type = #tpu.core_type<tc>, window_params = [{transform_indices = @transform_0, window_bounds = array<i64: 256, 32>}, {pipeline_mode = #tpu.pipeline_mode<synchronous>, transform_indices = @transform_1, window_bounds = array<i64: 2, 1, 16, 16>}, {pipeline_mode = #tpu.pipeline_mode<synchronous>, transform_indices = @transform_2, window_bounds = array<i64: 1, 32>}, {pipeline_mode = #tpu.pipeline_mode<synchronous>, transform_indices = @transform_3, window_bounds = array<i64: 1, 32>}, {pipeline_mode = #tpu.pipeline_mode<synchronous>, transform_indices = @transform_4, window_bounds = array<i64: 32, 96>}, {pipeline_mode = #tpu.pipeline_mode<synchronous>, transform_indices = @transform_5, window_bounds = array<i64: 32, 32>}, {pipeline_mode = #tpu.pipeline_mode<synchronous>, transform_indices = @transform_6, window_bounds = array<i64: 1, 32>}, {transform_indices = @transform_7, window_bounds = array<i64: 256, 32>}]} {
    %c0 = arith.constant 0 : index
    %c0_0 = arith.constant 0 : index
    %0 = vector.load %arg1[%c0, %c0_0] : memref<256x32xbf16, #tpu.memory_space<vmem>>, vector<256x32xbf16>
    %1 = arith.extf %0 : vector<256x32xbf16> to vector<256x32xf32>
    %cst = arith.constant dense<0.000000e+00> : vector<256xf32>
    %2 = vector.multi_reduction <add>, %1, %cst [1] : vector<256x32xf32> to vector<256xf32>
    %3 = vector.shape_cast %2 : vector<256xf32> to vector<256x1xf32>
    %cst_1 = arith.constant 3.200000e+01 : f32
    %4 = vector.broadcast %cst_1 : f32 to vector<256x1xf32>
    %5 = arith.divf %3, %4 : vector<256x1xf32>
    %6 = vector.broadcast %5 : vector<256x1xf32> to vector<256x32xf32>
    %7 = arith.subf %1, %6 : vector<256x32xf32>
    %8 = arith.mulf %7, %7 : vector<256x32xf32>
    %cst_2 = arith.constant dense<0.000000e+00> : vector<256xf32>
    %9 = vector.multi_reduction <add>, %8, %cst_2 [1] : vector<256x32xf32> to vector<256xf32>
    %10 = vector.shape_cast %9 : vector<256xf32> to vector<256x1xf32>
    %cst_3 = arith.constant 3.200000e+01 : f32
    %11 = vector.broadcast %cst_3 : f32 to vector<256x1xf32>
    %12 = arith.divf %10, %11 : vector<256x1xf32>
    %13 = vector.broadcast %5 : vector<256x1xf32> to vector<256x32xf32>
    %14 = arith.subf %1, %13 : vector<256x32xf32>
    %cst_4 = arith.constant 9.99999974E-6 : f32
    %15 = vector.broadcast %cst_4 : f32 to vector<256x1xf32>
    %16 = arith.addf %12, %15 : vector<256x1xf32>
    %17 = math.rsqrt %16 : vector<256x1xf32>
    %18 = vector.broadcast %17 : vector<256x1xf32> to vector<256x32xf32>
    %19 = arith.mulf %14, %18 : vector<256x32xf32>
    %c0_5 = arith.constant 0 : index
    %c0_6 = arith.constant 0 : index
    %20 = vector.load %arg3[%c0_5, %c0_6] : memref<1x32xf32, #tpu.memory_space<vmem>>, vector<1x32xf32>
    %21 = vector.broadcast %20 : vector<1x32xf32> to vector<256x32xf32>
    %22 = arith.mulf %19, %21 : vector<256x32xf32>
    %c0_7 = arith.constant 0 : index
    %c0_8 = arith.constant 0 : index
    %23 = vector.load %arg4[%c0_7, %c0_8] : memref<1x32xf32, #tpu.memory_space<vmem>>, vector<1x32xf32>
    %24 = vector.broadcast %23 : vector<1x32xf32> to vector<256x32xf32>
    %25 = arith.addf %22, %24 : vector<256x32xf32>
    %26 = arith.truncf %25 : vector<256x32xf32> to vector<256x32xbf16>
    %c0_9 = arith.constant 0 : index
    %c0_10 = arith.constant 0 : index
    %27 = vector.load %arg5[%c0_9, %c0_10] : memref<32x96xbf16, #tpu.memory_space<vmem>>, vector<32x96xbf16>
    %cst_11 = arith.constant dense<0.000000e+00> : vector<256x96xf32>
    %28 = tpu.matmul %26, %27, %cst_11 {dimension_numbers = #tpu.dot_dimension_numbers<[1], [0], [0], [1], [0, 0, 1, 1], [], []>} : vector<256x32xbf16>, vector<32x96xbf16>, vector<256x96xf32> -> vector<256x96xf32>
    %29 = arith.truncf %28 : vector<256x96xf32> to vector<256x96xbf16>
    %30 = vector.extract_strided_slice %29 {offsets = [0, 0], sizes = [256, 16], strides = [1, 1]} : vector<256x96xbf16> to vector<256x16xbf16>
    %31 = vector.extract_strided_slice %29 {offsets = [0, 16], sizes = [256, 16], strides = [1, 1]} : vector<256x96xbf16> to vector<256x16xbf16>
    %32 = vector.shape_cast %30 : vector<256x16xbf16> to vector<1x256x16xbf16>
    %33 = vector.shape_cast %31 : vector<256x16xbf16> to vector<1x256x16xbf16>
    %34 = tpu.concatenate %32, %33 in 0 : vector<1x256x16xbf16>, vector<1x256x16xbf16> -> vector<2x256x16xbf16>
    %35 = vector.shape_cast %34 : vector<2x256x16xbf16> to vector<32x16x16xbf16>
    %36 = vector.extract_strided_slice %29 {offsets = [0, 32], sizes = [256, 16], strides = [1, 1]} : vector<256x96xbf16> to vector<256x16xbf16>
    %37 = vector.extract_strided_slice %29 {offsets = [0, 48], sizes = [256, 16], strides = [1, 1]} : vector<256x96xbf16> to vector<256x16xbf16>
    %38 = vector.shape_cast %36 : vector<256x16xbf16> to vector<1x256x16xbf16>
    %39 = vector.shape_cast %37 : vector<256x16xbf16> to vector<1x256x16xbf16>
    %40 = tpu.concatenate %38, %39 in 0 : vector<1x256x16xbf16>, vector<1x256x16xbf16> -> vector<2x256x16xbf16>
    %41 = vector.shape_cast %40 : vector<2x256x16xbf16> to vector<32x16x16xbf16>
    %42 = vector.extract_strided_slice %29 {offsets = [0, 64], sizes = [256, 16], strides = [1, 1]} : vector<256x96xbf16> to vector<256x16xbf16>
    %43 = vector.extract_strided_slice %29 {offsets = [0, 80], sizes = [256, 16], strides = [1, 1]} : vector<256x96xbf16> to vector<256x16xbf16>
    %44 = vector.shape_cast %42 : vector<256x16xbf16> to vector<1x256x16xbf16>
    %45 = vector.shape_cast %43 : vector<256x16xbf16> to vector<1x256x16xbf16>
    %46 = tpu.concatenate %44, %45 in 0 : vector<1x256x16xbf16>, vector<1x256x16xbf16> -> vector<2x256x16xbf16>
    %47 = vector.shape_cast %46 : vector<2x256x16xbf16> to vector<32x16x16xbf16>
    "tpu.trace_start"() <{level = 10 : i32, message = "bqd,bkd->bqk"}> : () -> ()
    %cst_12 = arith.constant dense<0.000000e+00> : vector<32x16x16xf32>
    %48 = tpu.matmul %35, %41, %cst_12 {dimension_numbers = #tpu.dot_dimension_numbers<[2], [2], [1], [1], [0, 0, 0, 1, 1, 1], [0], [0]>} : vector<32x16x16xbf16>, vector<32x16x16xbf16>, vector<32x16x16xf32> -> vector<32x16x16xf32>
    "tpu.trace_stop"() : () -> ()
    %49 = vector.shape_cast %48 : vector<32x16x16xf32> to vector<2x16x16x16xf32>
    %c0_13 = arith.constant 0 : index
    %c0_14 = arith.constant 0 : index
    %c0_15 = arith.constant 0 : index
    %c0_16 = arith.constant 0 : index
    %50 = vector.load %arg2[%c0_13, %c0_14, %c0_15, %c0_16] : memref<2x1x16x16xbf16, #tpu.memory_space<vmem>>, vector<2x1x16x16xbf16>
    %51 = arith.extf %50 : vector<2x1x16x16xbf16> to vector<2x1x16x16xf32>
    %52 = vector.broadcast %51 : vector<2x1x16x16xf32> to vector<2x16x16x16xf32>
    %53 = arith.addf %49, %52 : vector<2x16x16x16xf32>
    %cst_17 = arith.constant dense<0xFF800000> : vector<2x16x16xf32>
    %54 = vector.multi_reduction <maximumf>, %53, %cst_17 [3] : vector<2x16x16x16xf32> to vector<2x16x16xf32>
    %55 = vector.shape_cast %54 : vector<2x16x16xf32> to vector<2x16x16x1xf32>
    %56 = vector.broadcast %55 : vector<2x16x16x1xf32> to vector<2x16x16x16xf32>
    %57 = arith.subf %53, %56 : vector<2x16x16x16xf32>
    %58 = math.exp %57 : vector<2x16x16x16xf32>
    %cst_18 = arith.constant dense<0.000000e+00> : vector<2x16x16xf32>
    %59 = vector.multi_reduction <add>, %58, %cst_18 [3] : vector<2x16x16x16xf32> to vector<2x16x16xf32>
    %60 = vector.shape_cast %59 : vector<2x16x16xf32> to vector<2x16x16x1xf32>
    %61 = tpu.reciprocal %60 {approx = true} : vector<2x16x16x1xf32> -> vector<2x16x16x1xf32>
    %62 = vector.broadcast %61 : vector<2x16x16x1xf32> to vector<2x16x16x16xf32>
    %63 = arith.mulf %58, %62 : vector<2x16x16x16xf32>
    %64 = vector.shape_cast %63 : vector<2x16x16x16xf32> to vector<32x16x16xf32>
    %65 = arith.truncf %64 : vector<32x16x16xf32> to vector<32x16x16xbf16>
    "tpu.trace_start"() <{level = 10 : i32, message = "bqk,bkd->bqd"}> : () -> ()
    %cst_19 = arith.constant dense<0.000000e+00> : vector<32x16x16xf32>
    %66 = tpu.matmul %65, %47, %cst_19 {dimension_numbers = #tpu.dot_dimension_numbers<[2], [1], [1], [2], [0, 0, 0, 1, 1, 2], [0], [0]>} : vector<32x16x16xbf16>, vector<32x16x16xbf16>, vector<32x16x16xf32> -> vector<32x16x16xf32>
    "tpu.trace_stop"() : () -> ()
    %67 = arith.truncf %66 : vector<32x16x16xf32> to vector<32x16x16xbf16>
    %68 = vector.shape_cast %67 : vector<32x16x16xbf16> to vector<2x256x16xbf16>
    %69 = vector.extract_strided_slice %68 {offsets = [0, 0, 0], sizes = [1, 256, 16], strides = [1, 1, 1]} : vector<2x256x16xbf16> to vector<1x256x16xbf16>
    %70 = vector.shape_cast %69 : vector<1x256x16xbf16> to vector<256x16xbf16>
    %71 = vector.extract_strided_slice %68 {offsets = [1, 0, 0], sizes = [1, 256, 16], strides = [1, 1, 1]} : vector<2x256x16xbf16> to vector<1x256x16xbf16>
    %72 = vector.shape_cast %71 : vector<1x256x16xbf16> to vector<256x16xbf16>
    %73 = tpu.concatenate %70, %72 in 1 : vector<256x16xbf16>, vector<256x16xbf16> -> vector<256x32xbf16>
    %c0_20 = arith.constant 0 : index
    %c0_21 = arith.constant 0 : index
    %74 = vector.load %arg6[%c0_20, %c0_21] : memref<32x32xbf16, #tpu.memory_space<vmem>>, vector<32x32xbf16>
    %cst_22 = arith.constant dense<0.000000e+00> : vector<256x32xf32>
    %75 = tpu.matmul %73, %74, %cst_22 {dimension_numbers = #tpu.dot_dimension_numbers<[1], [0], [0], [1], [0, 0, 1, 1], [], []>} : vector<256x32xbf16>, vector<32x32xbf16>, vector<256x32xf32> -> vector<256x32xf32>
    %c0_23 = arith.constant 0 : index
    %c0_24 = arith.constant 0 : index
    %76 = vector.load %arg7[%c0_23, %c0_24] : memref<1x32xf32, #tpu.memory_space<vmem>>, vector<1x32xf32>
    %77 = vector.broadcast %76 : vector<1x32xf32> to vector<256x32xf32>
    %78 = arith.addf %75, %77 : vector<256x32xf32>
    %79 = arith.addf %1, %78 : vector<256x32xf32>
    %80 = arith.truncf %79 : vector<256x32xf32> to vector<256x32xbf16>
    %c0_25 = arith.constant 0 : index
    %c0_26 = arith.constant 0 : index
    %81 = vector.load %arg8[%c0_25, %c0_26] : memref<256x32xbf16, #tpu.memory_space<vmem>>, vector<256x32xbf16>
    tpu.vector_store %arg8[%c0_25, %c0_26], %80 {strides = array<i32>} : memref<256x32xbf16, #tpu.memory_space<vmem>>, vector<256x32xbf16>,
    return
  }
  func.func @transform_0(%arg0: i32) -> (i32, i32) {
    %c0_i32 = arith.constant 0 : i32
    %c0_i32_0 = arith.constant 0 : i32
    return %arg0, %c0_i32 : i32, i32
  }
  func.func @transform_1(%arg0: i32) -> (i32, i32, i32, i32) {
    %c0_i32 = arith.constant 0 : i32
    %c0_i32_0 = arith.constant 0 : i32
    %c0_i32_1 = arith.constant 0 : i32
    %c0_i32_2 = arith.constant 0 : i32
    %c0_i32_3 = arith.constant 0 : i32
    return %c0_i32, %c0_i32_0, %c0_i32_1, %c0_i32_2 : i32, i32, i32, i32
  }
  func.func @transform_2(%arg0: i32) -> (i32, i32) {
    %c0_i32 = arith.constant 0 : i32
    %c0_i32_0 = arith.constant 0 : i32
    %c0_i32_1 = arith.constant 0 : i32
    return %c0_i32, %c0_i32_0 : i32, i32
  }
  func.func @transform_3(%arg0: i32) -> (i32, i32) {
    %c0_i32 = arith.constant 0 : i32
    %c0_i32_0 = arith.constant 0 : i32
    %c0_i32_1 = arith.constant 0 : i32
    return %c0_i32, %c0_i32_0 : i32, i32
  }
  func.func @transform_4(%arg0: i32) -> (i32, i32) {
    %c0_i32 = arith.constant 0 : i32
    %c0_i32_0 = arith.constant 0 : i32
    %c0_i32_1 = arith.constant 0 : i32
    return %c0_i32, %c0_i32_0 : i32, i32
  }
  func.func @transform_5(%arg0: i32) -> (i32, i32) {
    %c0_i32 = arith.constant 0 : i32
    %c0_i32_0 = arith.constant 0 : i32
    %c0_i32_1 = arith.constant 0 : i32
    return %c0_i32, %c0_i32_0 : i32, i32
  }
  func.func @transform_6(%arg0: i32) -> (i32, i32) {
    %c0_i32 = arith.constant 0 : i32
    %c0_i32_0 = arith.constant 0 : i32
    %c0_i32_1 = arith.constant 0 : i32
    return %c0_i32, %c0_i32_0 : i32, i32
  }
  func.func @transform_7(%arg0: i32) -> (i32, i32) {
    %c0_i32 = arith.constant 0 : i32
    %c0_i32_0 = arith.constant 0 : i32
    return %arg0, %c0_i32 : i32, i32
  }
}

</mosaic_0001>

<bundles_post_ra>
// kernel: tpu_custom_call.1
= control target key start
LH: loop header
LB: loop body
LE: loop exit
PB: predicated region body
PF: predicated region fallthrough
CT: control target
= control target key end

     0   :  { %s4536_s10 = smov 112   ;;  %s4537_s11 = smov 64   ;;  %vm4329_vm0 = vcmask 130048   ;;  %vm4410_vm1 = vcmask 257024   ;;  %s6153_s0 = inlined_call_operand.vmem [shape: bf16[128,96], index: 0, kind: input, shape index: {}]   ;;  %s6154_s1 = inlined_call_operand.vmem [shape: bf16[128,32], index: 1, kind: output, shape index: {}]  }
   0x1   :  { %v4558_v0 = vld [vmem:[%s6153_s0 + $0x8] sm:$0xf]  ;;  %v4563_v1 = vld [vmem:[%s6153_s0] sm:$0xf]  ;;  %v4570_v2 = vld [vmem:[%s6153_s0 + $0xc] sm:$0xf] }
   0x2   :  { %45 = vrot.lane.b32.xlu1 %v4558_v0, %s4536_s10  ;;  %41 = vrot.lane.b32.xlu0 %v4563_v1, %s4536_s10  ;;  %v4575_v3 = vld [vmem:[%s6153_s0 + $0x4] sm:$0xf]  ;;  %v4582_v4 = vld [vmem:[%s6153_s0 + $0x14] sm:$0xf]  ;;  %s4540_s12 = smov 80   ;;  %v249_v44 = vshrl.u32 %v4558_v0, 16 }
   0x3   :  { %v4587_v5 = vld [vmem:[%s6153_s0 + $0x10] sm:$0xf]  ;;  %v4594_v6 = vld [vmem:[%s6153_s0 + $0x1c] sm:$0xf]  ;;  %v4599_v7 = vld [vmem:[%s6153_s0 + $0x18] sm:$0xf] }
   0x4   :  { %v4606_v8 = vld [vmem:[%s6153_s0 + $0x24] sm:$0xf]  ;;  %v4611_v9 = vld [vmem:[%s6153_s0 + $0x20] sm:$0xf]  ;;  %v4618_v10 = vld [vmem:[%s6153_s0 + $0x2c] sm:$0xf] }
   0x5   :  { %v4623_v11 = vld [vmem:[%s6153_s0 + $0x28] sm:$0xf]  ;;  %v4630_v12 = vld [vmem:[%s6153_s0 + $0x34] sm:$0xf]  ;;  %v4635_v13 = vld [vmem:[%s6153_s0 + $0x30] sm:$0xf] }
   0x6   :  { %47 = vrot.lane.b32.xlu1 %v4570_v2, %s4536_s10  ;;  %43 = vrot.lane.b32.xlu0 %v4575_v3, %s4536_s10  ;;  %v4642_v14 = vld [vmem:[%s6153_s0 + $0x3c] sm:$0xf]  ;;  %v4647_v15 = vld [vmem:[%s6153_s0 + $0x38] sm:$0xf]  ;;  %s4538_s0 = smov 48   ;;  %v205_v45 = vshrl.u32 %v4563_v1, 16 }
   0x7   :  { %6178 = vst [vmem:[#allocation2_spill] sm:$0xff] %v4647_v15  ;;  %v271_v48 = vshrl.u32 %v4570_v2, 16  ;;  %v227_v49 = vshrl.u32 %v4575_v3, 16  ;;  %v315_v50 = vshrl.u32 %v4582_v4, 16  ;;  %v293_v51 = vshrl.u32 %v4587_v5, 16  ;;  %s4544_s13 = smov 16  }
   0x8   :  { %v359_v54 = vshrl.u32 %v4594_v6, 16  ;;  %v337_v55 = vshrl.u32 %v4599_v7, 16 }
   0xa   :  { %51 = vrot.lane.b32.xlu1 %v4582_v4, %s4536_s10  ;;  %49 = vrot.lane.b32.xlu0 %v4587_v5, %s4536_s10 }
   0xe   :  { %55 = vrot.lane.b32.xlu1 %v4594_v6, %s4536_s10  ;;  %53 = vrot.lane.b32.xlu0 %v4599_v7, %s4536_s10 }
  0x12   :  { %59 = vrot.lane.b32.xlu1 %v4606_v8, %s4536_s10  ;;  %57 = vrot.lane.b32.xlu0 %v4611_v9, %s4536_s10 }
  0x16   :  { %63 = vrot.lane.b32.xlu1 %v4618_v10, %s4536_s10  ;;  %61 = vrot.lane.b32.xlu0 %v4623_v11, %s4536_s10 }
  0x1a   :  { %67 = vrot.lane.b32.xlu1 %v4630_v12, %s4536_s10  ;;  %65 = vrot.lane.b32.xlu0 %v4635_v13, %s4536_s10 }
  0x1e   :  { %71 = vrot.lane.b32.xlu1 %v4642_v14, %s4536_s10  ;;  %69 = vrot.lane.b32.xlu0 %v4647_v15, %s4536_s10  ;;  %s4539_s10 = smov 96  }
  0x22   :  { %139 = vrot.lane.b32.xlu1 %v4575_v3, %s4537_s11  ;;  %137 = vrot.lane.b32.xlu0 %v4563_v1, %s4537_s11 }
  0x26   :  { %143 = vrot.lane.b32.xlu1 %v4570_v2, %s4537_s11  ;;  %141 = vrot.lane.b32.xlu0 %v4558_v0, %s4537_s11 }
  0x2a   :  { %147 = vrot.lane.b32.xlu1 %v4582_v4, %s4537_s11  ;;  %145 = vrot.lane.b32.xlu0 %v4587_v5, %s4537_s11 }
  0x2e   :  { %151 = vrot.lane.b32.xlu1 %v4594_v6, %s4537_s11  ;;  %149 = vrot.lane.b32.xlu0 %v4599_v7, %s4537_s11 }
  0x32   :  { %155 = vrot.lane.b32.xlu1 %v4606_v8, %s4537_s11  ;;  %153 = vrot.lane.b32.xlu0 %v4611_v9, %s4537_s11 }
  0x36   :  { %159 = vrot.lane.b32.xlu1 %v4618_v10, %s4537_s11  ;;  %157 = vrot.lane.b32.xlu0 %v4623_v11, %s4537_s11 }
  0x3a   :  { %163 = vrot.lane.b32.xlu1 %v4630_v12, %s4537_s11  ;;  %161 = vrot.lane.b32.xlu0 %v4635_v13, %s4537_s11 }
  0x3e   :  { %167 = vrot.lane.b32.xlu1 %v4642_v14, %s4537_s11  ;;  %165 = vrot.lane.b32.xlu0 %v4647_v15, %s4537_s11 }
  0x42   :  { %171 = vrot.lane.b32.xlu1 %v4575_v3, %s4538_s0  ;;  %169 = vrot.lane.b32.xlu0 %v4563_v1, %s4538_s0 }
  0x46   :  { %175 = vrot.lane.b32.xlu1 %v4570_v2, %s4538_s0  ;;  %173 = vrot.lane.b32.xlu0 %v4558_v0, %s4538_s0 }
  0x4a   :  { %179 = vrot.lane.b32.xlu1 %v4582_v4, %s4538_s0  ;;  %177 = vrot.lane.b32.xlu0 %v4587_v5, %s4538_s0 }
  0x4e   :  { %183 = vrot.lane.b32.xlu1 %v4594_v6, %s4538_s0  ;;  %181 = vrot.lane.b32.xlu0 %v4599_v7, %s4538_s0 }
  0x52   :  { %187 = vrot.lane.b32.xlu1 %v4606_v8, %s4538_s0  ;;  %185 = vrot.lane.b32.xlu0 %v4611_v9, %s4538_s0 }
  0x56   :  { %191 = vrot.lane.b32.xlu1 %v4618_v10, %s4538_s0  ;;  %189 = vrot.lane.b32.xlu0 %v4623_v11, %s4538_s0 }
  0x5a   :  { %195 = vrot.lane.b32.xlu1 %v4630_v12, %s4538_s0  ;;  %193 = vrot.lane.b32.xlu0 %v4635_v13, %s4538_s0 }
  0x5e   :  { %199 = vrot.lane.b32.xlu1 %v4642_v14, %s4538_s0  ;;  %197 = vrot.lane.b32.xlu0 %v4647_v15, %s4538_s0 }
  0x62   :  { %75 = vrot.lane.b32.xlu1 %v4575_v3, %s4539_s10  ;;  %73 = vrot.lane.b32.xlu0 %v4563_v1, %s4539_s10 }
  0x66   :  { %79 = vrot.lane.b32.xlu1 %v4570_v2, %s4539_s10  ;;  %77 = vrot.lane.b32.xlu0 %v4558_v0, %s4539_s10 }
  0x6a   :  { %83 = vrot.lane.b32.xlu1 %v4582_v4, %s4539_s10  ;;  %81 = vrot.lane.b32.xlu0 %v4587_v5, %s4539_s10 }
  0x6e   :  { %87 = vrot.lane.b32.xlu1 %v4594_v6, %s4539_s10  ;;  %85 = vrot.lane.b32.xlu0 %v4599_v7, %s4539_s10 }
  0x72   :  { %91 = vrot.lane.b32.xlu1 %v4606_v8, %s4539_s10  ;;  %89 = vrot.lane.b32.xlu0 %v4611_v9, %s4539_s10 }
  0x74   :  { %v4693_v16 = vpop.permute.xlu1 %45  ;;  %v4695_v17 = vpop.permute.xlu0 %41 }
  0x75   :  { %v250_v52 = vshrl.u32 %v4693_v16, 16  ;;  %v206_v53 = vshrl.u32 %v4695_v17, 16  ;;  %v203_v58 = vpack.i.b16 %v4695_v17, %v4563_v1 }
  0x76   :  { %95 = vrot.lane.b32.xlu1 %v4618_v10, %s4539_s10  ;;  %93 = vrot.lane.b32.xlu0 %v4623_v11, %s4539_s10 }
  0x77   :  { %v4805_v61 = vpack.i.b16 %v206_v53, %v205_v45 }
  0x78   :  { %v4699_v18 = vpop.permute.xlu1 %47  ;;  %v4701_v19 = vpop.permute.xlu0 %43 }
  0x79   :  { %v272_v56 = vshrl.u32 %v4699_v18, 16  ;;  %v228_v57 = vshrl.u32 %v4701_v19, 16 }
  0x7a   :  { %99 = vrot.lane.b32.xlu1 %v4630_v12, %s4539_s10  ;;  %97 = vrot.lane.b32.xlu0 %v4635_v13, %s4539_s10 }
  0x7c   :  { %v4705_v20 = vpop.permute.xlu1 %51  ;;  %v4707_v21 = vpop.permute.xlu0 %49 }
  0x7d   :  { %v316_v63 = vshrl.u32 %v4705_v20, 16  ;;  %v294_v62 = vshrl.u32 %v4707_v21, 16 }
  0x7e   :  { %103 = vrot.lane.b32.xlu1 %v4642_v14, %s4539_s10  ;;  %101 = vrot.lane.b32.xlu0 %v4647_v15, %s4539_s10 }
  0x80   :  { %v4711_v22 = vpop.permute.xlu1 %55  ;;  %v4713_v23 = vpop.permute.xlu0 %53 }
  0x81   :  { %v338_v17 = vshrl.u32 %v4713_v23, 16 }
  0x82   :  { %107 = vrot.lane.b32.xlu1 %v4575_v3, %s4540_s12  ;;  %105 = vrot.lane.b32.xlu0 %v4563_v1, %s4540_s12  ;;  %v4815_v1 = vpack.i.b16 %v228_v57, %v227_v49  ;;  %v291_v49 = vpack.i.b16 %v4707_v21, %v4587_v5 }
  0x84   :  { %v4717_v24 = vpop.permute.xlu1 %59  ;;  %v4719_v25 = vpop.permute.xlu0 %57 }
  0x86   :  { %111 = vrot.lane.b32.xlu1 %v4570_v2, %s4540_s12  ;;  %109 = vrot.lane.b32.xlu0 %v4558_v0, %s4540_s12 }
  0x88   :  { %v4723_v26 = vpop.permute.xlu1 %63  ;;  %v4725_v27 = vpop.permute.xlu0 %61 }
  0x8a   :  { %115 = vrot.lane.b32.xlu1 %v4582_v4, %s4540_s12  ;;  %113 = vrot.lane.b32.xlu0 %v4587_v5, %s4540_s12 }
  0x8c   :  { %v4729_v28 = vpop.permute.xlu1 %67  ;;  %v4731_v29 = vpop.permute.xlu0 %65 }
  0x8e   :  { %119 = vrot.lane.b32.xlu1 %v4594_v6, %s4540_s12  ;;  %117 = vrot.lane.b32.xlu0 %v4599_v7, %s4540_s12 }
  0x90   :  { %v4735_v30 = vpop.permute.xlu1 %71  ;;  %v4737_v31 = vpop.permute.xlu0 %69 }
  0x91   :  { %6179 = vst [vmem:[#allocation3_spill] sm:$0xff] %v4735_v30  ;;  %6180 = vst [vmem:[#allocation4_spill] sm:$0xff] %v4737_v31 }
  0x92   :  { %123 = vrot.lane.b32.xlu1 %v4606_v8, %s4540_s12  ;;  %121 = vrot.lane.b32.xlu0 %v4611_v9, %s4540_s12 }
  0x94   :  { %v4741_v32 = vpop.permute.xlu1 %139  ;;  %v4743_v33 = vpop.permute.xlu0 %137 }
  0x95   :  { %v219_v45 = vshrl.u32 %v4743_v33, 16 }
  0x96   :  { %127 = vrot.lane.b32.xlu1 %v4618_v10, %s4540_s12  ;;  %125 = vrot.lane.b32.xlu0 %v4623_v11, %s4540_s12 }
  0x98   :  { %v4747_v34 = vpop.permute.xlu1 %143  ;;  %v4749_v35 = vpop.permute.xlu0 %141 }
  0x9a   :  { %131 = vrot.lane.b32.xlu1 %v4630_v12, %s4540_s12  ;;  %129 = vrot.lane.b32.xlu0 %v4635_v13, %s4540_s12 }
  0x9c   :  { %v4753_v36 = vpop.permute.xlu1 %147  ;;  %v4755_v37 = vpop.permute.xlu0 %145 }
  0x9e   :  { %135 = vrot.lane.b32.xlu1 %v4642_v14, %s4540_s12  ;;  %133 = vrot.lane.b32.xlu0 %v4647_v15, %s4540_s12 }
  0xa0   :  { %v4759_v38 = vpop.permute.xlu1 %151  ;;  %v4761_v39 = vpop.permute.xlu0 %149 }
  0xa4   :  { %v4763_v40 = vpop.permute.xlu1 %155  ;;  %v4765_v41 = vpop.permute.xlu0 %153 }
  0xa8   :  { %v4767_v42 = vpop.permute.xlu1 %159  ;;  %v4769_v43 = vpop.permute.xlu0 %157 }
  0xac   :  { %v4773_v46 = vpop.permute.xlu1 %163  ;;  %v4775_v47 = vpop.permute.xlu0 %161 }
  0xad   :  { %6181 = vst [vmem:[#allocation5_spill] sm:$0xff] %v4773_v46  ;;  %6182 = vst [vmem:[#allocation6_spill] sm:$0xff] %v4775_v47  ;;  %v247_v47 = vpack.i.b16 %v4693_v16, %v4558_v0  ;;  %v4803_v46 = vpack.i.b16 %v250_v52, %v249_v44  ;;  %v225_v0 = vpack.i.b16 %v4701_v19, %v4575_v3  ;;  %v360_v16 = vshrl.u32 %v4711_v22, 16 }
  0xae   :  { %v241_v44 = vshrl.u32 %v4741_v32, 16  ;;  %v313_v3 = vpack.i.b16 %v4705_v20, %v4582_v4  ;;  %v4825_v19 = vpack.i.b16 %v316_v63, %v315_v50  ;;  %v335_v4 = vpack.i.b16 %v4713_v23, %v4599_v7 }
  0xaf   :  { %v4845_v20 = vpack.i.b16 %v338_v17, %v337_v55  ;;  %v285_v50 = vshrl.u32 %v4747_v34, 16  ;;  %v404_v23 = vshrl.u32 %v4717_v24, 16  ;;  %v382_v55 = vshrl.u32 %v4719_v25, 16 }
  0xb0   :  { %v4793_v31 = vpop.permute.xlu1 %167  ;;  %v4795_v30 = vpop.permute.xlu0 %165  ;;  %v307_v63 = vshrl.u32 %v4755_v37, 16 }
  0xb1   :  { %6183 = vst [vmem:[#allocation7_spill] sm:$0xff] %v4793_v31  ;;  %6184 = vst [vmem:[#allocation8_spill] sm:$0xff] %v4795_v30  ;;  %v269_v30 = vpack.i.b16 %v4699_v18, %v4570_v2  ;;  %v4811_v31 = vpack.i.b16 %v272_v56, %v271_v48  ;;  %v4829_v56 = vpack.i.b16 %v294_v62, %v293_v51  ;;  %v263_v51 = vshrl.u32 %v4749_v35, 16 }
  0xb2   :  { %v329_v62 = vshrl.u32 %v4753_v36, 16 }
  0xb4   :  { %v172_v52 = vpop.permute.xlu1 %171  ;;  %v170_v53 = vpop.permute.xlu0 %169 }
  0xb5   :  { %v239_v60 = vpack.i.b16 %v172_v52, %v4741_v32  ;;  %v242_v2 = vshrl.u32 %v172_v52, 16  ;;  %v217_v18 = vpack.i.b16 %v170_v53, %v4743_v33  ;;  %v220_v48 = vshrl.u32 %v170_v53, 16 }
  0xb6   :  { %v357_v33 = vpack.i.b16 %v4711_v22, %v4594_v6  ;;  %v4841_v52 = vpack.i.b16 %v360_v16, %v359_v54 }
  0xb7   :  { %v4831_v57 = vpack.i.b16 %v242_v2, %v241_v44  ;;  %v4833_v59 = vcombine.low %v225_v0, %v239_v60  ;;  %v4835_v15 = vpack.i.b16 %v220_v48, %v219_v45  ;;  %v4837_v32 = vcombine.low %v203_v58, %v217_v18 }
  0xb8   :  { %v176_v5 = vpop.permute.xlu1 %175  ;;  %v174_v21 = vpop.permute.xlu0 %173  ;;  %v401_v48 = vpack.i.b16 %v4717_v24, %v4606_v8  ;;  %v6200_v58 = vld [vmem:[#allocation8_spill] sm:$0xff] }
  0xb9   :  { %v283_v6 = vpack.i.b16 %v176_v5, %v4747_v34  ;;  %v286_v22 = vshrl.u32 %v176_v5, 16  ;;  %v261_v54 = vpack.i.b16 %v174_v21, %v4749_v35  ;;  %v264_v7 = vshrl.u32 %v174_v21, 16 }
  0xba   :  { %v379_v5 = vpack.i.b16 %v4719_v25, %v4611_v9  ;;  %v6186_v25 = vshrl.u32 %v4611_v9, 16 }
  0xbb   :  { %v4859_v0 = vpack.i.b16 %v286_v22, %v285_v50  ;;  %v4861_v16 = vcombine.low %v269_v30, %v283_v6  ;;  %v4863_v17 = vpack.i.b16 %v264_v7, %v263_v51  ;;  %v4865_v44 = vcombine.low %v247_v47, %v261_v54  ;;  %v6194_v30 = vld [vmem:[#allocation4_spill] sm:$0xff] }
  0xbc   :  { %v180_v34 = vpop.permute.xlu1 %179  ;;  %v178_v45 = vpop.permute.xlu0 %177  ;;  %v6185_v51 = vshrl.u32 %v4606_v8, 16  ;;  %v4891_v6 = vpack.i.b16 %v382_v55, %v6186_v25  ;;  %v445_v22 = vpack.i.b16 %v4723_v26, %v4618_v10  ;;  %v448_v54 = vshrl.u32 %v4723_v26, 16 }
  0xbd   :  { %v327_v35 = vpack.i.b16 %v180_v34, %v4753_v36  ;;  %v330_v53 = vshrl.u32 %v180_v34, 16  ;;  %v305_v2 = vpack.i.b16 %v178_v45, %v4755_v37  ;;  %v308_v18 = vshrl.u32 %v178_v45, 16 }
  0xbe   :  { %v4887_v24 = vpack.i.b16 %v404_v23, %v6185_v51  ;;  %v423_v26 = vpack.i.b16 %v4725_v27, %v4623_v11  ;;  %v426_v45 = vshrl.u32 %v4725_v27, 16  ;;  %v492_v8 = vshrl.u32 %v4729_v28, 16 }
  0xbf   :  { %v4877_v21 = vpack.i.b16 %v330_v53, %v329_v62  ;;  %v4879_v50 = vcombine.low %v313_v3, %v327_v35  ;;  %v4881_v36 = vpack.i.b16 %v308_v18, %v307_v63  ;;  %v4883_v37 = vcombine.low %v291_v49, %v305_v2 }
  0xc0   :  { %v184_v7 = vpop.permute.xlu1 %183  ;;  %v182_v3 = vpop.permute.xlu0 %181  ;;  %v373_v62 = vshrl.u32 %v4759_v38, 16  ;;  %v351_v49 = vshrl.u32 %v4761_v39, 16  ;;  %v417_v35 = vshrl.u32 %v4763_v40, 16  ;;  %v395_v53 = vshrl.u32 %v4765_v41, 16 }
  0xc1   :  { %v371_v9 = vpack.i.b16 %v184_v7, %v4759_v38  ;;  %v374_v55 = vshrl.u32 %v184_v7, 16  ;;  %v349_v63 = vpack.i.b16 %v182_v3, %v4761_v39  ;;  %v352_v34 = vshrl.u32 %v182_v3, 16 }
  0xc2   :  { %v470_v47 = vshrl.u32 %v4731_v29, 16  ;;  %v514_v60 = vshrl.u32 %v6194_v30, 16 }
  0xc3   :  { %v4909_v2 = vpack.i.b16 %v374_v55, %v373_v62  ;;  %v4911_v18 = vcombine.low %v357_v33, %v371_v9  ;;  %v4913_v51 = vpack.i.b16 %v352_v34, %v351_v49  ;;  %v4915_v38 = vcombine.low %v335_v4, %v349_v63 }
  0xc4   :  { %v188_v25 = vpop.permute.xlu1 %187  ;;  %v186_v39 = vpop.permute.xlu0 %185  ;;  %v6188_v63 = vshrl.u32 %v4623_v11, 16 }
  0xc5   :  { %v415_v7 = vpack.i.b16 %v188_v25, %v4763_v40  ;;  %v418_v3 = vshrl.u32 %v188_v25, 16  ;;  %v393_v23 = vpack.i.b16 %v186_v39, %v4765_v41  ;;  %v396_v27 = vshrl.u32 %v186_v39, 16 }
  0xc6   :  { %v6187_v41 = vshrl.u32 %v4618_v10, 16  ;;  %v4939_v34 = vpack.i.b16 %v426_v45, %v6188_v63  ;;  %v489_v25 = vpack.i.b16 %v4729_v28, %v4630_v12  ;;  %v6192_v10 = vld [vmem:[#allocation6_spill] sm:$0xff] }
  0xc7   :  { %v4925_v4 = vpack.i.b16 %v418_v3, %v417_v35  ;;  %v4927_v49 = vcombine.low %v401_v48, %v415_v7  ;;  %v4929_v9 = vpack.i.b16 %v396_v27, %v395_v53  ;;  %v4931_v40 = vcombine.low %v379_v5, %v393_v23 }
  0xc8   :  { %v4935_v55 = vpack.i.b16 %v448_v54, %v6187_v41  ;;  %v467_v35 = vpack.i.b16 %v4731_v29, %v4635_v13  ;;  %v192_v48 = vpop.permute.xlu1 %191  ;;  %v190_v39 = vpop.permute.xlu0 %189  ;;  %v461_v53 = vshrl.u32 %v4767_v42, 16  ;;  %v439_v5 = vshrl.u32 %v4769_v43, 16  ;;  %v6191_v41 = vld [vmem:[#allocation5_spill] sm:$0xff] }
  0xc9   :  { %v459_v54 = vpack.i.b16 %v192_v48, %v4767_v42  ;;  %v462_v23 = vshrl.u32 %v192_v48, 16  ;;  %v437_v28 = vpack.i.b16 %v190_v39, %v4769_v43  ;;  %v440_v45 = vshrl.u32 %v190_v39, 16 }
  0xca   :  { %v6189_v29 = vshrl.u32 %v4630_v12, 16  ;;  %v6190_v3 = vshrl.u32 %v4635_v13, 16  ;;  %v505_v63 = vshrl.u32 %v6191_v41, 16  ;;  %v483_v62 = vshrl.u32 %v6192_v10, 16 }
  0xcb   :  { %v4963_v33 = vpack.i.b16 %v462_v23, %v461_v53  ;;  %v4965_v11 = vcombine.low %v445_v22, %v459_v54  ;;  %v4967_v42 = vpack.i.b16 %v440_v45, %v439_v5  ;;  %v4969_v43 = vcombine.low %v423_v26, %v437_v28  ;;  %v6198_v28 = vld [vmem:[#allocation2_spill] sm:$0xff] }
  0xcc   :  { %v4955_v7 = vpack.i.b16 %v492_v8, %v6189_v29  ;;  %v4959_v27 = vpack.i.b16 %v470_v47, %v6190_v3  ;;  %v196_v48 = vpop.permute.xlu1 %195  ;;  %v194_v12 = vpop.permute.xlu0 %193  ;;  %v6193_v29 = vld [vmem:[#allocation3_spill] sm:$0xff]  ;;  %v511_v45 = vpack.i.b16 %v6194_v30, %v6198_v28  ;;  %v527_v53 = vshrl.u32 %v6200_v58, 16 }
  0xcd   :  { %v503_v8 = vpack.i.b16 %v196_v48, %v6191_v41  ;;  %v506_v39 = vshrl.u32 %v196_v48, 16  ;;  %v481_v13 = vpack.i.b16 %v194_v12, %v6192_v10  ;;  %v484_v47 = vshrl.u32 %v194_v12, 16  ;;  %v6199_v12 = vld [vmem:[#allocation7_spill] sm:$0xff] }
  0xce   :  { %v536_v3 = vshrl.u32 %v6193_v29, 16  ;;  %v533_v10 = vpack.i.b16 %v6193_v29, %v4642_v14  ;;  %v549_v22 = vshrl.u32 %v6199_v12, 16  ;;  %v6201_v30 = vshrl.u32 %v4642_v14, 16 }
  0xcf   :  { %v4979_v26 = vpack.i.b16 %v506_v39, %v505_v63  ;;  %v4981_v5 = vcombine.low %v489_v25, %v503_v8  ;;  %v4983_v54 = vpack.i.b16 %v484_v47, %v483_v62  ;;  %v4985_v23 = vcombine.low %v467_v35, %v481_v13 }
  0xd0   :  { %v200_v41 = vpop.permute.xlu1 %199  ;;  %v198_v48 = vpop.permute.xlu0 %197  ;;  %v5001_v13 = vpack.i.b16 %v536_v3, %v6201_v30  ;;  %v6202_v47 = vshrl.u32 %v6198_v28, 16 }
  0xd1   :  { %6195 = vst [vmem:[#allocation5_spill] sm:$0xff] %v4979_v26  ;;  %6196 = vst [vmem:[#allocation6_spill] sm:$0xff] %v4983_v54  ;;  %v547_v35 = vpack.i.b16 %v200_v41, %v6199_v12  ;;  %v550_v63 = vshrl.u32 %v200_v41, 16  ;;  %v525_v8 = vpack.i.b16 %v198_v48, %v6200_v58  ;;  %v528_v39 = vshrl.u32 %v198_v48, 16 }
  0xd2   :  { %6197 = vst [vmem:[#allocation3_spill] sm:$0xff] %v4985_v23  ;;  %v5005_v29 = vpack.i.b16 %v514_v60, %v6202_v47 }
  0xd3   :  { %v5007_v23 = vpack.i.b16 %v550_v63, %v549_v22  ;;  %v1573_v25 = vcombine.low %v533_v10, %v547_v35  ;;  %v5009_v26 = vpack.i.b16 %v528_v39, %v527_v53  ;;  %v1505_v62 = vcombine.low %v511_v45, %v525_v8 }
  0xd4   :  { %v5011_v54 = vpop.permute.xlu1 %75  ;;  %v5013_v41 = vpop.permute.xlu0 %73  ;;  %v4541_v53 = vmov 1983009808   ;;  %v557_v45 = vlaneseq  ;;  %v4542_v63 = vmov 1934713408  }
  0xd5   :  { %v1607_v58 = vcombine.low %v5001_v13, %v5007_v23  ;;  %v1539_v14 = vcombine.low %v5005_v29, %v5009_v26  ;;  %v555_v28 = vunpack.c.l.s4 %v4541_v53  ;;  %v572_v8 = vunpack.c.l.s4 %v4542_v63 }
  0xd6   :  { %v558_v23 = vshrl.u32 %v557_v45, 7  ;;  %v6205_v63 = vcombine.low %v4805_v61, %v4835_v15  ;;  %v6207_v15 = vcombine.low %v4803_v46, %v4863_v17  ;;  %v6209_v46 = vcombine.low %v4829_v56, %v4881_v36 }
  0xd7   :  { %v556_v35 = vunpack.c.0.s8 %v555_v28  ;;  %v573_v13 = vunpack.c.0.s8 %v572_v8  ;;  %v6204_v28 = vcombine.low %v4815_v1, %v4831_v57  ;;  %v6206_v1 = vcombine.low %v4811_v31, %v4859_v0 }
  0xd8   :  { %v5019_v3 = vpop.permute.xlu1 %79  ;;  %v5021_v60 = vpop.permute.xlu0 %77  ;;  %v6208_v31 = vcombine.low %v4825_v19, %v4877_v21  ;;  %v6210_v19 = vcombine.low %v4841_v52, %v4909_v2  ;;  %v6211_v56 = vcombine.low %v4845_v20, %v4913_v51  ;;  %v6212_v52 = vcombine.low %v4887_v24, %v4925_v4 }
  0xd9   :  { %v5035_v30 = vsub.s32 %v556_v35, %v558_v23  ;;  %v6213_v20 = vcombine.low %v4891_v6, %v4929_v9  ;;  %v6214_v24 = vcombine.low %v4935_v55, %v4963_v33  ;;  %v6215_v6 = vcombine.low %v4939_v34, %v4967_v42  ;;  %v6217_v33 = vld [vmem:[#allocation5_spill] sm:$0xff]  ;;  %v6220_v34 = vld [vmem:[#allocation6_spill] sm:$0xff] }
  0xda   :  { %v6218_v55 = vcombine.low %v4955_v7, %v6217_v33  ;;  %v6221_v42 = vcombine.low %v4959_v27, %v6220_v34  ;;  %v278_v27 = vshrl.u32 %v5019_v3, 16 }
  0xdb   :  { %v5043_v53 = vrot.slane %v4833_v59, %v5035_v30  ;;  %v5051_v45 = vrot.slane %v6204_v28, %v5035_v30  ;;  %v5055_v35 = vrot.slane %v4837_v32, %v5035_v30  ;;  %v5061_v8 = vrot.slane %v6205_v63, %v5035_v30 }
  0xdc   :  { %v5023_v22 = vpop.permute.xlu1 %83  ;;  %v5025_v10 = vpop.permute.xlu0 %81  ;;  %v5065_v59 = vrot.slane %v4861_v16, %v5035_v30  ;;  %v5071_v57 = vrot.slane %v6206_v1, %v5035_v30  ;;  %v5075_v32 = vrot.slane %v4865_v44, %v5035_v30  ;;  %v5081_v61 = vrot.slane %v6207_v15, %v5035_v30  ;;  %v6219_v1 = vld [vmem:[#allocation3_spill] sm:$0xff] }
  0xdd   :  { %v5085_v16 = vrot.slane %v4879_v50, %v5035_v30  ;;  %v5095_v0 = vrot.slane %v6208_v31, %v5035_v30  ;;  %v5099_v44 = vrot.slane %v4883_v37, %v5035_v30  ;;  %v5105_v17 = vrot.slane %v6209_v46, %v5035_v30 }
  0xde   :  { %v5109_v50 = vrot.slane %v4911_v18, %v5035_v30  ;;  %v5115_v21 = vrot.slane %v6210_v19, %v5035_v30  ;;  %v5119_v37 = vrot.slane %v4915_v38, %v5035_v30  ;;  %v5125_v36 = vrot.slane %v6211_v56, %v5035_v30 }
  0xdf   :  { %v5129_v18 = vrot.slane %v4927_v49, %v5035_v30  ;;  %v5135_v2 = vrot.slane %v6212_v52, %v5035_v30  ;;  %v5139_v38 = vrot.slane %v4931_v40, %v5035_v30  ;;  %v5145_v51 = vrot.slane %v6213_v20, %v5035_v30 }
  0xe0   :  { %v5027_v48 = vpop.permute.xlu1 %87  ;;  %v5029_v12 = vpop.permute.xlu0 %85  ;;  %v5149_v49 = vrot.slane %v4965_v11, %v5035_v30  ;;  %v5155_v4 = vrot.slane %v6214_v24, %v5035_v30  ;;  %v5159_v40 = vrot.slane %v4969_v43, %v5035_v30  ;;  %v5165_v9 = vrot.slane %v6215_v6, %v5035_v30 }
  0xe1   :  { %6203 = vst [vmem:[#allocation4_spill] sm:$0xff] %v5029_v12  ;;  %v5045_v12 = vsub.s32 %v573_v13, %v558_v23  ;;  %v5169_v11 = vrot.slane %v4981_v5, %v5035_v30  ;;  %v5179_v43 = vrot.slane %v6218_v55, %v5035_v30  ;;  %v5183_v15 = vrot.slane %v6219_v1, %v5035_v30 }
  0xe2   :  { %v5189_v5 = vrot.slane %v6221_v42, %v5035_v30  ;;  %v234_v31 = vshrl.u32 %v5011_v54, 16  ;;  %v5193_v46 = vrot.slane %v1573_v25, %v5035_v30  ;;  %v5196_v19 = vrot.slane %v1607_v58, %v5035_v30 }
  0xe3   :  { %v5199_v7 = vrot.slane %v1505_v62, %v5035_v30  ;;  %v212_v56 = vshrl.u32 %v5013_v41, 16  ;;  %v5203_v52 = vrot.slane %v1539_v14, %v5035_v30 }
  0xe4   :  { %v5031_v26 = vpop.permute.xlu1 %91  ;;  %v5033_v39 = vpop.permute.xlu0 %89  ;;  %6222 = vst [vmem:[#allocation7_spill] sm:$0xff] %v5193_v46  ;;  %6223 = vst [vmem:[#allocation8_spill] sm:$0xff] %v5196_v19 }
  0xe5   :  { %6224 = vst [vmem:[#allocation5_spill] sm:$0xff] %v5199_v7  ;;  %6225 = vst [vmem:[#allocation3_spill] sm:$0xff] %v5203_v52 }
  0xe8   :  { %v5037_v47 = vpop.permute.xlu1 %95  ;;  %v5039_v29 = vpop.permute.xlu0 %93  ;;  %v6226_v58 = vld [vmem:[#allocation4_spill] sm:$0xff] }
  0xec   :  { %v5087_v23 = vpop.permute.xlu1 %99  ;;  %v5089_v13 = vpop.permute.xlu0 %97 }
  0xf0   :  { %v5171_v28 = vpop.permute.xlu1 %103  ;;  %v5173_v63 = vpop.permute.xlu0 %101 }
  0xf1   :  { %6216 = vst [vmem:[#allocation2_spill] sm:$0xff] %v5173_v63 }
  0xf4   :  { %v108_v55 = vpop.permute.xlu1 %107  ;;  %v106_v1 = vpop.permute.xlu0 %105 }
  0xf5   :  { %v233_v34 = vpack.i.b16 %v108_v55, %v5011_v54  ;;  %v235_v14 = vshrl.u32 %v108_v55, 16  ;;  %v211_v42 = vpack.i.b16 %v106_v1, %v5013_v41  ;;  %v213_v52 = vshrl.u32 %v106_v1, 16 }
  0xf7   :  { %v236_v7 = vpack.i.b16 %v235_v14, %v234_v31  ;;  %v636_v33 = vrot.slane %v233_v34, %v5035_v30  ;;  %v214_v62 = vpack.i.b16 %v213_v52, %v212_v56  ;;  %v568_v19 = vrot.slane %v211_v42, %v5035_v30 }
  0xf8   :  { %v112_v1 = vpop.permute.xlu1 %111  ;;  %v110_v46 = vpop.permute.xlu0 %109 }
  0xf9   :  { %v637_v20 = vcombine.low %v5043_v53, %v636_v33  ;;  %v638_v24 = vcombine.high %v5043_v53, %v636_v33  ;;  %v670_v25 = vrot.slane %v236_v7, %v5035_v30  ;;  %v569_v31 = vcombine.low %v5055_v35, %v568_v19 }
  0xfa   :  { %v570_v34 = vcombine.high %v5055_v35, %v568_v19  ;;  %v602_v56 = vrot.slane %v214_v62, %v5035_v30  ;;  %v277_v52 = vpack.i.b16 %v112_v1, %v5019_v3  ;;  %v279_v14 = vshrl.u32 %v112_v1, 16 }
  0xfb   :  { %v645_v42 = vrot.slane %v637_v20, %v5045_v12  ;;  %v652_v41 = vrot.slane %v638_v24, %v5045_v12  ;;  %v671_v55 = vcombine.low %v5051_v45, %v670_v25  ;;  %v672_v54 = vcombine.high %v5051_v45, %v670_v25 }
  0xfc   :  { %v577_v53 = vrot.slane %v569_v31, %v5045_v12  ;;  %v584_v7 = vrot.slane %v570_v34, %v5045_v12  ;;  %v603_v33 = vcombine.low %v5061_v8, %v602_v56  ;;  %v604_v35 = vcombine.high %v5061_v8, %v602_v56 }
  0xfd   :  { %v679_v19 = vrot.slane %v671_v55, %v5045_v12  ;;  %v686_v3 = vrot.slane %v672_v54, %v5045_v12  ;;  %v1689_v62 = vcombine.low %v645_v42, %v652_v41  ;;  %v4433_v20 = vcombine.high %v645_v42, %v652_v41 }
  0xfe   :  { %v611_v24 = vrot.slane %v603_v33, %v5045_v12  ;;  %v618_v1 = vrot.slane %v604_v35, %v5045_v12  ;;  %v1641_v6 = vcombine.low %v577_v53, %v584_v7  ;;  %v4431_v45 = vcombine.high %v577_v53, %v584_v7 }
  0xff   :  { %v1696_v25 = vrot.slane %v1689_v62, %v5035_v30  ;;  %v1704_v31 = vrot.slane %v4433_v20, %v5035_v30  ;;  %v1713_v34 = vcombine.low %v679_v19, %v686_v3  ;;  %v4434_v63 = vcombine.high %v679_v19, %v686_v3 }
 0x100   :  { %v1648_v8 = vrot.slane %v1641_v6, %v5035_v30  ;;  %v1656_v55 = vrot.slane %v4431_v45, %v5035_v30  ;;  %v1665_v56 = vcombine.low %v611_v24, %v618_v1  ;;  %v4432_v54 = vcombine.high %v611_v24, %v618_v1 }
 0x101   :  { %v1705_v41 = vcombine.low %v1696_v25, %v1704_v31  ;;  %v1720_v42 = vrot.slane %v1713_v34, %v5035_v30  ;;  %v1728_v33 = vrot.slane %v4434_v63, %v5035_v30  ;;  %v280_v35 = vpack.i.b16 %v279_v14, %v278_v27 }
 0x102   :  { %v1657_v53 = vcombine.low %v1648_v8, %v1656_v55  ;;  %v1672_v7 = vrot.slane %v1665_v56, %v5035_v30  ;;  %v1680_v62 = vrot.slane %v4432_v54, %v5035_v30  ;;  %v772_v19 = vrot.slane %v277_v52, %v5035_v30 }
 0x103   :  { %v1712_v6 = vrot.slane %v1705_v41, %v5045_v12  ;;  %v1729_v3 = vcombine.low %v1720_v42, %v1728_v33  ;;  %v806_v20 = vrot.slane %v280_v35, %v5035_v30  ;;  %v255_v24 = vpack.i.b16 %v110_v46, %v5021_v60 }
 0x104   :  { %v1664_v1 = vrot.slane %v1657_v53, %v5045_v12  ;;  %v1681_v45 = vcombine.low %v1672_v7, %v1680_v62  ;;  %v773_v63 = vcombine.low %v5065_v59, %v772_v19  ;;  %v774_v27 = vcombine.high %v5065_v59, %v772_v19 }
 0x105   :  { %v1736_v14 = vrot.slane %v1729_v3, %v5045_v12  ;;  %v2418_v25 = vshrl.u32 %v1712_v6, 16  ;;  %v807_v31 = vcombine.low %v5071_v57, %v806_v20  ;;  %v808_v52 = vcombine.high %v5071_v57, %v806_v20 }
 0x106   :  { %v1688_v34 = vrot.slane %v1681_v45, %v5045_v12  ;;  %v2412_v8 = vshrl.u32 %v1664_v1, 16  ;;  %v781_v55 = vrot.slane %v773_v63, %v5045_v12  ;;  %v788_v56 = vrot.slane %v774_v27, %v5045_v12  ;;  %v116_v27 = vpop.permute.xlu1 %115 }
 0x107   :  { %v5263_v54 = vpack.i.b16 %v1736_v14, %v1712_v6  ;;  %v2419_v41 = vshrl.u32 %v1736_v14, 16  ;;  %v815_v42 = vrot.slane %v807_v31, %v5045_v12  ;;  %v822_v59 = vrot.slane %v808_v52, %v5045_v12 }
 0x108   :  { %v5267_v33 = vpack.i.b16 %v1688_v34, %v1664_v1  ;;  %v2413_v35 = vshrl.u32 %v1688_v34, 16  ;;  %v1785_v53 = vcombine.low %v781_v55, %v788_v56  ;;  %v4437_v7 = vcombine.high %v781_v55, %v788_v56 }
 0x109   :  { %v5269_v57 = vpack.i.b16 %v2419_v41, %v2418_v25  ;;  %v2514_v62 = vshrl.u32 %v5263_v54, 16  ;;  %v1809_v19 = vcombine.low %v815_v42, %v822_v59  ;;  %v4438_v3 = vcombine.high %v815_v42, %v822_v59 }
 0x10a   :  { %v5272_v20 = vpack.i.b16 %v2413_v35, %v2412_v8  ;;  %v2508_v6 = vshrl.u32 %v5267_v33, 16  ;;  %v1792_v45 = vrot.slane %v1785_v53, %v5035_v30  ;;  %v1800_v63 = vrot.slane %v4437_v7, %v5035_v30  ;;  %v114_v35 = vpop.permute.xlu0 %113 }
 0x10b   :  { %v2515_v14 = vshrl.u32 %v5269_v57, 16  ;;  %v1816_v25 = vrot.slane %v1809_v19, %v5035_v30  ;;  %v1824_v31 = vrot.slane %v4438_v3, %v5035_v30  ;;  %v257_v55 = vshrl.u32 %v110_v46, 16 }
 0x10c   :  { %v2509_v34 = vshrl.u32 %v5272_v20, 16  ;;  %v1801_v8 = vcombine.low %v1792_v45, %v1800_v63  ;;  %v704_v42 = vrot.slane %v255_v24, %v5035_v30  ;;  %v321_v59 = vpack.i.b16 %v116_v27, %v5023_v22 }
 0x10d   :  { %v5285_v56 = vpack.i.b16 %v2515_v14, %v2514_v62  ;;  %v1825_v41 = vcombine.low %v1816_v25, %v1824_v31  ;;  %v6227_v19 = vshrl.u32 %v5021_v60, 16  ;;  %v323_v1 = vshrl.u32 %v116_v27, 16 }
 0x10e   :  { %v5289_v53 = vpack.i.b16 %v2509_v34, %v2508_v6  ;;  %v1808_v7 = vrot.slane %v1801_v8, %v5045_v12  ;;  %v705_v46 = vcombine.low %v5075_v32, %v704_v42  ;;  %v706_v62 = vcombine.high %v5075_v32, %v704_v42 }
 0x10f   :  { %v258_v3 = vpack.i.b16 %v257_v55, %v6227_v19  ;;  %v1832_v52 = vrot.slane %v1825_v41, %v5045_v12  ;;  %v908_v45 = vrot.slane %v321_v59, %v5035_v30  ;;  %v6228_v6 = vshrl.u32 %v5023_v22, 16 }
 0x110   :  { %v2430_v24 = vshrl.u32 %v1808_v7, 16  ;;  %v299_v25 = vpack.i.b16 %v114_v35, %v5025_v10  ;;  %v713_v27 = vrot.slane %v705_v46, %v5045_v12  ;;  %v720_v34 = vrot.slane %v706_v62, %v5045_v12 }
 0x111   :  { %v738_v63 = vrot.slane %v258_v3, %v5035_v30  ;;  %v324_v14 = vpack.i.b16 %v323_v1, %v6228_v6  ;;  %v5302_v31 = vpack.i.b16 %v1832_v52, %v1808_v7  ;;  %v2431_v60 = vshrl.u32 %v1832_v52, 16 }
 0x112   :  { %v909_v55 = vcombine.low %v5085_v16, %v908_v45  ;;  %v910_v41 = vcombine.high %v5085_v16, %v908_v45  ;;  %v1737_v1 = vcombine.low %v713_v27, %v720_v34  ;;  %v4435_v59 = vcombine.high %v713_v27, %v720_v34 }
 0x113   :  { %v739_v8 = vcombine.low %v5081_v61, %v738_v63  ;;  %v740_v32 = vcombine.high %v5081_v61, %v738_v63  ;;  %v5310_v42 = vpack.i.b16 %v2431_v60, %v2430_v24  ;;  %v2526_v22 = vshrl.u32 %v5302_v31, 16  ;;  %v120_v61 = vpop.permute.xlu1 %119 }
 0x114   :  { %v917_v19 = vrot.slane %v909_v55, %v5045_v12  ;;  %v924_v3 = vrot.slane %v910_v41, %v5045_v12  ;;  %v1744_v16 = vrot.slane %v1737_v1, %v5035_v30  ;;  %v1752_v62 = vrot.slane %v4435_v59, %v5035_v30 }
 0x115   :  { %v747_v52 = vrot.slane %v739_v8, %v5045_v12  ;;  %v754_v7 = vrot.slane %v740_v32, %v5045_v12  ;;  %v2527_v46 = vshrl.u32 %v5310_v42, 16  ;;  %v942_v63 = vrot.slane %v324_v14, %v5035_v30 }
 0x116   :  { %v1881_v6 = vcombine.low %v917_v19, %v924_v3  ;;  %v1753_v27 = vcombine.low %v1744_v16, %v1752_v62  ;;  %v4441_v34 = vcombine.high %v917_v19, %v924_v3  ;;  %v301_v8 = vshrl.u32 %v114_v35, 16 }
 0x117   :  { %v1761_v45 = vcombine.low %v747_v52, %v754_v7  ;;  %v4436_v24 = vcombine.high %v747_v52, %v754_v7  ;;  %v5323_v60 = vpack.i.b16 %v2527_v46, %v2526_v22  ;;  %v943_v41 = vcombine.low %v5095_v0, %v942_v63 }
 0x118   :  { %v944_v1 = vcombine.high %v5095_v0, %v942_v63  ;;  %v1760_v59 = vrot.slane %v1753_v27, %v5045_v12  ;;  %v1888_v52 = vrot.slane %v1881_v6, %v5035_v30  ;;  %v1896_v14 = vrot.slane %v4441_v34, %v5035_v30 }
 0x119   :  { %v1768_v32 = vrot.slane %v1761_v45, %v5035_v30  ;;  %v1776_v55 = vrot.slane %v4436_v24, %v5035_v30  ;;  %v6229_v22 = vshrl.u32 %v5025_v10, 16  ;;  %v951_v35 = vrot.slane %v943_v41, %v5045_v12 }
 0x11a   :  { %v958_v3 = vrot.slane %v944_v1, %v5045_v12  ;;  %v840_v46 = vrot.slane %v299_v25, %v5035_v30  ;;  %v2424_v16 = vshrl.u32 %v1760_v59, 16  ;;  %v1897_v62 = vcombine.low %v1888_v52, %v1896_v14 }
 0x11b   :  { %v302_v7 = vpack.i.b16 %v301_v8, %v6229_v22  ;;  %v1777_v19 = vcombine.low %v1768_v32, %v1776_v55  ;;  %v365_v45 = vpack.i.b16 %v120_v61, %v5027_v48 }
 0x11c   :  { %v1905_v63 = vcombine.low %v951_v35, %v958_v3  ;;  %v4442_v6 = vcombine.high %v951_v35, %v958_v3  ;;  %v841_v10 = vcombine.low %v5099_v44, %v840_v46  ;;  %v1904_v27 = vrot.slane %v1897_v62, %v5045_v12 }
 0x11d   :  { %v874_v0 = vrot.slane %v302_v7, %v5035_v30  ;;  %v1784_v24 = vrot.slane %v1777_v19, %v5045_v12  ;;  %v842_v34 = vcombine.high %v5099_v44, %v840_v46  ;;  %v367_v46 = vshrl.u32 %v120_v61, 16 }
 0x11e   :  { %v1912_v41 = vrot.slane %v1905_v63, %v5035_v30  ;;  %v1920_v1 = vrot.slane %v4442_v6, %v5035_v30  ;;  %v2442_v52 = vshrl.u32 %v1904_v27, 16  ;;  %v849_v14 = vrot.slane %v841_v10, %v5045_v12 }
 0x11f   :  { %v875_v8 = vcombine.low %v5105_v17, %v874_v0  ;;  %v876_v25 = vcombine.high %v5105_v17, %v874_v0  ;;  %v5345_v32 = vpack.i.b16 %v1784_v24, %v1760_v59  ;;  %v2425_v55 = vshrl.u32 %v1784_v24, 16 }
 0x120   :  { %v856_v22 = vrot.slane %v842_v34, %v5045_v12  ;;  %v1921_v35 = vcombine.low %v1912_v41, %v1920_v1  ;;  %v1044_v62 = vrot.slane %v365_v45, %v5035_v30 }
 0x121   :  { %v883_v7 = vrot.slane %v875_v8, %v5045_v12  ;;  %v5352_v19 = vpack.i.b16 %v2425_v55, %v2424_v16  ;;  %v2520_v44 = vshrl.u32 %v5345_v32, 16  ;;  %v890_v17 = vrot.slane %v876_v25, %v5045_v12  ;;  %v118_v55 = vpop.permute.xlu0 %117 }
 0x122   :  { %v1833_v59 = vcombine.low %v849_v14, %v856_v22  ;;  %v4439_v3 = vcombine.high %v849_v14, %v856_v22  ;;  %v1928_v63 = vrot.slane %v1921_v35, %v5045_v12  ;;  %v6230_v8 = vshrl.u32 %v5027_v48, 16 }
 0x123   :  { %v2521_v24 = vshrl.u32 %v5352_v19, 16  ;;  %v1857_v6 = vcombine.low %v883_v7, %v890_v17  ;;  %v4440_v34 = vcombine.high %v883_v7, %v890_v17  ;;  %v1045_v35 = vcombine.low %v5109_v50, %v1044_v62 }
 0x124   :  { %v1840_v16 = vrot.slane %v1833_v59, %v5035_v30  ;;  %v1848_v10 = vrot.slane %v4439_v3, %v5035_v30  ;;  %v368_v25 = vpack.i.b16 %v367_v46, %v6230_v8  ;;  %v5367_v45 = vpack.i.b16 %v1928_v63, %v1904_v27 }
 0x125   :  { %v5365_v61 = vpack.i.b16 %v2521_v24, %v2520_v44  ;;  %v2443_v41 = vshrl.u32 %v1928_v63, 16  ;;  %v1864_v1 = vrot.slane %v1857_v6, %v5035_v30  ;;  %v1872_v22 = vrot.slane %v4440_v34, %v5035_v30 }
 0x126   :  { %v1849_v14 = vcombine.low %v1840_v16, %v1848_v10  ;;  %v1046_v59 = vcombine.high %v5109_v50, %v1044_v62  ;;  %v2538_v48 = vshrl.u32 %v5367_v45, 16  ;;  %v1078_v7 = vrot.slane %v368_v25, %v5035_v30 }
 0x127   :  { %v5373_v3 = vpack.i.b16 %v2443_v41, %v2442_v52  ;;  %v343_v44 = vpack.i.b16 %v118_v55, %v6226_v58  ;;  %v1873_v17 = vcombine.low %v1864_v1, %v1872_v22  ;;  %v1053_v46 = vrot.slane %v1045_v35, %v5045_v12 }
 0x128   :  { %v1856_v27 = vrot.slane %v1849_v14, %v5045_v12  ;;  %v1060_v24 = vrot.slane %v1046_v59, %v5045_v12  ;;  %v1079_v52 = vcombine.low %v5115_v21, %v1078_v7  ;;  %v1080_v62 = vcombine.high %v5115_v21, %v1078_v7  ;;  %v124_v14 = vpop.permute.xlu1 %123 }
 0x129   :  { %v2539_v50 = vshrl.u32 %v5373_v3, 16  ;;  %v1880_v6 = vrot.slane %v1873_v17, %v5045_v12  ;;  %v345_v1 = vshrl.u32 %v118_v55, 16  ;;  %v6231_v63 = vshrl.u32 %v6226_v58, 16 }
 0x12a   :  { %v2436_v16 = vshrl.u32 %v1856_v27, 16  ;;  %v1977_v10 = vcombine.low %v1053_v46, %v1060_v24  ;;  %v4445_v34 = vcombine.high %v1053_v46, %v1060_v24  ;;  %v1087_v25 = vrot.slane %v1079_v52, %v5045_v12 }
 0x12b   :  { %v5387_v8 = vpack.i.b16 %v2539_v50, %v2538_v48  ;;  %v1094_v41 = vrot.slane %v1080_v62, %v5045_v12  ;;  %v5391_v22 = vpack.i.b16 %v1880_v6, %v1856_v27  ;;  %v2437_v35 = vshrl.u32 %v1880_v6, 16 }
 0x12c   :  { %v1984_v59 = vrot.slane %v1977_v10, %v5035_v30  ;;  %v1992_v21 = vrot.slane %v4445_v34, %v5035_v30  ;;  %v346_v46 = vpack.i.b16 %v345_v1, %v6231_v63  ;;  %v976_v48 = vrot.slane %v343_v44, %v5035_v30 }
 0x12d   :  { %v2001_v7 = vcombine.low %v1087_v25, %v1094_v41  ;;  %v4446_v17 = vcombine.high %v1087_v25, %v1094_v41  ;;  %v5398_v24 = vpack.i.b16 %v2437_v35, %v2436_v16  ;;  %v2532_v50 = vshrl.u32 %v5391_v22, 16  ;;  %v122_v35 = vpop.permute.xlu0 %121 }
 0x12e   :  { %v1993_v55 = vcombine.low %v1984_v59, %v1992_v21  ;;  %v409_v27 = vpack.i.b16 %v124_v14, %v5031_v26  ;;  %v977_v6 = vcombine.low %v5119_v37, %v976_v48  ;;  %v978_v10 = vcombine.high %v5119_v37, %v976_v48 }
 0x12f   :  { %v2008_v52 = vrot.slane %v2001_v7, %v5035_v30  ;;  %v2016_v62 = vrot.slane %v4446_v17, %v5035_v30  ;;  %v2533_v44 = vshrl.u32 %v5398_v24, 16  ;;  %v1010_v16 = vrot.slane %v346_v46, %v5035_v30 }
 0x130   :  { %v2000_v63 = vrot.slane %v1993_v55, %v5045_v12  ;;  %v985_v25 = vrot.slane %v977_v6, %v5045_v12  ;;  %v992_v41 = vrot.slane %v978_v10, %v5045_v12  ;;  %v411_v1 = vshrl.u32 %v124_v14, 16 }
 0x131   :  { %v2017_v34 = vcombine.low %v2008_v52, %v2016_v62  ;;  %v5413_v59 = vpack.i.b16 %v2533_v44, %v2532_v50  ;;  %v1011_v37 = vcombine.low %v5125_v36, %v1010_v16  ;;  %v1012_v7 = vcombine.high %v5125_v36, %v1010_v16 }
 0x132   :  { %v2454_v21 = vshrl.u32 %v2000_v63, 16  ;;  %v1929_v48 = vcombine.low %v985_v25, %v992_v41  ;;  %v4443_v55 = vcombine.high %v985_v25, %v992_v41  ;;  %v6232_v46 = vshrl.u32 %v5031_v26, 16 }
 0x133   :  { %v2024_v17 = vrot.slane %v2017_v34, %v5045_v12  ;;  %v1019_v62 = vrot.slane %v1011_v37, %v5045_v12  ;;  %v1026_v6 = vrot.slane %v1012_v7, %v5045_v12  ;;  %v1180_v14 = vrot.slane %v409_v27, %v5035_v30 }
 0x134   :  { %v412_v52 = vpack.i.b16 %v411_v1, %v6232_v46  ;;  %v387_v50 = vpack.i.b16 %v122_v35, %v5033_v39  ;;  %v1936_v36 = vrot.slane %v1929_v48, %v5035_v30  ;;  %v1944_v16 = vrot.slane %v4443_v55, %v5035_v30 }
 0x135   :  { %v5424_v10 = vpack.i.b16 %v2024_v17, %v2000_v63  ;;  %v2455_v44 = vshrl.u32 %v2024_v17, 16  ;;  %v1953_v34 = vcombine.low %v1019_v62, %v1026_v6  ;;  %v4444_v25 = vcombine.high %v1019_v62, %v1026_v6 }
 0x136   :  { %v1181_v26 = vcombine.low %v5129_v18, %v1180_v14  ;;  %v1182_v41 = vcombine.high %v5129_v18, %v1180_v14  ;;  %v1945_v27 = vcombine.low %v1936_v36, %v1944_v16  ;;  %v1214_v7 = vrot.slane %v412_v52, %v5035_v30  ;;  %v128_v36 = vpop.permute.xlu1 %127 }
 0x137   :  { %v5430_v1 = vpack.i.b16 %v2455_v44, %v2454_v21  ;;  %v2550_v37 = vshrl.u32 %v5424_v10, 16  ;;  %v1960_v63 = vrot.slane %v1953_v34, %v5035_v30  ;;  %v1968_v17 = vrot.slane %v4444_v25, %v5035_v30 }
 0x138   :  { %v1189_v48 = vrot.slane %v1181_v26, %v5045_v12  ;;  %v1196_v55 = vrot.slane %v1182_v41, %v5045_v12  ;;  %v1952_v21 = vrot.slane %v1945_v27, %v5045_v12  ;;  %v1215_v62 = vcombine.low %v5135_v2, %v1214_v7 }
 0x139   :  { %v2551_v18 = vshrl.u32 %v5430_v1, 16  ;;  %v1969_v6 = vcombine.low %v1960_v63, %v1968_v17  ;;  %v1216_v52 = vcombine.high %v5135_v2, %v1214_v7  ;;  %v389_v26 = vshrl.u32 %v122_v35, 16 }
 0x13a   :  { %v2073_v14 = vcombine.low %v1189_v48, %v1196_v55  ;;  %v4449_v44 = vcombine.high %v1189_v48, %v1196_v55  ;;  %v2448_v34 = vshrl.u32 %v1952_v21, 16  ;;  %v1223_v25 = vrot.slane %v1215_v62, %v5045_v12 }
 0x13b   :  { %v5444_v16 = vpack.i.b16 %v2551_v18, %v2550_v37  ;;  %v1976_v41 = vrot.slane %v1969_v6, %v5045_v12  ;;  %v1230_v46 = vrot.slane %v1216_v52, %v5045_v12  ;;  %v6233_v63 = vshrl.u32 %v5033_v39, 16 }
 0x13c   :  { %v2080_v27 = vrot.slane %v2073_v14, %v5035_v30  ;;  %v2088_v58 = vrot.slane %v4449_v44, %v5035_v30  ;;  %v1112_v7 = vrot.slane %v387_v50, %v5035_v30  ;;  %v453_v37 = vpack.i.b16 %v128_v36, %v5037_v47 }
 0x13d   :  { %v390_v2 = vpack.i.b16 %v389_v26, %v6233_v63  ;;  %v455_v17 = vshrl.u32 %v128_v36, 16  ;;  %v5455_v48 = vpack.i.b16 %v1976_v41, %v1952_v21  ;;  %v2449_v55 = vshrl.u32 %v1976_v41, 16 }
 0x13e   :  { %v2089_v35 = vcombine.low %v2080_v27, %v2088_v58  ;;  %v2097_v18 = vcombine.low %v1223_v25, %v1230_v46  ;;  %v4450_v62 = vcombine.high %v1223_v25, %v1230_v46  ;;  %v1113_v6 = vcombine.low %v5139_v38, %v1112_v7  ;;  %v126_v27 = vpop.permute.xlu0 %125 }
 0x13f   :  { %v1114_v52 = vcombine.high %v5139_v38, %v1112_v7  ;;  %v1146_v14 = vrot.slane %v390_v2, %v5035_v30  ;;  %v5460_v44 = vpack.i.b16 %v2449_v55, %v2448_v34  ;;  %v2544_v39 = vshrl.u32 %v5455_v48, 16 }
 0x140   :  { %v2096_v50 = vrot.slane %v2089_v35, %v5045_v12  ;;  %v2104_v36 = vrot.slane %v2097_v18, %v5035_v30  ;;  %v2112_v21 = vrot.slane %v4450_v62, %v5035_v30  ;;  %v1121_v58 = vrot.slane %v1113_v6, %v5045_v12 }
 0x141   :  { %v1128_v46 = vrot.slane %v1114_v52, %v5045_v12  ;;  %v1147_v25 = vcombine.low %v5145_v51, %v1146_v14  ;;  %v2545_v34 = vshrl.u32 %v5460_v44, 16  ;;  %v1148_v41 = vcombine.high %v5145_v51, %v1146_v14 }
 0x142   :  { %v2466_v26 = vshrl.u32 %v2096_v50, 16  ;;  %v2113_v63 = vcombine.low %v2104_v36, %v2112_v21  ;;  %v6234_v62 = vshrl.u32 %v5037_v47, 16  ;;  %v1316_v52 = vrot.slane %v453_v37, %v5035_v30 }
 0x143   :  { %v1155_v2 = vrot.slane %v1147_v25, %v5045_v12  ;;  %v2025_v7 = vcombine.low %v1121_v58, %v1128_v46  ;;  %v4447_v55 = vcombine.high %v1121_v58, %v1128_v46  ;;  %v5474_v35 = vpack.i.b16 %v2545_v34, %v2544_v39 }
 0x144   :  { %v1162_v18 = vrot.slane %v1148_v41, %v5045_v12  ;;  %v456_v6 = vpack.i.b16 %v455_v17, %v6234_v62  ;;  %v2120_v38 = vrot.slane %v2113_v63, %v5045_v12  ;;  %v431_v14 = vpack.i.b16 %v126_v27, %v5039_v29  ;;  %v132_v62 = vpop.permute.xlu1 %131 }
 0x145   :  { %v2032_v0 = vrot.slane %v2025_v7, %v5035_v30  ;;  %v2040_v51 = vrot.slane %v4447_v55, %v5035_v30  ;;  %v1317_v39 = vcombine.low %v5149_v49, %v1316_v52  ;;  %v1318_v58 = vcombine.high %v5149_v49, %v1316_v52 }
 0x146   :  { %v2049_v36 = vcombine.low %v1155_v2, %v1162_v18  ;;  %v4448_v21 = vcombine.high %v1155_v2, %v1162_v18  ;;  %v5486_v46 = vpack.i.b16 %v2120_v38, %v2096_v50  ;;  %v2467_v47 = vshrl.u32 %v2120_v38, 16 }
 0x147   :  { %v2041_v17 = vcombine.low %v2032_v0, %v2040_v51  ;;  %v1350_v37 = vrot.slane %v456_v6, %v5035_v30  ;;  %v1325_v41 = vrot.slane %v1317_v39, %v5045_v12  ;;  %v1332_v63 = vrot.slane %v1318_v58, %v5045_v12 }
 0x148   :  { %v2056_v25 = vrot.slane %v2049_v36, %v5035_v30  ;;  %v2064_v34 = vrot.slane %v4448_v21, %v5035_v30  ;;  %v5493_v7 = vpack.i.b16 %v2467_v47, %v2466_v26  ;;  %v2562_v2 = vshrl.u32 %v5486_v46, 16 }
 0x149   :  { %v2048_v49 = vrot.slane %v2041_v17, %v5045_v12  ;;  %v1351_v50 = vcombine.low %v5155_v4, %v1350_v37  ;;  %v1352_v0 = vcombine.high %v5155_v4, %v1350_v37  ;;  %v2169_v55 = vcombine.low %v1325_v41, %v1332_v63 }
 0x14a   :  { %v2065_v38 = vcombine.low %v2056_v25, %v2064_v34  ;;  %v4453_v18 = vcombine.high %v1325_v41, %v1332_v63  ;;  %v2563_v52 = vshrl.u32 %v5493_v7, 16  ;;  %v433_v47 = vshrl.u32 %v126_v27, 16 }
 0x14b   :  { %v2460_v51 = vshrl.u32 %v2048_v49, 16  ;;  %v1359_v26 = vrot.slane %v1351_v50, %v5045_v12  ;;  %v1366_v21 = vrot.slane %v1352_v0, %v5045_v12  ;;  %v2176_v39 = vrot.slane %v2169_v55, %v5035_v30 }
 0x14c   :  { %v2072_v36 = vrot.slane %v2065_v38, %v5045_v12  ;;  %v2184_v58 = vrot.slane %v4453_v18, %v5035_v30  ;;  %v5507_v4 = vpack.i.b16 %v2563_v52, %v2562_v2  ;;  %v1248_v17 = vrot.slane %v431_v14, %v5035_v30 }
 0x14d   :  { %v497_v37 = vpack.i.b16 %v132_v62, %v5087_v23  ;;  %v2193_v63 = vcombine.low %v1359_v26, %v1366_v21  ;;  %v4454_v50 = vcombine.high %v1359_v26, %v1366_v21  ;;  %v6235_v38 = vshrl.u32 %v5039_v29, 16 }
 0x14e   :  { %v5511_v25 = vpack.i.b16 %v2072_v36, %v2048_v49  ;;  %v2461_v34 = vshrl.u32 %v2072_v36, 16  ;;  %v2185_v41 = vcombine.low %v2176_v39, %v2184_v58  ;;  %v1249_v55 = vcombine.low %v5159_v40, %v1248_v17 }
 0x14f   :  { %v434_v0 = vpack.i.b16 %v433_v47, %v6235_v38  ;;  %v1250_v18 = vcombine.high %v5159_v40, %v1248_v17  ;;  %v2200_v49 = vrot.slane %v2193_v63, %v5035_v30  ;;  %v2208_v52 = vrot.slane %v4454_v50, %v5035_v30 }
 0x150   :  { %v5517_v2 = vpack.i.b16 %v2461_v34, %v2460_v51  ;;  %v2556_v27 = vshrl.u32 %v5511_v25, 16  ;;  %v2192_v14 = vrot.slane %v2185_v41, %v5045_v12  ;;  %v1257_v36 = vrot.slane %v1249_v55, %v5045_v12 }
 0x151   :  { %v1264_v26 = vrot.slane %v1250_v18, %v5045_v12  ;;  %v1282_v29 = vrot.slane %v434_v0, %v5035_v30  ;;  %v499_v39 = vshrl.u32 %v132_v62, 16  ;;  %v2209_v58 = vcombine.low %v2200_v49, %v2208_v52 }
 0x152   :  { %v2557_v40 = vshrl.u32 %v5517_v2, 16  ;;  %v2478_v51 = vshrl.u32 %v2192_v14, 16  ;;  %v6236_v50 = vshrl.u32 %v5087_v23, 16  ;;  %v1452_v0 = vrot.slane %v497_v37, %v5035_v30 }
 0x153   :  { %v1283_v47 = vcombine.low %v5165_v9, %v1282_v29  ;;  %v1284_v17 = vcombine.high %v5165_v9, %v1282_v29  ;;  %v2121_v34 = vcombine.low %v1257_v36, %v1264_v26  ;;  %v4451_v63 = vcombine.high %v1257_v36, %v1264_v26 }
 0x154   :  { %v5531_v41 = vpack.i.b16 %v2557_v40, %v2556_v27  ;;  %v500_v38 = vpack.i.b16 %v499_v39, %v6236_v50  ;;  %v2216_v55 = vrot.slane %v2209_v58, %v5045_v12  ;;  %v1453_v9 = vcombine.low %v5169_v11, %v1452_v0 }
 0x155   :  { %v1291_v18 = vrot.slane %v1283_v47, %v5045_v12  ;;  %v1298_v62 = vrot.slane %v1284_v17, %v5045_v12  ;;  %v2128_v49 = vrot.slane %v2121_v34, %v5035_v30  ;;  %v2136_v52 = vrot.slane %v4451_v63, %v5035_v30 }
 0x156   :  { %v1454_v27 = vcombine.high %v5169_v11, %v1452_v0  ;;  %v1486_v36 = vrot.slane %v500_v38, %v5035_v30  ;;  %v5544_v23 = vpack.i.b16 %v2216_v55, %v2192_v14  ;;  %v2479_v26 = vshrl.u32 %v2216_v55, 16  ;;  %v130_v14 = vpop.permute.xlu0 %129 }
 0x157   :  { %v2145_v37 = vcombine.low %v1291_v18, %v1298_v62  ;;  %v4452_v29 = vcombine.high %v1291_v18, %v1298_v62  ;;  %v2137_v40 = vcombine.low %v2128_v49, %v2136_v52  ;;  %v1461_v39 = vrot.slane %v1453_v9, %v5045_v12  ;;  %v136_v52 = vpop.permute.xlu1 %135 }
 0x158   :  { %v1468_v58 = vrot.slane %v1454_v27, %v5045_v12  ;;  %v1487_v47 = vcombine.low %v5179_v43, %v1486_v36  ;;  %v5549_v17 = vpack.i.b16 %v2479_v26, %v2478_v51  ;;  %v2574_v34 = vshrl.u32 %v5544_v23, 16 }
 0x159   :  { %v2152_v11 = vrot.slane %v2145_v37, %v5035_v30  ;;  %v2160_v63 = vrot.slane %v4452_v29, %v5035_v30  ;;  %v2144_v50 = vrot.slane %v2137_v40, %v5045_v12  ;;  %v1488_v38 = vcombine.high %v5179_v43, %v1486_v36 }
 0x15a   :  { %v1495_v0 = vrot.slane %v1487_v47, %v5045_v12  ;;  %v2265_v55 = vcombine.low %v1461_v39, %v1468_v58  ;;  %v2575_v51 = vshrl.u32 %v5549_v17, 16  ;;  %v4457_v49 = vcombine.high %v1461_v39, %v1468_v58 }
 0x15b   :  { %v2161_v62 = vcombine.low %v2152_v11, %v2160_v63  ;;  %v2472_v9 = vshrl.u32 %v2144_v50, 16  ;;  %v1502_v27 = vrot.slane %v1488_v38, %v5045_v12  ;;  %v475_v37 = vpack.i.b16 %v130_v14, %v5089_v13 }
 0x15c   :  { %v2272_v26 = vrot.slane %v2265_v55, %v5035_v30  ;;  %v5563_v29 = vpack.i.b16 %v2575_v51, %v2574_v34  ;;  %v2280_v36 = vrot.slane %v4457_v49, %v5035_v30  ;;  %v477_v40 = vshrl.u32 %v130_v14, 16 }
 0x15d   :  { %v2168_v43 = vrot.slane %v2161_v62, %v5045_v12  ;;  %v2289_v47 = vcombine.low %v1495_v0, %v1502_v27  ;;  %v4458_v18 = vcombine.high %v1495_v0, %v1502_v27  ;;  %v1384_v11 = vrot.slane %v475_v37, %v5035_v30 }
 0x15e   :  { %v541_v39 = vpack.i.b16 %v136_v52, %v5171_v28  ;;  %v2281_v38 = vcombine.low %v2272_v26, %v2280_v36  ;;  %v6237_v55 = vshrl.u32 %v5089_v13, 16 }
 0x15f   :  { %v5569_v58 = vpack.i.b16 %v2168_v43, %v2144_v50  ;;  %v2473_v63 = vshrl.u32 %v2168_v43, 16  ;;  %v2296_v34 = vrot.slane %v2289_v47, %v5035_v30  ;;  %v2304_v51 = vrot.slane %v4458_v18, %v5035_v30 }
 0x160   :  { %v478_v6 = vpack.i.b16 %v477_v40, %v6237_v55  ;;  %v1385_v62 = vcombine.low %v5183_v15, %v1384_v11  ;;  %v1386_v14 = vcombine.high %v5183_v15, %v1384_v11  ;;  %v2288_v50 = vrot.slane %v2281_v38, %v5045_v12 }
 0x161   :  { %v5577_v0 = vpack.i.b16 %v2473_v63, %v2472_v9  ;;  %v2568_v49 = vshrl.u32 %v5569_v58, 16  ;;  %v2305_v26 = vcombine.low %v2296_v34, %v2304_v51  ;;  %v543_v43 = vshrl.u32 %v136_v52, 16 }
 0x162   :  { %v1418_v27 = vrot.slane %v478_v6, %v5035_v30  ;;  %v1393_v13 = vrot.slane %v1385_v62, %v5045_v12  ;;  %v1400_v37 = vrot.slane %v1386_v14, %v5045_v12  ;;  %v2490_v15 = vshrl.u32 %v2288_v50, 16 }
 0x163   :  { %v2569_v36 = vshrl.u32 %v5577_v0, 16  ;;  %v2312_v40 = vrot.slane %v2305_v26, %v5045_v12  ;;  %v6238_v52 = vshrl.u32 %v5171_v28, 16  ;;  %v1588_v34 = vrot.slane %v541_v39, %v5035_v30 }
 0x164   :  { %v1419_v9 = vcombine.low %v5189_v5, %v1418_v27  ;;  %v1420_v47 = vcombine.high %v5189_v5, %v1418_v27  ;;  %v2217_v11 = vcombine.low %v1393_v13, %v1400_v37  ;;  %v4455_v6 = vcombine.high %v1393_v13, %v1400_v37  ;;  %v6240_v27 = vld [vmem:[#allocation7_spill] sm:$0xff] }
 0x165   :  { %v5590_v63 = vpack.i.b16 %v2569_v36, %v2568_v49  ;;  %v544_v55 = vpack.i.b16 %v543_v43, %v6238_v52  ;;  %v5596_v51 = vpack.i.b16 %v2312_v40, %v2288_v50  ;;  %v2491_v62 = vshrl.u32 %v2312_v40, 16 }
 0x166   :  { %v1427_v38 = vrot.slane %v1419_v9, %v5045_v12  ;;  %v1434_v14 = vrot.slane %v1420_v47, %v5045_v12  ;;  %v2224_v26 = vrot.slane %v2217_v11, %v5035_v30  ;;  %v2232_v5 = vrot.slane %v4455_v6, %v5035_v30  ;;  %v6241_v47 = vld [vmem:[#allocation8_spill] sm:$0xff]  ;;  %v134_v6 = vpop.permute.xlu0 %133 }
 0x167   :  { %6239 = vst [vmem:[#allocation6_spill] sm:$0xff] %v5596_v51  ;;  %v1589_v13 = vcombine.low %v6240_v27, %v1588_v34  ;;  %v1590_v49 = vcombine.high %v6240_v27, %v1588_v34  ;;  %v1622_v37 = vrot.slane %v544_v55, %v5035_v30  ;;  %v5604_v36 = vpack.i.b16 %v2491_v62, %v2490_v15 }
 0x168   :  { %v2586_v28 = vshrl.u32 %v5596_v51, 16  ;;  %v2241_v39 = vcombine.low %v1427_v38, %v1434_v14  ;;  %v4456_v50 = vcombine.high %v1427_v38, %v1434_v14  ;;  %v2233_v43 = vcombine.low %v2224_v26, %v2232_v5 }
 0x169   :  { %v1597_v9 = vrot.slane %v1589_v13, %v5045_v12  ;;  %v1604_v40 = vrot.slane %v1590_v49, %v5045_v12  ;;  %v1623_v11 = vcombine.low %v6241_v47, %v1622_v37  ;;  %v2587_v34 = vshrl.u32 %v5604_v36, 16  ;;  %v6243_v49 = vld [vmem:[#allocation2_spill] sm:$0xff] }
 0x16a   :  { %v2248_v15 = vrot.slane %v2241_v39, %v5035_v30  ;;  %v2256_v55 = vrot.slane %v4456_v50, %v5035_v30  ;;  %v2240_v62 = vrot.slane %v2233_v43, %v5045_v12  ;;  %v1624_v38 = vcombine.high %v6241_v47, %v1622_v37 }
 0x16b   :  { %v1631_v14 = vrot.slane %v1623_v11, %v5045_v12  ;;  %v2361_v26 = vcombine.low %v1597_v9, %v1604_v40  ;;  %v5618_v5 = vpack.i.b16 %v2587_v34, %v2586_v28  ;;  %v4461_v13 = vcombine.high %v1597_v9, %v1604_v40 }
 0x16c   :  { %v2257_v27 = vcombine.low %v2248_v15, %v2256_v55  ;;  %v519_v18 = vpack.i.b16 %v134_v6, %v6243_v49  ;;  %v2484_v52 = vshrl.u32 %v2240_v62, 16  ;;  %v1638_v21 = vrot.slane %v1624_v38, %v5045_v12 }
 0x16d   :  { %6242 = vst [vmem:[#allocation4_spill] sm:$0xff] %v5618_v5  ;;  %v2368_v39 = vrot.slane %v2361_v26, %v5035_v30  ;;  %v521_v51 = vshrl.u32 %v134_v6, 16  ;;  %v2376_v43 = vrot.slane %v4461_v13, %v5035_v30  ;;  %v6244_v28 = vpack.i.b16 %v5272_v20, %v5267_v33  ;;  %v6246_v26 = vld [vmem:[#allocation5_spill] sm:$0xff] }
 0x16e   :  { %v2264_v50 = vrot.slane %v2257_v27, %v5045_v12  ;;  %v1520_v37 = vrot.slane %v519_v18, %v5035_v30  ;;  %v2385_v9 = vcombine.low %v1631_v14, %v1638_v21  ;;  %v4462_v40 = vcombine.high %v1631_v14, %v1638_v21 }
 0x16f   :  { %v2608_v47 = vrot.slane %v6244_v28, %v5035_v30  ;;  %v6245_v11 = vshrl.u32 %v6243_v49, 16  ;;  %v2633_v15 = vrot.slane %v5289_v53, %v5035_v30  ;;  %v2377_v38 = vcombine.low %v2368_v39, %v2376_v43  ;;  %v6247_v39 = vld [vmem:[#allocation3_spill] sm:$0xff] }
 0x170   :  { %v5634_v6 = vpack.i.b16 %v2264_v50, %v2240_v62  ;;  %v2485_v55 = vshrl.u32 %v2264_v50, 16  ;;  %v1521_v27 = vcombine.low %v6246_v26, %v1520_v37  ;;  %v2392_v18 = vrot.slane %v2385_v9, %v5035_v30 }
 0x171   :  { %v522_v34 = vpack.i.b16 %v521_v51, %v6245_v11  ;;  %v2400_v13 = vrot.slane %v4462_v40, %v5035_v30  ;;  %v1522_v33 = vcombine.high %v6246_v26, %v1520_v37  ;;  %v2384_v53 = vrot.slane %v2377_v38, %v5045_v12 }
 0x172   :  { %v5641_v21 = vpack.i.b16 %v2485_v55, %v2484_v52  ;;  %v2580_v51 = vshrl.u32 %v5634_v6, 16  ;;  %v1529_v62 = vrot.slane %v1521_v27, %v5045_v12  ;;  %v6173_v9 = vmov 0  }
 0x173   :  { %v1554_v20 = vrot.slane %v522_v34, %v5035_v30  ;;  %v2401_v14 = vcombine.low %v2392_v18, %v2400_v13  ;;  %v1536_v49 = vrot.slane %v1522_v33, %v5045_v12  ;;  %v2502_v52 = vshrl.u32 %v2384_v53, 16 }
 0x174   :  { %v2581_v28 = vshrl.u32 %v5641_v21, 16  ;;  %v2609_v40 = vcombine.high %v2608_v47, %v6173_v9  ;;  %v2616_v18 = vrot.slane %v2608_v47, %v5045_v12 }
 0x175   :  { %v1555_v50 = vcombine.low %v6247_v39, %v1554_v20  ;;  %v1556_v43 = vcombine.high %v6247_v39, %v1554_v20  ;;  %v2408_v11 = vrot.slane %v2401_v14, %v5045_v12  ;;  %v2313_v38 = vcombine.low %v1529_v62, %v1536_v49 }
 0x176   :  { %v5656_v26 = vpack.i.b16 %v2581_v28, %v2580_v51  ;;  %v4459_v27 = vcombine.high %v1529_v62, %v1536_v49  ;;  %v2623_v13 = vrot.slane %v2609_v40, %v5045_v12 }
 0x177   :  { %v1563_v34 = vrot.slane %v1555_v50, %v5045_v12  ;;  %v1570_v55 = vrot.slane %v1556_v43, %v5045_v12  ;;  %v5660_v33 = vpack.i.b16 %v2408_v11, %v2384_v53  ;;  %v2503_v20 = vshrl.u32 %v2408_v11, 16 }
 0x178   :  { %v2320_v39 = vrot.slane %v2313_v38, %v5035_v30  ;;  %v2328_v14 = vrot.slane %v4459_v27, %v5035_v30  ;;  %v6249_v50 = vmov 0   ;;  %v2641_v43 = vrot.slane %v2633_v15, %v5045_v12 }
 0x179   :  { %6248 = vst [vmem:[#allocation7_spill] sm:$0xff] %v5660_v33  ;;  %v2337_v37 = vcombine.low %v1563_v34, %v1570_v55  ;;  %v4460_v9 = vcombine.high %v1563_v34, %v1570_v55  ;;  %v2634_v5 = vcombine.high %v2633_v15, %v6249_v50  ;;  %v5666_v51 = vpack.i.b16 %v2503_v20, %v2502_v52 }
 0x17a   :  { %v2598_v62 = vshrl.u32 %v5660_v33, 16  ;;  %v6250_v53 = vpack.i.b16 %v5269_v57, %v5263_v54  ;;  %v2329_v28 = vcombine.low %v2320_v39, %v2328_v14  ;;  %v2683_v34 = vrot.slane %v5285_v56, %v5035_v30 }
 0x17b   :  { %v2344_v47 = vrot.slane %v2337_v37, %v5035_v30  ;;  %v2352_v40 = vrot.slane %v4460_v9, %v5035_v30  ;;  %v2648_v11 = vrot.slane %v2634_v5, %v5045_v12  ;;  %v2599_v52 = vshrl.u32 %v5666_v51, 16 }
 0x17c   :  { %v2658_v49 = vrot.slane %v6250_v53, %v5035_v30  ;;  %v2336_v54 = vrot.slane %v2329_v28, %v5045_v12  ;;  %v2684_v38 = vcombine.high %v2683_v34, %v6249_v50  ;;  %v2691_v9 = vrot.slane %v2683_v34, %v5045_v12 }
 0x17d   :  { %v2353_v57 = vcombine.low %v2344_v47, %v2352_v40  ;;  %v5686_v5 = vpack.i.b16 %v2599_v52, %v2598_v62  ;;  %v3401_v27 = vcombine.low %v2616_v18, %v2623_v13  ;;  %v4463_v20 = vcombine.high %v2616_v18, %v2623_v13 }
 0x17e   :  { %v2659_v37 = vcombine.high %v2658_v49, %v6249_v50  ;;  %v2666_v55 = vrot.slane %v2658_v49, %v5045_v12  ;;  %v2496_v14 = vshrl.u32 %v2336_v54, 16  ;;  %v2698_v53 = vrot.slane %v2684_v38, %v5045_v12 }
 0x17f   :  { %v2360_v39 = vrot.slane %v2353_v57, %v5045_v12  ;;  %v3425_v15 = vcombine.low %v2641_v43, %v2648_v11  ;;  %v3408_v49 = vrot.slane %v3401_v27, %v5035_v30  ;;  %v3416_v47 = vrot.slane %v4463_v20, %v5035_v30 }
 0x180   :  { %v2673_v56 = vrot.slane %v2659_v37, %v5045_v12  ;;  %v4464_v28 = vcombine.high %v2641_v43, %v2648_v11  ;;  %v3473_v57 = vcombine.low %v2691_v9, %v2698_v53  ;;  %v4466_v43 = vcombine.high %v2691_v9, %v2698_v53 }
 0x181   :  { %v5693_v33 = vpack.i.b16 %v2360_v39, %v2336_v54  ;;  %v2497_v62 = vshrl.u32 %v2360_v39, 16  ;;  %v3432_v34 = vrot.slane %v3425_v15, %v5035_v30  ;;  %v3417_v37 = vcombine.low %v3408_v49, %v3416_v47 }
 0x182   :  { %v3449_v40 = vcombine.low %v2666_v55, %v2673_v56  ;;  %v4465_v52 = vcombine.high %v2666_v55, %v2673_v56  ;;  %v3440_v18 = vrot.slane %v4464_v28, %v5035_v30  ;;  %v3480_v15 = vrot.slane %v3473_v57, %v5035_v30 }
 0x183   :  { %v5698_v38 = vpack.i.b16 %v2497_v62, %v2496_v14  ;;  %v2592_v27 = vshrl.u32 %v5693_v33, 16  ;;  %v5703_v11 = vrot.slane %v3417_v37, %v5045_v12  ;;  %v6252_v55 = vpack.i.b16 %v5352_v19, %v5345_v32 }
 0x184   :  { %v3456_v13 = vrot.slane %v3449_v40, %v5035_v30  ;;  %v3464_v20 = vrot.slane %v4465_v52, %v5035_v30  ;;  %v3441_v54 = vcombine.low %v3432_v34, %v3440_v18  ;;  %v3488_v47 = vrot.slane %v4466_v43, %v5035_v30 }
 0x185   :  { %6251 = vst [vmem:[#allocation8_spill] sm:$0xff] %v5703_v11  ;;  %v2708_v56 = vrot.slane %v6252_v55, %v5035_v30  ;;  %v2593_v14 = vshrl.u32 %v5698_v38, 16  ;;  %v4172_v53 = vshrl.u32 %v5703_v11, 16  ;;  %v2733_v34 = vrot.slane %v5365_v61, %v5035_v30 }
 0x186   :  { %v3465_v49 = vcombine.low %v3456_v13, %v3464_v20  ;;  %v5715_v9 = vrot.slane %v3441_v54, %v5045_v12  ;;  %v3489_v19 = vcombine.low %v3480_v15, %v3488_v47  ;;  %v6254_v18 = vpack.i.b16 %v5310_v42, %v5302_v31 }
 0x187   :  { %v2709_v28 = vcombine.high %v2708_v56, %v6249_v50  ;;  %v2716_v40 = vrot.slane %v2708_v56, %v5045_v12  ;;  %v5720_v62 = vpack.i.b16 %v2593_v14, %v2592_v27  ;;  %v2783_v57 = vrot.slane %v5323_v60, %v5035_v30 }
 0x188   :  { %6253 = vst [vmem:[#allocation2_spill] sm:$0xff] %v5715_v9  ;;  %v5723_v32 = vrot.slane %v3465_v49, %v5045_v12  ;;  %v4173_v52 = vshrl.u32 %v5715_v9, 16  ;;  %v2758_v13 = vrot.slane %v6254_v18, %v5035_v30  ;;  %v5736_v27 = vrot.slane %v3489_v19, %v5045_v12 }
 0x189   :  { %v2723_v37 = vrot.slane %v2709_v28, %v5045_v12  ;;  %v2734_v43 = vcombine.high %v2733_v34, %v6249_v50  ;;  %v2741_v61 = vrot.slane %v2733_v34, %v5045_v12  ;;  %v2784_v31 = vcombine.high %v2783_v57, %v6249_v50 }
 0x18a   :  { %v4178_v20 = vshrl.u32 %v5723_v32, 16  ;;  %v4174_v54 = vpack.i.b16 %v4173_v52, %v4172_v53  ;;  %v2759_v15 = vcombine.high %v2758_v13, %v6249_v50  ;;  %v2766_v55 = vrot.slane %v2758_v13, %v5045_v12 }
 0x18b   :  { %v4179_v42 = vshrl.u32 %v5736_v27, 16  ;;  %v2748_v60 = vrot.slane %v2734_v43, %v5045_v12  ;;  %v2791_v56 = vrot.slane %v2783_v57, %v5045_v12  ;;  %v3497_v14 = vcombine.low %v2716_v40, %v2723_v37 }
 0x18c   :  { %v2773_v49 = vrot.slane %v2759_v15, %v5045_v12  ;;  %v2798_v47 = vrot.slane %v2784_v31, %v5045_v12  ;;  %v4467_v28 = vcombine.high %v2716_v40, %v2723_v37  ;;  %v6255_v53 = vpack.i.b16 %v5398_v24, %v5391_v22 }
 0x18d   :  { %v4180_v34 = vpack.i.b16 %v4179_v42, %v4178_v20  ;;  %v3504_v52 = vrot.slane %v3497_v14, %v5035_v30  ;;  %v3521_v18 = vcombine.low %v2741_v61, %v2748_v60  ;;  %v4468_v13 = vcombine.high %v2741_v61, %v2748_v60 }
 0x18e   :  { %v2808_v19 = vrot.slane %v6255_v53, %v5035_v30  ;;  %v3512_v43 = vrot.slane %v4467_v28, %v5035_v30  ;;  %v3545_v39 = vcombine.low %v2766_v55, %v2773_v49  ;;  %v4469_v57 = vcombine.high %v2766_v55, %v2773_v49 }
 0x18f   :  { %v3569_v9 = vcombine.low %v2791_v56, %v2798_v47  ;;  %v4503_v11 = vcombine.low %v4174_v54, %v4180_v34  ;;  %v3528_v15 = vrot.slane %v3521_v18, %v5035_v30  ;;  %v3536_v40 = vrot.slane %v4468_v13, %v5035_v30 }
 0x190   :  { %v4470_v37 = vcombine.high %v2791_v56, %v2798_v47  ;;  %v3513_v31 = vcombine.low %v3504_v52, %v3512_v43  ;;  %v3552_v22 = vrot.slane %v3545_v39, %v5035_v30  ;;  %v3560_v24 = vrot.slane %v4469_v57, %v5035_v30 }
 0x191   :  { %v3576_v20 = vrot.slane %v3569_v9, %v5035_v30  ;;  %4313 = vrot.lane.b32.xlu0 %v4503_v11, %s4544_s13  ;;  %v3537_v61 = vcombine.low %v3528_v15, %v3536_v40  ;;  %v2809_v54 = vcombine.high %v2808_v19, %v6249_v50  ;;  %v2816_v42 = vrot.slane %v2808_v19, %v5045_v12 }
 0x192   :  { %v3584_v55 = vrot.slane %v4470_v37, %v5035_v30  ;;  %v5765_v60 = vrot.slane %v3513_v31, %v5045_v12  ;;  %v3561_v56 = vcombine.low %v3552_v22, %v3560_v24  ;;  %v2833_v39 = vrot.slane %v5413_v59, %v5035_v30 }
 0x193   :  { %v6256_v9 = vpack.i.b16 %v5373_v3, %v5367_v45  ;;  %v5774_v11 = vrot.slane %v3537_v61, %v5045_v12  ;;  %v2823_v47 = vrot.slane %v2809_v54, %v5045_v12  ;;  %v2883_v28 = vrot.slane %v5387_v8, %v5035_v30 }
 0x194   :  { %v3585_v49 = vcombine.low %v3576_v20, %v3584_v55  ;;  %v5780_v53 = vrot.slane %v3561_v56, %v5045_v12  ;;  %v4184_v19 = vshrl.u32 %v5765_v60, 16  ;;  %v2834_v59 = vcombine.high %v2833_v39, %v6249_v50 }
 0x195   :  { %v2858_v14 = vrot.slane %v6256_v9, %v5035_v30  ;;  %v2841_v34 = vrot.slane %v2833_v39, %v5045_v12  ;;  %v4185_v3 = vshrl.u32 %v5774_v11, 16  ;;  %v2884_v43 = vcombine.high %v2883_v28, %v6249_v50 }
 0x196   :  { %v5786_v45 = vrot.slane %v3585_v49, %v5045_v12  ;;  %v4190_v8 = vshrl.u32 %v5780_v53, 16  ;;  %v2848_v13 = vrot.slane %v2834_v59, %v5045_v12  ;;  %v2891_v57 = vrot.slane %v2883_v28, %v5045_v12 }
 0x197   :  { %v2859_v52 = vcombine.high %v2858_v14, %v6249_v50  ;;  %v2866_v18 = vrot.slane %v2858_v14, %v5045_v12  ;;  %v4186_v15 = vpack.i.b16 %v4185_v3, %v4184_v19  ;;  %v3593_v31 = vcombine.low %v2816_v42, %v2823_v47 }
 0x198   :  { %v4191_v40 = vshrl.u32 %v5786_v45, 16  ;;  %v2898_v22 = vrot.slane %v2884_v43, %v5045_v12  ;;  %v4471_v24 = vcombine.high %v2816_v42, %v2823_v47  ;;  %v3617_v20 = vcombine.low %v2841_v34, %v2848_v13 }
 0x199   :  { %v2873_v37 = vrot.slane %v2859_v52, %v5045_v12  ;;  %v4472_v61 = vcombine.high %v2841_v34, %v2848_v13  ;;  %v3600_v54 = vrot.slane %v3593_v31, %v5035_v30 }
 0x19a   :  { %v4192_v55 = vpack.i.b16 %v4191_v40, %v4190_v8  ;;  %v3608_v9 = vrot.slane %v4471_v24, %v5035_v30  ;;  %v3624_v14 = vrot.slane %v3617_v20, %v5035_v30  ;;  %v3665_v28 = vcombine.low %v2891_v57, %v2898_v22 }
 0x19b   :  { %v3641_v56 = vcombine.low %v2866_v18, %v2873_v37  ;;  %v4473_v39 = vcombine.high %v2866_v18, %v2873_v37  ;;  %v3632_v49 = vrot.slane %v4472_v61, %v5035_v30  ;;  %v4474_v42 = vcombine.high %v2891_v57, %v2898_v22 }
 0x19c   :  { %v4504_v19 = vcombine.low %v4186_v15, %v4192_v55  ;;  %v3609_v47 = vcombine.low %v3600_v54, %v3608_v9  ;;  %v3672_v52 = vrot.slane %v3665_v28, %v5035_v30  ;;  %v6257_v18 = vpack.i.b16 %v5460_v44, %v5455_v48 }
 0x19d   :  { %v3648_v59 = vrot.slane %v3641_v56, %v5035_v30  ;;  %v3656_v3 = vrot.slane %v4473_v39, %v5035_v30  ;;  %v3633_v34 = vcombine.low %v3624_v14, %v3632_v49  ;;  %v3680_v43 = vrot.slane %v4474_v42, %v5035_v30 }
 0x19e   :  { %v2908_v8 = vrot.slane %v6257_v18, %v5035_v30  ;;  %4315 = vrot.lane.b32.xlu1 %v4504_v19, %s4544_s13  ;;  %v2933_v15 = vrot.slane %v5474_v35, %v5035_v30  ;;  %v6258_v57 = vpack.i.b16 %v5430_v1, %v5424_v10  ;;  %v5818_v37 = vrot.slane %v3609_v47, %v5045_v12 }
 0x19f   :  { %v3657_v13 = vcombine.low %v3648_v59, %v3656_v3  ;;  %v5821_v31 = vrot.slane %v3633_v34, %v5045_v12  ;;  %v3681_v24 = vcombine.low %v3672_v52, %v3680_v43  ;;  %v2983_v28 = vrot.slane %v5444_v16, %v5035_v30 }
 0x1a0   :  { %v2958_v40 = vrot.slane %v6258_v57, %v5035_v30  ;;  %v2909_v48 = vcombine.high %v2908_v8, %v6249_v50  ;;  %v2916_v44 = vrot.slane %v2908_v8, %v5045_v12  ;;  %v2934_v35 = vcombine.high %v2933_v15, %v6249_v50 }
 0x1a1   :  { %v5826_v22 = vrot.slane %v3657_v13, %v5045_v12  ;;  %v2941_v20 = vrot.slane %v2933_v15, %v5045_v12  ;;  %v4196_v10 = vshrl.u32 %v5818_v37, 16  ;;  %v4197_v1 = vshrl.u32 %v5821_v31, 16 }
 0x1a2   :  { %v2923_v61 = vrot.slane %v2909_v48, %v5045_v12  ;;  %v2959_v55 = vcombine.high %v2958_v40, %v6249_v50  ;;  %v5835_v54 = vrot.slane %v3681_v24, %v5045_v12  ;;  %v2948_v39 = vrot.slane %v2934_v35, %v5045_v12 }
 0x1a3   :  { %v4202_v56 = vshrl.u32 %v5826_v22, 16  ;;  %v2966_v9 = vrot.slane %v2958_v40, %v5045_v12  ;;  %v4198_v14 = vpack.i.b16 %v4197_v1, %v4196_v10  ;;  %v2984_v34 = vcombine.high %v2983_v28, %v6249_v50 }
 0x1a4   :  { %v2973_v49 = vrot.slane %v2959_v55, %v5045_v12  ;;  %v3689_v19 = vcombine.low %v2916_v44, %v2923_v61  ;;  %v4203_v59 = vshrl.u32 %v5835_v54, 16  ;;  %v4475_v3 = vcombine.high %v2916_v44, %v2923_v61 }
 0x1a5   :  { %v3713_v42 = vcombine.low %v2941_v20, %v2948_v39  ;;  %v4476_v47 = vcombine.high %v2941_v20, %v2948_v39  ;;  %v2991_v52 = vrot.slane %v2983_v28, %v5045_v12  ;;  %v2998_v57 = vrot.slane %v2984_v34, %v5045_v12 }
 0x1a6   :  { %v3696_v18 = vrot.slane %v3689_v19, %v5035_v30  ;;  %v3737_v8 = vcombine.low %v2966_v9, %v2973_v49  ;;  %v4204_v13 = vpack.i.b16 %v4203_v59, %v4202_v56  ;;  %v3704_v43 = vrot.slane %v4475_v3, %v5035_v30 }
 0x1a7   :  { %v3720_v15 = vrot.slane %v3713_v42, %v5035_v30  ;;  %v3728_v16 = vrot.slane %v4476_v47, %v5035_v30  ;;  %v4477_v48 = vcombine.high %v2966_v9, %v2973_v49  ;;  %v6259_v44 = vpack.i.b16 %v5517_v2, %v5511_v25 }
 0x1a8   :  { %v3744_v40 = vrot.slane %v3737_v8, %v5035_v30  ;;  %v4505_v35 = vcombine.low %v4198_v14, %v4204_v13  ;;  %v3705_v20 = vcombine.low %v3696_v18, %v3704_v43  ;;  %v3033_v1 = vrot.slane %v5531_v41, %v5035_v30 }
 0x1a9   :  { %v3008_v24 = vrot.slane %v6259_v44, %v5035_v30  ;;  %v3729_v10 = vcombine.low %v3720_v15, %v3728_v16  ;;  %v3752_v61 = vrot.slane %v4477_v48, %v5035_v30  ;;  %v3761_v55 = vcombine.low %v2991_v52, %v2998_v57 }
 0x1aa   :  { %v4478_v56 = vcombine.high %v2991_v52, %v2998_v57  ;;  %4317 = vrot.lane.b32.xlu0 %v4505_v35, %s4544_s13  ;;  %v5862_v9 = vrot.slane %v3705_v20, %v5045_v12  ;;  %v3034_v14 = vcombine.high %v3033_v1, %v6249_v50  ;;  %v3041_v42 = vrot.slane %v3033_v1, %v5045_v12 }
 0x1ab   :  { %v3009_v39 = vcombine.high %v3008_v24, %v6249_v50  ;;  %v5865_v25 = vrot.slane %v3729_v10, %v5045_v12  ;;  %v3016_v2 = vrot.slane %v3008_v24, %v5045_v12  ;;  %v3753_v49 = vcombine.low %v3744_v40, %v3752_v61 }
 0x1ac   :  { %v3768_v41 = vrot.slane %v3761_v55, %v5035_v30  ;;  %v3776_v28 = vrot.slane %v4478_v56, %v5035_v30  ;;  %v4208_v59 = vshrl.u32 %v5862_v9, 16  ;;  %v3048_v47 = vrot.slane %v3034_v14, %v5045_v12 }
 0x1ad   :  { %v3023_v19 = vrot.slane %v3009_v39, %v5045_v12  ;;  %v4209_v3 = vshrl.u32 %v5865_v25, 16  ;;  %v5877_v34 = vrot.slane %v3753_v49, %v5045_v12  ;;  %v6260_v18 = vpack.i.b16 %v5493_v7, %v5486_v46 }
 0x1ae   :  { %v3777_v52 = vcombine.low %v3768_v41, %v3776_v28  ;;  %v3083_v13 = vrot.slane %v5507_v4, %v5035_v30  ;;  %v3809_v57 = vcombine.low %v3041_v42, %v3048_v47  ;;  %v4480_v61 = vcombine.high %v3041_v42, %v3048_v47 }
 0x1af   :  { %v3058_v8 = vrot.slane %v6260_v18, %v5035_v30  ;;  %v4210_v43 = vpack.i.b16 %v4209_v3, %v4208_v59  ;;  %v3785_v15 = vcombine.low %v3016_v2, %v3023_v19  ;;  %v4479_v16 = vcombine.high %v3016_v2, %v3023_v19 }
 0x1b0   :  { %v5886_v40 = vrot.slane %v3777_v52, %v5045_v12  ;;  %v4214_v48 = vshrl.u32 %v5877_v34, 16  ;;  %v3084_v35 = vcombine.high %v3083_v13, %v6249_v50  ;;  %v3091_v46 = vrot.slane %v3083_v13, %v5045_v12 }
 0x1b1   :  { %v3059_v44 = vcombine.high %v3058_v8, %v6249_v50  ;;  %v3066_v24 = vrot.slane %v3058_v8, %v5045_v12  ;;  %v3792_v7 = vrot.slane %v3785_v15, %v5035_v30  ;;  %v3800_v4 = vrot.slane %v4479_v16, %v5035_v30 }
 0x1b2   :  { %v4215_v20 = vshrl.u32 %v5886_v40, 16  ;;  %v3816_v1 = vrot.slane %v3809_v57, %v5035_v30  ;;  %v3098_v55 = vrot.slane %v3084_v35, %v5045_v12  ;;  %v6261_v39 = vpack.i.b16 %v5577_v0, %v5569_v58 }
 0x1b3   :  { %v3073_v10 = vrot.slane %v3059_v44, %v5045_v12  ;;  %v3801_v56 = vcombine.low %v3792_v7, %v3800_v4  ;;  %v3133_v14 = vrot.slane %v5590_v63, %v5035_v30  ;;  %v3824_v41 = vrot.slane %v4480_v61, %v5035_v30 }
 0x1b4   :  { %v3108_v2 = vrot.slane %v6261_v39, %v5035_v30  ;;  %v4216_v49 = vpack.i.b16 %v4215_v20, %v4214_v48  ;;  %v3857_v3 = vcombine.low %v3091_v46, %v3098_v55  ;;  %v4482_v42 = vcombine.high %v3091_v46, %v3098_v55 }
 0x1b5   :  { %v3833_v28 = vcombine.low %v3066_v24, %v3073_v10  ;;  %v4481_v19 = vcombine.high %v3066_v24, %v3073_v10  ;;  %v5907_v59 = vrot.slane %v3801_v56, %v5045_v12  ;;  %v3825_v18 = vcombine.low %v3816_v1, %v3824_v41 }
 0x1b6   :  { %v3109_v47 = vcombine.high %v3108_v2, %v6249_v50  ;;  %v4506_v52 = vcombine.low %v4210_v43, %v4216_v49  ;;  %v3864_v63 = vrot.slane %v3857_v3, %v5035_v30  ;;  %v3872_v8 = vrot.slane %v4482_v42, %v5035_v30 }
 0x1b7   :  { %v3840_v58 = vrot.slane %v3833_v28, %v5035_v30  ;;  %v3848_v0 = vrot.slane %v4481_v19, %v5035_v30  ;;  %v4220_v13 = vshrl.u32 %v5907_v59, 16  ;;  %v3116_v15 = vrot.slane %v3108_v2, %v5045_v12 }
 0x1b8   :  { %4319 = vrot.lane.b32.xlu1 %v4506_v52, %s4544_s13  ;;  %v5918_v16 = vrot.slane %v3825_v18, %v5045_v12  ;;  %v3123_v43 = vrot.slane %v3109_v47, %v5045_v12  ;;  %v3134_v48 = vcombine.high %v3133_v14, %v6249_v50  ;;  %v3873_v44 = vcombine.low %v3864_v63, %v3872_v8 }
 0x1b9   :  { %v3849_v57 = vcombine.low %v3840_v58, %v3848_v0  ;;  %v3141_v24 = vrot.slane %v3133_v14, %v5045_v12  ;;  %v6262_v35 = vpack.i.b16 %v5549_v17, %v5544_v23  ;;  %v3183_v7 = vrot.slane %v5563_v29, %v5035_v30 }
 0x1ba   :  { %v4221_v20 = vshrl.u32 %v5918_v16, 16  ;;  %v3148_v10 = vrot.slane %v3134_v48, %v5045_v12  ;;  %v3881_v1 = vcombine.low %v3116_v15, %v3123_v43  ;;  %v5935_v61 = vrot.slane %v3873_v44, %v5045_v12 }
 0x1bb   :  { %v3158_v46 = vrot.slane %v6262_v35, %v5035_v30  ;;  %v5930_v4 = vrot.slane %v3849_v57, %v5045_v12  ;;  %v3184_v23 = vcombine.high %v3183_v7, %v6249_v50  ;;  %v3191_v39 = vrot.slane %v3183_v7, %v5045_v12 }
 0x1bc   :  { %v4222_v17 = vpack.i.b16 %v4221_v20, %v4220_v13  ;;  %v3888_v2 = vrot.slane %v3881_v1, %v5035_v30  ;;  %v4227_v14 = vshrl.u32 %v5935_v61, 16  ;;  %v4483_v28 = vcombine.high %v3116_v15, %v3123_v43 }
 0x1bd   :  { %v3159_v55 = vcombine.high %v3158_v46, %v6249_v50  ;;  %v3166_v56 = vrot.slane %v3158_v46, %v5045_v12  ;;  %v4226_v29 = vshrl.u32 %v5930_v4, 16  ;;  %v3198_v41 = vrot.slane %v3184_v23, %v5045_v12 }
 0x1be   :  { %v3905_v19 = vcombine.low %v3141_v24, %v3148_v10  ;;  %v4484_v3 = vcombine.high %v3141_v24, %v3148_v10  ;;  %v6263_v42 = vpack.i.b16 %v5641_v21, %v5634_v6  ;;  %v3233_v52 = vrot.slane %v5656_v26, %v5035_v30 }
 0x1bf   :  { %v3173_v49 = vrot.slane %v3159_v55, %v5045_v12  ;;  %v4228_v18 = vpack.i.b16 %v4227_v14, %v4226_v29  ;;  %v3896_v58 = vrot.slane %v4483_v28, %v5035_v30  ;;  %v3953_v15 = vcombine.low %v3191_v39, %v3198_v41 }
 0x1c0   :  { %v3208_v47 = vrot.slane %v6263_v42, %v5035_v30  ;;  %v3912_v8 = vrot.slane %v3905_v19, %v5035_v30  ;;  %v3920_v13 = vrot.slane %v4484_v3, %v5035_v30  ;;  %v4486_v57 = vcombine.high %v3191_v39, %v3198_v41  ;;  %v6266_v19 = vld [vmem:[#allocation4_spill] sm:$0xff] }
 0x1c1   :  { %v3929_v0 = vcombine.low %v3166_v56, %v3173_v49  ;;  %v4485_v63 = vcombine.high %v3166_v56, %v3173_v49  ;;  %v4507_v43 = vcombine.low %v4222_v17, %v4228_v18  ;;  %v3897_v48 = vcombine.low %v3888_v2, %v3896_v58  ;;  %v6264_v2 = vld [vmem:[#allocation6_spill] sm:$0xff] }
 0x1c2   :  { %v3921_v21 = vcombine.low %v3912_v8, %v3920_v13  ;;  %v3960_v26 = vrot.slane %v3953_v15, %v5035_v30  ;;  %v3968_v24 = vrot.slane %v4486_v57, %v5035_v30  ;;  %v3209_v35 = vcombine.high %v3208_v47, %v6249_v50 }
 0x1c3   :  { %v3936_v44 = vrot.slane %v3929_v0, %v5035_v30  ;;  %v3944_v6 = vrot.slane %v4485_v63, %v5035_v30  ;;  %4321 = vrot.lane.b32.xlu0 %v4507_v43, %s4544_s13  ;;  %v5962_v46 = vrot.slane %v3897_v48, %v5045_v12  ;;  %v3216_v20 = vrot.slane %v3208_v47, %v5045_v12 }
 0x1c4   :  { %v3234_v10 = vcombine.high %v3233_v52, %v6249_v50  ;;  %v5967_v1 = vrot.slane %v3921_v21, %v5045_v12  ;;  %v3969_v55 = vcombine.low %v3960_v26, %v3968_v24  ;;  %v3223_v56 = vrot.slane %v3209_v35, %v5045_v12 }
 0x1c5   :  { %v3945_v7 = vcombine.low %v3936_v44, %v3944_v6  ;;  %v3241_v23 = vrot.slane %v3233_v52, %v5045_v12  ;;  %v4232_v29 = vshrl.u32 %v5962_v46, 16  ;;  %v6265_v14 = vpack.i.b16 %v5604_v36, %v6264_v2 }
 0x1c6   :  { %v3248_v39 = vrot.slane %v3234_v10, %v5045_v12  ;;  %v5981_v41 = vrot.slane %v3969_v55, %v5045_v12  ;;  %v4233_v28 = vshrl.u32 %v5967_v1, 16  ;;  %v3283_v3 = vrot.slane %v6266_v19, %v5035_v30 }
 0x1c7   :  { %v5972_v17 = vrot.slane %v3945_v7, %v5045_v12  ;;  %v3258_v49 = vrot.slane %v6265_v14, %v5035_v30  ;;  %v3977_v42 = vcombine.low %v3216_v20, %v3223_v56  ;;  %v4487_v58 = vcombine.high %v3216_v20, %v3223_v56 }
 0x1c8   :  { %v4234_v0 = vpack.i.b16 %v4233_v28, %v4232_v29  ;;  %v4239_v36 = vshrl.u32 %v5981_v41, 16  ;;  %v3284_v63 = vcombine.high %v3283_v3, %v6249_v50  ;;  %v3291_v8 = vrot.slane %v3283_v3, %v5045_v12 }
 0x1c9   :  { %v4238_v47 = vshrl.u32 %v5972_v17, 16  ;;  %v3259_v52 = vcombine.high %v3258_v49, %v6249_v50  ;;  %v3266_v18 = vrot.slane %v3258_v49, %v5045_v12  ;;  %v3984_v15 = vrot.slane %v3977_v42, %v5035_v30 }
 0x1ca   :  { %v3992_v57 = vrot.slane %v4487_v58, %v5035_v30  ;;  %v4001_v43 = vcombine.low %v3241_v23, %v3248_v39  ;;  %v3298_v44 = vrot.slane %v3284_v63, %v5045_v12  ;;  %v4488_v6 = vcombine.high %v3241_v23, %v3248_v39  ;;  %v6268_v58 = vld [vmem:[#allocation7_spill] sm:$0xff] }
 0x1cb   :  { %v3273_v13 = vrot.slane %v3259_v52, %v5045_v12  ;;  %v4240_v48 = vpack.i.b16 %v4239_v36, %v4238_v47  ;;  %v6267_v21 = vpack.i.b16 %v5698_v38, %v5693_v33  ;;  %v3333_v47 = vrot.slane %v5720_v62, %v5035_v30 }
 0x1cc   :  { %v3993_v24 = vcombine.low %v3984_v15, %v3992_v57  ;;  %v4008_v35 = vrot.slane %v4001_v43, %v5035_v30  ;;  %v4016_v55 = vrot.slane %v4488_v6, %v5035_v30  ;;  %v4049_v56 = vcombine.low %v3291_v8, %v3298_v44 }
 0x1cd   :  { %v3308_v26 = vrot.slane %v6267_v21, %v5035_v30  ;;  %v4025_v7 = vcombine.low %v3266_v18, %v3273_v13  ;;  %v4489_v20 = vcombine.high %v3266_v18, %v3273_v13  ;;  %v4508_v10 = vcombine.low %v4234_v0, %v4240_v48 }
 0x1ce   :  { %v4490_v29 = vcombine.high %v3291_v8, %v3298_v44  ;;  %v6003_v2 = vrot.slane %v3993_v24, %v5045_v12  ;;  %v4017_v38 = vcombine.low %v4008_v35, %v4016_v55  ;;  %v4056_v14 = vrot.slane %v4049_v56, %v5035_v30 }
 0x1cf   :  { %v4032_v23 = vrot.slane %v4025_v7, %v5035_v30  ;;  %v4040_v39 = vrot.slane %v4489_v20, %v5035_v30  ;;  %v3309_v33 = vcombine.high %v3308_v26, %v6249_v50  ;;  %4323 = vrot.lane.b32.xlu1 %v4508_v10, %s4544_s13  ;;  %v3316_v28 = vrot.slane %v3308_v26, %v5045_v12 }
 0x1d0   :  { %v4064_v49 = vrot.slane %v4490_v29, %v5035_v30  ;;  %v4244_v3 = vshrl.u32 %v6003_v2, 16  ;;  %v6017_v52 = vrot.slane %v4017_v38, %v5045_v12  ;;  %v6269_v0 = vpack.i.b16 %v5666_v51, %v6268_v58 }
 0x1d1   :  { %v4041_v19 = vcombine.low %v4032_v23, %v4040_v39  ;;  %v3323_v42 = vrot.slane %v3309_v33, %v5045_v12  ;;  %v3383_v63 = vrot.slane %v5686_v5, %v5035_v30  ;;  %v3334_v13 = vcombine.high %v3333_v47, %v6249_v50 }
 0x1d2   :  { %v4065_v18 = vcombine.low %v4056_v14, %v4064_v49  ;;  %v3358_v36 = vrot.slane %v6269_v0, %v5035_v30  ;;  %v3341_v15 = vrot.slane %v3333_v47, %v5045_v12  ;;  %v4245_v43 = vshrl.u32 %v6017_v52, 16 }
 0x1d3   :  { %v6026_v8 = vrot.slane %v4041_v19, %v5045_v12  ;;  %v4073_v62 = vcombine.low %v3316_v28, %v3323_v42  ;;  %v3348_v5 = vrot.slane %v3334_v13, %v5045_v12  ;;  %v3384_v6 = vcombine.high %v3383_v63, %v6249_v50 }
 0x1d4   :  { %v4072_v57 = vrot.slane %v4065_v18, %v5045_v12  ;;  %v3359_v48 = vcombine.high %v3358_v36, %v6249_v50  ;;  %v3366_v51 = vrot.slane %v3358_v36, %v5045_v12  ;;  %v3391_v21 = vrot.slane %v3383_v63, %v5045_v12 }
 0x1d5   :  { %v4250_v44 = vshrl.u32 %v6026_v8, 16  ;;  %v4246_v26 = vpack.i.b16 %v4245_v43, %v4244_v3  ;;  %v4080_v7 = vrot.slane %v4073_v62, %v5035_v30  ;;  %v3398_v20 = vrot.slane %v3384_v6, %v5045_v12 }
 0x1d6   :  { %v4251_v24 = vshrl.u32 %v4072_v57, 16  ;;  %v3373_v35 = vrot.slane %v3359_v48, %v5045_v12  ;;  %v4491_v10 = vcombine.high %v3316_v28, %v3323_v42  ;;  %v4097_v55 = vcombine.low %v3341_v15, %v3348_v5 }
 0x1d7   :  { %v4492_v56 = vcombine.high %v3341_v15, %v3348_v5  ;;  %v4145_v14 = vcombine.low %v3391_v21, %v3398_v20  ;;  %v4494_v47 = vcombine.high %v3391_v21, %v3398_v20  ;;  %v4195_v62 = vpack.i.b16 %v5821_v31, %v5818_v37 }
 0x1d8   :  { %v4252_v29 = vpack.i.b16 %v4251_v24, %v4250_v44  ;;  %v4121_v23 = vcombine.low %v3366_v51, %v3373_v35  ;;  %v4493_v39 = vcombine.high %v3366_v51, %v3373_v35  ;;  %v4088_v33 = vrot.slane %v4491_v10, %v5035_v30 }
 0x1d9   :  { %v4104_v50 = vrot.slane %v4097_v55, %v5035_v30  ;;  %v4112_v38 = vrot.slane %v4492_v56, %v5035_v30  ;;  %v4152_v42 = vrot.slane %v4145_v14, %v5035_v30  ;;  %v4160_v0 = vrot.slane %v4494_v47, %v5035_v30 }
 0x1da   :  { %v4509_v49 = vcombine.low %v4246_v26, %v4252_v29  ;;  %v4128_v19 = vrot.slane %v4121_v23, %v5035_v30  ;;  %v4136_v3 = vrot.slane %v4493_v39, %v5035_v30  ;;  %v4089_v18 = vcombine.low %v4080_v7, %v4088_v33 }
 0x1db   :  { %v4113_v28 = vcombine.low %v4104_v50, %v4112_v38  ;;  %v4161_v15 = vcombine.low %v4152_v42, %v4160_v0  ;;  %v4201_v51 = vpack.i.b16 %v5835_v54, %v5826_v22  ;;  %v4213_v30 = vpack.i.b16 %v5886_v40, %v5877_v34 }
 0x1dc   :  { %4325 = vrot.lane.b32.xlu0 %v4509_v49, %s4544_s13  ;;  %v4137_v58 = vcombine.low %v4128_v19, %v4136_v3  ;;  %v4096_v36 = vrot.slane %v4089_v18, %v5045_v12  ;;  %v4207_v6 = vpack.i.b16 %v5865_v25, %v5862_v9  ;;  %v4219_v24 = vpack.i.b16 %v5918_v16, %v5907_v59 }
 0x1dd   :  { %v4120_v63 = vrot.slane %v4113_v28, %v5045_v12  ;;  %v4168_v44 = vrot.slane %v4161_v15, %v5045_v12  ;;  %v4497_v26 = vcombine.low %v4195_v62, %v4201_v51  ;;  %v4225_v37 = vpack.i.b16 %v5935_v61, %v5930_v4 }
 0x1de   :  { %v4144_v13 = vrot.slane %v4137_v58, %v5045_v12  ;;  %v4256_v43 = vshrl.u32 %v4096_v36, 16  ;;  %v4498_v35 = vcombine.low %v4207_v6, %v4213_v30  ;;  %v4237_v12 = vpack.i.b16 %v5981_v41, %v5972_v17  ;;  %v6270_v41 = vld [vmem:[#allocation8_spill] sm:$0xff] }
 0x1df   :  { %v4257_v48 = vshrl.u32 %v4120_v63, 16  ;;  %v4263_v31 = vshrl.u32 %v4168_v44, 16  ;;  %v4231_v22 = vpack.i.b16 %v5967_v1, %v5962_v46  ;;  %v4499_v54 = vcombine.low %v4219_v24, %v4225_v37  ;;  %v6271_v46 = vld [vmem:[#allocation2_spill] sm:$0xff] }
 0x1e0   :  { %v4262_v5 = vshrl.u32 %v4144_v13, 16  ;;  %v4243_v9 = vpack.i.b16 %v6017_v52, %v6003_v2  ;;  %v4249_v25 = vpack.i.b16 %v4072_v57, %v6026_v8  ;;  %v4261_v34 = vpack.i.b16 %v4168_v44, %v4144_v13 }
 0x1e1   :  { %v4258_v21 = vpack.i.b16 %v4257_v48, %v4256_v43  ;;  %v4500_v59 = vcombine.low %v4231_v22, %v4237_v12  ;;  %v4255_v16 = vpack.i.b16 %v4120_v63, %v4096_v36  ;;  %v4177_v17 = vpack.i.b16 %v5736_v27, %v5723_v32 }
 0x1e2   :  { %v4264_v40 = vpack.i.b16 %v4263_v31, %v4262_v5  ;;  %v4501_v7 = vcombine.low %v4243_v9, %v4249_v25  ;;  %v4171_v1 = vpack.i.b16 %v6271_v46, %v6270_v41  ;;  %v4189_v32 = vpack.i.b16 %v5786_v45, %v5780_v53 }
 0x1e3   :  { %v4502_v61 = vcombine.low %v4255_v16, %v4261_v34  ;;  %v4183_v27 = vpack.i.b16 %v5774_v11, %v5765_v60 }
 0x1e4   :  { %v4510_v4 = vcombine.low %v4258_v21, %v4264_v40  ;;  %v4495_v20 = vcombine.low %v4171_v1, %v4177_v17 }
 0x1e5   :  { %v4496_v10 = vcombine.low %v4183_v27, %v4189_v32 }
 0x1e6   :  { %4327 = vrot.lane.b32.xlu1 %v4510_v4, %s4544_s13 }
 0x203   :  { %v4314_v2 = vpop.permute.xlu0 %4313 }
 0x204   :  { %v4332_v52 = vsel %vm4329_vm0, %v4495_v20, %v4314_v2 }
 0x205   :  { %v4511_v8 = vcombine.low %v4332_v52, %v4332_v52  ;;  %v4512_v57 = vcombine.high %v4332_v52, %v4332_v52 }
 0x207   :  { %4411 = vst.msk [vmem:[%s6154_s1] sm:$0xf] %vm4410_vm1, %v4511_v8  ;;  %4412 = vst.msk [vmem:[%s6154_s1 + $0x4] sm:$0xf] %vm4410_vm1, %v4512_v57 }
 0x210   :  { %v4316_v55 = vpop.permute.xlu1 %4315 }
 0x211   :  { %v4335_v56 = vsel %vm4329_vm0, %v4496_v10, %v4316_v55 }
 0x212   :  { %v4513_v29 = vcombine.low %v4335_v56, %v4335_v56  ;;  %v4514_v23 = vcombine.high %v4335_v56, %v4335_v56 }
 0x214   :  { %4413 = vst.msk [vmem:[%s6154_s1 + $0x8] sm:$0xf] %vm4410_vm1, %v4513_v29  ;;  %4414 = vst.msk [vmem:[%s6154_s1 + $0xc] sm:$0xf] %vm4410_vm1, %v4514_v23 }
 0x21c   :  { %v4318_v53 = vpop.permute.xlu0 %4317 }
 0x21d   :  { %v4338_v45 = vsel %vm4329_vm0, %v4497_v26, %v4318_v53 }
 0x21e   :  { %v4515_v60 = vcombine.low %v4338_v45, %v4338_v45  ;;  %v4516_v11 = vcombine.high %v4338_v45, %v4338_v45 }
 0x220   :  { %4415 = vst.msk [vmem:[%s6154_s1 + $0x10] sm:$0xf] %vm4410_vm1, %v4515_v60  ;;  %4416 = vst.msk [vmem:[%s6154_s1 + $0x14] sm:$0xf] %vm4410_vm1, %v4516_v11 }
 0x22a   :  { %v4320_v39 = vpop.permute.xlu1 %4319 }
 0x22b   :  { %v4341_v33 = vsel %vm4329_vm0, %v4498_v35, %v4320_v39 }
 0x22c   :  { %v4517_v50 = vcombine.low %v4341_v33, %v4341_v33  ;;  %v4518_v38 = vcombine.high %v4341_v33, %v4341_v33 }
 0x22e   :  { %4417 = vst.msk [vmem:[%s6154_s1 + $0x18] sm:$0xf] %vm4410_vm1, %v4517_v50  ;;  %4418 = vst.msk [vmem:[%s6154_s1 + $0x1c] sm:$0xf] %vm4410_vm1, %v4518_v38 }
 0x235   :  { %v4322_v14 = vpop.permute.xlu0 %4321 }
 0x236   :  { %v4344_v49 = vsel %vm4329_vm0, %v4499_v54, %v4322_v14 }
 0x237   :  { %v4519_v19 = vcombine.low %v4344_v49, %v4344_v49  ;;  %v4520_v3 = vcombine.high %v4344_v49, %v4344_v49 }
 0x239   :  { %4419 = vst.msk [vmem:[%s6154_s1 + $0x20] sm:$0xf] %vm4410_vm1, %v4519_v19  ;;  %4420 = vst.msk [vmem:[%s6154_s1 + $0x24] sm:$0xf] %vm4410_vm1, %v4520_v3 }
 0x241   :  { %v4324_v47 = vpop.permute.xlu1 %4323 }
 0x242   :  { %v4347_v18 = vsel %vm4329_vm0, %v4500_v59, %v4324_v47 }
 0x243   :  { %v4521_v28 = vcombine.low %v4347_v18, %v4347_v18  ;;  %v4522_v42 = vcombine.high %v4347_v18, %v4347_v18 }
 0x245   :  { %4421 = vst.msk [vmem:[%s6154_s1 + $0x28] sm:$0xf] %vm4410_vm1, %v4521_v28  ;;  %4422 = vst.msk [vmem:[%s6154_s1 + $0x2c] sm:$0xf] %vm4410_vm1, %v4522_v42 }
 0x24e   :  { %v4326_v58 = vpop.permute.xlu0 %4325 }
 0x24f   :  { %v4350_v0 = vsel %vm4329_vm0, %v4501_v7, %v4326_v58 }
 0x250   :  { %v4523_v36 = vcombine.low %v4350_v0, %v4350_v0  ;;  %v4524_v63 = vcombine.high %v4350_v0, %v4350_v0 }
 0x252   :  { %4423 = vst.msk [vmem:[%s6154_s1 + $0x30] sm:$0xf] %vm4410_vm1, %v4523_v36  ;;  %4424 = vst.msk [vmem:[%s6154_s1 + $0x34] sm:$0xf] %vm4410_vm1, %v4524_v63 }
 0x258   :  { %v4328_v13 = vpop.permute.xlu1 %4327 }
 0x259   :  { %v4353_v15 = vsel %vm4329_vm0, %v4502_v61, %v4328_v13 }
 0x25a   :  { %v4525_v62 = vcombine.low %v4353_v15, %v4353_v15  ;;  %v4526_v43 = vcombine.high %v4353_v15, %v4353_v15 }
 0x25c   :  { %4425 = vst.msk [vmem:[%s6154_s1 + $0x38] sm:$0xf] %vm4410_vm1, %v4525_v62  ;;  %4426 = vst.msk [vmem:[%s6154_s1 + $0x3c] sm:$0xf] %vm4410_vm1, %v4526_v43 }

// kernel: tpu_custom_call.1
= control target key start
LH: loop header
LB: loop body
LE: loop exit
PB: predicated region body
PF: predicated region fallthrough
CT: control target
= control target key end

     0   :  { %7 = vsyncpa [#allocation3], 0  ;;  %s591_s0 = inlined_call_operand.hbm [shape: f32[16,128], index: 0, kind: input, shape index: {}]   ;;  %s592_s1 = inlined_call_operand.vmem [shape: f32[1,128], index: 1, kind: input, shape index: {}]   ;;  %s593_s2 = inlined_call_operand.hbm [shape: f32[16,128], index: 2, kind: output, shape index: {}]  }
   0x1   :  { %9 = vsyncpa [#allocation3 + $0x1], 0 }
   0x2   :  { %10 = vsyncpa [#allocation4], 0 }
   0x3   :  { %12 = vsyncpa [#allocation4 + $0x1], 0  ;;  %s427_s9 = smov 0   ;;  %s429_s10 = smov 0  }
   0x4   :  { %s431_s11 = smov 0   ;;  %s433_s12 = smov 0  }
   0x5 LB: > { %s448_s13 = sadd.s32 4294967295, %s408_s12   ;;  %s253_s14 = sadd.s32 4294967294, %s408_s12   ;;  %s408_s12 = sphi %s433_s12, %s608_s12   ;;  %s404_s11 = sphi %s431_s11, %s607_s11   ;;  %s400_s10 = sphi %s429_s10, %s606_s10   ;;  %s396_s9 = sphi %s427_s9, %s605_s9  }
   0x6   : > { %s452_s15 = sadd.s32 1, %s408_s12   ;;  %s25_s16 = sadd.s32 1, %s404_s11 }
   0x7   : > { %s22_s17 = ssub.s32 %s408_s12, %s452_s15  ;;  %p32_p0 = scmp.ne.s32.totalorder %s404_s11, %s400_s10 }
   0x8   : > { %p23_p1 = scmp.eq.s32.totalorder %s22_s17, 0  ;;  %p33_p2 = scmp.eq.s32.totalorder %s408_s12, 0 }
   0x9   : > { %p38_p3 = scmp.ne.s32.totalorder %s400_s10, %s396_s9  ;;  %p39_p4 = scmp.eq.s32.totalorder %s448_s13, 0 }
   0xa   : > { %s464_s18 = scalar_select %p23_p1, %s404_s11, %s25_s16  }
   0xb   : > { %p466_p5 = por %p33_p2, %p32_p0  ;;  %p470_p6 = por %p39_p4, %p38_p3 }
   0xc   : > { %p83_p7 = scmp.eq.s32.totalorder %s448_s13, 1  ;;  %p89_p8 = scmp.eq.s32.totalorder %s253_s14, 1 }
   0xd   : > { %p278_p10 = scmp.lt.s32.totalorder %s408_s12, 2  ;;  %s112_s23 = sand.u32 1, %s404_s11  }
   0xe   : > { %p477_p11 = por %p83_p7, %p32_p0  ;;  %p481_p12 = por %p89_p8, %p38_p3 }
   0xf   : > { %s257_s24 = sshll.u32 %s408_s12, 7  ;;  %s256_s25 = sshll.u32 %s112_s23, 3 }
  0x10   : > { %s597_s21 = scalar_select %p477_p11, 1, 0 }
  0x11   : > { %s598_s22 = scalar_select %p481_p12, 1, 0 }
  0x12   : > { %s490_s28 = scalar_lea.hbm %s591_s0, %s257_s24  ;;  %s116_s29 = scalar_lea.vmem [#allocation2], %s256_s25 }
  0x13   : > { %s123_s30 = sshll.u32 %s116_s29, 4  ;;  %p494_p13 = pnand %p278_p10, %p466_p5  ;;  %s498_s30 = int_to_ptr.vmem [resolvable:$true] %s123_s30 }
  0x14   : > { %s113_s4 = scalar_lea.sflag [#allocation3], %s112_s23  ;;  %s312_s5 = scalar_lea.hbm %s490_s28, 128 }
  0x15   : > { %p313_p2 = scmp.ne.s32.totalorder %s490_s28, %s312_s5  ;;  %p314_p3 = pneg %p494_p13 }
  0x16   : > { %s317_s8 = scalar_lea.hbm %s591_s0, 256  ;;  %p318_p5 = scmp.lt.u32.totalorder %s490_s28, %s591_s0 }
  0x17   : > { %p315_p4 = pnand %p314_p3, %p313_p2  ;;  %p319_p8 = scmp.lt.u32.totalorder %s317_s8, %s312_s5 }
  0x18   : > { %p321_p9 = scmp.lt.u32.totalorder %s312_s5, %s490_s28 }
  0x19   : > { %p316_p7 = pneg %p315_p4  ;;  %p320_p10 = por %p319_p8, %p318_p5 }
  0x1b   : > { %p322_p0 = por %p321_p9, %p320_p10 }
  0x1d   : > { %p323_p1 = pnand %p322_p0, %p316_p7 }
  0x1f   : > { %326 = shalt.err (!%p323_p1)
}
  0x20   : > { %s327_s17 = scalar_lea.vmem %s498_s30, 128  ;;  %s410_s19 = smov [#allocation2]  }
  0x21   : > { %p328_p2 = scmp.ne.s32.totalorder %s498_s30, %s327_s17  ;;  %s332_s23 = sshll.u32 %s410_s19, 4  ;;  %s333_s23 = int_to_ptr.vmem [resolvable:$false] %s332_s23 }
  0x22   : > { %s334_s24 = scalar_lea.vmem %s333_s23, 256  ;;  %p335_p11 = scmp.lt.s32.totalorder %s498_s30, %s333_s23 }
  0x23   : > { %p330_p4 = pnand %p328_p2, %p314_p3  ;;  %p336_p5 = scmp.lt.s32.totalorder %s334_s24, %s327_s17 }
  0x25   : > { %p331_p12 = pneg %p330_p4  ;;  %p337_p8 = por %p336_p5, %p335_p11 }
  0x27   : > { %p338_p9 = pnand %p337_p8, %p331_p12 }
  0x29   : > { %341 = shalt.err (!%p338_p9)
}
  0x2a   : > { %273 = dma.hbm_to_vmem [thread:$0]  (!%p494_p13), %s490_s28, 128, %s498_s30, %s113_s4  }
  0x2b   : > { %p600_p0 = scmp.lt.s32.totalorder %s408_s12, 3  ;;  %p601_p1 = scmp.ge.s32.totalorder %s408_s12, 1 }
  0x2d   : > { %p129_p3 = pnand %p601_p1, %p600_p0 }
  0x2e   : > { %s532_s25 = sand.u32 (!%p129_p3), 1, %s400_s10  }
  0x2f   : > { %132 = sbr.rel (%p129_p3) target bundleno = 81 (0x51), region = 28  ;;  %s259_s26 = sshll.u32 (!%p129_p3), %s532_s25, 3 }
  0x30   : > { %s135_s27 = scalar_lea.sflag (!%p129_p3), [#allocation3], %s532_s25  ;;  %s138_s29 = scalar_lea.vmem (!%p129_p3), [#allocation2], %s259_s26 }
  0x36   : > { %387 = dma.done.wait (%p470_p6), %s135_s27, 128  }
  0x37   : > { %389 = vsyncadd (%p470_p6), %s135_s27, 4294967168  ;;  %s158_s28 = scalar_lea.vmem [#allocation5], %s259_s26  ;;  %s263_s3 = sshll.u32 %s448_s13, 7  ;;  %v159_v0 = vld [vmem:[%s138_s29] sm:$0xff] }
  0x38   : > { %s183_s30 = sshll.u32 %s158_s28, 4  ;;  %v261_v1 = vld [vmem:[%s592_s1] ss:$0 sm:$0xff]  ;;  %s549_s20 = scalar_lea.hbm %s593_s2, %s263_s3  ;;  %s544_s30 = int_to_ptr.vmem [resolvable:$true] %s183_s30 }
  0x39   : > { %v167_v2 = vadd.f32 %v261_v1, %v159_v0  ;;  %s170_s8 = scalar_lea.sflag [#allocation4], %s532_s25  ;;  %s342_s14 = scalar_lea.vmem %s544_s30, 128 }
  0x3a   : > { %p343_p6 = scmp.ne.s32.totalorder %s544_s30, %s342_s14  ;;  %p602_p11 = scmp.ne.s32.totalorder %s597_s21, 0 }
  0x3b   : > { %168 = vst [vmem:[%s158_s28] sm:$0xff] %v167_v2  ;;  %s411_s13 = smov [#allocation5]  }
  0x3c   : > { %p344_p12 = pnand %p343_p6, %p602_p11  ;;  %s346_s16 = sshll.u32 %s411_s13, 4  ;;  %s347_s16 = int_to_ptr.vmem [resolvable:$false] %s346_s16 }
  0x3d   : > { %s348_s17 = scalar_lea.vmem %s347_s16, 256  ;;  %p349_p7 = scmp.lt.s32.totalorder %s544_s30, %s347_s16 }
  0x3e   : > { %p345_p13 = pneg %p344_p12  ;;  %p350_p10 = scmp.lt.s32.totalorder %s348_s17, %s342_s14 }
  0x40   : > { %p351_p2 = por %p350_p10, %p349_p7 }
  0x42   : > { %p352_p4 = pnand %p351_p2, %p345_p13 }
  0x44   : > { %355 = shalt.err (!%p352_p4)
}
  0x45   : > { %s356_s19 = scalar_lea.hbm %s549_s20, 128  ;;  %s360_s25 = scalar_lea.hbm %s593_s2, 256 }
  0x46   : > { %p357_p5 = scmp.ne.s32.totalorder %s549_s20, %s356_s19  ;;  %p361_p0 = scmp.lt.u32.totalorder %s549_s20, %s593_s2 }
  0x47   : > { %p362_p1 = scmp.lt.u32.totalorder %s360_s25, %s356_s19  ;;  %p364_p6 = scmp.lt.u32.totalorder %s356_s19, %s549_s20 }
  0x48   : > { %p358_p8 = pnand %p357_p5, %p602_p11 }
  0x49   : > { %p363_p3 = por %p362_p1, %p361_p0 }
  0x4a   : > { %p359_p9 = pneg %p358_p8 }
  0x4b   : > { %p365_p12 = por %p364_p6, %p363_p3 }
  0x4d   : > { %p366_p13 = pnand %p365_p12, %p359_p9 }
  0x4f   : > { %369 = shalt.err (!%p366_p13)
}
  0x50   : > { %268 = dma.vmem_to_hbm [thread:$0]  (%p602_p11), %s544_s30, 128, %s549_s20, %s170_s8  }
  0x51 PF: > { %s195_s29 = sand.u32 1, %s396_s9   ;;  %p603_p7 = scmp.ne.s32.totalorder %s598_s22, 0 }
  0x52   : > { %p604_p10 = scmp.ge.s32.totalorder %s408_s12, 2  ;;  %s196_s28 = scalar_lea.sflag [#allocation4], %s195_s29 }
  0x54   : > { %p275_p2 = pnand %p604_p10, %p603_p7 }
  0x56   : > { %391 = dma.done.wait (!%p275_p2), %s196_s28, 128  }
  0x57   : > { %393 = vsyncadd (!%p275_p2), %s196_s28, 4294967168  ;;  %p15_p4 = scmp.ge.s32.totalorder %s452_s15, 4   ;;  %s605_s9 = smov %s400_s10 }
  0x58   : > { %s606_s10 = smov %s404_s11  ;;  %s607_s11 = smov %s464_s18 }
  0x59   : > { %s608_s12 = smov %s452_s15  ;;  %17 = sbr.rel (!%p15_p4) target bundleno = 5 (0x5), region = 73 }
  0x60   :  { %201 = vsyncpa [#allocation3], 1 }
  0x61   :  { %203 = vsyncpa [#allocation3 + $0x1], 1 }
  0x62   :  { %204 = vsyncpa [#allocation4], 1 }
  0x63   :  { %206 = vsyncpa [#allocation4 + $0x1], 1 }

// kernel: tpu_custom_call.1
= control target key start
LH: loop header
LB: loop body
LE: loop exit
PB: predicated region body
PF: predicated region fallthrough
CT: control target
= control target key end

     0   :  { %s6904_s24 = smov 0   ;;  %s9331_s0 = inlined_call_operand.vmem [shape: bf16[512,32], index: 0, kind: input, shape index: {}]   ;;  %s9332_s1 = inlined_call_operand.vmem [shape: bf16[2,1,16,16], index: 1, kind: input, shape index: {}]   ;;  %s9333_s2 = inlined_call_operand.vmem [shape: f32[1,32], index: 2, kind: input, shape index: {}]   ;;  %s9334_s3 = inlined_call_operand.vmem [shape: f32[1,32], index: 3, kind: input, shape index: {}]   ;;  %s9335_s4 = inlined_call_operand.vmem [shape: bf16[32,96], index: 4, kind: input, shape index: {}]   ;;  %s9336_s5 = inlined_call_operand.vmem [shape: bf16[32,32], index: 5, kind: input, shape index: {}]   ;;  %s9337_s6 = inlined_call_operand.vmem [shape: f32[1,32], index: 6, kind: input, shape index: {}]   ;;  %s9338_s7 = inlined_call_operand.vmem [shape: bf16[512,32], index: 7, kind: output, shape index: {}]  }
   0x1 LB: > { %s5622_s25 = sadd.s32 4294967295, %s6856_s24   ;;  %p5626_p0 = scmp.ge.s32.totalorder %s6856_s24, 1  ;;  %s6856_s24 = sphi %s6904_s24, %s17_s24  }
   0x2   : > { %p238_p1 = scmp.lt.s32.totalorder %s6856_s24, 3 }
   0x4   : > { %p239_p2 = pnand %p5626_p0, %p238_p1 }
   0x6   : > { %242 = sbr.rel (%p239_p2) target bundleno = 2083 (0x823), region = 48 }
   0xd   : > { %s5627_s26 = sshll.u32 %s5622_s25, 5  ;;  %vm347_vm0 = vcmask 261120   ;;  %vm6859_vm1 = vmmov 0   ;;  %s6860_s16 = smov 96   ;;  %vm1150_vm2 = vcmask 130048   ;;  %vm5533_vm3 = vcmask 257024  }
   0xe   : > { %p271_p3 = scmp.lt.s32.totalorder %s5627_s26, 63  ;;  %s6861_s17 = smov 112  }
   0xf   : > { %s6862_s18 = smov 64  }
  0x10   : > { %s9607_s26 = smov (!%p271_p3, %s5627_s26), 63 }
  0x11   : > { %s5628_s27 = sshll.u32 %s9607_s26, 2 }
  0x12   : > { %s6920_s30 = scalar_lea.vmem %s9331_s0, %s5628_s27  ;;  %s9202_s12 = scalar_lea.vmem %s9338_s7, %s5628_s27 }
  0x13   : > { %v5801_v0 = vld [vmem:[%s6920_s30] sm:$0xff]   ;;  %v5872_v1 = vld [vmem:[%s6920_s30 + $0x8] sm:$0xff]   ;;  %v5873_v6 = vld [vmem:[%s6920_s30 + $0x10] sm:$0xff]  }
  0x14   : > { %v6924_v2 = vunpack.c.l.bf16 %v5801_v0  ;;  %v6926_v3 = vunpack.c.l.bf16 %v5872_v1  ;;  %v6928_v4 = vunpack.c.h.bf16 %v5801_v0  ;;  %v6930_v5 = vunpack.c.h.bf16 %v5872_v1  ;;  %v5874_v13 = vld [vmem:[%s6920_s30 + $0x18] sm:$0xff]   ;;  %v5875_v18 = vld [vmem:[%s6920_s30 + $0x20] sm:$0xff]   ;;  %v5876_v23 = vld [vmem:[%s6920_s30 + $0x28] sm:$0xff]  }
  0x15   : > { %v6941_v11 = vunpack.c.l.bf16 %v5873_v6  ;;  %v6943_v12 = vunpack.c.h.bf16 %v5873_v6  ;;  %v6950_v16 = vunpack.c.l.bf16 %v5874_v13  ;;  %v6952_v17 = vunpack.c.h.bf16 %v5874_v13  ;;  %v5877_v28 = vld [vmem:[%s6920_s30 + $0x30] sm:$0xff]   ;;  %v5878_v33 = vld [vmem:[%s6920_s30 + $0x38] sm:$0xff]   ;;  %v5879_v38 = vld [vmem:[%s6920_s30 + $0x40] sm:$0xff]  }
  0x16   : > { %9410 = vst [vmem:[#allocation2_spill] sm:$0xff] %v6924_v2  ;;  %9411 = vst [vmem:[#allocation3_spill] sm:$0xff] %v6926_v3  ;;  %v348_v7 = vsel %vm347_vm0, %v6924_v2, 0.0  ;;  %v354_v8 = vsel %vm347_vm0, %v6926_v3, 0.0  ;;  %v351_v9 = vsel %vm347_vm0, %v6928_v4, 0.0  ;;  %v357_v10 = vsel %vm347_vm0, %v6930_v5, 0.0 }
  0x17   : > { %9412 = vst [vmem:[#allocation4_spill] sm:$0xff] %v6928_v4  ;;  %9413 = vst [vmem:[#allocation5_spill] sm:$0xff] %v6930_v5  ;;  %349 = vadd.xlane.f32.xlu0 %v348_v7  ;;  %355 = vadd.xlane.f32.xlu1 %v354_v8  ;;  %v360_v14 = vsel %vm347_vm0, %v6941_v11, 0.0  ;;  %v363_v15 = vsel %vm347_vm0, %v6943_v12, 0.0  ;;  %v366_v19 = vsel %vm347_vm0, %v6950_v16, 0.0  ;;  %v369_v20 = vsel %vm347_vm0, %v6952_v17, 0.0 }
  0x18   : > { %9414 = vst [vmem:[#allocation6_spill] sm:$0xff] %v6941_v11  ;;  %9415 = vst [vmem:[#allocation7_spill] sm:$0xff] %v6943_v12  ;;  %v6959_v21 = vunpack.c.l.bf16 %v5875_v18  ;;  %v6961_v22 = vunpack.c.h.bf16 %v5875_v18  ;;  %v6968_v26 = vunpack.c.l.bf16 %v5876_v23  ;;  %v6970_v27 = vunpack.c.h.bf16 %v5876_v23  ;;  %v5880_v43 = vld [vmem:[%s6920_s30 + $0x48] sm:$0xff]   ;;  %v5881_v48 = vld [vmem:[%s6920_s30 + $0x50] sm:$0xff]  }
  0x19   : > { %9416 = vst [vmem:[#allocation8_spill] sm:$0xff] %v6950_v16  ;;  %9417 = vst [vmem:[#allocation9_spill] sm:$0xff] %v6952_v17  ;;  %v6977_v31 = vunpack.c.l.bf16 %v5877_v28  ;;  %v6979_v32 = vunpack.c.h.bf16 %v5877_v28  ;;  %v6986_v36 = vunpack.c.l.bf16 %v5878_v33  ;;  %v6988_v37 = vunpack.c.h.bf16 %v5878_v33  ;;  %v5882_v53 = vld [vmem:[%s6920_s30 + $0x58] sm:$0xff]   ;;  %v5883_v58 = vld [vmem:[%s6920_s30 + $0x60] sm:$0xff]  }
  0x1a   : > { %9418 = vst [vmem:[#allocation10_spill] sm:$0xff] %v6959_v21  ;;  %9419 = vst [vmem:[#allocation11_spill] sm:$0xff] %v6961_v22  ;;  %v372_v24 = vsel %vm347_vm0, %v6959_v21, 0.0  ;;  %v375_v25 = vsel %vm347_vm0, %v6961_v22, 0.0  ;;  %v378_v29 = vsel %vm347_vm0, %v6968_v26, 0.0  ;;  %v381_v30 = vsel %vm347_vm0, %v6970_v27, 0.0 }
  0x1b   : > { %352 = vadd.xlane.f32.xlu0 %v351_v9  ;;  %358 = vadd.xlane.f32.xlu1 %v357_v10  ;;  %9420 = vst [vmem:[#allocation12_spill] sm:$0xff] %v6968_v26  ;;  %9421 = vst [vmem:[#allocation13_spill] sm:$0xff] %v6970_v27  ;;  %v384_v34 = vsel %vm347_vm0, %v6977_v31, 0.0  ;;  %v387_v35 = vsel %vm347_vm0, %v6979_v32, 0.0  ;;  %v390_v39 = vsel %vm347_vm0, %v6986_v36, 0.0  ;;  %v393_v40 = vsel %vm347_vm0, %v6988_v37, 0.0 }
  0x1c   : > { %9422 = vst [vmem:[#allocation14_spill] sm:$0xff] %v6977_v31  ;;  %9423 = vst [vmem:[#allocation15_spill] sm:$0xff] %v6979_v32  ;;  %v6995_v41 = vunpack.c.l.bf16 %v5879_v38  ;;  %v6997_v42 = vunpack.c.h.bf16 %v5879_v38  ;;  %v7004_v46 = vunpack.c.l.bf16 %v5880_v43  ;;  %v7006_v47 = vunpack.c.h.bf16 %v5880_v43  ;;  %v5884_v63 = vld [vmem:[%s6920_s30 + $0x68] sm:$0xff]  }
  0x1d   : > { %9424 = vst [vmem:[#allocation16_spill] sm:$0xff] %v6986_v36  ;;  %9425 = vst [vmem:[#allocation17_spill] sm:$0xff] %v6988_v37  ;;  %v7013_v51 = vunpack.c.l.bf16 %v5881_v48  ;;  %v7015_v52 = vunpack.c.h.bf16 %v5881_v48  ;;  %v7022_v56 = vunpack.c.l.bf16 %v5882_v53  ;;  %v7024_v57 = vunpack.c.h.bf16 %v5882_v53 }
  0x1e   : > { %9426 = vst [vmem:[#allocation18_spill] sm:$0xff] %v6995_v41  ;;  %9427 = vst [vmem:[#allocation19_spill] sm:$0xff] %v6997_v42  ;;  %v396_v44 = vsel %vm347_vm0, %v6995_v41, 0.0  ;;  %v399_v45 = vsel %vm347_vm0, %v6997_v42, 0.0  ;;  %v402_v49 = vsel %vm347_vm0, %v7004_v46, 0.0  ;;  %v405_v50 = vsel %vm347_vm0, %v7006_v47, 0.0 }
  0x1f   : > { %361 = vadd.xlane.f32.xlu0 %v360_v14  ;;  %364 = vadd.xlane.f32.xlu1 %v363_v15  ;;  %9428 = vst [vmem:[#allocation20_spill] sm:$0xff] %v7004_v46  ;;  %9429 = vst [vmem:[#allocation21_spill] sm:$0xff] %v7006_v47  ;;  %v408_v54 = vsel %vm347_vm0, %v7013_v51, 0.0  ;;  %v411_v55 = vsel %vm347_vm0, %v7015_v52, 0.0  ;;  %v414_v59 = vsel %vm347_vm0, %v7022_v56, 0.0  ;;  %v417_v60 = vsel %vm347_vm0, %v7024_v57, 0.0 }
  0x20   : > { %9430 = vst [vmem:[#allocation22_spill] sm:$0xff] %v7013_v51  ;;  %9431 = vst [vmem:[#allocation23_spill] sm:$0xff] %v7015_v52  ;;  %v7031_v61 = vunpack.c.l.bf16 %v5883_v58  ;;  %v7033_v62 = vunpack.c.h.bf16 %v5883_v58  ;;  %v7040_v6 = vunpack.c.l.bf16 %v5884_v63  ;;  %v7042_v7 = vunpack.c.h.bf16 %v5884_v63 }
  0x21   : > { %9432 = vst [vmem:[#allocation24_spill] sm:$0xff] %v7022_v56  ;;  %9433 = vst [vmem:[#allocation25_spill] sm:$0xff] %v7024_v57 }
  0x22   : > { %9434 = vst [vmem:[#allocation26_spill] sm:$0xff] %v7031_v61  ;;  %9435 = vst [vmem:[#allocation27_spill] sm:$0xff] %v7033_v62  ;;  %v420_v0 = vsel %vm347_vm0, %v7031_v61, 0.0  ;;  %v423_v1 = vsel %vm347_vm0, %v7033_v62, 0.0  ;;  %v426_v8 = vsel %vm347_vm0, %v7040_v6, 0.0  ;;  %v429_v9 = vsel %vm347_vm0, %v7042_v7, 0.0 }
  0x23   : > { %367 = vadd.xlane.f32.xlu0 %v366_v19  ;;  %370 = vadd.xlane.f32.xlu1 %v369_v20  ;;  %9436 = vst [vmem:[#allocation28_spill] sm:$0xff] %v7040_v6  ;;  %9437 = vst [vmem:[#allocation29_spill] sm:$0xff] %v7042_v7 }
  0x27   : > { %373 = vadd.xlane.f32.xlu0 %v372_v24  ;;  %376 = vadd.xlane.f32.xlu1 %v375_v25 }
  0x2b   : > { %379 = vadd.xlane.f32.xlu0 %v378_v29  ;;  %382 = vadd.xlane.f32.xlu1 %v381_v30  ;;  %v5885_v30 = vld [vmem:[%s6920_s30 + $0x70] sm:$0xff]  }
  0x2c   : > { %v7066_v38 = vunpack.c.l.bf16 %v5885_v30 }
  0x2e   : > { %9438 = vst [vmem:[#allocation30_spill] sm:$0xff] %v7066_v38  ;;  %v432_v53 = vsel %vm347_vm0, %v7066_v38, 0.0 }
  0x2f   : > { %385 = vadd.xlane.f32.xlu0 %v384_v34  ;;  %388 = vadd.xlane.f32.xlu1 %v387_v35 }
  0x33   : > { %391 = vadd.xlane.f32.xlu0 %v390_v39  ;;  %394 = vadd.xlane.f32.xlu1 %v393_v40 }
  0x37   : > { %397 = vadd.xlane.f32.xlu0 %v396_v44  ;;  %400 = vadd.xlane.f32.xlu1 %v399_v45 }
  0x3b   : > { %403 = vadd.xlane.f32.xlu0 %v402_v49  ;;  %406 = vadd.xlane.f32.xlu1 %v405_v50  ;;  %v5886_v49 = vld [vmem:[%s6920_s30 + $0x78] sm:$0xff]   ;;  %s6863_s30 = smov 16  }
  0x3f   : > { %409 = vadd.xlane.f32.xlu0 %v408_v54  ;;  %412 = vadd.xlane.f32.xlu1 %v411_v55  ;;  %v7077_v55 = vunpack.c.l.bf16 %v5886_v49 }
  0x41   : > { %9439 = vst [vmem:[#allocation31_spill] sm:$0xff] %v7077_v55 }
  0x43   : > { %415 = vadd.xlane.f32.xlu0 %v414_v59  ;;  %418 = vadd.xlane.f32.xlu1 %v417_v60 }
  0x47   : > { %421 = vadd.xlane.f32.xlu0 %v420_v0  ;;  %424 = vadd.xlane.f32.xlu1 %v423_v1  ;;  %v7083_v0 = vunpack.c.h.bf16 %v5885_v30 }
  0x49   : > { %9440 = vst [vmem:[#allocation32_spill] sm:$0xff] %v7083_v0 }
  0x4b   : > { %427 = vadd.xlane.f32.xlu0 %v426_v8  ;;  %430 = vadd.xlane.f32.xlu1 %v429_v9  ;;  %v438_v9 = vsel %vm347_vm0, %v7077_v55, 0.0 }
  0xa4   : > { %v350_v10 = vpop.xlane.xlu0 %349  ;;  %v356_v13 = vpop.xlane.xlu1 %355 }
  0xa5   : > { %v445_v14 = vmul.f32 0.03125, %v350_v10  ;;  %v447_v15 = vmul.f32 0.03125, %v356_v13  ;;  %v7090_v13 = vunpack.c.h.bf16 %v5886_v49 }
  0xa7   : > { %v7049_v18 = vsub.f32 %v6924_v2, %v445_v14  ;;  %v7052_v19 = vsub.f32 %v6926_v3, %v447_v15  ;;  %9441 = vst [vmem:[#allocation33_spill] sm:$0xff] %v7090_v13 }
  0xa8   : > { %v353_v20 = vpop.xlane.xlu0 %352  ;;  %v359_v23 = vpop.xlane.xlu1 %358 }
  0xa9   : > { %v446_v24 = vmul.f32 0.03125, %v353_v20  ;;  %v448_v25 = vmul.f32 0.03125, %v359_v23  ;;  %v509_v28 = vmul.f32 %v7049_v18, %v7049_v18  ;;  %v511_v29 = vmul.f32 %v7052_v19, %v7052_v19 }
  0xaa   : > { %v435_v20 = vsel %vm347_vm0, %v7083_v0, 0.0 }
  0xab   : > { %v7060_v33 = vsub.f32 %v6928_v4, %v446_v24  ;;  %v7063_v34 = vsub.f32 %v6930_v5, %v448_v25  ;;  %v541_v35 = vsel %vm347_vm0, %v509_v28, 0.0  ;;  %v547_v43 = vsel %vm347_vm0, %v511_v29, 0.0 }
  0xac   : > { %542 = vadd.xlane.f32.xlu0 %v541_v35  ;;  %v362_v39 = vpop.xlane.xlu0 %361  ;;  %v365_v40 = vpop.xlane.xlu1 %364  ;;  %v441_v29 = vsel %vm347_vm0, %v7090_v13, 0.0 }
  0xad   : > { %v510_v44 = vmul.f32 %v7060_v33, %v7060_v33  ;;  %v512_v45 = vmul.f32 %v7063_v34, %v7063_v34  ;;  %v449_v48 = vmul.f32 0.03125, %v362_v39  ;;  %v450_v54 = vmul.f32 0.03125, %v365_v40 }
  0xaf   : > { %v544_v50 = vsel %vm347_vm0, %v510_v44, 0.0  ;;  %v550_v60 = vsel %vm347_vm0, %v512_v45, 0.0  ;;  %v7081_v63 = vsub.f32 %v6941_v11, %v449_v48  ;;  %v7086_v8 = vsub.f32 %v6943_v12, %v450_v54 }
  0xb0   : > { %548 = vadd.xlane.f32.xlu0 %v547_v43  ;;  %545 = vadd.xlane.f32.xlu1 %v544_v50  ;;  %v368_v58 = vpop.xlane.xlu0 %367  ;;  %v371_v59 = vpop.xlane.xlu1 %370 }
  0xb1   : > { %v451_v1 = vmul.f32 0.03125, %v368_v58  ;;  %v452_v10 = vmul.f32 0.03125, %v371_v59  ;;  %v513_v24 = vmul.f32 %v7081_v63, %v7081_v63  ;;  %v514_v35 = vmul.f32 %v7086_v8, %v7086_v8 }
  0xb3   : > { %v7095_v23 = vsub.f32 %v6950_v16, %v451_v1  ;;  %v7100_v28 = vsub.f32 %v6952_v17, %v452_v10  ;;  %v553_v43 = vsel %vm347_vm0, %v513_v24, 0.0  ;;  %v556_v50 = vsel %vm347_vm0, %v514_v35, 0.0 }
  0xb4   : > { %433 = vadd.xlane.f32.xlu0 %v432_v53  ;;  %551 = vadd.xlane.f32.xlu1 %v550_v60  ;;  %v374_v14 = vpop.xlane.xlu0 %373  ;;  %v377_v15 = vpop.xlane.xlu1 %376 }
  0xb5   : > { %v453_v25 = vmul.f32 0.03125, %v374_v14  ;;  %v454_v30 = vmul.f32 0.03125, %v377_v15  ;;  %v515_v45 = vmul.f32 %v7095_v23, %v7095_v23  ;;  %v516_v54 = vmul.f32 %v7100_v28, %v7100_v28 }
  0xb7   : > { %v7108_v44 = vsub.f32 %v6959_v21, %v453_v25  ;;  %v7113_v49 = vsub.f32 %v6961_v22, %v454_v30  ;;  %v559_v60 = vsel %vm347_vm0, %v515_v45, 0.0  ;;  %v562_v15 = vsel %vm347_vm0, %v516_v54, 0.0 }
  0xb8   : > { %439 = vadd.xlane.f32.xlu0 %v438_v9  ;;  %436 = vadd.xlane.f32.xlu1 %v435_v20  ;;  %v380_v39 = vpop.xlane.xlu0 %379  ;;  %v383_v40 = vpop.xlane.xlu1 %382 }
  0xb9   : > { %v455_v48 = vmul.f32 0.03125, %v380_v39  ;;  %v456_v53 = vmul.f32 0.03125, %v383_v40  ;;  %v517_v9 = vmul.f32 %v7108_v44, %v7108_v44  ;;  %v518_v24 = vmul.f32 %v7113_v49, %v7113_v49 }
  0xbb   : > { %v7120_v1 = vsub.f32 %v6968_v26, %v455_v48  ;;  %v7125_v14 = vsub.f32 %v6970_v27, %v456_v53  ;;  %v565_v30 = vsel %vm347_vm0, %v517_v9, 0.0  ;;  %v568_v45 = vsel %vm347_vm0, %v518_v24, 0.0 }
  0xbc   : > { %442 = vadd.xlane.f32.xlu1 %v441_v29  ;;  %554 = vadd.xlane.f32.xlu0 %v553_v43  ;;  %v386_v58 = vpop.xlane.xlu0 %385  ;;  %v389_v59 = vpop.xlane.xlu1 %388 }
  0xbd   : > { %v457_v10 = vmul.f32 0.03125, %v386_v58  ;;  %v458_v20 = vmul.f32 0.03125, %v389_v59  ;;  %v519_v39 = vmul.f32 %v7120_v1, %v7120_v1 }
  0xbf   : > { %v7132_v35 = vsub.f32 %v6977_v31, %v457_v10  ;;  %v7137_v43 = vsub.f32 %v6979_v32, %v458_v20  ;;  %v571_v58 = vsel %vm347_vm0, %v519_v39, 0.0 }
  0xc0   : > { %557 = vadd.xlane.f32.xlu1 %v556_v50  ;;  %560 = vadd.xlane.f32.xlu0 %v559_v60  ;;  %v392_v25 = vpop.xlane.xlu0 %391  ;;  %v395_v29 = vpop.xlane.xlu1 %394  ;;  %v520_v50 = vmul.f32 %v7125_v14, %v7125_v14 }
  0xc1   : > { %v459_v40 = vmul.f32 0.03125, %v392_v25  ;;  %v460_v48 = vmul.f32 0.03125, %v395_v29  ;;  %v521_v60 = vmul.f32 %v7132_v35, %v7132_v35  ;;  %v522_v24 = vmul.f32 %v7137_v43, %v7137_v43 }
  0xc3   : > { %v7144_v59 = vsub.f32 %v6986_v36, %v459_v40  ;;  %v7149_v10 = vsub.f32 %v6988_v37, %v460_v48 }
  0xc4   : > { %563 = vadd.xlane.f32.xlu1 %v562_v15  ;;  %566 = vadd.xlane.f32.xlu0 %v565_v30  ;;  %v398_v53 = vpop.xlane.xlu0 %397  ;;  %v401_v54 = vpop.xlane.xlu1 %400  ;;  %v574_v15 = vsel %vm347_vm0, %v520_v50, 0.0  ;;  %v577_v30 = vsel %vm347_vm0, %v521_v60, 0.0  ;;  %v580_v50 = vsel %vm347_vm0, %v522_v24, 0.0 }
  0xc5   : > { %v461_v9 = vmul.f32 0.03125, %v398_v53  ;;  %v462_v20 = vmul.f32 0.03125, %v401_v54  ;;  %v523_v40 = vmul.f32 %v7144_v59, %v7144_v59  ;;  %v524_v54 = vmul.f32 %v7149_v10, %v7149_v10 }
  0xc7   : > { %v7156_v39 = vsub.f32 %v6995_v41, %v461_v9  ;;  %v7161_v48 = vsub.f32 %v6997_v42, %v462_v20  ;;  %v583_v9 = vsel %vm347_vm0, %v523_v40, 0.0  ;;  %v586_v24 = vsel %vm347_vm0, %v524_v54, 0.0 }
  0xc8   : > { %569 = vadd.xlane.f32.xlu1 %v568_v45  ;;  %572 = vadd.xlane.f32.xlu0 %v571_v58  ;;  %v404_v25 = vpop.xlane.xlu0 %403  ;;  %v407_v29 = vpop.xlane.xlu1 %406 }
  0xc9   : > { %v463_v45 = vmul.f32 0.03125, %v404_v25  ;;  %v464_v53 = vmul.f32 0.03125, %v407_v29 }
  0xcb   : > { %v7168_v41 = vsub.f32 %v7004_v46, %v463_v45  ;;  %v7173_v20 = vsub.f32 %v7006_v47, %v464_v53  ;;  %v6526_v45 = vld [vmem:[%s9335_s4] sm:$0xff]  }
  0xcc   : > { %575 = vadd.xlane.f32.xlu1 %v574_v15  ;;  %578 = vadd.xlane.f32.xlu0 %v577_v30  ;;  %v410_v58 = vpop.xlane.xlu0 %409  ;;  %v413_v60 = vpop.xlane.xlu1 %412  ;;  %v525_v15 = vmul.f32 %v7156_v39, %v7156_v39  ;;  %v526_v30 = vmul.f32 %v7161_v48, %v7161_v48 }
  0xcd   : > { %v465_v25 = vmul.f32 0.03125, %v410_v58  ;;  %v466_v29 = vmul.f32 0.03125, %v413_v60  ;;  %v527_v53 = vmul.f32 %v7168_v41, %v7168_v41  ;;  %6052 = vmatprep.subr.bf16.mxu0 %v6526_v45  ;;  %6508 = vmatprep.subr.bf16.mxu1 %v6526_v45 }
  0xce   : > { %v589_v46 = vsel %vm347_vm0, %v525_v15, 0.0  ;;  %6053 = vmatpush3.bf16.msra.mxu0 %v6526_v45  ;;  %6510 = vmatpush3.bf16.msra.mxu1 %v6526_v45  ;;  %v592_v60 = vsel %vm347_vm0, %v526_v30, 0.0  ;;  %v528_v15 = vmul.f32 %v7173_v20, %v7173_v20 }
  0xcf   : > { %v7188_v54 = vsub.f32 %v7015_v52, %v466_v29  ;;  %v595_v47 = vsel %vm347_vm0, %v527_v53, 0.0 }
  0xd0   : > { %581 = vadd.xlane.f32.xlu1 %v580_v50  ;;  %584 = vadd.xlane.f32.xlu0 %v583_v9  ;;  %v416_v42 = vpop.xlane.xlu0 %415  ;;  %v419_v40 = vpop.xlane.xlu1 %418  ;;  %v7183_v50 = vsub.f32 %v7013_v51, %v465_v25 }
  0xd1   : > { %v467_v58 = vmul.f32 0.03125, %v416_v42  ;;  %v468_v9 = vmul.f32 0.03125, %v419_v40  ;;  %v6527_v42 = vld [vmem:[%s9335_s4 + $0x8] sm:$0xff]   ;;  %v598_v40 = vsel %vm347_vm0, %v528_v15, 0.0  ;;  %v530_v53 = vmul.f32 %v7188_v54, %v7188_v54 }
  0xd2   : > { %6054 = vmatprep.subr.bf16.mxu0 %v6527_v42  ;;  %6509 = vmatprep.subr.bf16.mxu1 %v6527_v42 }
  0xd3   : > { %6055 = vmatpush3.bf16.msra.mxu0 %v6527_v42  ;;  %6511 = vmatpush3.bf16.msra.mxu1 %v6527_v42  ;;  %v7203_v30 = vsub.f32 %v7024_v57, %v468_v9 }
  0xd4   : > { %587 = vadd.xlane.f32.xlu1 %v586_v24  ;;  %590 = vadd.xlane.f32.xlu0 %v589_v46  ;;  %v422_v25 = vpop.xlane.xlu0 %421  ;;  %v425_v51 = vpop.xlane.xlu1 %424  ;;  %v7198_v24 = vsub.f32 %v7022_v56, %v467_v58  ;;  %v529_v46 = vmul.f32 %v7183_v50, %v7183_v50 }
  0xd5   : > { %v469_v29 = vmul.f32 0.03125, %v422_v25  ;;  %v470_v45 = vmul.f32 0.03125, %v425_v51  ;;  %v604_v51 = vsel %vm347_vm0, %v530_v53, 0.0  ;;  %v532_v15 = vmul.f32 %v7203_v30, %v7203_v30 }
  0xd6   : > { %v601_v52 = vsel %vm347_vm0, %v529_v46, 0.0  ;;  %v531_v42 = vmul.f32 %v7198_v24, %v7198_v24 }
  0xd7   : > { %v7210_v25 = vsub.f32 %v7031_v61, %v469_v29  ;;  %v7215_v9 = vsub.f32 %v7033_v62, %v470_v45 }
  0xd8   : > { %593 = vadd.xlane.f32.xlu1 %v592_v60  ;;  %596 = vadd.xlane.f32.xlu0 %v595_v47  ;;  %v428_v58 = vpop.xlane.xlu0 %427  ;;  %v431_v47 = vpop.xlane.xlu1 %430  ;;  %v607_v46 = vsel %vm347_vm0, %v531_v42, 0.0 }
  0xd9   : > { %v471_v60 = vmul.f32 0.03125, %v428_v58  ;;  %v472_v61 = vmul.f32 0.03125, %v431_v47  ;;  %v533_v58 = vmul.f32 %v7210_v25, %v7210_v25  ;;  %v534_v53 = vmul.f32 %v7215_v9, %v7215_v9 }
  0xdb   : > { %v7222_v29 = vsub.f32 %v7040_v6, %v471_v60  ;;  %v613_v45 = vsel %vm347_vm0, %v533_v58, 0.0  ;;  %v616_v60 = vsel %vm347_vm0, %v534_v53, 0.0 }
  0xdc   : > { %599 = vadd.xlane.f32.xlu1 %v598_v40  ;;  %602 = vadd.xlane.f32.xlu0 %v601_v52  ;;  %v610_v52 = vsel %vm347_vm0, %v532_v15, 0.0  ;;  %v7228_v40 = vsub.f32 %v7042_v7, %v472_v61 }
  0xdd   : > { %v535_v42 = vmul.f32 %v7222_v29, %v7222_v29 }
  0xdf   : > { %v619_v47 = vsel %vm347_vm0, %v535_v42, 0.0 }
  0xe0   : > { %605 = vadd.xlane.f32.xlu1 %v604_v51  ;;  %608 = vadd.xlane.f32.xlu0 %v607_v46  ;;  %v536_v51 = vmul.f32 %v7228_v40, %v7228_v40 }
  0xe2   : > { %v622_v61 = vsel %vm347_vm0, %v536_v51, 0.0 }
  0xe4   : > { %611 = vadd.xlane.f32.xlu1 %v610_v52  ;;  %614 = vadd.xlane.f32.xlu0 %v613_v45 }
  0xe8   : > { %617 = vadd.xlane.f32.xlu1 %v616_v60  ;;  %620 = vadd.xlane.f32.xlu0 %v619_v47 }
  0xec   : > { %623 = vadd.xlane.f32.xlu1 %v622_v61 }
 0x139   : > { %v543_v15 = vpop.xlane.xlu0 %542 }
 0x13a   : > { %v637_v46 = vmul.f32 0.03125, %v543_v15 }
 0x13c   : > { %v669_v58 = vadd.f32 1e-05, %v637_v46 }
 0x13d   : > { %v546_v62 = vpop.xlane.xlu1 %545  ;;  %v549_v7 = vpop.xlane.xlu0 %548 }
 0x13e   : > { %6530 = vrsqrt.f32 %v669_v58  ;;  %v638_v52 = vmul.f32 0.03125, %v546_v62  ;;  %v639_v45 = vmul.f32 0.03125, %v549_v7 }
 0x140   : > { %v670_v6 = vadd.f32 1e-05, %v638_v52  ;;  %v671_v53 = vadd.f32 1e-05, %v639_v45 }
 0x141   : > { %v552_v57 = vpop.xlane.xlu1 %551  ;;  %v434_v42 = vpop.xlane.xlu0 %433 }
 0x142   : > { %6532 = vrsqrt.f32 %v670_v6  ;;  %v640_v56 = vmul.f32 0.03125, %v552_v57  ;;  %v473_v32 = vmul.f32 0.03125, %v434_v42 }
 0x143   : > { %6534 = vrsqrt.f32 %v671_v53 }
 0x144   : > { %v672_v60 = vadd.f32 1e-05, %v640_v56  ;;  %v7241_v47 = vsub.f32 %v7066_v38, %v473_v32 }
 0x145   : > { %v437_v51 = vpop.xlane.xlu1 %436  ;;  %v440_v61 = vpop.xlane.xlu0 %439 }
 0x146   : > { %6536 = vrsqrt.f32 %v672_v60  ;;  %v474_v15 = vmul.f32 0.03125, %v437_v51  ;;  %v475_v46 = vmul.f32 0.03125, %v440_v61  ;;  %v537_v62 = vmul.f32 %v7241_v47, %v7241_v47  ;;  %v7260_v51 = vld [vmem:[%s9333_s2] ss:$0 sm:$0xff] }
 0x148   : > { %v6531_v7 = vpop.eup %6530  ;;  %v7246_v58 = vsub.f32 %v7083_v0, %v474_v15  ;;  %v7249_v57 = vsub.f32 %v7077_v55, %v475_v46  ;;  %v625_v56 = vsel %vm347_vm0, %v537_v62, 0.0 }
 0x149   : > { %v443_v6 = vpop.xlane.xlu1 %442  ;;  %626 = vadd.xlane.f32.xlu0 %v625_v56  ;;  %v555_v32 = vpop.xlane.xlu0 %554  ;;  %v733_v52 = vmul.f32 %v6531_v7, %v7049_v18 }
 0x14a   : > { %v476_v45 = vmul.f32 0.03125, %v443_v6  ;;  %v641_v53 = vmul.f32 0.03125, %v555_v32  ;;  %v538_v42 = vmul.f32 %v7246_v58, %v7246_v58  ;;  %v539_v60 = vmul.f32 %v7249_v57, %v7249_v57 }
 0x14b   : > { %v772_v0 = vmul.f32 %v7260_v51, %v733_v52 }
 0x14c   : > { %v6533_v61 = vpop.eup %6532  ;;  %v7263_v15 = vsub.f32 %v7090_v13, %v476_v45  ;;  %v673_v46 = vadd.f32 1e-05, %v641_v53  ;;  %v628_v18 = vsel %vm347_vm0, %v538_v42, 0.0  ;;  %v631_v62 = vsel %vm347_vm0, %v539_v60, 0.0  ;;  %v7274_v53 = vld [vmem:[%s9334_s3] ss:$0 sm:$0xff] }
 0x14d   : > { %v6535_v7 = vpop.eup %6534  ;;  %629 = vadd.xlane.f32.xlu1 %v628_v18  ;;  %v558_v56 = vpop.xlane.xlu1 %557  ;;  %632 = vadd.xlane.f32.xlu0 %v631_v62  ;;  %v734_v32 = vmul.f32 %v6533_v61, %v7060_v33 }
 0x14e   : > { %v561_v6 = vpop.xlane.xlu0 %560  ;;  %6538 = vrsqrt.f32 %v673_v46  ;;  %v642_v38 = vmul.f32 0.03125, %v558_v56  ;;  %v540_v45 = vmul.f32 %v7263_v15, %v7263_v15  ;;  %v735_v60 = vmul.f32 %v6535_v7, %v7052_v19 }
 0x14f   : > { %v643_v55 = vmul.f32 0.03125, %v561_v6  ;;  %v773_v42 = vmul.f32 %v7260_v51, %v734_v32  ;;  %v811_v56 = vadd.f32 %v7274_v53, %v772_v0 }
 0x150   : > { %v6537_v18 = vpop.eup %6536  ;;  %v674_v62 = vadd.f32 1e-05, %v642_v38  ;;  %v634_v52 = vsel %vm347_vm0, %v540_v45, 0.0  ;;  %v774_v37 = vmul.f32 %v7260_v51, %v735_v60 }
 0x151   : > { %v675_v33 = vadd.f32 1e-05, %v643_v55  ;;  %635 = vadd.xlane.f32.xlu1 %v634_v52  ;;  %v564_v61 = vpop.xlane.xlu1 %563  ;;  %v812_v6 = vadd.f32 %v7274_v53, %v773_v42  ;;  %v736_v13 = vmul.f32 %v6537_v18, %v7063_v34 }
 0x152   : > { %v567_v46 = vpop.xlane.xlu0 %566  ;;  %6540 = vrsqrt.f32 %v674_v62  ;;  %v644_v32 = vmul.f32 0.03125, %v564_v61  ;;  %v813_v0 = vadd.f32 %v7274_v53, %v774_v37 }
 0x153   : > { %v645_v31 = vmul.f32 0.03125, %v567_v46  ;;  %6542 = vrsqrt.f32 %v675_v33  ;;  %v843_v19 = vpack.c.bf16 %v812_v6, %v811_v56  ;;  %v775_v38 = vmul.f32 %v7260_v51, %v736_v13 }
 0x154   : > { %v676_v55 = vadd.f32 1e-05, %v644_v32 }
 0x155   : > { %v677_v7 = vadd.f32 1e-05, %v645_v31  ;;  %v570_v45 = vpop.xlane.xlu1 %569  ;;  %6056 = vmatprep.mubr.msk.bf16.mxu0 %vm347_vm0, %v843_v19  ;;  %v814_v42 = vadd.f32 %v7274_v53, %v775_v38 }
 0x156   : > { %v573_v52 = vpop.xlane.xlu0 %572  ;;  %6544 = vrsqrt.f32 %v676_v55  ;;  %v646_v34 = vmul.f32 0.03125, %v570_v45 }
 0x157   : > { %v647_v60 = vmul.f32 0.03125, %v573_v52  ;;  %6546 = vrsqrt.f32 %v677_v7  ;;  %v844_v18 = vpack.c.bf16 %v814_v42, %v813_v0 }
 0x158   : > { %v6539_v62 = vpop.eup %6538  ;;  %v678_v33 = vadd.f32 1e-05, %v646_v34 }
 0x159   : > { %v679_v61 = vadd.f32 1e-05, %v647_v60  ;;  %v576_v46 = vpop.xlane.xlu1 %575  ;;  %6057 = vmatmul.mubr.msk.bf16.vlgmr.msra.gmra.mrb[0].mxu0 %vm347_vm0, %v844_v18  ;;  %v737_v13 = vmul.f32 %v6539_v62, %v7081_v63 }
 0x15a   : > { %v579_v31 = vpop.xlane.xlu0 %578  ;;  %6548 = vrsqrt.f32 %v678_v33  ;;  %v648_v56 = vmul.f32 0.03125, %v576_v46 }
 0x15b   : > { %v649_v6 = vmul.f32 0.03125, %v579_v31  ;;  %6550 = vrsqrt.f32 %v679_v61  ;;  %v776_v52 = vmul.f32 %v7260_v51, %v737_v13 }
 0x15c   : > { %v6541_v37 = vpop.eup %6540  ;;  %v680_v32 = vadd.f32 1e-05, %v648_v56 }
 0x15d   : > { %v681_v19 = vadd.f32 1e-05, %v649_v6  ;;  %v6543_v38 = vpop.eup %6542  ;;  %v582_v55 = vpop.xlane.xlu1 %581  ;;  %v738_v45 = vmul.f32 %v6541_v37, %v7086_v8  ;;  %v815_v31 = vadd.f32 %v7274_v53, %v776_v52 }
 0x15e   : > { %v585_v7 = vpop.xlane.xlu0 %584  ;;  %6552 = vrsqrt.f32 %v680_v32  ;;  %v650_v0 = vmul.f32 0.03125, %v582_v55  ;;  %v739_v34 = vmul.f32 %v6543_v38, %v7095_v23 }
 0x15f   : > { %v651_v42 = vmul.f32 0.03125, %v585_v7  ;;  %6554 = vrsqrt.f32 %v681_v19  ;;  %v777_v63 = vmul.f32 %v7260_v51, %v738_v45 }
 0x160   : > { %v6545_v60 = vpop.eup %6544  ;;  %v682_v18 = vadd.f32 1e-05, %v650_v0  ;;  %v778_v56 = vmul.f32 %v7260_v51, %v739_v34 }
 0x161   : > { %v683_v62 = vadd.f32 1e-05, %v651_v42  ;;  %v6547_v33 = vpop.eup %6546  ;;  %v588_v61 = vpop.xlane.xlu1 %587  ;;  %v816_v8 = vadd.f32 %v7274_v53, %v777_v63  ;;  %v740_v13 = vmul.f32 %v6545_v60, %v7100_v28 }
 0x162   : > { %v591_v46 = vpop.xlane.xlu0 %590  ;;  %6556 = vrsqrt.f32 %v682_v18  ;;  %v652_v6 = vmul.f32 0.03125, %v588_v61  ;;  %v741_v19 = vmul.f32 %v6547_v33, %v7108_v44  ;;  %v817_v28 = vadd.f32 %v7274_v53, %v778_v56 }
 0x163   : > { %v653_v23 = vmul.f32 0.03125, %v591_v46  ;;  %6558 = vrsqrt.f32 %v683_v62  ;;  %v845_v37 = vpack.c.bf16 %v816_v8, %v815_v31  ;;  %v779_v32 = vmul.f32 %v7260_v51, %v740_v13 }
 0x164   : > { %v6549_v38 = vpop.eup %6548  ;;  %v684_v55 = vadd.f32 1e-05, %v652_v6  ;;  %v780_v63 = vmul.f32 %v7260_v51, %v741_v19 }
 0x165   : > { %v685_v7 = vadd.f32 1e-05, %v653_v23  ;;  %v6551_v45 = vpop.eup %6550  ;;  %v594_v52 = vpop.xlane.xlu1 %593  ;;  %6060 = vmatprep.mubr.msk.bf16.mxu0 %vm347_vm0, %v845_v37  ;;  %v818_v42 = vadd.f32 %v7274_v53, %v779_v32  ;;  %v742_v34 = vmul.f32 %v6549_v38, %v7113_v49 }
 0x166   : > { %v597_v0 = vpop.xlane.xlu0 %596  ;;  %6560 = vrsqrt.f32 %v684_v55  ;;  %v654_v60 = vmul.f32 0.03125, %v594_v52  ;;  %v743_v44 = vmul.f32 %v6551_v45, %v7120_v1  ;;  %v819_v49 = vadd.f32 %v7274_v53, %v780_v63 }
 0x167   : > { %v655_v18 = vmul.f32 0.03125, %v597_v0  ;;  %6562 = vrsqrt.f32 %v685_v7  ;;  %v846_v62 = vpack.c.bf16 %v818_v42, %v817_v28  ;;  %v781_v33 = vmul.f32 %v7260_v51, %v742_v34 }
 0x168   : > { %v6553_v61 = vpop.eup %6552  ;;  %v686_v46 = vadd.f32 1e-05, %v654_v60  ;;  %v782_v1 = vmul.f32 %v7260_v51, %v743_v44 }
 0x169   : > { %v687_v31 = vadd.f32 1e-05, %v655_v18  ;;  %v6555_v8 = vpop.eup %6554  ;;  %v600_v13 = vpop.xlane.xlu1 %599  ;;  %6061 = vmatmul.mubr.msk.bf16.gmra.mrb[4].mxu0 %vm347_vm0, %v846_v62  ;;  %v820_v6 = vadd.f32 %v7274_v53, %v781_v33  ;;  %v744_v23 = vmul.f32 %v6553_v61, %v7125_v14 }
 0x16a   : > { %v603_v56 = vpop.xlane.xlu0 %602  ;;  %6564 = vrsqrt.f32 %v686_v46  ;;  %v656_v37 = vmul.f32 0.03125, %v600_v13  ;;  %v745_v55 = vmul.f32 %v6555_v8, %v7132_v35  ;;  %v821_v14 = vadd.f32 %v7274_v53, %v782_v1 }
 0x16b   : > { %v657_v32 = vmul.f32 0.03125, %v603_v56  ;;  %6566 = vrsqrt.f32 %v687_v31  ;;  %v847_v19 = vpack.c.bf16 %v820_v6, %v819_v49  ;;  %v783_v38 = vmul.f32 %v7260_v51, %v744_v23 }
 0x16c   : > { %v6557_v7 = vpop.eup %6556  ;;  %v688_v45 = vadd.f32 1e-05, %v656_v37  ;;  %v784_v60 = vmul.f32 %v7260_v51, %v745_v55 }
 0x16d   : > { %v689_v52 = vadd.f32 1e-05, %v657_v32  ;;  %v6559_v0 = vpop.eup %6558  ;;  %v606_v28 = vpop.xlane.xlu1 %605  ;;  %6064 = vmatprep.mubr.msk.bf16.mxu0 %vm347_vm0, %v847_v19  ;;  %v822_v34 = vadd.f32 %v7274_v53, %v783_v38  ;;  %v746_v63 = vmul.f32 %v6557_v7, %v7137_v43 }
 0x16e   : > { %v609_v42 = vpop.xlane.xlu0 %608  ;;  %6568 = vrsqrt.f32 %v688_v45  ;;  %v658_v18 = vmul.f32 0.03125, %v606_v28  ;;  %v747_v35 = vmul.f32 %v6559_v0, %v7144_v59  ;;  %v823_v43 = vadd.f32 %v7274_v53, %v784_v60 }
 0x16f   : > { %v659_v44 = vmul.f32 0.03125, %v609_v42  ;;  %6570 = vrsqrt.f32 %v689_v52  ;;  %v848_v62 = vpack.c.bf16 %v822_v34, %v821_v14  ;;  %v785_v33 = vmul.f32 %v7260_v51, %v746_v63 }
 0x170   : > { %v6561_v61 = vpop.eup %6560  ;;  %v690_v46 = vadd.f32 1e-05, %v658_v18  ;;  %v786_v59 = vmul.f32 %v7260_v51, %v747_v35 }
 0x171   : > { %v691_v31 = vadd.f32 1e-05, %v659_v44  ;;  %v6563_v8 = vpop.eup %6562  ;;  %v612_v13 = vpop.xlane.xlu1 %611  ;;  %6065 = vmatmul.mubr.msk.bf16.gmra.mrb[8].mxu0 %vm347_vm0, %v848_v62  ;;  %v824_v49 = vadd.f32 %v7274_v53, %v785_v33  ;;  %v748_v6 = vmul.f32 %v6561_v61, %v7149_v10 }
 0x172   : > { %v615_v56 = vpop.xlane.xlu0 %614  ;;  %6572 = vrsqrt.f32 %v690_v46  ;;  %v660_v23 = vmul.f32 0.03125, %v612_v13  ;;  %v749_v19 = vmul.f32 %v6563_v8, %v7156_v39  ;;  %v825_v10 = vadd.f32 %v7274_v53, %v786_v59 }
 0x173   : > { %v661_v1 = vmul.f32 0.03125, %v615_v56  ;;  %6574 = vrsqrt.f32 %v691_v31  ;;  %v849_v37 = vpack.c.bf16 %v824_v49, %v823_v43  ;;  %v787_v32 = vmul.f32 %v7260_v51, %v748_v6 }
 0x174   : > { %v6565_v38 = vpop.eup %6564  ;;  %v692_v55 = vadd.f32 1e-05, %v660_v23  ;;  %v788_v14 = vmul.f32 %v7260_v51, %v749_v19 }
 0x175   : > { %v693_v7 = vadd.f32 1e-05, %v661_v1  ;;  %v6567_v45 = vpop.eup %6566  ;;  %v618_v52 = vpop.xlane.xlu1 %617  ;;  %6068 = vmatprep.mubr.msk.bf16.mxu0 %vm347_vm0, %v849_v37  ;;  %v826_v28 = vadd.f32 %v7274_v53, %v787_v32  ;;  %v750_v42 = vmul.f32 %v6565_v38, %v7161_v48 }
 0x176   : > { %v621_v0 = vpop.xlane.xlu0 %620  ;;  %6576 = vrsqrt.f32 %v692_v55  ;;  %v662_v34 = vmul.f32 0.03125, %v618_v52  ;;  %v751_v39 = vmul.f32 %v6567_v45, %v7168_v41  ;;  %v827_v48 = vadd.f32 %v7274_v53, %v788_v14 }
 0x177   : > { %v663_v63 = vmul.f32 0.03125, %v621_v0  ;;  %6578 = vrsqrt.f32 %v693_v7  ;;  %v850_v60 = vpack.c.bf16 %v826_v28, %v825_v10  ;;  %v789_v18 = vmul.f32 %v7260_v51, %v750_v42 }
 0x178   : > { %v6569_v44 = vpop.eup %6568  ;;  %v694_v35 = vadd.f32 1e-05, %v662_v34  ;;  %v790_v8 = vmul.f32 %v7260_v51, %v751_v39 }
 0x179   : > { %v695_v62 = vadd.f32 1e-05, %v663_v63  ;;  %v6571_v33 = vpop.eup %6570  ;;  %v624_v61 = vpop.xlane.xlu1 %623  ;;  %6069 = vmatmul.mubr.msk.bf16.gmra.mrb[12].mxu0 %vm347_vm0, %v850_v60  ;;  %v828_v46 = vadd.f32 %v7274_v53, %v789_v18  ;;  %v752_v31 = vmul.f32 %v6569_v44, %v7173_v20 }
 0x17a   : > { %6580 = vrsqrt.f32 %v694_v35  ;;  %v664_v41 = vmul.f32 0.03125, %v624_v61  ;;  %v753_v13 = vmul.f32 %v6571_v33, %v7183_v50  ;;  %v829_v23 = vadd.f32 %v7274_v53, %v790_v8 }
 0x17b   : > { %6582 = vrsqrt.f32 %v695_v62  ;;  %v851_v56 = vpack.c.bf16 %v828_v46, %v827_v48  ;;  %v791_v43 = vmul.f32 %v7260_v51, %v752_v31 }
 0x17c   : > { %v6573_v49 = vpop.eup %6572  ;;  %v696_v6 = vadd.f32 1e-05, %v664_v41  ;;  %v792_v37 = vmul.f32 %v7260_v51, %v753_v13 }
 0x17d   : > { %v6575_v59 = vpop.eup %6574  ;;  %6072 = vmatprep.mubr.msk.bf16.mxu1 %vm347_vm0, %v851_v56  ;;  %v830_v1 = vadd.f32 %v7274_v53, %v791_v43  ;;  %v754_v20 = vmul.f32 %v6573_v49, %v7188_v54 }
 0x17e   : > { %6584 = vrsqrt.f32 %v696_v6  ;;  %v755_v50 = vmul.f32 %v6575_v59, %v7198_v24  ;;  %v831_v7 = vadd.f32 %v7274_v53, %v792_v37 }
 0x17f   : > { %v852_v32 = vpack.c.bf16 %v830_v1, %v829_v23  ;;  %v793_v19 = vmul.f32 %v7260_v51, %v754_v20 }
 0x180   : > { %v6577_v38 = vpop.eup %6576  ;;  %v794_v54 = vmul.f32 %v7260_v51, %v755_v50 }
 0x181   : > { %v6579_v55 = vpop.eup %6578  ;;  %6073 = vmatmul.mubr.msk.bf16.vlgmr.msra.gmra.mrb[0].mxu1 %vm347_vm0, %v852_v32  ;;  %v832_v45 = vadd.f32 %v7274_v53, %v793_v19  ;;  %v756_v52 = vmul.f32 %v6577_v38, %v7203_v30 }
 0x182   : > { %v757_v0 = vmul.f32 %v6579_v55, %v7210_v25  ;;  %v833_v14 = vadd.f32 %v7274_v53, %v794_v54 }
 0x183   : > { %v853_v10 = vpack.c.bf16 %v832_v45, %v831_v7  ;;  %v795_v24 = vmul.f32 %v7260_v51, %v756_v52 }
 0x184   : > { %v6581_v28 = vpop.eup %6580  ;;  %v796_v39 = vmul.f32 %v7260_v51, %v757_v0 }
 0x185   : > { %v6583_v42 = vpop.eup %6582  ;;  %6076 = vmatprep.mubr.msk.bf16.mxu1 %vm347_vm0, %v853_v10  ;;  %v834_v34 = vadd.f32 %v7274_v53, %v795_v24  ;;  %v758_v63 = vmul.f32 %v6581_v28, %v7215_v9 }
 0x186   : > { %v759_v30 = vmul.f32 %v6583_v42, %v7222_v29  ;;  %v835_v44 = vadd.f32 %v7274_v53, %v796_v39  ;;  %v9358_v42 = vmov 0.0  }
 0x187   : > { %v854_v60 = vpack.c.bf16 %v834_v34, %v833_v14  ;;  %v797_v25 = vmul.f32 %v7260_v51, %v758_v63  ;;  %6088 = vmatprep.subr.bf16.mxu1 %v9358_v42  ;;  %6136 = vmatprep.subr.bf16.mxu0 %v9358_v42 }
 0x188   : > { %v6585_v18 = vpop.eup %6584  ;;  %v798_v33 = vmul.f32 %v7260_v51, %v759_v30  ;;  %6138 = vmatprep.mubr.msk.bf16.mxu0 %vm6859_vm1, %v9358_v42 }
 0x189   : > { %6077 = vmatmul.mubr.msk.bf16.gmra.mrb[4].mxu1 %vm347_vm0, %v854_v60  ;;  %v836_v35 = vadd.f32 %v7274_v53, %v797_v25  ;;  %v760_v62 = vmul.f32 %v6585_v18, %v7228_v40 }
 0x18a   : > { %v837_v29 = vadd.f32 %v7274_v53, %v798_v33 }
 0x18b   : > { %v855_v61 = vpack.c.bf16 %v836_v35, %v835_v44  ;;  %v799_v9 = vmul.f32 %v7260_v51, %v760_v62 }
 0x18d   : > { %6080 = vmatprep.mubr.msk.bf16.mxu1 %vm347_vm0, %v855_v61  ;;  %v838_v48 = vadd.f32 %v7274_v53, %v799_v9 }
 0x18f   : > { %v856_v46 = vpack.c.bf16 %v838_v48, %v837_v29 }
 0x191   : > { %6081 = vmatmul.mubr.msk.bf16.gmra.mrb[8].mxu1 %vm347_vm0, %v856_v46 }
 0x1d6   : > { %v627_v31 = vpop.xlane.xlu0 %626 }
 0x1d7   : > { %v665_v8 = vmul.f32 0.03125, %v627_v31 }
 0x1d9   : > { %v697_v41 = vadd.f32 1e-05, %v665_v8 }
 0x1da   : > { %v630_v13 = vpop.xlane.xlu1 %629  ;;  %v633_v56 = vpop.xlane.xlu0 %632 }
 0x1db   : > { %6586 = vrsqrt.f32 %v697_v41  ;;  %v666_v40 = vmul.f32 0.03125, %v630_v13  ;;  %v667_v43 = vmul.f32 0.03125, %v633_v56 }
 0x1dd   : > { %v698_v49 = vadd.f32 1e-05, %v666_v40  ;;  %v699_v6 = vadd.f32 1e-05, %v667_v43 }
 0x1de   : > { %v636_v59 = vpop.xlane.xlu1 %635 }
 0x1df   : > { %6588 = vrsqrt.f32 %v698_v49  ;;  %v668_v23 = vmul.f32 0.03125, %v636_v59 }
 0x1e0   : > { %6590 = vrsqrt.f32 %v699_v6 }
 0x1e1   : > { %v700_v1 = vadd.f32 1e-05, %v668_v23 }
 0x1e3   : > { %6592 = vrsqrt.f32 %v700_v1 }
 0x1e5   : > { %v6587_v20 = vpop.eup %6586 }
 0x1e6   : > { %v761_v37 = vmul.f32 %v6587_v20, %v7241_v47 }
 0x1e8   : > { %v800_v38 = vmul.f32 %v7260_v51, %v761_v37 }
 0x1e9   : > { %v6589_v50 = vpop.eup %6588 }
 0x1ea   : > { %v6591_v32 = vpop.eup %6590  ;;  %v762_v19 = vmul.f32 %v6589_v50, %v7246_v58  ;;  %v839_v52 = vadd.f32 %v7274_v53, %v800_v38 }
 0x1eb   : > { %v763_v55 = vmul.f32 %v6591_v32, %v7249_v57 }
 0x1ec   : > { %v801_v7 = vmul.f32 %v7260_v51, %v762_v19 }
 0x1ed   : > { %v6593_v45 = vpop.eup %6592  ;;  %v802_v10 = vmul.f32 %v7260_v51, %v763_v55 }
 0x1ee   : > { %v840_v54 = vadd.f32 %v7274_v53, %v801_v7  ;;  %v764_v0 = vmul.f32 %v6593_v45, %v7263_v15 }
 0x1ef   : > { %v841_v58 = vadd.f32 %v7274_v53, %v802_v10 }
 0x1f0   : > { %v857_v47 = vpack.c.bf16 %v840_v54, %v839_v52  ;;  %v803_v24 = vmul.f32 %v7260_v51, %v764_v0 }
 0x1f2   : > { %6084 = vmatprep.mubr.msk.bf16.mxu1 %vm347_vm0, %v857_v47  ;;  %v842_v57 = vadd.f32 %v7274_v53, %v803_v24 }
 0x1f4   : > { %v858_v28 = vpack.c.bf16 %v842_v57, %v841_v58 }
 0x1f6   : > { %6085 = vmatmul.mubr.msk.bf16.gmra.mrb[12].mxu1 %vm347_vm0, %v858_v28 }
 0x1f7   : > { %6090 = vmatprep.mubr.msk.bf16.mxu1 %vm6859_vm1, %v9358_v42 }
 0x22c   : > { %v6058_v51 = vpop.f32.mrb[0].mxu0 }
 0x22d   : > { %v957_v15 = vpop.f32.mrb[1].mxu0 }
 0x22e   : > { %v6059_v14 = vpop.f32.mrb[2].mxu0 }
 0x22f   : > { %v7392_v34 = vpack.c.bf16 %v6059_v14, %v6058_v51  ;;  %v960_v53 = vpop.f32.mrb[3].mxu0 }
 0x230   : > { %v7394_v63 = vpack.c.bf16 %v960_v53, %v957_v15 }
 0x231   : > { %1198 = vrot.lane.b32.xlu1 %v7392_v34, %s6860_s16 }
 0x232   : > { %1148 = vrot.lane.b32.xlu0 %v7394_v63, %s6860_s16 }
 0x23c   : > { %v6062_v39 = vpop.f32.mrb[4].mxu0 }
 0x23d   : > { %v973_v30 = vpop.f32.mrb[5].mxu0 }
 0x23e   : > { %v6063_v60 = vpop.f32.mrb[6].mxu0 }
 0x23f   : > { %v7400_v25 = vpack.c.bf16 %v6063_v60, %v6062_v39  ;;  %v976_v18 = vpop.f32.mrb[7].mxu0 }
 0x240   : > { %v7402_v44 = vpack.c.bf16 %v976_v18, %v973_v30 }
 0x242   : > { %1247 = vrot.lane.b32.xlu1 %v7402_v44, %s6860_s16 }
 0x244   : > { %v6066_v35 = vpop.f32.mrb[8].mxu0 }
 0x245   : > { %v989_v62 = vpop.f32.mrb[9].mxu0 }
 0x246   : > { %1296 = vrot.lane.b32.xlu1 %v7400_v25, %s6860_s16  ;;  %v6067_v33 = vpop.f32.mrb[10].mxu0 }
 0x247   : > { %v7408_v61 = vpack.c.bf16 %v6067_v33, %v6066_v35  ;;  %v992_v9 = vpop.f32.mrb[11].mxu0 }
 0x248   : > { %v7410_v29 = vpack.c.bf16 %v992_v9, %v989_v62 }
 0x24a   : > { %1116 = vrot.lane.b32.xlu1 %v7394_v63, %s6861_s17  ;;  %1345 = vrot.lane.b32.xlu0 %v7410_v29, %s6860_s16 }
 0x24c   : > { %v6070_v48 = vpop.f32.mrb[12].mxu0 }
 0x24d   : > { %v1005_v46 = vpop.f32.mrb[13].mxu0 }
 0x24e   : > { %1394 = vrot.lane.b32.xlu1 %v7408_v61, %s6860_s16  ;;  %1118 = vrot.lane.b32.xlu0 %v7392_v34, %s6861_s17  ;;  %v6071_v31 = vpop.f32.mrb[14].mxu0 }
 0x24f   : > { %v7420_v8 = vpack.c.bf16 %v6071_v31, %v6070_v48  ;;  %v1008_v41 = vpop.f32.mrb[15].mxu0 }
 0x250   : > { %v7422_v13 = vpack.c.bf16 %v1008_v41, %v1005_v46 }
 0x252   : > { %1122 = vrot.lane.b32.xlu1 %v7400_v25, %s6861_s17  ;;  %1120 = vrot.lane.b32.xlu0 %v7402_v44, %s6861_s17 }
 0x254   : > { %v6074_v56 = vpop.f32.mrb[0].mxu1 }
 0x255   : > { %v1021_v40 = vpop.f32.mrb[1].mxu1 }
 0x256   : > { %1124 = vrot.lane.b32.xlu1 %v7410_v29, %s6861_s17  ;;  %1443 = vrot.lane.b32.xlu0 %v7422_v13, %s6860_s16  ;;  %v6075_v43 = vpop.f32.mrb[2].mxu1 }
 0x257   : > { %v7432_v49 = vpack.c.bf16 %v6075_v43, %v6074_v56  ;;  %v1024_v6 = vpop.f32.mrb[3].mxu1 }
 0x258   : > { %v7434_v59 = vpack.c.bf16 %v1024_v6, %v1021_v40 }
 0x25a   : > { %1492 = vrot.lane.b32.xlu1 %v7420_v8, %s6860_s16  ;;  %1126 = vrot.lane.b32.xlu0 %v7408_v61, %s6861_s17 }
 0x25c   : > { %v6078_v23 = vpop.f32.mrb[4].mxu1 }
 0x25d   : > { %v1037_v1 = vpop.f32.mrb[5].mxu1 }
 0x25e   : > { %1130 = vrot.lane.b32.xlu1 %v7420_v8, %s6861_s17  ;;  %1128 = vrot.lane.b32.xlu0 %v7422_v13, %s6861_s17  ;;  %v6079_v20 = vpop.f32.mrb[6].mxu1 }
 0x25f   : > { %v7444_v37 = vpack.c.bf16 %v6079_v20, %v6078_v23  ;;  %v1040_v50 = vpop.f32.mrb[7].mxu1 }
 0x260   : > { %v7446_v32 = vpack.c.bf16 %v1040_v50, %v1037_v1 }
 0x262   : > { %1590 = vrot.lane.b32.xlu1 %v7432_v49, %s6860_s16  ;;  %1541 = vrot.lane.b32.xlu0 %v7434_v59, %s6860_s16 }
 0x264   : > { %v6082_v19 = vpop.f32.mrb[8].mxu1 }
 0x265   : > { %v1053_v38 = vpop.f32.mrb[9].mxu1 }
 0x266   : > { %1134 = vrot.lane.b32.xlu1 %v7432_v49, %s6861_s17  ;;  %1132 = vrot.lane.b32.xlu0 %v7434_v59, %s6861_s17  ;;  %v6083_v55 = vpop.f32.mrb[10].mxu1 }
 0x267   : > { %v7456_v7 = vpack.c.bf16 %v6083_v55, %v6082_v19  ;;  %v1056_v45 = vpop.f32.mrb[11].mxu1 }
 0x268   : > { %v7458_v52 = vpack.c.bf16 %v1056_v45, %v1053_v38 }
 0x26a   : > { %1688 = vrot.lane.b32.xlu1 %v7444_v37, %s6860_s16  ;;  %1639 = vrot.lane.b32.xlu0 %v7446_v32, %s6860_s16 }
 0x26e   : > { %1138 = vrot.lane.b32.xlu1 %v7444_v37, %s6861_s17  ;;  %1136 = vrot.lane.b32.xlu0 %v7446_v32, %s6861_s17 }
 0x272   : > { %1786 = vrot.lane.b32.xlu1 %v7456_v7, %s6860_s16  ;;  %1737 = vrot.lane.b32.xlu0 %v7458_v52, %s6860_s16 }
 0x276   : > { %1142 = vrot.lane.b32.xlu1 %v7456_v7, %s6861_s17  ;;  %1140 = vrot.lane.b32.xlu0 %v7458_v52, %s6861_s17 }
 0x2a3   : > { %v1199_v10 = vpop.permute.xlu1 %1198 }
 0x2a4   : > { %v1149_v54 = vpop.permute.xlu0 %1148  ;;  %v1204_v47 = vsel %vm1150_vm2, %v1199_v10, 0 }
 0x2a5   : > { %v1155_v0 = vsel %vm1150_vm2, %v1149_v54, 0 }
 0x2a6   : > { %6089 = vmatpush3.bf16.xpose.msra.mxu1 %v1155_v0 }
 0x2a7   : > { %6094 = vmatprep.subr.bf16.mxu1 %v9358_v42 }
 0x2ad   : > { %6091 = vmatmul.mubr.msk.bf16.vlgmr.msra.gmra.mrb[16].mxu1 %vm1150_vm2, %v7394_v63 }
 0x2ae   : > { %6095 = vmatpush3.bf16.xpose.msra.mxu1 %v1204_v47  ;;  %6096 = vmatprep.mubr.msk.bf16.mxu1 %vm6859_vm1, %v9358_v42 }
 0x2af   : > { %6100 = vmatprep.subr.bf16.mxu1 %v9358_v42 }
 0x2b4   : > { %v1248_v24 = vpop.permute.xlu1 %1247 }
 0x2b5   : > { %v1253_v58 = vsel %vm1150_vm2, %v1248_v24, 0  ;;  %6097 = vmatmul.mubr.msk.bf16.vlgmr.msra.gmra.mrb[20].mxu1 %vm1150_vm2, %v7392_v34 }
 0x2b6   : > { %6101 = vmatpush3.bf16.xpose.msra.mxu1 %v1253_v58  ;;  %6102 = vmatprep.mubr.msk.bf16.mxu1 %vm6859_vm1, %v9358_v42 }
 0x2b7   : > { %6106 = vmatprep.subr.bf16.mxu1 %v9358_v42 }
 0x2b8   : > { %v1297_v57 = vpop.permute.xlu1 %1296 }
 0x2b9   : > { %v1302_v15 = vsel %vm1150_vm2, %v1297_v57, 0 }
 0x2bc   : > { %v7490_v28 = vpop.permute.xlu1 %1116  ;;  %v1346_v51 = vpop.permute.xlu0 %1345 }
 0x2bd   : > { %6103 = vmatmul.mubr.msk.bf16.vlgmr.msra.gmra.mrb[24].mxu1 %vm1150_vm2, %v7402_v44  ;;  %v1351_v60 = vsel %vm1150_vm2, %v1346_v51, 0 }
 0x2be   : > { %6107 = vmatpush3.bf16.xpose.msra.mxu1 %v1302_v15  ;;  %6108 = vmatprep.mubr.msk.bf16.mxu1 %vm6859_vm1, %v9358_v42 }
 0x2bf   : > { %6112 = vmatprep.subr.bf16.mxu1 %v9358_v42 }
 0x2c0   : > { %v1395_v14 = vpop.permute.xlu1 %1394  ;;  %v7498_v53 = vpop.permute.xlu0 %1118 }
 0x2c1   : > { %v1400_v41 = vsel %vm1150_vm2, %v1395_v14, 0 }
 0x2c4   : > { %v7500_v39 = vpop.permute.xlu1 %1122  ;;  %v7502_v30 = vpop.permute.xlu0 %1120 }
 0x2c5   : > { %6109 = vmatmul.mubr.msk.bf16.vlgmr.msra.gmra.mrb[28].mxu1 %vm1150_vm2, %v7400_v25 }
 0x2c6   : > { %6113 = vmatpush3.bf16.xpose.msra.mxu1 %v1351_v60  ;;  %6114 = vmatprep.mubr.msk.bf16.mxu1 %vm6859_vm1, %v9358_v42 }
 0x2c7   : > { %6118 = vmatprep.subr.bf16.mxu1 %v9358_v42 }
 0x2c8   : > { %v7510_v18 = vpop.permute.xlu1 %1124  ;;  %v1444_v35 = vpop.permute.xlu0 %1443 }
 0x2c9   : > { %v6086_v62 = vpop.f32.mrb[12].mxu1  ;;  %v1449_v1 = vsel %vm1150_vm2, %v1444_v35, 0 }
 0x2ca   : > { %v1069_v33 = vpop.f32.mrb[13].mxu1 }
 0x2cb   : > { %v6087_v9 = vpop.f32.mrb[14].mxu1 }
 0x2cc   : > { %v7512_v48 = vpack.c.bf16 %v6087_v9, %v6086_v62  ;;  %v1493_v46 = vpop.permute.xlu1 %1492  ;;  %v1072_v31 = vpop.f32.mrb[15].mxu1 }
 0x2cd   : > { %v7515_v56 = vpack.c.bf16 %v1072_v31, %v1069_v33  ;;  %v7517_v40 = vpop.permute.xlu0 %1126  ;;  %6115 = vmatmul.mubr.msk.bf16.vlgmr.msra.gmra.mrb[32].mxu1 %vm1150_vm2, %v7410_v29  ;;  %v1498_v45 = vsel %vm1150_vm2, %v1493_v46, 0 }
 0x2ce   : > { %1884 = vrot.lane.b32.xlu1 %v7512_v48, %s6860_s16  ;;  %6119 = vmatpush3.bf16.xpose.msra.mxu1 %v1400_v41 }
 0x2cf   : > { %1835 = vrot.lane.b32.xlu0 %v7515_v56, %s6860_s16  ;;  %6120 = vmatprep.mubr.msk.bf16.mxu1 %vm6859_vm1, %v9358_v42 }
 0x2d0   : > { %v7527_v43 = vpop.permute.xlu1 %1130  ;;  %6124 = vmatprep.subr.bf16.mxu1 %v9358_v42 }
 0x2d1   : > { %v7530_v6 = vpop.permute.xlu0 %1128 }
 0x2d2   : > { %1146 = vrot.lane.b32.xlu1 %v7512_v48, %s6861_s17 }
 0x2d3   : > { %1144 = vrot.lane.b32.xlu0 %v7515_v56, %s6861_s17 }
 0x2d4   : > { %v1591_v23 = vpop.permute.xlu1 %1590 }
 0x2d5   : > { %v1542_v20 = vpop.permute.xlu0 %1541  ;;  %6121 = vmatmul.mubr.msk.bf16.vlgmr.msra.gmra.mrb[36].mxu1 %vm1150_vm2, %v7408_v61  ;;  %v1596_v24 = vsel %vm1150_vm2, %v1591_v23, 0 }
 0x2d6   : > { %v1547_v50 = vsel %vm1150_vm2, %v1542_v20, 0  ;;  %1982 = vrot.lane.b32.xlu1 %v7498_v53, %s6860_s16  ;;  %6125 = vmatpush3.bf16.xpose.msra.mxu1 %v1449_v1 }
 0x2d7   : > { %6137 = vmatpush3.bf16.xpose.msra.mxu0 %v1547_v50  ;;  %1933 = vrot.lane.b32.xlu0 %v7490_v28, %s6860_s16 }
 0x2d8   : > { %v7544_v19 = vpop.permute.xlu1 %1134  ;;  %6126 = vmatprep.mubr.msk.bf16.mxu1 %vm6859_vm1, %v9358_v42  ;;  %6130 = vmatprep.subr.bf16.mxu1 %v9358_v42 }
 0x2d9   : > { %v7549_v38 = vpop.permute.xlu0 %1132  ;;  %6148 = vmatprep.subr.bf16.mxu0 %v9358_v42 }
 0x2da   : > { %2080 = vrot.lane.b32.xlu1 %v7500_v39, %s6860_s16 }
 0x2db   : > { %2031 = vrot.lane.b32.xlu0 %v7502_v30, %s6860_s16 }
 0x2dc   : > { %v1689_v55 = vpop.permute.xlu1 %1688 }
 0x2dd   : > { %v1640_v54 = vpop.permute.xlu0 %1639  ;;  %6127 = vmatmul.mubr.msk.bf16.vlgmr.msra.gmra.mrb[40].mxu1 %vm1150_vm2, %v7422_v13  ;;  %v1694_v15 = vsel %vm1150_vm2, %v1689_v55, 0  ;;  %v5865_v55 = vld [vmem:[%s9332_s1] sm:$0xff]  }
 0x2de   : > { %v1645_v0 = vsel %vm1150_vm2, %v1640_v54, 0  ;;  %6139 = vmatmul.mubr.msk.bf16.vlgmr.msra.gmra.mrb[16].mxu0 %vm1150_vm2, %v7434_v59  ;;  %6131 = vmatpush3.bf16.xpose.msra.mxu1 %v1498_v45 }
 0x2df   : > { %2178 = vrot.lane.b32.xlu1 %v7517_v40, %s6860_s16  ;;  %6149 = vmatpush3.bf16.xpose.msra.mxu0 %v1645_v0  ;;  %v7791_v0 = vunpack.c.l.bf16 %v5865_v55 }
 0x2e0   : > { %2129 = vrot.lane.b32.xlu0 %v7510_v18, %s6860_s16  ;;  %6132 = vmatprep.mubr.msk.bf16.mxu1 %vm6859_vm1, %v9358_v42  ;;  %v7573_v47 = vpop.permute.xlu1 %1138 }
 0x2e1   : > { %v7568_v10 = vpop.permute.xlu0 %1136  ;;  %6150 = vmatprep.mubr.msk.bf16.mxu0 %vm6859_vm1, %v9358_v42  ;;  %6142 = vmatprep.subr.bf16.mxu1 %v9358_v42 }
 0x2e2   : > { %6160 = vmatprep.subr.bf16.mxu0 %v9358_v42 }
 0x2e3   : > { %2276 = vrot.lane.b32.xlu1 %v7527_v43, %s6860_s16 }
 0x2e4   : > { %2227 = vrot.lane.b32.xlu0 %v7530_v6, %s6860_s16  ;;  %v1787_v51 = vpop.permute.xlu1 %1786 }
 0x2e5   : > { %v1738_v58 = vpop.permute.xlu0 %1737  ;;  %6133 = vmatmul.mubr.msk.bf16.vlgmr.msra.gmra.mrb[44].mxu1 %vm1150_vm2, %v7420_v8  ;;  %v1792_v35 = vsel %vm1150_vm2, %v1787_v51, 0 }
 0x2e6   : > { %v1743_v57 = vsel %vm1150_vm2, %v1738_v58, 0  ;;  %6151 = vmatmul.mubr.msk.bf16.vlgmr.msra.gmra.mrb[20].mxu0 %vm1150_vm2, %v7446_v32  ;;  %6143 = vmatpush3.bf16.xpose.msra.mxu1 %v1596_v24 }
 0x2e7   : > { %2374 = vrot.lane.b32.xlu1 %v7544_v19, %s6860_s16  ;;  %6161 = vmatpush3.bf16.xpose.msra.mxu0 %v1743_v57 }
 0x2e8   : > { %2325 = vrot.lane.b32.xlu0 %v7549_v38, %s6860_s16  ;;  %6144 = vmatprep.mubr.msk.bf16.mxu1 %vm6859_vm1, %v9358_v42  ;;  %v7603_v14 = vpop.permute.xlu1 %1142 }
 0x2e9   : > { %6162 = vmatprep.mubr.msk.bf16.mxu0 %vm6859_vm1, %v9358_v42  ;;  %6154 = vmatprep.subr.bf16.mxu1 %v9358_v42  ;;  %v7607_v60 = vpop.permute.xlu0 %1140 }
 0x2ea   : > { %6172 = vmatprep.subr.bf16.mxu0 %v9358_v42 }
 0x2eb   : > { %2472 = vrot.lane.b32.xlu1 %v7573_v47, %s6860_s16 }
 0x2ec   : > { %2423 = vrot.lane.b32.xlu0 %v7568_v10, %s6860_s16 }
 0x2ed   : > { %6145 = vmatmul.mubr.msk.bf16.vlgmr.msra.gmra.mrb[48].mxu1 %vm1150_vm2, %v7432_v49 }
 0x2ee   : > { %6163 = vmatmul.mubr.msk.bf16.vlgmr.msra.gmra.mrb[24].mxu0 %vm1150_vm2, %v7458_v52  ;;  %6155 = vmatpush3.bf16.xpose.msra.mxu1 %v1694_v15 }
 0x2ef   : > { %2570 = vrot.lane.b32.xlu1 %v7603_v14, %s6860_s16  ;;  %6156 = vmatprep.mubr.msk.bf16.mxu1 %vm6859_vm1, %v9358_v42 }
 0x2f0   : > { %2521 = vrot.lane.b32.xlu0 %v7607_v60, %s6860_s16  ;;  %6166 = vmatprep.subr.bf16.mxu1 %v9358_v42 }
 0x2f1   : > { %6174 = vmatprep.mubr.msk.bf16.mxu0 %vm6859_vm1, %v9358_v42 }
 0x2f4   : > { %3525 = vrot.lane.b32.xlu0 %v7394_v63, %s6862_s18 }
 0x2f5   : > { %6157 = vmatmul.mubr.msk.bf16.vlgmr.msra.gmra.mrb[52].mxu1 %vm1150_vm2, %v7444_v37 }
 0x2f6   : > { %6167 = vmatpush3.bf16.xpose.msra.mxu1 %v1792_v35  ;;  %6168 = vmatprep.mubr.msk.bf16.mxu1 %vm6859_vm1, %v9358_v42 }
 0x2f7   : > { %6178 = vmatprep.subr.bf16.mxu1 %v9358_v42 }
 0x2f8   : > { %3619 = vrot.lane.b32.xlu0 %v7402_v44, %s6862_s18 }
 0x2fc   : > { %3713 = vrot.lane.b32.xlu0 %v7410_v29, %s6862_s18 }
 0x2fd   : > { %6169 = vmatmul.mubr.msk.bf16.vlgmr.msra.gmra.mrb[56].mxu1 %vm1150_vm2, %v7456_v7 }
 0x2fe   : > { %6180 = vmatprep.mubr.msk.bf16.mxu1 %vm6859_vm1, %v9358_v42 }
 0x340   : > { %v1885_v63 = vpop.permute.xlu1 %1884 }
 0x341   : > { %v1890_v62 = vsel %vm1150_vm2, %v1885_v63, 0  ;;  %v1836_v33 = vpop.permute.xlu0 %1835 }
 0x342   : > { %v1841_v9 = vsel %vm1150_vm2, %v1836_v33, 0  ;;  %6179 = vmatpush3.bf16.xpose.msra.mxu1 %v1890_v62 }
 0x343   : > { %6173 = vmatpush3.bf16.xpose.msra.mxu0 %v1841_v9  ;;  %6190 = vmatprep.subr.bf16.mxu1 %v9358_v42 }
 0x344   : > { %v7637_v44 = vpop.permute.xlu1 %1146  ;;  %6184 = vmatprep.subr.bf16.mxu0 %v9358_v42 }
 0x345   : > { %9442 = vst [vmem:[#allocation34_spill] sm:$0xff] %v7637_v44  ;;  %2668 = vrot.lane.b32.xlu1 %v7637_v44, %s6860_s16  ;;  %v7642_v29 = vpop.permute.xlu0 %1144 }
 0x346   : > { %9443 = vst [vmem:[#allocation35_spill] sm:$0xff] %v7642_v29  ;;  %2619 = vrot.lane.b32.xlu0 %v7642_v29, %s6860_s16 }
 0x348   : > { %v1983_v46 = vpop.permute.xlu1 %1982 }
 0x349   : > { %v1988_v31 = vsel %vm1150_vm2, %v1983_v46, 0  ;;  %6181 = vmatmul.mubr.msk.bf16.vlgmr.msra.gmra.mrb[60].mxu1 %vm1150_vm2, %v7512_v48  ;;  %3572 = vrot.lane.b32.xlu1 %v7392_v34, %s6862_s18  ;;  %v1934_v41 = vpop.permute.xlu0 %1933 }
 0x34a   : > { %v1939_v23 = vsel %vm1150_vm2, %v1934_v41, 0  ;;  %6175 = vmatmul.mubr.msk.bf16.vlgmr.msra.gmra.mrb[28].mxu0 %vm1150_vm2, %v7515_v56  ;;  %6191 = vmatpush3.bf16.xpose.msra.mxu1 %v1988_v31  ;;  %v7804_v41 = vunpack.c.h.bf16 %v5865_v55 }
 0x34b   : > { %3807 = vrot.lane.b32.xlu0 %v7422_v13, %s6862_s18  ;;  %6185 = vmatpush3.bf16.xpose.msra.mxu0 %v1939_v23 }
 0x34c   : > { %6192 = vmatprep.mubr.msk.bf16.mxu1 %vm6859_vm1, %v9358_v42  ;;  %6202 = vmatprep.subr.bf16.mxu1 %v9358_v42  ;;  %v2081_v34 = vpop.permute.xlu1 %2080 }
 0x34d   : > { %3666 = vrot.lane.b32.xlu1 %v7400_v25, %s6862_s18  ;;  %6186 = vmatprep.mubr.msk.bf16.mxu0 %vm6859_vm1, %v9358_v42  ;;  %v2032_v1 = vpop.permute.xlu0 %2031  ;;  %v2086_v13 = vsel %vm1150_vm2, %v2081_v34, 0 }
 0x34e   : > { %6196 = vmatprep.subr.bf16.mxu0 %v9358_v42  ;;  %v2037_v25 = vsel %vm1150_vm2, %v2032_v1, 0 }
 0x34f   : > { %3901 = vrot.lane.b32.xlu0 %v7434_v59, %s6862_s18 }
 0x351   : > { %6193 = vmatmul.mubr.msk.bf16.vlgmr.msra.gmra.mrb[64].mxu1 %vm1150_vm2, %v7498_v53  ;;  %3760 = vrot.lane.b32.xlu1 %v7408_v61, %s6862_s18  ;;  %v2179_v61 = vpop.permute.xlu1 %2178 }
 0x352   : > { %6203 = vmatpush3.bf16.xpose.msra.mxu1 %v2086_v13  ;;  %6187 = vmatmul.mubr.msk.bf16.vlgmr.msra.gmra.mrb[32].mxu0 %vm1150_vm2, %v7490_v28  ;;  %v2130_v59 = vpop.permute.xlu0 %2129 }
 0x353   : > { %3995 = vrot.lane.b32.xlu0 %v7446_v32, %s6862_s18  ;;  %6197 = vmatpush3.bf16.xpose.msra.mxu0 %v2037_v25  ;;  %v2184_v32 = vsel %vm1150_vm2, %v2179_v61, 0 }
 0x354   : > { %6204 = vmatprep.mubr.msk.bf16.mxu1 %vm6859_vm1, %v9358_v42  ;;  %6214 = vmatprep.subr.bf16.mxu1 %v9358_v42 }
 0x355   : > { %3854 = vrot.lane.b32.xlu1 %v7420_v8, %s6862_s18  ;;  %6198 = vmatprep.mubr.msk.bf16.mxu0 %vm6859_vm1, %v9358_v42  ;;  %v2135_v8 = vsel %vm1150_vm2, %v2130_v59, 0 }
 0x356   : > { %6208 = vmatprep.subr.bf16.mxu0 %v9358_v42 }
 0x357   : > { %4089 = vrot.lane.b32.xlu0 %v7458_v52, %s6862_s18  ;;  %v2228_v52 = vpop.permute.xlu0 %2227 }
 0x358   : > { %v2233_v20 = vsel %vm1150_vm2, %v2228_v52, 0 }
 0x359   : > { %6205 = vmatmul.mubr.msk.bf16.vlgmr.msra.gmra.mrb[68].mxu1 %vm1150_vm2, %v7500_v39  ;;  %3948 = vrot.lane.b32.xlu1 %v7432_v49, %s6862_s18  ;;  %v2277_v49 = vpop.permute.xlu1 %2276 }
 0x35a   : > { %6215 = vmatpush3.bf16.xpose.msra.mxu1 %v2184_v32  ;;  %6199 = vmatmul.mubr.msk.bf16.vlgmr.msra.gmra.mrb[36].mxu0 %vm1150_vm2, %v7502_v30 }
 0x35b   : > { %4183 = vrot.lane.b32.xlu0 %v7515_v56, %s6862_s18  ;;  %6209 = vmatpush3.bf16.xpose.msra.mxu0 %v2135_v8  ;;  %v2282_v56 = vsel %vm1150_vm2, %v2277_v49, 0 }
 0x35c   : > { %6216 = vmatprep.mubr.msk.bf16.mxu1 %vm6859_vm1, %v9358_v42  ;;  %6210 = vmatprep.mubr.msk.bf16.mxu0 %vm6859_vm1, %v9358_v42 }
 0x35d   : > { %4042 = vrot.lane.b32.xlu1 %v7444_v37, %s6862_s18  ;;  %6226 = vmatprep.subr.bf16.mxu1 %v9358_v42  ;;  %v2375_v37 = vpop.permute.xlu1 %2374 }
 0x35e   : > { %6220 = vmatprep.subr.bf16.mxu0 %v9358_v42 }
 0x35f   : > { %4277 = vrot.lane.b32.xlu0 %v7490_v28, %s6862_s18  ;;  %v2380_v28 = vsel %vm1150_vm2, %v2375_v37, 0 }
 0x361   : > { %4136 = vrot.lane.b32.xlu1 %v7456_v7, %s6862_s18  ;;  %6217 = vmatmul.mubr.msk.bf16.vlgmr.msra.gmra.mrb[72].mxu1 %vm1150_vm2, %v7517_v40  ;;  %v2326_v7 = vpop.permute.xlu0 %2325 }
 0x362   : > { %6227 = vmatpush3.bf16.xpose.msra.mxu1 %v2282_v56  ;;  %6211 = vmatmul.mubr.msk.bf16.vlgmr.msra.gmra.mrb[40].mxu0 %vm1150_vm2, %v7510_v18 }
 0x363   : > { %4371 = vrot.lane.b32.xlu0 %v7502_v30, %s6862_s18  ;;  %6221 = vmatpush3.bf16.xpose.msra.mxu0 %v2233_v20  ;;  %v2331_v30 = vsel %vm1150_vm2, %v2326_v7, 0 }
 0x364   : > { %6228 = vmatprep.mubr.msk.bf16.mxu1 %vm6859_vm1, %v9358_v42  ;;  %6222 = vmatprep.mubr.msk.bf16.mxu0 %vm6859_vm1, %v9358_v42 }
 0x365   : > { %4230 = vrot.lane.b32.xlu1 %v7512_v48, %s6862_s18  ;;  %6238 = vmatprep.subr.bf16.mxu1 %v9358_v42 }
 0x366   : > { %6232 = vmatprep.subr.bf16.mxu0 %v9358_v42 }
 0x367   : > { %4465 = vrot.lane.b32.xlu0 %v7510_v18, %s6862_s18  ;;  %v2424_v18 = vpop.permute.xlu0 %2423 }
 0x368   : > { %v2429_v50 = vsel %vm1150_vm2, %v2424_v18, 0 }
 0x369   : > { %4324 = vrot.lane.b32.xlu1 %v7498_v53, %s6862_s18  ;;  %6229 = vmatmul.mubr.msk.bf16.vlgmr.msra.gmra.mrb[76].mxu1 %vm1150_vm2, %v7527_v43  ;;  %v2473_v53 = vpop.permute.xlu1 %2472 }
 0x36a   : > { %6239 = vmatpush3.bf16.xpose.msra.mxu1 %v2380_v28  ;;  %6223 = vmatmul.mubr.msk.bf16.vlgmr.msra.gmra.mrb[44].mxu0 %vm1150_vm2, %v7530_v6  ;;  %v2478_v48 = vsel %vm1150_vm2, %v2473_v53, 0 }
 0x36b   : > { %4653 = vrot.lane.b32.xlu0 %v7549_v38, %s6862_s18  ;;  %6233 = vmatpush3.bf16.xpose.msra.mxu0 %v2331_v30 }
 0x36c   : > { %6240 = vmatprep.mubr.msk.bf16.mxu1 %vm6859_vm1, %v9358_v42  ;;  %6234 = vmatprep.mubr.msk.bf16.mxu0 %vm6859_vm1, %v9358_v42 }
 0x36d   : > { %4418 = vrot.lane.b32.xlu1 %v7500_v39, %s6862_s18  ;;  %6250 = vmatprep.subr.bf16.mxu1 %v9358_v42  ;;  %v2571_v39 = vpop.permute.xlu1 %2570 }
 0x36e   : > { %6244 = vmatprep.subr.bf16.mxu0 %v9358_v42 }
 0x36f   : > { %4559 = vrot.lane.b32.xlu0 %v7530_v6, %s6862_s18  ;;  %v2576_v6 = vsel %vm1150_vm2, %v2571_v39, 0 }
 0x371   : > { %4512 = vrot.lane.b32.xlu1 %v7517_v40, %s6862_s18  ;;  %6241 = vmatmul.mubr.msk.bf16.vlgmr.msra.gmra.mrb[80].mxu1 %vm1150_vm2, %v7544_v19  ;;  %v2522_v40 = vpop.permute.xlu0 %2521 }
 0x372   : > { %6235 = vmatmul.mubr.msk.bf16.vlgmr.msra.gmra.mrb[48].mxu0 %vm1150_vm2, %v7549_v38  ;;  %6251 = vmatpush3.bf16.xpose.msra.mxu1 %v2478_v48  ;;  %v2527_v38 = vsel %vm1150_vm2, %v2522_v40, 0 }
 0x373   : > { %6245 = vmatpush3.bf16.xpose.msra.mxu0 %v2429_v50  ;;  %6252 = vmatprep.mubr.msk.bf16.mxu1 %vm6859_vm1, %v9358_v42 }
 0x374   : > { %6246 = vmatprep.mubr.msk.bf16.mxu0 %vm6859_vm1, %v9358_v42  ;;  %6262 = vmatprep.subr.bf16.mxu1 %v9358_v42 }
 0x375   : > { %4606 = vrot.lane.b32.xlu1 %v7527_v43, %s6862_s18  ;;  %6256 = vmatprep.subr.bf16.mxu0 %v9358_v42  ;;  %v3526_v59 = vpop.permute.xlu0 %3525 }
 0x379   : > { %4700 = vrot.lane.b32.xlu1 %v7544_v19, %s6862_s18  ;;  %6253 = vmatmul.mubr.msk.bf16.vlgmr.msra.gmra.mrb[84].mxu1 %vm1150_vm2, %v7573_v47  ;;  %v7819_v56 = vpop.permute.xlu0 %3619 }
 0x37a   : > { %6247 = vmatmul.mubr.msk.bf16.vlgmr.msra.gmra.mrb[52].mxu0 %vm1150_vm2, %v7568_v10  ;;  %6263 = vmatpush3.bf16.xpose.msra.mxu1 %v2576_v6  ;;  %9444 = vst [vmem:[#allocation36_spill] sm:$0xff] %v7819_v56 }
 0x37b   : > { %6257 = vmatpush3.bf16.xpose.msra.mxu0 %v2527_v38  ;;  %6264 = vmatprep.mubr.msk.bf16.mxu1 %vm6859_vm1, %v9358_v42 }
 0x37c   : > { %6258 = vmatprep.mubr.msk.bf16.mxu0 %vm6859_vm1, %v9358_v42  ;;  %6274 = vmatprep.subr.bf16.mxu1 %v9358_v42 }
 0x37d   : > { %4747 = vrot.lane.b32.xlu1 %v7568_v10, %s6862_s18  ;;  %6268 = vmatprep.subr.bf16.mxu0 %v9358_v42  ;;  %v7828_v50 = vpop.permute.xlu0 %3713 }
 0x37e   : > { %9445 = vst [vmem:[#allocation37_spill] sm:$0xff] %v7828_v50 }
 0x380   : > { %v1191_v43 = vpop.f32.mrb[16].mxu1 }
 0x381   : > { %v6092_v19 = vpop.f32.mrb[17].mxu1  ;;  %6265 = vmatmul.mubr.msk.bf16.vlgmr.msra.gmra.mrb[88].mxu1 %vm1150_vm2, %v7603_v14  ;;  %4794 = vrot.lane.b32.xlu1 %v7573_v47, %s6862_s18  ;;  %v7794_v47 = vadd.f32 %v7791_v0, %v1191_v43 }
 0x382   : > { %v1194_v45 = vpop.f32.mrb[18].mxu1  ;;  %6259 = vmatmul.mubr.msk.bf16.vlgmr.msra.gmra.mrb[56].mxu0 %vm1150_vm2, %v7607_v60  ;;  %6276 = vmatprep.mubr.msk.bf16.mxu1 %vm6859_vm1, %v9358_v42 }
 0x383   : > { %v6093_v54 = vpop.f32.mrb[19].mxu1  ;;  %6270 = vmatprep.mubr.msk.bf16.mxu0 %vm6859_vm1, %v9358_v42  ;;  %v2789_v51 = vsel %vm1150_vm2, %v7794_v47, -inf  ;;  %v7807_v23 = vadd.f32 %v7804_v41, %v1194_v45 }
 0x385   : > { %v2792_v61 = vsel %vm1150_vm2, %v7807_v23, -inf }
 0x388   : > { %v1240_v10 = vpop.f32.mrb[20].mxu1 }
 0x389   : > { %v6098_v24 = vpop.f32.mrb[21].mxu1  ;;  %v7831_v39 = vadd.f32 %v7791_v0, %v1240_v10 }
 0x38a   : > { %v1243_v58 = vpop.f32.mrb[22].mxu1 }
 0x38b   : > { %v6099_v57 = vpop.f32.mrb[23].mxu1  ;;  %v2795_v54 = vsel %vm1150_vm2, %v7831_v39, -inf }
 0x38e   : > { %2790 = vmax.xlane.f32.xlu0 %v2789_v51 }
 0x390   : > { %v7798_v15 = vpop.f32.mrb[24].mxu1 }
 0x391   : > { %v6104_v35 = vpop.f32.mrb[25].mxu1 }
 0x392   : > { %v1292_v63 = vpop.f32.mrb[26].mxu1 }
 0x393   : > { %v6105_v62 = vpop.f32.mrb[27].mxu1 }
 0x398   : > { %v7800_v33 = vpop.f32.mrb[28].mxu1 }
 0x399   : > { %v6110_v9 = vpop.f32.mrb[29].mxu1 }
 0x39a   : > { %v7802_v46 = vpop.f32.mrb[30].mxu1 }
 0x39b   : > { %v6111_v31 = vpop.f32.mrb[31].mxu1 }
 0x3a0   : > { %v7809_v34 = vpop.f32.mrb[32].mxu1 }
 0x3a1   : > { %v6116_v1 = vpop.f32.mrb[33].mxu1  ;;  %v7943_v36 = vadd.f32 %v7791_v0, %v7809_v34 }
 0x3a2   : > { %v7811_v13 = vpop.f32.mrb[34].mxu1 }
 0x3a3   : > { %v6117_v25 = vpop.f32.mrb[35].mxu1 }
 0x3a4   : > { %v7854_v25 = vadd.f32 %v7804_v41, %v1243_v58 }
 0x3a5   : > { %2793 = vmax.xlane.f32.xlu1 %v2792_v61 }
 0x3a8   : > { %v7815_v32 = vpop.f32.mrb[36].mxu1 }
 0x3a9   : > { %v6122_v8 = vpop.f32.mrb[37].mxu1  ;;  %v7960_v34 = vadd.f32 %v7791_v0, %v7815_v32 }
 0x3aa   : > { %v7817_v49 = vpop.f32.mrb[38].mxu1 }
 0x3ab   : > { %v6123_v52 = vpop.f32.mrb[39].mxu1  ;;  %v7972_v26 = vadd.f32 %v7804_v41, %v7817_v49  ;;  %v2819_v16 = vsel %vm1150_vm2, %v7960_v34, -inf }
 0x3b0   : > { %v7821_v20 = vpop.f32.mrb[40].mxu1 }
 0x3b1   : > { %v1583_v37 = vpop.f32.mrb[16].mxu0  ;;  %v6128_v7 = vpop.f32.mrb[41].mxu1 }
 0x3b2   : > { %v7824_v28 = vadd.f32 %v7791_v0, %v1583_v37  ;;  %v6140_v30 = vpop.f32.mrb[17].mxu0  ;;  %v7826_v53 = vpop.f32.mrb[42].mxu1  ;;  %v7862_v37 = vadd.f32 %v7804_v41, %v1292_v63 }
 0x3b3   : > { %v1586_v18 = vpop.f32.mrb[18].mxu0  ;;  %v6129_v48 = vpop.f32.mrb[43].mxu1  ;;  %v7868_v30 = vadd.f32 %v7791_v0, %v7798_v15  ;;  %v7988_v49 = vadd.f32 %v7804_v41, %v7826_v53 }
 0x3b4   : > { %v7834_v40 = vadd.f32 %v7804_v41, %v1586_v18  ;;  %v6141_v6 = vpop.f32.mrb[19].mxu0  ;;  %v2837_v38 = vsel %vm1150_vm2, %v7824_v28, -inf  ;;  %v2798_v18 = vsel %vm1150_vm2, %v7854_v25, -inf  ;;  %v2804_v15 = vsel %vm1150_vm2, %v7862_v37, -inf }
 0x3b5   : > { %2838 = vmax.xlane.f32.xlu0 %v2837_v38 }
 0x3b6   : > { %v2840_v43 = vsel %vm1150_vm2, %v7834_v40, -inf }
 0x3b7   : > { %2841 = vmax.xlane.f32.xlu1 %v2840_v43  ;;  %v2669_v19 = vpop.permute.xlu1 %2668 }
 0x3b8   : > { %v2674_v55 = vsel %vm1150_vm2, %v2669_v19, 0  ;;  %v7841_v45 = vpop.f32.mrb[44].mxu1  ;;  %v2620_v10 = vpop.permute.xlu0 %2619 }
 0x3b9   : > { %v1681_v24 = vpop.f32.mrb[20].mxu0  ;;  %2796 = vmax.xlane.f32.xlu0 %v2795_v54  ;;  %v2625_v57 = vsel %vm1150_vm2, %v2620_v10, 0  ;;  %v6134_v51 = vpop.f32.mrb[45].mxu1  ;;  %6275 = vmatpush3.bf16.xpose.msra.mxu1 %v2674_v55 }
 0x3ba   : > { %v7847_v35 = vadd.f32 %v7791_v0, %v1681_v24  ;;  %v6152_v62 = vpop.f32.mrb[21].mxu0  ;;  %v7849_v9 = vpop.f32.mrb[46].mxu1  ;;  %6269 = vmatpush3.bf16.xpose.msra.mxu0 %v2625_v57  ;;  %6286 = vmatprep.subr.bf16.mxu1 %v9358_v42  ;;  %v2801_v24 = vsel %vm1150_vm2, %v7868_v30, -inf  ;;  %v7898_v57 = vadd.f32 %v7804_v41, %v7802_v46 }
 0x3bb   : > { %v1684_v31 = vpop.f32.mrb[22].mxu0  ;;  %v6135_v1 = vpop.f32.mrb[47].mxu1  ;;  %6280 = vmatprep.subr.bf16.mxu0 %v9358_v42  ;;  %v7904_v62 = vadd.f32 %v7791_v0, %v7800_v33  ;;  %v8008_v5 = vadd.f32 %v7804_v41, %v7849_v9 }
 0x3bc   : > { %v7857_v61 = vadd.f32 %v7804_v41, %v1684_v31  ;;  %v6153_v8 = vpop.f32.mrb[23].mxu0  ;;  %v2849_v52 = vsel %vm1150_vm2, %v7847_v35, -inf  ;;  %v3573_v48 = vpop.permute.xlu1 %3572  ;;  %v2810_v46 = vsel %vm1150_vm2, %v7898_v57, -inf }
 0x3bd   : > { %2850 = vmax.xlane.f32.xlu0 %v2849_v52 }
 0x3be   : > { %v2852_v7 = vsel %vm1150_vm2, %v7857_v61, -inf }
 0x3bf   : > { %2853 = vmax.xlane.f32.xlu1 %v2852_v7 }
 0x3c0   : > { %v7870_v58 = vpop.f32.mrb[48].mxu1  ;;  %6277 = vmatmul.mubr.msk.bf16.vlgmr.msra.gmra.mrb[92].mxu1 %vm1150_vm2, %v7637_v44 }
 0x3c1   : > { %v1779_v6 = vpop.f32.mrb[24].mxu0  ;;  %2799 = vmax.xlane.f32.xlu0 %v2798_v18  ;;  %6271 = vmatmul.mubr.msk.bf16.vlgmr.msra.gmra.mrb[60].mxu0 %vm1150_vm2, %v7642_v29  ;;  %v6146_v63 = vpop.f32.mrb[49].mxu1  ;;  %v2807_v18 = vsel %vm1150_vm2, %v7904_v62, -inf }
 0x3c2   : > { %v6164_v38 = vpop.f32.mrb[25].mxu0  ;;  %6287 = vmatpush3.bf16.msra.mxu1 %v3573_v48  ;;  %6281 = vmatpush3.bf16.msra.mxu0 %v3526_v59  ;;  %v7880_v43 = vpop.f32.mrb[50].mxu1  ;;  %v7885_v55 = vadd.f32 %v7791_v0, %v1779_v6 }
 0x3c3   : > { %2805 = vmax.xlane.f32.xlu1 %v2804_v15  ;;  %v1782_v19 = vpop.f32.mrb[26].mxu0  ;;  %6282 = vmatprep.mubr.msk.bf16.mxu0 %vm6859_vm1, %v9358_v42  ;;  %v6147_v10 = vpop.f32.mrb[51].mxu1  ;;  %v8024_v9 = vadd.f32 %v7804_v41, %v7880_v43 }
 0x3c4   : > { %v7888_v54 = vadd.f32 %v7804_v41, %v1782_v19  ;;  %6292 = vmatprep.subr.bf16.mxu0 %v9358_v42  ;;  %6288 = vmatprep.mubr.msk.bf16.mxu1 %vm6859_vm1, %v9358_v42  ;;  %v6165_v59 = vpop.f32.mrb[27].mxu0  ;;  %v2861_v1 = vsel %vm1150_vm2, %v7885_v55, -inf  ;;  %v7920_v38 = vpop.permute.xlu1 %3666 }
 0x3c5   : > { %2802 = vmax.xlane.f32.xlu0 %v2801_v24  ;;  %6298 = vmatprep.subr.bf16.mxu1 %v9358_v42  ;;  %9446 = vst [vmem:[#allocation38_spill] sm:$0xff] %v7920_v38  ;;  %v7926_v10 = vpop.permute.xlu0 %3807 }
 0x3c6   : > { %v2864_v51 = vsel %vm1150_vm2, %v7888_v54, -inf  ;;  %9449 = vst [vmem:[#allocation41_spill] sm:$0xff] %v7926_v10 }
 0x3c7   : > { %2865 = vmax.xlane.f32.xlu1 %v2864_v51 }
 0x3c8   : > { %v7906_v31 = vpop.f32.mrb[52].mxu1  ;;  %v7922_v15 = vpop.permute.xlu1 %3760 }
 0x3c9   : > { %2862 = vmax.xlane.f32.xlu0 %v2861_v1  ;;  %v6158_v8 = vpop.f32.mrb[53].mxu1  ;;  %9447 = vst [vmem:[#allocation39_spill] sm:$0xff] %v7922_v15  ;;  %v7930_v59 = vpop.permute.xlu0 %3901 }
 0x3ca   : > { %v7910_v52 = vpop.f32.mrb[54].mxu1  ;;  %9451 = vst [vmem:[#allocation43_spill] sm:$0xff] %v7930_v59 }
 0x3cb   : > { %2811 = vmax.xlane.f32.xlu1 %v2810_v46  ;;  %v6159_v7 = vpop.f32.mrb[55].mxu1 }
 0x3cc   : > { %v7924_v19 = vpop.permute.xlu1 %3854 }
 0x3cd   : > { %2808 = vmax.xlane.f32.xlu0 %v2807_v18  ;;  %9448 = vst [vmem:[#allocation40_spill] sm:$0xff] %v7924_v19 }
 0x3d0   : > { %v7916_v33 = vpop.f32.mrb[56].mxu1  ;;  %v7928_v24 = vpop.permute.xlu1 %3948 }
 0x3d1   : > { %v6170_v48 = vpop.f32.mrb[57].mxu1  ;;  %9450 = vst [vmem:[#allocation42_spill] sm:$0xff] %v7928_v24 }
 0x3d2   : > { %v7918_v6 = vpop.f32.mrb[58].mxu1 }
 0x3d3   : > { %v6171_v63 = vpop.f32.mrb[59].mxu1 }
 0x3d4   : > { %v7932_v51 = vpop.permute.xlu1 %4042 }
 0x3d5   : > { %9452 = vst [vmem:[#allocation44_spill] sm:$0xff] %v7932_v51  ;;  %v8044_v51 = vadd.f32 %v7804_v41, %v7910_v52  ;;  %v5887_v52 = vld [vmem:[%s9332_s1 + $0x8] sm:$0xff]  }
 0x3d6   : > { %v8075_v59 = vunpack.c.l.bf16 %v5887_v52 }
 0x41c   : > { %v7934_v1 = vpop.f32.mrb[60].mxu1 }
 0x41d   : > { %v1877_v8 = vpop.f32.mrb[28].mxu0  ;;  %v6182_v46 = vpop.f32.mrb[61].mxu1 }
 0x41e   : > { %v7937_v7 = vadd.f32 %v7791_v0, %v1877_v8  ;;  %v6176_v18 = vpop.f32.mrb[29].mxu0  ;;  %v7939_v48 = vpop.f32.mrb[62].mxu1  ;;  %v7952_v8 = vadd.f32 %v7804_v41, %v7811_v13 }
 0x41f   : > { %v1880_v63 = vpop.f32.mrb[30].mxu0  ;;  %v6183_v42 = vpop.f32.mrb[63].mxu1 }
 0x420   : > { %v7946_v22 = vadd.f32 %v7804_v41, %v1880_v63  ;;  %v6177_v27 = vpop.f32.mrb[31].mxu0  ;;  %v2873_v21 = vsel %vm1150_vm2, %v7937_v7, -inf  ;;  %v7956_v42 = vpop.permute.xlu0 %3995  ;;  %v2816_v32 = vsel %vm1150_vm2, %v7952_v8, -inf }
 0x421   : > { %2874 = vmax.xlane.f32.xlu0 %v2873_v21  ;;  %9453 = vst [vmem:[#allocation45_spill] sm:$0xff] %v7956_v42  ;;  %v7962_v18 = vpop.permute.xlu1 %4136  ;;  %v2813_v21 = vsel %vm1150_vm2, %v7943_v36, -inf }
 0x422   : > { %v2876_v46 = vsel %vm1150_vm2, %v7946_v22, -inf  ;;  %9454 = vst [vmem:[#allocation46_spill] sm:$0xff] %v7962_v18 }
 0x423   : > { %2877 = vmax.xlane.f32.xlu1 %v2876_v46 }
 0x424   : > { %v7964_v27 = vpop.f32.mrb[64].mxu1 }
 0x425   : > { %v6194_v63 = vpop.f32.mrb[65].mxu1  ;;  %2814 = vmax.xlane.f32.xlu0 %v2813_v21  ;;  %v7968_v13 = vpop.f32.mrb[32].mxu0 }
 0x426   : > { %v6188_v46 = vpop.f32.mrb[33].mxu0  ;;  %v7974_v12 = vpop.f32.mrb[66].mxu1  ;;  %v7982_v63 = vadd.f32 %v7791_v0, %v7821_v20 }
 0x427   : > { %v6195_v17 = vpop.f32.mrb[67].mxu1  ;;  %2817 = vmax.xlane.f32.xlu1 %v2816_v32  ;;  %v7978_v11 = vpop.f32.mrb[34].mxu0  ;;  %v2822_v46 = vsel %vm1150_vm2, %v7972_v26, -inf  ;;  %v7996_v32 = vadd.f32 %v7791_v0, %v7841_v45  ;;  %v2828_v45 = vsel %vm1150_vm2, %v7988_v49, -inf }
 0x428   : > { %v6189_v21 = vpop.f32.mrb[35].mxu0  ;;  %v7992_v17 = vpop.permute.xlu0 %4089 }
 0x429   : > { %2820 = vmax.xlane.f32.xlu0 %v2819_v16  ;;  %9455 = vst [vmem:[#allocation47_spill] sm:$0xff] %v7992_v17  ;;  %v7998_v20 = vpop.permute.xlu1 %4230  ;;  %v2825_v16 = vsel %vm1150_vm2, %v7982_v63, -inf  ;;  %v2831_v18 = vsel %vm1150_vm2, %v7996_v32, -inf }
 0x42a   : > { %9456 = vst [vmem:[#allocation48_spill] sm:$0xff] %v7998_v20 }
 0x42b   : > { %2823 = vmax.xlane.f32.xlu1 %v2822_v46 }
 0x42c   : > { %v8000_v21 = vpop.f32.mrb[68].mxu1 }
 0x42d   : > { %v6206_v4 = vpop.f32.mrb[69].mxu1  ;;  %2826 = vmax.xlane.f32.xlu0 %v2825_v16  ;;  %v8004_v53 = vpop.f32.mrb[36].mxu0 }
 0x42e   : > { %v6200_v46 = vpop.f32.mrb[37].mxu0  ;;  %v8010_v2 = vpop.f32.mrb[70].mxu1  ;;  %v8018_v4 = vadd.f32 %v7791_v0, %v7870_v58 }
 0x42f   : > { %v6207_v3 = vpop.f32.mrb[71].mxu1  ;;  %2829 = vmax.xlane.f32.xlu1 %v2828_v45  ;;  %v8014_v20 = vpop.f32.mrb[38].mxu0  ;;  %v2834_v46 = vsel %vm1150_vm2, %v8008_v5, -inf  ;;  %v8032_v45 = vadd.f32 %v7791_v0, %v7906_v31  ;;  %v2846_v31 = vsel %vm1150_vm2, %v8024_v9, -inf }
 0x430   : > { %v6201_v16 = vpop.f32.mrb[39].mxu0  ;;  %v8028_v3 = vpop.permute.xlu0 %4183 }
 0x431   : > { %2832 = vmax.xlane.f32.xlu0 %v2831_v18  ;;  %9457 = vst [vmem:[#allocation49_spill] sm:$0xff] %v8028_v3  ;;  %v8034_v58 = vpop.permute.xlu1 %4324  ;;  %v2843_v18 = vsel %vm1150_vm2, %v8018_v4, -inf  ;;  %v2855_v24 = vsel %vm1150_vm2, %v8032_v45, -inf }
 0x432   : > { %9458 = vst [vmem:[#allocation50_spill] sm:$0xff] %v8034_v58 }
 0x433   : > { %2835 = vmax.xlane.f32.xlu1 %v2834_v46 }
 0x434   : > { %v8036_v16 = vpop.f32.mrb[72].mxu1 }
 0x435   : > { %v6218_v17 = vpop.f32.mrb[73].mxu1  ;;  %2844 = vmax.xlane.f32.xlu0 %v2843_v18  ;;  %v8040_v43 = vpop.f32.mrb[40].mxu0 }
 0x436   : > { %v6212_v46 = vpop.f32.mrb[41].mxu0  ;;  %v8046_v3 = vpop.f32.mrb[74].mxu1  ;;  %v8054_v17 = vadd.f32 %v7791_v0, %v7916_v33 }
 0x437   : > { %v6219_v58 = vpop.f32.mrb[75].mxu1  ;;  %2847 = vmax.xlane.f32.xlu1 %v2846_v31  ;;  %v8050_v42 = vpop.f32.mrb[42].mxu0  ;;  %v8063_v46 = vadd.f32 %v7804_v41, %v7918_v6  ;;  %v2858_v31 = vsel %vm1150_vm2, %v8044_v51, -inf }
 0x438   : > { %v6213_v18 = vpop.f32.mrb[43].mxu0  ;;  %v8065_v58 = vpop.permute.xlu1 %4418  ;;  %v2867_v6 = vsel %vm1150_vm2, %v8054_v17, -inf }
 0x439   : > { %2856 = vmax.xlane.f32.xlu0 %v2855_v24  ;;  %9459 = vst [vmem:[#allocation51_spill] sm:$0xff] %v8065_v58  ;;  %v8069_v33 = vpop.permute.xlu0 %4277  ;;  %v8073_v18 = vadd.f32 %v7791_v0, %v7934_v1  ;;  %v2870_v1 = vsel %vm1150_vm2, %v8063_v46, -inf }
 0x43a   : > { %9460 = vst [vmem:[#allocation52_spill] sm:$0xff] %v8069_v33  ;;  %v8087_v33 = vunpack.c.h.bf16 %v5887_v52 }
 0x43b   : > { %2859 = vmax.xlane.f32.xlu1 %v2858_v31  ;;  %v8085_v31 = vadd.f32 %v7804_v41, %v7939_v48  ;;  %v2879_v48 = vsel %vm1150_vm2, %v8073_v18, -inf }
 0x43c   : > { %v8077_v19 = vpop.f32.mrb[76].mxu1 }
 0x43d   : > { %v6230_v24 = vpop.f32.mrb[77].mxu1  ;;  %2868 = vmax.xlane.f32.xlu0 %v2867_v6  ;;  %v8081_v58 = vpop.f32.mrb[44].mxu0  ;;  %v8099_v6 = vadd.f32 %v8075_v59, %v7964_v27 }
 0x43e   : > { %v6224_v29 = vpop.f32.mrb[45].mxu0  ;;  %v8089_v0 = vpop.f32.mrb[78].mxu1 }
 0x43f   : > { %v6231_v44 = vpop.f32.mrb[79].mxu1  ;;  %2871 = vmax.xlane.f32.xlu1 %v2870_v1  ;;  %v8093_v10 = vpop.f32.mrb[46].mxu0  ;;  %v8105_v29 = vadd.f32 %v8087_v33, %v7974_v12  ;;  %v8113_v1 = vadd.f32 %v8075_v59, %v7968_v13 }
 0x440   : > { %v8095_v24 = vpop.permute.xlu1 %4512  ;;  %v6225_v41 = vpop.f32.mrb[47].mxu0  ;;  %v2882_v44 = vsel %vm1150_vm2, %v8085_v31, -inf }
 0x441   : > { %9461 = vst [vmem:[#allocation53_spill] sm:$0xff] %v8095_v24  ;;  %2880 = vmax.xlane.f32.xlu0 %v2879_v48  ;;  %9462 = vst [vmem:[#allocation54_spill] sm:$0xff] %v8105_v29  ;;  %v8109_v52 = vpop.permute.xlu0 %4371  ;;  %v2891_v41 = vsel %vm1150_vm2, %v8099_v6, -inf  ;;  %v2894_v13 = vsel %vm1150_vm2, %v8105_v29, -inf }
 0x442   : > { %9463 = vst [vmem:[#allocation55_spill] sm:$0xff] %v8109_v52 }
 0x443   : > { %2883 = vmax.xlane.f32.xlu1 %v2882_v44  ;;  %v8125_v44 = vadd.f32 %v8087_v33, %v7978_v11  ;;  %v8141_v11 = vadd.f32 %v8087_v33, %v8010_v2 }
 0x444   : > { %v8115_v27 = vpop.f32.mrb[80].mxu1  ;;  %v8121_v12 = vpop.permute.xlu1 %4606 }
 0x445   : > { %v6242_v48 = vpop.f32.mrb[81].mxu1  ;;  %2892 = vmax.xlane.f32.xlu0 %v2891_v41  ;;  %v8119_v24 = vpop.f32.mrb[48].mxu0  ;;  %9464 = vst [vmem:[#allocation56_spill] sm:$0xff] %v8121_v12  ;;  %9465 = vst [vmem:[#allocation57_spill] sm:$0xff] %v8125_v44  ;;  %v8135_v41 = vadd.f32 %v8075_v59, %v8000_v21  ;;  %v2885_v12 = vsel %vm1150_vm2, %v8113_v1, -inf  ;;  %v8149_v21 = vadd.f32 %v8075_v59, %v8004_v53  ;;  %v2906_v53 = vsel %vm1150_vm2, %v8141_v11, -inf }
 0x446   : > { %v6236_v52 = vpop.f32.mrb[49].mxu0  ;;  %v8129_v15 = vpop.f32.mrb[82].mxu1  ;;  %9467 = vst [vmem:[#allocation59_spill] sm:$0xff] %v8141_v11 }
 0x447   : > { %2895 = vmax.xlane.f32.xlu1 %v2894_v13  ;;  %v8131_v50 = vpop.f32.mrb[50].mxu0  ;;  %9466 = vst [vmem:[#allocation58_spill] sm:$0xff] %v8135_v41  ;;  %v6243_v48 = vpop.f32.mrb[83].mxu1  ;;  %v2888_v52 = vsel %vm1150_vm2, %v8125_v44, -inf  ;;  %9469 = vst [vmem:[#allocation61_spill] sm:$0xff] %v8149_v21 }
 0x448   : > { %v6237_v38 = vpop.f32.mrb[51].mxu0  ;;  %v8145_v13 = vpop.permute.xlu0 %4465 }
 0x449   : > { %2886 = vmax.xlane.f32.xlu0 %v2885_v12  ;;  %9468 = vst [vmem:[#allocation60_spill] sm:$0xff] %v8145_v13  ;;  %v2903_v38 = vsel %vm1150_vm2, %v8135_v41, -inf  ;;  %v8157_v2 = vpop.permute.xlu1 %4700 }
 0x44a   : > { %9470 = vst [vmem:[#allocation62_spill] sm:$0xff] %v8157_v2  ;;  %v2897_v2 = vsel %vm1150_vm2, %v8149_v21, -inf }
 0x44b   : > { %2889 = vmax.xlane.f32.xlu1 %v2888_v52  ;;  %v8161_v52 = vadd.f32 %v8087_v33, %v8014_v20 }
 0x44c   : > { %v8151_v48 = vpop.f32.mrb[84].mxu1  ;;  %v8175_v20 = vpop.permute.xlu0 %4653 }
 0x44d   : > { %v6254_v12 = vpop.f32.mrb[85].mxu1  ;;  %2904 = vmax.xlane.f32.xlu0 %v2903_v38  ;;  %v8155_v56 = vpop.f32.mrb[52].mxu0  ;;  %9471 = vst [vmem:[#allocation63_spill] sm:$0xff] %v8161_v52  ;;  %v8171_v38 = vadd.f32 %v8075_v59, %v8036_v16  ;;  %9473 = vst [vmem:[#allocation65_spill] sm:$0xff] %v8175_v20  ;;  %v8187_v16 = vadd.f32 %v8075_v59, %v8040_v43 }
 0x44e   : > { %v6248_v13 = vpop.f32.mrb[53].mxu0  ;;  %v8165_v29 = vpop.f32.mrb[86].mxu1 }
 0x44f   : > { %2907 = vmax.xlane.f32.xlu1 %v2906_v53  ;;  %v8167_v44 = vpop.f32.mrb[54].mxu0  ;;  %9472 = vst [vmem:[#allocation64_spill] sm:$0xff] %v8171_v38  ;;  %v6255_v12 = vpop.f32.mrb[87].mxu1  ;;  %v8179_v13 = vadd.f32 %v8087_v33, %v8046_v3  ;;  %v2900_v53 = vsel %vm1150_vm2, %v8161_v52, -inf  ;;  %v8197_v3 = vadd.f32 %v8087_v33, %v8050_v42  ;;  %v2909_v42 = vsel %vm1150_vm2, %v8187_v16, -inf }
 0x450   : > { %v6249_v41 = vpop.f32.mrb[55].mxu0  ;;  %v8183_v11 = vpop.permute.xlu1 %4747 }
 0x451   : > { %2898 = vmax.xlane.f32.xlu0 %v2897_v2  ;;  %9474 = vst [vmem:[#allocation66_spill] sm:$0xff] %v8179_v13  ;;  %9475 = vst [vmem:[#allocation67_spill] sm:$0xff] %v8183_v11  ;;  %v2915_v41 = vsel %vm1150_vm2, %v8171_v38, -inf  ;;  %v2918_v11 = vsel %vm1150_vm2, %v8179_v13, -inf  ;;  %v8205_v21 = vpop.permute.xlu0 %4559  ;;  %v8217_v13 = vadd.f32 %v8087_v33, %v8089_v0 }
 0x452   : > { %9476 = vst [vmem:[#allocation68_spill] sm:$0xff] %v8197_v3  ;;  %9477 = vst [vmem:[#allocation69_spill] sm:$0xff] %v8205_v21 }
 0x453   : > { %2901 = vmax.xlane.f32.xlu1 %v2900_v53  ;;  %9480 = vst [vmem:[#allocation72_spill] sm:$0xff] %v8217_v13  ;;  %v2930_v0 = vsel %vm1150_vm2, %v8217_v13, -inf  ;;  %v8257_v13 = vadd.f32 %v8087_v33, %v8131_v50  ;;  %v8269_v50 = vadd.f32 %v8087_v33, %v8165_v29 }
 0x454   : > { %v8189_v12 = vpop.f32.mrb[88].mxu1 }
 0x455   : > { %v6266_v2 = vpop.f32.mrb[89].mxu1  ;;  %2916 = vmax.xlane.f32.xlu0 %v2915_v41  ;;  %v8193_v20 = vpop.f32.mrb[56].mxu0  ;;  %v8209_v41 = vadd.f32 %v8075_v59, %v8077_v19  ;;  %v8223_v19 = vadd.f32 %v8075_v59, %v8081_v58  ;;  %v8236_v58 = vadd.f32 %v8075_v59, %v8115_v27  ;;  %v8250_v27 = vadd.f32 %v8075_v59, %v8119_v24 }
 0x456   : > { %v6260_v53 = vpop.f32.mrb[57].mxu0  ;;  %v8201_v52 = vpop.f32.mrb[90].mxu1  ;;  %v8263_v24 = vadd.f32 %v8075_v59, %v8151_v48  ;;  %v8275_v48 = vadd.f32 %v8075_v59, %v8155_v56  ;;  %v2954_v29 = vsel %vm1150_vm2, %v8269_v50, -inf }
 0x457   : > { %2919 = vmax.xlane.f32.xlu1 %v2918_v11  ;;  %v8203_v43 = vpop.f32.mrb[58].mxu0  ;;  %9478 = vst [vmem:[#allocation70_spill] sm:$0xff] %v8209_v41  ;;  %v6267_v2 = vpop.f32.mrb[91].mxu1  ;;  %v2912_v11 = vsel %vm1150_vm2, %v8197_v3, -inf }
 0x458   : > { %v6261_v38 = vpop.f32.mrb[59].mxu0  ;;  %v8213_v53 = vpop.permute.xlu1 %4794  ;;  %v2927_v2 = vsel %vm1150_vm2, %v8209_v41, -inf  ;;  %v2921_v41 = vsel %vm1150_vm2, %v8223_v19, -inf  ;;  %v2945_v56 = vsel %vm1150_vm2, %v8275_v48, -inf }
 0x459   : > { %2910 = vmax.xlane.f32.xlu0 %v2909_v42  ;;  %9479 = vst [vmem:[#allocation71_spill] sm:$0xff] %v8213_v53  ;;  %v2791_v21 = vpop.xlane.xlu0 %2790  ;;  %v8229_v42 = vadd.f32 %v8087_v33, %v8093_v10  ;;  %v8243_v10 = vadd.f32 %v8087_v33, %v8129_v15 }
 0x45a   : > { %v2981_v53 = vsub.f32 %v7794_v47, %v2791_v21 }
 0x45b   : > { %2913 = vmax.xlane.f32.xlu1 %v2912_v11  ;;  %v2924_v47 = vsel %vm1150_vm2, %v8229_v42, -inf }
 0x45c   : > { %v2794_v38 = vpop.xlane.xlu1 %2793  ;;  %v3045_v21 = vmul.f32 1.442695, %v2981_v53 }
 0x45d   : > { %2928 = vmax.xlane.f32.xlu0 %v2927_v2  ;;  %v2839_v11 = vpop.xlane.xlu0 %2838  ;;  %v2982_v2 = vsub.f32 %v7807_v23, %v2794_v38  ;;  %v2939_v23 = vsel %vm1150_vm2, %v8236_v58, -inf }
 0x45e   : > { %6594 = vpow2.f32 %v3045_v21  ;;  %v8281_v21 = vadd.f32 %v8087_v33, %v8167_v44 }
 0x45f   : > { %2931 = vmax.xlane.f32.xlu1 %v2930_v0  ;;  %v2997_v0 = vsub.f32 %v7824_v28, %v2839_v11  ;;  %v2942_v28 = vsel %vm1150_vm2, %v8243_v10, -inf  ;;  %v2933_v11 = vsel %vm1150_vm2, %v8250_v27, -inf }
 0x460   : > { %v2842_v3 = vpop.xlane.xlu1 %2841  ;;  %v2948_v44 = vsel %vm1150_vm2, %v8281_v21, -inf }
 0x461   : > { %2922 = vmax.xlane.f32.xlu0 %v2921_v41  ;;  %v3047_v41 = vmul.f32 1.442695, %v2982_v2  ;;  %v2998_v38 = vsub.f32 %v7834_v40, %v2842_v3  ;;  %v2797_v15 = vpop.xlane.xlu0 %2796  ;;  %v3077_v53 = vmul.f32 1.442695, %v2997_v0  ;;  %v2936_v3 = vsel %vm1150_vm2, %v8257_v13, -inf }
 0x462   : > { %v2983_v0 = vsub.f32 %v7831_v39, %v2797_v15 }
 0x463   : > { %2925 = vmax.xlane.f32.xlu1 %v2924_v47  ;;  %6596 = vpow2.f32 %v3047_v41  ;;  %v3079_v40 = vmul.f32 1.442695, %v2998_v38  ;;  %v2951_v47 = vsel %vm1150_vm2, %v8263_v24, -inf }
 0x464   : > { %6598 = vpow2.f32 %v3077_v53 }
 0x465   : > { %2940 = vmax.xlane.f32.xlu0 %v2939_v23  ;;  %v2851_v2 = vpop.xlane.xlu0 %2850  ;;  %6600 = vpow2.f32 %v3079_v40  ;;  %v2854_v23 = vpop.xlane.xlu1 %2853 }
 0x466   : > { %v3001_v38 = vsub.f32 %v7847_v35, %v2851_v2  ;;  %v3002_v40 = vsub.f32 %v7857_v61, %v2854_v23  ;;  %v8307_v61 = vadd.f32 %v8075_v59, %v8189_v12 }
 0x467   : > { %2943 = vmax.xlane.f32.xlu1 %v2942_v28 }
 0x468   : > { %v8288_v41 = vpop.eup %6594  ;;  %9481 = vst [vmem:[#allocation73_spill] sm:$0xff] %v8307_v61  ;;  %v2963_v12 = vsel %vm1150_vm2, %v8307_v61, -inf }
 0x469   : > { %2934 = vmax.xlane.f32.xlu0 %v2933_v11  ;;  %v2800_v28 = vpop.xlane.xlu0 %2799  ;;  %v3049_v11 = vmul.f32 1.442695, %v2983_v0  ;;  %v3173_v39 = vsel %vm1150_vm2, %v8288_v41, 0.0 }
 0x46b   : > { %2937 = vmax.xlane.f32.xlu1 %v2936_v3  ;;  %v3085_v3 = vmul.f32 1.442695, %v3001_v38  ;;  %6602 = vpow2.f32 %v3049_v11  ;;  %v8319_v38 = vadd.f32 %v8075_v59, %v8193_v20 }
 0x46d   : > { %2952 = vmax.xlane.f32.xlu0 %v2951_v47  ;;  %v8293_v53 = vpop.eup %6596  ;;  %v2984_v47 = vsub.f32 %v7854_v25, %v2800_v28  ;;  %6604 = vpow2.f32 %v3085_v3  ;;  %v8313_v25 = vadd.f32 %v8087_v33, %v8201_v52  ;;  %9483 = vst [vmem:[#allocation75_spill] sm:$0xff] %v8319_v38  ;;  %v8325_v28 = vadd.f32 %v8087_v33, %v8203_v43  ;;  %v2803_v20 = vpop.xlane.xlu0 %2802 }
 0x46e   : > { %v8298_v15 = vpop.eup %6598  ;;  %v3176_v35 = vsel %vm1150_vm2, %v8293_v53, 0.0  ;;  %v2806_v3 = vpop.xlane.xlu1 %2805 }
 0x46f   : > { %2955 = vmax.xlane.f32.xlu1 %v2954_v29  ;;  %v8303_v2 = vpop.eup %6600  ;;  %v3087_v29 = vmul.f32 1.442695, %v3002_v40  ;;  %v3221_v0 = vsel %vm1150_vm2, %v8298_v15, 0.0  ;;  %v3051_v23 = vmul.f32 1.442695, %v2984_v47  ;;  %9482 = vst [vmem:[#allocation74_spill] sm:$0xff] %v8313_v25 }
 0x470   : > { %9484 = vst [vmem:[#allocation76_spill] sm:$0xff] %v8325_v28  ;;  %v2966_v52 = vsel %vm1150_vm2, %v8313_v25, -inf  ;;  %v2960_v40 = vsel %vm1150_vm2, %v8325_v28, -inf  ;;  %v2986_v25 = vsub.f32 %v7862_v37, %v2806_v3 }
 0x471   : > { %2946 = vmax.xlane.f32.xlu0 %v2945_v56  ;;  %v3224_v56 = vsel %vm1150_vm2, %v8303_v2, 0.0  ;;  %6606 = vpow2.f32 %v3087_v29 }
 0x472   : > { %6608 = vpow2.f32 %v3051_v23 }
 0x473   : > { %2949 = vmax.xlane.f32.xlu1 %v2948_v44  ;;  %v2957_v44 = vsel %vm1150_vm2, %v8319_v38, -inf }
 0x475   : > { %3174 = vadd.xlane.f32.xlu0 %v3173_v39  ;;  %v8331_v11 = vpop.eup %6602 }
 0x476   : > { %v3179_v43 = vsel %vm1150_vm2, %v8331_v11, 0.0 }
 0x477   : > { %3177 = vadd.xlane.f32.xlu1 %v3176_v35  ;;  %v8335_v39 = vpop.eup %6604 }
 0x478   : > { %v3233_v35 = vsel %vm1150_vm2, %v8335_v39, 0.0 }
 0x479   : > { %3222 = vadd.xlane.f32.xlu0 %v3221_v0  ;;  %v2863_v0 = vpop.xlane.xlu0 %2862 }
 0x47b   : > { %3225 = vadd.xlane.f32.xlu1 %v3224_v56  ;;  %v8339_v47 = vpop.eup %6606  ;;  %v2985_v56 = vsub.f32 %v7868_v30, %v2803_v20  ;;  %v3055_v30 = vmul.f32 1.442695, %v2986_v25 }
 0x47c   : > { %v8343_v29 = vpop.eup %6608  ;;  %v3236_v23 = vsel %vm1150_vm2, %v8339_v47, 0.0 }
 0x47d   : > { %2964 = vmax.xlane.f32.xlu0 %v2963_v12  ;;  %v2866_v12 = vpop.xlane.xlu1 %2865 }
 0x47f   : > { %2967 = vmax.xlane.f32.xlu1 %v2966_v52  ;;  %v3005_v52 = vsub.f32 %v7885_v55, %v2863_v0 }
 0x481   : > { %2958 = vmax.xlane.f32.xlu0 %v2957_v44  ;;  %v3182_v44 = vsel %vm1150_vm2, %v8343_v29, 0.0  ;;  %v3093_v28 = vmul.f32 1.442695, %v3005_v52 }
 0x483   : > { %2961 = vmax.xlane.f32.xlu1 %v2960_v40  ;;  %v3053_v40 = vmul.f32 1.442695, %v2985_v56 }
 0x485   : > { %3180 = vadd.xlane.f32.xlu0 %v3179_v43  ;;  %v3006_v43 = vsub.f32 %v7888_v54, %v2866_v12  ;;  %6610 = vpow2.f32 %v3053_v40 }
 0x486   : > { %6612 = vpow2.f32 %v3093_v28 }
 0x487   : > { %3234 = vadd.xlane.f32.xlu1 %v3233_v35  ;;  %v2809_v35 = vpop.xlane.xlu0 %2808  ;;  %v3095_v38 = vmul.f32 1.442695, %v3006_v43 }
 0x488   : > { %v2987_v61 = vsub.f32 %v7904_v62, %v2809_v35 }
 0x489   : > { %3237 = vadd.xlane.f32.xlu0 %v3236_v23  ;;  %6614 = vpow2.f32 %v3095_v38 }
 0x48a   : > { %v3057_v56 = vmul.f32 1.442695, %v2987_v61  ;;  %6616 = vpow2.f32 %v3055_v30 }
 0x48b   : > { %3183 = vadd.xlane.f32.xlu1 %v3182_v44 }
 0x48c   : > { %6618 = vpow2.f32 %v3057_v56 }
 0x48f   : > { %v8372_v38 = vpop.eup %6610 }
 0x490   : > { %9486 = vst [vmem:[#allocation78_spill] sm:$0xff] %v8372_v38  ;;  %v8376_v43 = vpop.eup %6612 }
 0x491   : > { %9487 = vst [vmem:[#allocation79_spill] sm:$0xff] %v8376_v43  ;;  %v3245_v30 = vsel %vm1150_vm2, %v8376_v43, 0.0 }
 0x493   : > { %v2710_v20 = vpop.f32.mrb[92].mxu1  ;;  %v8380_v35 = vpop.eup %6614 }
 0x494   : > { %v8355_v55 = vadd.f32 %v8075_v59, %v2710_v20  ;;  %v2661_v0 = vpop.f32.mrb[60].mxu0  ;;  %v6278_v23 = vpop.f32.mrb[93].mxu1  ;;  %9488 = vst [vmem:[#allocation80_spill] sm:$0xff] %v8380_v35 }
 0x495   : > { %v8358_v54 = vadd.f32 %v8075_v59, %v2661_v0  ;;  %v6272_v37 = vpop.f32.mrb[61].mxu0  ;;  %v2713_v3 = vpop.f32.mrb[94].mxu1  ;;  %v3248_v0 = vsel %vm1150_vm2, %v8380_v35, 0.0 }
 0x496   : > { %v2664_v12 = vpop.f32.mrb[62].mxu0  ;;  %v6279_v52 = vpop.f32.mrb[95].mxu1  ;;  %v2975_v62 = vsel %vm1150_vm2, %v8355_v55, -inf  ;;  %v8363_v25 = vadd.f32 %v8087_v33, %v2713_v3 }
 0x497   : > { %v8366_v28 = vadd.f32 %v8087_v33, %v2664_v12  ;;  %v6273_v44 = vpop.f32.mrb[63].mxu0  ;;  %2976 = vmax.xlane.f32.xlu0 %v2975_v62  ;;  %v2969_v59 = vsel %vm1150_vm2, %v8358_v54, -inf  ;;  %v3185_v33 = vsel %vm1150_vm2, %v8372_v38, 0.0  ;;  %v8384_v20 = vpop.eup %6616 }
 0x498   : > { %9485 = vst [vmem:[#allocation77_spill] sm:$0xff] %v8363_v25  ;;  %2970 = vmax.xlane.f32.xlu1 %v2969_v59  ;;  %v2978_v40 = vsel %vm1150_vm2, %v8363_v25, -inf  ;;  %9489 = vst [vmem:[#allocation81_spill] sm:$0xff] %v8384_v20  ;;  %v8388_v23 = vpop.eup %6618  ;;  %v3188_v56 = vsel %vm1150_vm2, %v8384_v20, 0.0  ;;  %v2812_v3 = vpop.xlane.xlu1 %2811 }
 0x499   : > { %v2972_v61 = vsel %vm1150_vm2, %v8366_v28, -inf  ;;  %9490 = vst [vmem:[#allocation82_spill] sm:$0xff] %v8388_v23  ;;  %v3191_v37 = vsel %vm1150_vm2, %v8388_v23, 0.0  ;;  %v2988_v12 = vsub.f32 %v7898_v57, %v2812_v3 }
 0x49b   : > { %2973 = vmax.xlane.f32.xlu0 %v2972_v61  ;;  %v3059_v44 = vmul.f32 1.442695, %v2988_v12 }
 0x49c   : > { %2979 = vmax.xlane.f32.xlu1 %v2978_v40 }
 0x49f   : > { %3186 = vadd.xlane.f32.xlu0 %v3185_v33 }
 0x4a0   : > { %3246 = vadd.xlane.f32.xlu1 %v3245_v30 }
 0x4a3   : > { %3249 = vadd.xlane.f32.xlu0 %v3248_v0 }
 0x4a4   : > { %3189 = vadd.xlane.f32.xlu1 %v3188_v56 }
 0x4a7   : > { %3192 = vadd.xlane.f32.xlu0 %v3191_v37 }
 0x4ae   : > { %v2875_v52 = vpop.xlane.xlu0 %2874 }
 0x4af   : > { %v3009_v62 = vsub.f32 %v7937_v7, %v2875_v52 }
 0x4b0   : > { %v2878_v59 = vpop.xlane.xlu1 %2877 }
 0x4b1   : > { %v3101_v61 = vmul.f32 1.442695, %v3009_v62  ;;  %v3010_v40 = vsub.f32 %v7946_v22, %v2878_v59 }
 0x4b2   : > { %v2815_v33 = vpop.xlane.xlu0 %2814 }
 0x4b3   : > { %6620 = vpow2.f32 %v3101_v61  ;;  %v3103_v30 = vmul.f32 1.442695, %v3010_v40  ;;  %v2989_v0 = vsub.f32 %v7943_v36, %v2815_v33 }
 0x4b4   : > { %6622 = vpow2.f32 %v3059_v44  ;;  %v2818_v56 = vpop.xlane.xlu1 %2817 }
 0x4b5   : > { %6624 = vpow2.f32 %v3103_v30  ;;  %v3061_v37 = vmul.f32 1.442695, %v2989_v0  ;;  %v2990_v43 = vsub.f32 %v7952_v8, %v2818_v56 }
 0x4b6   : > { %v2821_v57 = vpop.xlane.xlu0 %2820 }
 0x4b7   : > { %6626 = vpow2.f32 %v3061_v37  ;;  %v3063_v3 = vmul.f32 1.442695, %v2990_v43  ;;  %v2991_v7 = vsub.f32 %v7960_v34, %v2821_v57 }
 0x4b8   : > { %v2824_v12 = vpop.xlane.xlu1 %2823 }
 0x4b9   : > { %6628 = vpow2.f32 %v3063_v3  ;;  %v3065_v52 = vmul.f32 1.442695, %v2991_v7  ;;  %v2992_v22 = vsub.f32 %v7972_v26, %v2824_v12 }
 0x4ba   : > { %v2827_v62 = vpop.xlane.xlu0 %2826 }
 0x4bb   : > { %6630 = vpow2.f32 %v3065_v52  ;;  %v3067_v59 = vmul.f32 1.442695, %v2992_v22  ;;  %v2993_v36 = vsub.f32 %v7982_v63, %v2827_v62 }
 0x4bc   : > { %v2830_v44 = vpop.xlane.xlu1 %2829 }
 0x4bd   : > { %v8402_v61 = vpop.eup %6620  ;;  %6632 = vpow2.f32 %v3067_v59  ;;  %v3069_v8 = vmul.f32 1.442695, %v2993_v36  ;;  %v2994_v40 = vsub.f32 %v7988_v49, %v2830_v44 }
 0x4be   : > { %9491 = vst [vmem:[#allocation83_spill] sm:$0xff] %v8402_v61  ;;  %v8405_v43 = vpop.eup %6622  ;;  %v2833_v34 = vpop.xlane.xlu0 %2832  ;;  %v3257_v33 = vsel %vm1150_vm2, %v8402_v61, 0.0 }
 0x4bf   : > { %9492 = vst [vmem:[#allocation84_spill] sm:$0xff] %v8405_v43  ;;  %v8409_v30 = vpop.eup %6624  ;;  %6634 = vpow2.f32 %v3069_v8  ;;  %v3071_v26 = vmul.f32 1.442695, %v2994_v40  ;;  %v2995_v0 = vsub.f32 %v7996_v32, %v2833_v34  ;;  %3258 = vadd.xlane.f32.xlu1 %v3257_v33  ;;  %v3194_v7 = vsel %vm1150_vm2, %v8405_v43, 0.0 }
 0x4c0   : > { %9493 = vst [vmem:[#allocation85_spill] sm:$0xff] %v8409_v30  ;;  %v2836_v63 = vpop.xlane.xlu1 %2835  ;;  %v3260_v56 = vsel %vm1150_vm2, %v8409_v30, 0.0 }
 0x4c1   : > { %v8414_v37 = vpop.eup %6626  ;;  %6636 = vpow2.f32 %v3071_v26  ;;  %v3073_v49 = vmul.f32 1.442695, %v2995_v0  ;;  %v2996_v57 = vsub.f32 %v8008_v5, %v2836_v63  ;;  %3261 = vadd.xlane.f32.xlu0 %v3260_v56 }
 0x4c2   : > { %9494 = vst [vmem:[#allocation86_spill] sm:$0xff] %v8414_v37  ;;  %v2845_v3 = vpop.xlane.xlu0 %2844  ;;  %v3197_v62 = vsel %vm1150_vm2, %v8414_v37, 0.0 }
 0x4c3   : > { %v8419_v12 = vpop.eup %6628  ;;  %6638 = vpow2.f32 %v3073_v49  ;;  %v3075_v32 = vmul.f32 1.442695, %v2996_v57  ;;  %v2999_v52 = vsub.f32 %v8018_v4, %v2845_v3  ;;  %3195 = vadd.xlane.f32.xlu1 %v3194_v7 }
 0x4c4   : > { %9495 = vst [vmem:[#allocation87_spill] sm:$0xff] %v8419_v12  ;;  %v2848_v22 = vpop.xlane.xlu1 %2847  ;;  %v3200_v8 = vsel %vm1150_vm2, %v8419_v12, 0.0 }
 0x4c5   : > { %v8424_v59 = vpop.eup %6630  ;;  %6640 = vpow2.f32 %v3075_v32  ;;  %v3081_v5 = vmul.f32 1.442695, %v2999_v52  ;;  %v3000_v36 = vsub.f32 %v8024_v9, %v2848_v22  ;;  %3198 = vadd.xlane.f32.xlu0 %v3197_v62 }
 0x4c6   : > { %9496 = vst [vmem:[#allocation88_spill] sm:$0xff] %v8424_v59  ;;  %v2857_v44 = vpop.xlane.xlu0 %2856  ;;  %v3203_v26 = vsel %vm1150_vm2, %v8424_v59, 0.0 }
 0x4c7   : > { %v8429_v40 = vpop.eup %6632  ;;  %6642 = vpow2.f32 %v3081_v5  ;;  %v3083_v4 = vmul.f32 1.442695, %v3000_v36  ;;  %v3003_v34 = vsub.f32 %v8032_v45, %v2857_v44  ;;  %3201 = vadd.xlane.f32.xlu1 %v3200_v8 }
 0x4c8   : > { %9497 = vst [vmem:[#allocation89_spill] sm:$0xff] %v8429_v40  ;;  %v2860_v33 = vpop.xlane.xlu1 %2859  ;;  %v3206_v56 = vsel %vm1150_vm2, %v8429_v40, 0.0 }
 0x4c9   : > { %v8434_v0 = vpop.eup %6634  ;;  %6644 = vpow2.f32 %v3083_v4  ;;  %v3089_v9 = vmul.f32 1.442695, %v3003_v34  ;;  %3204 = vadd.xlane.f32.xlu0 %v3203_v26 }
 0x4ca   : > { %9498 = vst [vmem:[#allocation90_spill] sm:$0xff] %v8434_v0  ;;  %v2869_v63 = vpop.xlane.xlu0 %2868  ;;  %v3209_v45 = vsel %vm1150_vm2, %v8434_v0, 0.0  ;;  %v3004_v0 = vsub.f32 %v8044_v51, %v2860_v33 }
 0x4cb   : > { %v8438_v49 = vpop.eup %6636  ;;  %6646 = vpow2.f32 %v3089_v9  ;;  %3207 = vadd.xlane.f32.xlu1 %v3206_v56 }
 0x4cc   : > { %9499 = vst [vmem:[#allocation91_spill] sm:$0xff] %v8438_v49  ;;  %v2872_v57 = vpop.xlane.xlu1 %2871  ;;  %v3212_v32 = vsel %vm1150_vm2, %v8438_v49, 0.0  ;;  %v3091_v12 = vmul.f32 1.442695, %v3004_v0 }
 0x4cd   : > { %v8442_v3 = vpop.eup %6638  ;;  %3210 = vadd.xlane.f32.xlu0 %v3209_v45  ;;  %v3008_v37 = vsub.f32 %v8063_v46, %v2872_v57 }
 0x4ce   : > { %9500 = vst [vmem:[#allocation92_spill] sm:$0xff] %v8442_v3  ;;  %v2881_v7 = vpop.xlane.xlu0 %2880  ;;  %v3215_v62 = vsel %vm1150_vm2, %v8442_v3, 0.0  ;;  %6648 = vpow2.f32 %v3091_v12 }
 0x4cf   : > { %v8446_v52 = vpop.eup %6640  ;;  %3213 = vadd.xlane.f32.xlu1 %v3212_v32  ;;  %v3099_v51 = vmul.f32 1.442695, %v3008_v37  ;;  %v9506_v37 = vld [vmem:[#allocation54_spill] sm:$0xff] }
 0x4d0   : > { %9501 = vst [vmem:[#allocation93_spill] sm:$0xff] %v8446_v52  ;;  %v2884_v22 = vpop.xlane.xlu1 %2883  ;;  %v3218_v44 = vsel %vm1150_vm2, %v8446_v52, 0.0 }
 0x4d1   : > { %v8450_v5 = vpop.eup %6642  ;;  %3216 = vadd.xlane.f32.xlu0 %v3215_v62  ;;  %v3012_v20 = vsub.f32 %v8085_v31, %v2884_v22 }
 0x4d2   : > { %9502 = vst [vmem:[#allocation94_spill] sm:$0xff] %v8450_v5  ;;  %v2893_v36 = vpop.xlane.xlu0 %2892  ;;  %v3227_v34 = vsel %vm1150_vm2, %v8450_v5, 0.0 }
 0x4d3   : > { %v8454_v8 = vpop.eup %6644  ;;  %3219 = vadd.xlane.f32.xlu1 %v3218_v44  ;;  %v3107_v46 = vmul.f32 1.442695, %v3012_v20 }
 0x4d4   : > { %9503 = vst [vmem:[#allocation95_spill] sm:$0xff] %v8454_v8  ;;  %v8456_v4 = vpop.xlane.xlu1 %2895  ;;  %v3230_v56 = vsel %vm1150_vm2, %v8454_v8, 0.0 }
 0x4d5   : > { %v8460_v26 = vpop.eup %6646  ;;  %3228 = vadd.xlane.f32.xlu0 %v3227_v34  ;;  %v3016_v12 = vsub.f32 %v9506_v37, %v8456_v4  ;;  %v9509_v4 = vld [vmem:[#allocation61_spill] sm:$0xff] }
 0x4d6   : > { %9504 = vst [vmem:[#allocation96_spill] sm:$0xff] %v8460_v26  ;;  %v2887_v9 = vpop.xlane.xlu0 %2886  ;;  %v3239_v32 = vsel %vm1150_vm2, %v8460_v26, 0.0 }
 0x4d7   : > { %3231 = vadd.xlane.f32.xlu1 %v3230_v56 }
 0x4d8   : > { %v2890_v45 = vpop.xlane.xlu1 %2889  ;;  %v8520_v22 = vpop.eup %6648 }
 0x4d9   : > { %3240 = vadd.xlane.f32.xlu0 %v3239_v32 }
 0x4da   : > { %v8466_v62 = vpop.xlane.xlu0 %2904 }
 0x4dc   : > { %v8468_v44 = vpop.xlane.xlu1 %2907 }
 0x4de   : > { %v8470_v61 = vpop.xlane.xlu0 %2898 }
 0x4e0   : > { %v8472_v30 = vpop.xlane.xlu1 %2901 }
 0x4e2   : > { %v8474_v35 = vpop.xlane.xlu0 %2916 }
 0x4e4   : > { %v8476_v34 = vpop.xlane.xlu1 %2919 }
 0x4e6   : > { %v8478_v5 = vpop.xlane.xlu0 %2910 }
 0x4e8   : > { %v8480_v56 = vpop.xlane.xlu1 %2913  ;;  %4888 = vrot.lane.b32.xlu1 %v7603_v14, %s6862_s18  ;;  %v3007_v14 = vsub.f32 %v8054_v17, %v2869_v63  ;;  %v3015_v17 = vsub.f32 %v8099_v6, %v2893_v36  ;;  %v3013_v63 = vsub.f32 %v8113_v1, %v2887_v9  ;;  %v9507_v1 = vld [vmem:[#allocation58_spill] sm:$0xff]  ;;  %v9508_v9 = vld [vmem:[#allocation59_spill] sm:$0xff] }
 0x4ea   : > { %v8484_v32 = vpop.xlane.xlu0 %2928  ;;  %v3097_v23 = vmul.f32 1.442695, %v3007_v14  ;;  %v3113_v57 = vmul.f32 1.442695, %v3015_v17  ;;  %v3017_v17 = vsub.f32 %v9509_v4, %v8470_v61 }
 0x4ec   : > { %v8486_v26 = vpop.xlane.xlu1 %2931  ;;  %6650 = vpow2.f32 %v3097_v23  ;;  %v3109_v23 = vmul.f32 1.442695, %v3013_v63  ;;  %v9510_v63 = vld [vmem:[#allocation63_spill] sm:$0xff] }
 0x4ed   : > { %6652 = vpow2.f32 %v3099_v51  ;;  %v3115_v51 = vmul.f32 1.442695, %v3016_v12  ;;  %v3117_v12 = vmul.f32 1.442695, %v3017_v17 }
 0x4ee   : > { %v8488_v8 = vpop.xlane.xlu0 %2922 }
 0x4ef   : > { %4841 = vrot.lane.b32.xlu0 %v7607_v60, %s6862_s18  ;;  %v3011_v60 = vsub.f32 %v8073_v18, %v2881_v7  ;;  %v9505_v7 = vld [vmem:[#allocation57_spill] sm:$0xff] }
 0x4f0   : > { %v8492_v52 = vpop.xlane.xlu1 %2925  ;;  %v3014_v14 = vsub.f32 %v9505_v7, %v2890_v45  ;;  %v3020_v45 = vsub.f32 %v9508_v9, %v8468_v44 }
 0x4f1   : > { %v3105_v38 = vmul.f32 1.442695, %v3011_v60 }
 0x4f2   : > { %v8494_v3 = vpop.xlane.xlu0 %2940  ;;  %v3111_v20 = vmul.f32 1.442695, %v3014_v14 }
 0x4f3   : > { %6654 = vpow2.f32 %v3105_v38  ;;  %v3019_v38 = vsub.f32 %v9507_v1, %v8466_v62  ;;  %v3242_v62 = vsel %vm1150_vm2, %v8520_v22, 0.0 }
 0x4f4   : > { %v8496_v49 = vpop.xlane.xlu1 %2943 }
 0x4f5   : > { %v3121_v44 = vmul.f32 1.442695, %v3019_v38  ;;  %v9511_v38 = vld [vmem:[#allocation64_spill] sm:$0xff] }
 0x4f6   : > { %v8499_v40 = vpop.xlane.xlu0 %2934  ;;  %v8526_v60 = vpop.eup %6650 }
 0x4f7   : > { %v3251_v61 = vsel %vm1150_vm2, %v8526_v60, 0.0 }
 0x4f8   : > { %v8502_v59 = vpop.xlane.xlu1 %2937 }
 0x4fa   : > { %v8505_v43 = vpop.xlane.xlu0 %2952 }
 0x4fc   : > { %v8508_v25 = vpop.xlane.xlu1 %2955 }
 0x4fe   : > { %v8511_v33 = vpop.xlane.xlu0 %2946 }
 0x500   : > { %v8514_v0 = vpop.xlane.xlu1 %2949 }
 0x502   : > { %v3175_v18 = vpop.xlane.xlu0 %3174 }
 0x503   : > { %6656 = vrcp.f32 %v3175_v18  ;;  %v3018_v18 = vsub.f32 %v9510_v63, %v8472_v30 }
 0x504   : > { %v3178_v31 = vpop.xlane.xlu1 %3177  ;;  %6658 = vpow2.f32 %v3107_v46 }
 0x505   : > { %6660 = vrcp.f32 %v3178_v31  ;;  %v3123_v31 = vmul.f32 1.442695, %v3020_v45 }
 0x506   : > { %v3223_v6 = vpop.xlane.xlu0 %3222 }
 0x507   : > { %6662 = vrcp.f32 %v3223_v6  ;;  %v3119_v6 = vmul.f32 1.442695, %v3018_v18  ;;  %v3021_v18 = vsub.f32 %v8187_v16, %v8478_v5 }
 0x508   : > { %6664 = vpow2.f32 %v3113_v57  ;;  %v3226_v36 = vpop.xlane.xlu1 %3225  ;;  %v8536_v57 = vpop.eup %6652 }
 0x509   : > { %6666 = vrcp.f32 %v3226_v36  ;;  %v8540_v14 = vpop.eup %6654  ;;  %v3023_v36 = vsub.f32 %v9511_v38, %v8474_v35 }
 0x50a   : > { %6668 = vpow2.f32 %v3109_v23  ;;  %v8530_v46 = vpop.xlane.xlu0 %2964  ;;  %v3263_v17 = vsel %vm1150_vm2, %v8540_v14, 0.0 }
 0x50b   : > { %6670 = vpow2.f32 %v3111_v20  ;;  %v3254_v20 = vsel %vm1150_vm2, %v8536_v57, 0.0 }
 0x50c   : > { %v8538_v7 = vpop.xlane.xlu1 %2967  ;;  %3243 = vadd.xlane.f32.xlu1 %v3242_v62  ;;  %6672 = vpow2.f32 %v3115_v51 }
 0x50d   : > { %v6657_v37 = vpop.eup %6656  ;;  %6674 = vpow2.f32 %v3121_v44 }
 0x50e   : > { %3252 = vadd.xlane.f32.xlu0 %v3251_v61  ;;  %v8544_v30 = vpop.xlane.xlu0 %2958  ;;  %v8546_v23 = vpop.eup %6658  ;;  %6676 = vpow2.f32 %v3123_v31  ;;  %v3429_v51 = vmul.f32 %v6657_v37, %v8288_v41  ;;  %v9512_v61 = vld [vmem:[#allocation68_spill] sm:$0xff] }
 0x50f   : > { %v6661_v1 = vpop.eup %6660  ;;  %6678 = vpow2.f32 %v3117_v12  ;;  %v3266_v44 = vsel %vm1150_vm2, %v8546_v23, 0.0  ;;  %v3022_v37 = vsub.f32 %v9512_v61, %v8480_v56  ;;  %v3125_v56 = vmul.f32 1.442695, %v3021_v18 }
 0x510   : > { %v8552_v9 = vpop.xlane.xlu1 %2961  ;;  %3255 = vadd.xlane.f32.xlu1 %v3254_v20  ;;  %v3430_v4 = vmul.f32 %v6661_v1, %v8293_v53  ;;  %6680 = vpow2.f32 %v3119_v6  ;;  %v3129_v53 = vmul.f32 1.442695, %v3023_v36  ;;  %v9513_v1 = vld [vmem:[#allocation66_spill] sm:$0xff]  ;;  %v3025_v61 = vsub.f32 %v8223_v19, %v8488_v8 }
 0x511   : > { %v6663_v45 = vpop.eup %6662  ;;  %v3024_v38 = vsub.f32 %v9513_v1, %v8476_v34  ;;  %v3127_v34 = vmul.f32 1.442695, %v3022_v37 }
 0x512   : > { %v8558_v63 = vpop.eup %6664  ;;  %3264 = vadd.xlane.f32.xlu0 %v3263_v17  ;;  %v3181_v35 = vpop.xlane.xlu0 %3180  ;;  %v3493_v31 = vpack.c.bf16 %v3430_v4, %v3429_v51  ;;  %v8569_v20 = vmul.f32 %v6663_v45, %v8298_v15  ;;  %v9514_v15 = vld [vmem:[#allocation36_spill] sm:$0xff]  ;;  %v9515_v51 = vmov 0.0   ;;  %v9516_v17 = vld [vmem:[#allocation70_spill] sm:$0xff]  ;;  %v3133_v8 = vmul.f32 1.442695, %v3025_v61 }
 0x513   : > { %v6667_v62 = vpop.eup %6666  ;;  %6682 = vrcp.f32 %v3181_v35  ;;  %v3275_v5 = vsel %vm1150_vm2, %v8558_v63, 0.0  ;;  %v3027_v18 = vsub.f32 %v9516_v17, %v8484_v32 }
 0x514   : > { %v8564_v41 = vpop.eup %6668  ;;  %v8572_v12 = vmul.f32 %v6667_v62, %v8303_v2  ;;  %v3235_v16 = vpop.xlane.xlu1 %3234  ;;  %3267 = vadd.xlane.f32.xlu1 %v3266_v44  ;;  %6283 = vmatmul.mubr.msk.bf16.vlgmr.msra.gmra.mrb[64].mxu0 %vm1150_vm2, %v3493_v31  ;;  %v3131_v31 = vmul.f32 1.442695, %v3024_v38  ;;  %v9517_v38 = vld [vmem:[#allocation72_spill] sm:$0xff] }
 0x515   : > { %v8577_v6 = vpop.eup %6670  ;;  %6684 = vrcp.f32 %v3235_v16  ;;  %6293 = vmatpush3.bf16.msra.mxu0 %v9514_v15  ;;  %v3269_v45 = vsel %vm1150_vm2, %v8564_v41, 0.0  ;;  %6294 = vmatprep.mubr.msk.bf16.mxu0 %vm6859_vm1, %v9515_v51  ;;  %v3031_v15 = vsub.f32 %v8236_v58, %v8494_v3 }
 0x516   : > { %3276 = vadd.xlane.f32.xlu0 %v3275_v5  ;;  %v3238_v2 = vpop.xlane.xlu0 %3237  ;;  %6304 = vmatprep.subr.bf16.mxu0 %v9515_v51  ;;  %v8589_v4 = vpop.eup %6672  ;;  %v3272_v62 = vsel %vm1150_vm2, %v8577_v6, 0.0  ;;  %v3137_v5 = vmul.f32 1.442695, %v3027_v18 }
 0x517   : > { %6686 = vrcp.f32 %v3238_v2  ;;  %v8595_v44 = vpop.eup %6674  ;;  %v3278_v32 = vsel %vm1150_vm2, %v8589_v4, 0.0 }
 0x518   : > { %6688 = vpow2.f32 %v3129_v53  ;;  %v3184_v35 = vpop.xlane.xlu1 %3183  ;;  %3270 = vadd.xlane.f32.xlu1 %v3269_v45  ;;  %v8599_v16 = vpop.eup %6676  ;;  %v3026_v53 = vsub.f32 %v8229_v42, %v8492_v52  ;;  %v3287_v19 = vsel %vm1150_vm2, %v8595_v44, 0.0 }
 0x519   : > { %6690 = vrcp.f32 %v3184_v35  ;;  %v8605_v37 = vpop.eup %6678  ;;  %v3029_v35 = vsub.f32 %v8250_v27, %v8499_v40  ;;  %v3290_v61 = vsel %vm1150_vm2, %v8599_v16, 0.0 }
 0x51a   : > { %6692 = vpow2.f32 %v3125_v56  ;;  %3273 = vadd.xlane.f32.xlu0 %v3272_v62  ;;  %v8607_v1 = vpop.eup %6680  ;;  %v3028_v56 = vsub.f32 %v9517_v38, %v8486_v26  ;;  %v3135_v52 = vmul.f32 1.442695, %v3026_v53  ;;  %v3281_v2 = vsel %vm1150_vm2, %v8605_v37, 0.0 }
 0x51b   : > { %6694 = vpow2.f32 %v3127_v34  ;;  %v3284_v26 = vsel %vm1150_vm2, %v8607_v1, 0.0 }
 0x51c   : > { %3279 = vadd.xlane.f32.xlu1 %v3278_v32  ;;  %6696 = vpow2.f32 %v3131_v31  ;;  %v3139_v17 = vmul.f32 1.442695, %v3028_v56  ;;  %v3145_v31 = vmul.f32 1.442695, %v3031_v15  ;;  %v3030_v32 = vsub.f32 %v8257_v13, %v8502_v59 }
 0x51d   : > { %v6683_v42 = vpop.eup %6682  ;;  %6698 = vpow2.f32 %v3137_v5  ;;  %v3032_v13 = vsub.f32 %v8243_v10, %v8496_v49  ;;  %v3035_v59 = vsub.f32 %v8263_v24, %v8505_v43  ;;  %v3033_v10 = vsub.f32 %v8275_v48, %v8511_v33  ;;  %v9518_v49 = vld [vmem:[#allocation38_spill] sm:$0xff] }
 0x51e   : > { %3288 = vadd.xlane.f32.xlu0 %v3287_v19  ;;  %6700 = vpow2.f32 %v3133_v8  ;;  %v3431_v27 = vmul.f32 %v6683_v42, %v8331_v11  ;;  %v3141_v11 = vmul.f32 1.442695, %v3029_v35  ;;  %v3143_v42 = vmul.f32 1.442695, %v3030_v32 }
 0x51f   : > { %v6685_v45 = vpop.eup %6684  ;;  %6702 = vpow2.f32 %v3135_v52 }
 0x520   : > { %3282 = vadd.xlane.f32.xlu1 %v3281_v2  ;;  %v8624_v62 = vmul.f32 %v6685_v45, %v8335_v39  ;;  %6704 = vpow2.f32 %v3139_v17  ;;  %v3147_v2 = vmul.f32 1.442695, %v3032_v13  ;;  %v3153_v45 = vmul.f32 1.442695, %v3035_v59 }
 0x521   : > { %v6687_v34 = vpop.eup %6686  ;;  %6706 = vpow2.f32 %v3145_v31 }
 0x522   : > { %v8619_v18 = vpop.eup %6688  ;;  %v8627_v58 = vmul.f32 %v6687_v34, %v8339_v47  ;;  %3285 = vadd.xlane.f32.xlu0 %v3284_v26  ;;  %6708 = vpow2.f32 %v3141_v11  ;;  %v3034_v34 = vsub.f32 %v8281_v21, %v8514_v0  ;;  %v3149_v26 = vmul.f32 1.442695, %v3033_v10 }
 0x523   : > { %v6691_v3 = vpop.eup %6690  ;;  %v3299_v38 = vsel %vm1150_vm2, %v8619_v18, 0.0  ;;  %6710 = vpow2.f32 %v3143_v42  ;;  %v9521_v42 = vld [vmem:[#allocation76_spill] sm:$0xff] }
 0x524   : > { %v8631_v53 = vpop.eup %6692  ;;  %v3432_v39 = vmul.f32 %v6691_v3, %v8343_v29  ;;  %3291 = vadd.xlane.f32.xlu1 %v3290_v61  ;;  %v8637_v40 = vpop.xlane.xlu0 %2976  ;;  %6712 = vpow2.f32 %v3147_v2  ;;  %v3036_v61 = vsub.f32 %v8269_v50, %v8508_v25  ;;  %v3151_v0 = vmul.f32 1.442695, %v3034_v34  ;;  %v9520_v25 = vld [vmem:[#allocation75_spill] sm:$0xff] }
 0x525   : > { %v8641_v5 = vpop.xlane.xlu1 %2970  ;;  %v8645_v56 = vpop.eup %6694  ;;  %v3293_v19 = vsel %vm1150_vm2, %v8631_v53, 0.0  ;;  %6714 = vpow2.f32 %v3153_v45  ;;  %v3038_v10 = vsub.f32 %v9521_v42, %v8552_v9  ;;  %v3043_v9 = vsub.f32 %v8355_v55, %v8637_v40 }
 0x526   : > { %3300 = vadd.xlane.f32.xlu0 %v3299_v38  ;;  %v3494_v29 = vpack.c.bf16 %v3432_v39, %v3431_v27  ;;  %v8653_v8 = vpop.eup %6696  ;;  %v3296_v24 = vsel %vm1150_vm2, %v8645_v56, 0.0  ;;  %v9519_v27 = vld [vmem:[#allocation73_spill] sm:$0xff]  ;;  %v3155_v50 = vmul.f32 1.442695, %v3036_v61 }
 0x527   : > { %v8667_v43 = vpop.eup %6698  ;;  %v3302_v48 = vsel %vm1150_vm2, %v8653_v8, 0.0  ;;  %v3039_v39 = vsub.f32 %v9519_v27, %v8530_v46  ;;  %v3169_v55 = vmul.f32 1.442695, %v3043_v9 }
 0x528   : > { %3294 = vadd.xlane.f32.xlu1 %v3293_v19  ;;  %6289 = vmatmul.mubr.msk.bf16.vlgmr.msra.gmra.mrb[96].mxu1 %vm1150_vm2, %v3494_v29  ;;  %v8656_v52 = vpop.xlane.xlu0 %2973  ;;  %v8672_v33 = vpop.eup %6700  ;;  %v3311_v31 = vsel %vm1150_vm2, %v8667_v43, 0.0  ;;  %v3037_v29 = vsub.f32 %v9520_v25, %v8544_v30  ;;  %v9522_v30 = vld [vmem:[#allocation74_spill] sm:$0xff] }
 0x529   : > { %6299 = vmatpush3.bf16.msra.mxu1 %v9518_v49  ;;  %v8661_v15 = vpop.xlane.xlu1 %2979  ;;  %6300 = vmatprep.mubr.msk.bf16.mxu1 %vm6859_vm1, %v9515_v51  ;;  %v8676_v17 = vpop.eup %6702  ;;  %v3305_v32 = vsel %vm1150_vm2, %v8672_v33, 0.0  ;;  %v3161_v46 = vmul.f32 1.442695, %v3039_v39  ;;  %v3040_v2 = vsub.f32 %v9522_v30, %v8538_v7  ;;  %v3042_v40 = vsub.f32 %v8366_v28, %v8656_v52 }
 0x52a   : > { %3297 = vadd.xlane.f32.xlu0 %v3296_v24  ;;  %6310 = vmatprep.subr.bf16.mxu1 %v9515_v51  ;;  %v8686_v21 = vpop.eup %6704  ;;  %v3308_v13 = vsel %vm1150_vm2, %v8676_v17, 0.0  ;;  %v3157_v45 = vmul.f32 1.442695, %v3037_v29 }
 0x52b   : > { %v8692_v11 = vpop.eup %6706  ;;  %v3314_v59 = vsel %vm1150_vm2, %v8686_v21, 0.0  ;;  %v3163_v7 = vmul.f32 1.442695, %v3040_v2 }
 0x52c   : > { %3303 = vadd.xlane.f32.xlu1 %v3302_v48  ;;  %v3187_v35 = vpop.xlane.xlu0 %3186  ;;  %v8698_v19 = vpop.eup %6708  ;;  %v3323_v49 = vsel %vm1150_vm2, %v8692_v11, 0.0 }
 0x52d   : > { %v8678_v3 = vpop.xlane.xlu1 %3246  ;;  %6716 = vrcp.f32 %v3187_v35  ;;  %v8704_v24 = vpop.eup %6710  ;;  %v3317_v48 = vsel %vm1150_vm2, %v8698_v19, 0.0 }
 0x52e   : > { %3312 = vadd.xlane.f32.xlu0 %v3311_v31  ;;  %6718 = vpow2.f32 %v3149_v26  ;;  %v8710_v34 = vpop.eup %6712  ;;  %v3159_v26 = vmul.f32 1.442695, %v3038_v10  ;;  %v3320_v31 = vsel %vm1150_vm2, %v8704_v24, 0.0  ;;  %v3167_v10 = vmul.f32 1.442695, %v3042_v40 }
 0x52f   : > { %v8714_v35 = vpop.eup %6714  ;;  %v3326_v27 = vsel %vm1150_vm2, %v8710_v34, 0.0 }
 0x530   : > { %3306 = vadd.xlane.f32.xlu1 %v3305_v32  ;;  %v3041_v32 = vsub.f32 %v8358_v54, %v8641_v5  ;;  %v3335_v54 = vsel %vm1150_vm2, %v8714_v35, 0.0 }
 0x531   : > { %v3190_v38 = vpop.xlane.xlu1 %3189 }
 0x532   : > { %6720 = vrcp.f32 %v3190_v38  ;;  %3309 = vadd.xlane.f32.xlu0 %v3308_v13  ;;  %v9523_v38 = vld [vmem:[#allocation78_spill] sm:$0xff]  ;;  %v3165_v29 = vmul.f32 1.442695, %v3041_v32 }
 0x533   : > { %6722 = vpow2.f32 %v3151_v0 }
 0x534   : > { %3315 = vadd.xlane.f32.xlu1 %v3314_v59  ;;  %6724 = vpow2.f32 %v3155_v50  ;;  %v9524_v50 = vld [vmem:[#allocation81_spill] sm:$0xff] }
 0x535   : > { %6726 = vpow2.f32 %v3161_v46  ;;  %v9525_v59 = vld [vmem:[#allocation77_spill] sm:$0xff] }
 0x536   : > { %3324 = vadd.xlane.f32.xlu0 %v3323_v49  ;;  %6728 = vpow2.f32 %v3157_v45  ;;  %v3044_v46 = vsub.f32 %v9525_v59, %v8661_v15  ;;  %v9526_v15 = vld [vmem:[#allocation37_spill] sm:$0xff] }
 0x537   : > { %v6717_v61 = vpop.eup %6716  ;;  %6730 = vpow2.f32 %v3159_v26  ;;  %v8751_v26 = vpop.xlane.xlu0 %3249 }
 0x538   : > { %3318 = vadd.xlane.f32.xlu1 %v3317_v48  ;;  %v8720_v0 = vpop.eup %6718  ;;  %v3433_v13 = vmul.f32 %v6717_v61, %v9523_v38  ;;  %6732 = vpow2.f32 %v3163_v7  ;;  %v3171_v2 = vmul.f32 1.442695, %v3044_v46 }
 0x539   : > { %v3329_v42 = vsel %vm1150_vm2, %v8720_v0, 0.0  ;;  %6734 = vpow2.f32 %v3169_v55 }
 0x53a   : > { %3321 = vadd.xlane.f32.xlu0 %v3320_v31  ;;  %6736 = vpow2.f32 %v3165_v29 }
 0x53b   : > { %6738 = vpow2.f32 %v3167_v10 }
 0x53c   : > { %v6721_v39 = vpop.eup %6720  ;;  %3327 = vadd.xlane.f32.xlu1 %v3326_v27  ;;  %6740 = vpow2.f32 %v3171_v2 }
 0x53d   : > { %v3434_v25 = vmul.f32 %v6721_v39, %v9524_v50  ;;  %v8730_v5 = vpop.eup %6722  ;;  %v3193_v39 = vpop.xlane.xlu0 %3192 }
 0x53e   : > { %3336 = vadd.xlane.f32.xlu0 %v3335_v54  ;;  %v8736_v52 = vpop.eup %6724  ;;  %v3332_v49 = vsel %vm1150_vm2, %v8730_v5, 0.0  ;;  %6742 = vrcp.f32 %v3193_v39  ;;  %v9528_v39 = vld [vmem:[#allocation84_spill] sm:$0xff] }
 0x53f   : > { %v3495_v28 = vpack.c.bf16 %v3434_v25, %v3433_v13  ;;  %v8741_v30 = vpop.eup %6726  ;;  %v3338_v45 = vsel %vm1150_vm2, %v8736_v52, 0.0 }
 0x540   : > { %3330 = vadd.xlane.f32.xlu1 %v3329_v42  ;;  %v8749_v48 = vpop.eup %6728  ;;  %v3347_v9 = vsel %vm1150_vm2, %v8741_v30, 0.0 }
 0x541   : > { %6295 = vmatmul.mubr.msk.bf16.vlgmr.msra.gmra.mrb[68].mxu0 %vm1150_vm2, %v3495_v28  ;;  %v8755_v31 = vpop.eup %6730  ;;  %v3341_v61 = vsel %vm1150_vm2, %v8749_v48, 0.0 }
 0x542   : > { %6305 = vmatpush3.bf16.msra.mxu0 %v9526_v15  ;;  %3333 = vadd.xlane.f32.xlu0 %v3332_v49  ;;  %v8759_v7 = vpop.eup %6732  ;;  %v3344_v32 = vsel %vm1150_vm2, %v8755_v31, 0.0 }
 0x543   : > { %6306 = vmatprep.mubr.msk.bf16.mxu0 %vm6859_vm1, %v9515_v51  ;;  %6316 = vmatprep.subr.bf16.mxu0 %v9515_v51  ;;  %v8763_v27 = vpop.eup %6734  ;;  %v3350_v55 = vsel %vm1150_vm2, %v8759_v7, 0.0 }
 0x544   : > { %3339 = vadd.xlane.f32.xlu1 %v3338_v45  ;;  %v8767_v40 = vpop.eup %6736  ;;  %v3359_v13 = vsel %vm1150_vm2, %v8763_v27, 0.0 }
 0x545   : > { %v8773_v50 = vpop.eup %6738  ;;  %v3353_v54 = vsel %vm1150_vm2, %v8767_v40, 0.0 }
 0x546   : > { %3348 = vadd.xlane.f32.xlu0 %v3347_v9  ;;  %v8779_v29 = vpop.eup %6740  ;;  %v3356_v46 = vsel %vm1150_vm2, %v8773_v50, 0.0 }
 0x547   : > { %v3362_v28 = vsel %vm1150_vm2, %v8779_v29, 0.0 }
 0x548   : > { %3342 = vadd.xlane.f32.xlu1 %v3341_v61  ;;  %v6743_v15 = vpop.eup %6742  ;;  %v9527_v61 = vld [vmem:[#allocation82_spill] sm:$0xff] }
 0x54a   : > { %3345 = vadd.xlane.f32.xlu0 %v3344_v32  ;;  %v3435_v32 = vmul.f32 %v6743_v15, %v9527_v61  ;;  %v9532_v61 = vld [vmem:[#allocation88_spill] sm:$0xff] }
 0x54c   : > { %v8769_v38 = vpop.xlane.xlu1 %3258  ;;  %3351 = vadd.xlane.f32.xlu1 %v3350_v55 }
 0x54e   : > { %3360 = vadd.xlane.f32.xlu0 %v3359_v13  ;;  %v8775_v25 = vpop.xlane.xlu0 %3261 }
 0x550   : > { %v3196_v59 = vpop.xlane.xlu1 %3195  ;;  %3354 = vadd.xlane.f32.xlu1 %v3353_v54 }
 0x551   : > { %6744 = vrcp.f32 %v3196_v59 }
 0x552   : > { %3357 = vadd.xlane.f32.xlu0 %v3356_v46  ;;  %v3199_v42 = vpop.xlane.xlu0 %3198 }
 0x553   : > { %6746 = vrcp.f32 %v3199_v42 }
 0x554   : > { %v3202_v10 = vpop.xlane.xlu1 %3201  ;;  %3363 = vadd.xlane.f32.xlu1 %v3362_v28  ;;  %v9529_v28 = vld [vmem:[#allocation86_spill] sm:$0xff] }
 0x555   : > { %6748 = vrcp.f32 %v3202_v10 }
 0x556   : > { %v3205_v49 = vpop.xlane.xlu0 %3204 }
 0x557   : > { %6750 = vrcp.f32 %v3205_v49  ;;  %v9530_v49 = vld [vmem:[#allocation87_spill] sm:$0xff] }
 0x558   : > { %v3208_v2 = vpop.xlane.xlu1 %3207 }
 0x559   : > { %6752 = vrcp.f32 %v3208_v2 }
 0x55a   : > { %v3211_v45 = vpop.xlane.xlu0 %3210 }
 0x55b   : > { %v6745_v9 = vpop.eup %6744  ;;  %6754 = vrcp.f32 %v3211_v45  ;;  %v9531_v45 = vld [vmem:[#allocation39_spill] sm:$0xff] }
 0x55c   : > { %v3436_v55 = vmul.f32 %v6745_v9, %v9528_v39  ;;  %v3214_v13 = vpop.xlane.xlu1 %3213  ;;  %v9533_v39 = vld [vmem:[#allocation89_spill] sm:$0xff] }
 0x55d   : > { %v6747_v54 = vpop.eup %6746  ;;  %6756 = vrcp.f32 %v3214_v13 }
 0x55e   : > { %v3217_v59 = vpop.xlane.xlu0 %3216  ;;  %v3496_v46 = vpack.c.bf16 %v3436_v55, %v3435_v32  ;;  %v3437_v10 = vmul.f32 %v6747_v54, %v9529_v28  ;;  %v9536_v28 = vld [vmem:[#allocation90_spill] sm:$0xff] }
 0x55f   : > { %v6749_v42 = vpop.eup %6748  ;;  %6758 = vrcp.f32 %v3217_v59 }
 0x560   : > { %v3438_v47 = vmul.f32 %v6749_v42, %v9530_v49  ;;  %v3220_v36 = vpop.xlane.xlu1 %3219  ;;  %6301 = vmatmul.mubr.msk.bf16.vlgmr.msra.gmra.mrb[100].mxu1 %vm1150_vm2, %v3496_v46  ;;  %v9535_v46 = vld [vmem:[#allocation34_spill] sm:$0xff]  ;;  %v9537_v49 = vld [vmem:[#allocation91_spill] sm:$0xff] }
 0x561   : > { %v6751_v2 = vpop.eup %6750  ;;  %6760 = vrcp.f32 %v3220_v36  ;;  %6311 = vmatpush3.bf16.msra.mxu1 %v9531_v45  ;;  %6312 = vmatprep.mubr.msk.bf16.mxu1 %vm6859_vm1, %v9515_v51  ;;  %v9534_v36 = vld [vmem:[#allocation41_spill] sm:$0xff]  ;;  %v9538_v45 = vld [vmem:[#allocation35_spill] sm:$0xff] }
 0x562   : > { %v3497_v15 = vpack.c.bf16 %v3438_v47, %v3437_v10  ;;  %6322 = vmatprep.subr.bf16.mxu1 %v9515_v51  ;;  %v3439_v32 = vmul.f32 %v6751_v2, %v9532_v61  ;;  %v3229_v13 = vpop.xlane.xlu0 %3228 }
 0x563   : > { %v6753_v9 = vpop.eup %6752 }
 0x564   : > { %v3440_v55 = vmul.f32 %v6753_v9, %v9533_v39  ;;  %v3232_v54 = vpop.xlane.xlu1 %3231  ;;  %6307 = vmatmul.mubr.msk.bf16.vlgmr.msra.gmra.mrb[72].mxu0 %vm1150_vm2, %v3497_v15  ;;  %v9539_v9 = vld [vmem:[#allocation40_spill] sm:$0xff] }
 0x565   : > { %v6755_v59 = vpop.eup %6754  ;;  %6762 = vrcp.f32 %v3232_v54  ;;  %6317 = vmatpush3.bf16.msra.mxu0 %v9534_v36  ;;  %4982 = vrot.lane.b32.xlu1 %v9535_v46, %s6862_s18  ;;  %v9540_v39 = vld [vmem:[#allocation92_spill] sm:$0xff] }
 0x566   : > { %v3498_v42 = vpack.c.bf16 %v3440_v55, %v3439_v32  ;;  %6318 = vmatprep.mubr.msk.bf16.mxu0 %vm6859_vm1, %v9515_v51  ;;  %6328 = vmatprep.subr.bf16.mxu0 %v9515_v51  ;;  %6764 = vrcp.f32 %v3229_v13  ;;  %v3441_v10 = vmul.f32 %v6755_v59, %v9536_v28  ;;  %v9541_v13 = vld [vmem:[#allocation93_spill] sm:$0xff]  ;;  %v9542_v59 = vld [vmem:[#allocation43_spill] sm:$0xff] }
 0x567   : > { %v6757_v47 = vpop.eup %6756  ;;  %6766 = vrcp.f32 %v8751_v26  ;;  %v9544_v28 = vld [vmem:[#allocation95_spill] sm:$0xff] }
 0x568   : > { %v3442_v2 = vmul.f32 %v6757_v47, %v9537_v49  ;;  %4935 = vrot.lane.b32.xlu0 %v9538_v45, %s6862_s18  ;;  %6313 = vmatmul.mubr.msk.bf16.vlgmr.msra.gmra.mrb[104].mxu1 %vm1150_vm2, %v3498_v42  ;;  %v9543_v47 = vld [vmem:[#allocation42_spill] sm:$0xff]  ;;  %6768 = vrcp.f32 %v8678_v3  ;;  %v9546_v45 = vpack.c.bf16 %v8572_v12, %v8569_v20  ;;  %v9548_v3 = vld [vmem:[#allocation44_spill] sm:$0xff]  ;;  %v9549_v12 = vpack.c.bf16 %v8627_v58, %v8624_v62  ;;  %v9553_v62 = vld [vmem:[#allocation49_spill] sm:$0xff] }
 0x569   : > { %v6759_v15 = vpop.eup %6758  ;;  %6323 = vmatpush3.bf16.msra.mxu1 %v9539_v9  ;;  %6324 = vmatprep.mubr.msk.bf16.mxu1 %vm6859_vm1, %v9515_v51  ;;  %v9545_v49 = vld [vmem:[#allocation94_spill] sm:$0xff]  ;;  %6770 = vrcp.f32 %v8775_v25  ;;  %v9551_v25 = vld [vmem:[#allocation80_spill] sm:$0xff]  ;;  %v9554_v58 = vld [vmem:[#allocation85_spill] sm:$0xff] }
 0x56a   : > { %v3499_v61 = vpack.c.bf16 %v3442_v2, %v3441_v10  ;;  %6334 = vmatprep.subr.bf16.mxu1 %v9515_v51  ;;  %v3443_v55 = vmul.f32 %v6759_v15, %v9540_v39  ;;  %v9547_v15 = vld [vmem:[#allocation45_spill] sm:$0xff]  ;;  %6772 = vrcp.f32 %v8769_v38  ;;  %v9552_v39 = vld [vmem:[#allocation79_spill] sm:$0xff] }
 0x56b   : > { %v6761_v32 = vpop.eup %6760 }
 0x56c   : > { %v3444_v54 = vmul.f32 %v6761_v32, %v9541_v13  ;;  %6319 = vmatmul.mubr.msk.bf16.vlgmr.msra.gmra.mrb[76].mxu0 %vm1150_vm2, %v3499_v61  ;;  %v9550_v61 = vld [vmem:[#allocation47_spill] sm:$0xff] }
 0x56d   : > { %6329 = vmatpush3.bf16.msra.mxu0 %v9542_v59  ;;  %6330 = vmatprep.mubr.msk.bf16.mxu0 %vm6859_vm1, %v9515_v51 }
 0x56e   : > { %v3500_v36 = vpack.c.bf16 %v3444_v54, %v3443_v55  ;;  %6340 = vmatprep.subr.bf16.mxu0 %v9515_v51 }
 0x56f   : > { %v6763_v46 = vpop.eup %6762 }
 0x570   : > { %6325 = vmatmul.mubr.msk.bf16.vlgmr.msra.gmra.mrb[108].mxu1 %vm1150_vm2, %v3500_v36  ;;  %v6765_v42 = vpop.eup %6764  ;;  %v3448_v10 = vmul.f32 %v6763_v46, %v9544_v28  ;;  %v9555_v36 = vld [vmem:[#allocation83_spill] sm:$0xff]  ;;  %v3241_v28 = vpop.xlane.xlu0 %3240 }
 0x571   : > { %6335 = vmatpush3.bf16.msra.mxu1 %v9543_v47  ;;  %6336 = vmatprep.mubr.msk.bf16.mxu1 %vm6859_vm1, %v9515_v51  ;;  %v3447_v2 = vmul.f32 %v6765_v42, %v9545_v49  ;;  %v6767_v20 = vpop.eup %6766  ;;  %v9556_v47 = vld [vmem:[#allocation52_spill] sm:$0xff]  ;;  %6774 = vrcp.f32 %v3241_v28 }
 0x572   : > { %6346 = vmatprep.subr.bf16.mxu1 %v9515_v51  ;;  %v6769_v9 = vpop.eup %6768  ;;  %v3454_v32 = vmul.f32 %v6767_v20, %v9551_v25 }
 0x573   : > { %v3502_v26 = vpack.c.bf16 %v3448_v10, %v3447_v2  ;;  %v3453_v55 = vmul.f32 %v6769_v9, %v9552_v39  ;;  %v6771_v54 = vpop.eup %6770  ;;  %v8865_v10 = vpop.permute.xlu1 %4888 }
 0x574   : > { %6331 = vmatmul.mubr.msk.bf16.vlgmr.msra.gmra.mrb[80].mxu0 %vm1150_vm2, %v9546_v45  ;;  %v6773_v38 = vpop.eup %6772  ;;  %v3458_v59 = vmul.f32 %v6771_v54, %v9554_v58  ;;  %v8867_v49 = vpop.permute.xlu0 %4841  ;;  %v9558_v58 = vld [vmem:[#allocation46_spill] sm:$0xff] }
 0x575   : > { %6341 = vmatpush3.bf16.msra.mxu0 %v9547_v15  ;;  %6342 = vmatprep.mubr.msk.bf16.mxu0 %vm6859_vm1, %v9515_v51  ;;  %v3505_v13 = vpack.c.bf16 %v3454_v32, %v3453_v55  ;;  %v3457_v46 = vmul.f32 %v6773_v38, %v9555_v36 }
 0x576   : > { %6352 = vmatprep.subr.bf16.mxu0 %v9515_v51 }
 0x577   : > { %v3507_v42 = vpack.c.bf16 %v3458_v59, %v3457_v46 }
 0x578   : > { %6337 = vmatmul.mubr.msk.bf16.vlgmr.msra.gmra.mrb[112].mxu1 %vm1150_vm2, %v3502_v26 }
 0x579   : > { %6347 = vmatpush3.bf16.msra.mxu1 %v9548_v3  ;;  %6348 = vmatprep.mubr.msk.bf16.mxu1 %vm6859_vm1, %v9515_v51 }
 0x57a   : > { %6358 = vmatprep.subr.bf16.mxu1 %v9515_v51 }
 0x57b   : > { %v6775_v20 = vpop.eup %6774 }
 0x57c   : > { %6343 = vmatmul.mubr.msk.bf16.vlgmr.msra.gmra.mrb[84].mxu0 %vm1150_vm2, %v9549_v12 }
 0x57d   : > { %6353 = vmatpush3.bf16.msra.mxu0 %v9550_v61  ;;  %6354 = vmatprep.mubr.msk.bf16.mxu0 %vm6859_vm1, %v9515_v51  ;;  %v9557_v61 = vld [vmem:[#allocation96_spill] sm:$0xff] }
 0x57e   : > { %6364 = vmatprep.subr.bf16.mxu0 %v9515_v51  ;;  %v3451_v25 = vmul.f32 %v6775_v20, %v9557_v61 }
 0x584   : > { %6355 = vmatmul.mubr.msk.bf16.vlgmr.msra.gmra.mrb[88].mxu0 %vm1150_vm2, %v3505_v13 }
 0x585   : > { %6365 = vmatpush3.bf16.msra.mxu0 %v9553_v62  ;;  %6366 = vmatprep.mubr.msk.bf16.mxu0 %vm6859_vm1, %v9515_v51 }
 0x586   : > { %6376 = vmatprep.subr.bf16.mxu0 %v9515_v51 }
 0x58c   : > { %6367 = vmatmul.mubr.msk.bf16.vlgmr.msra.gmra.mrb[92].mxu0 %vm1150_vm2, %v3507_v42 }
 0x58d   : > { %6377 = vmatpush3.bf16.msra.mxu0 %v9556_v47  ;;  %6378 = vmatprep.mubr.msk.bf16.mxu0 %vm6859_vm1, %v9515_v51 }
 0x58e   : > { %6388 = vmatprep.subr.bf16.mxu0 %v9515_v51 }
 0x599   : > { %v3244_v2 = vpop.xlane.xlu1 %3243 }
 0x59a   : > { %6776 = vrcp.f32 %v3244_v2 }
 0x59b   : > { %v3253_v45 = vpop.xlane.xlu0 %3252 }
 0x59d   : > { %v3256_v15 = vpop.xlane.xlu1 %3255 }
 0x59e   : > { %6778 = vrcp.f32 %v3256_v15 }
 0x59f   : > { %v3265_v26 = vpop.xlane.xlu0 %3264  ;;  %6780 = vrcp.f32 %v3253_v45 }
 0x5a1   : > { %v3268_v3 = vpop.xlane.xlu1 %3267 }
 0x5a2   : > { %6782 = vrcp.f32 %v3268_v3 }
 0x5a3   : > { %v3277_v12 = vpop.xlane.xlu0 %3276 }
 0x5a4   : > { %v6777_v9 = vpop.eup %6776 }
 0x5a5   : > { %v3452_v32 = vmul.f32 %v6777_v9, %v8520_v22  ;;  %v3271_v39 = vpop.xlane.xlu1 %3270 }
 0x5a6   : > { %6784 = vrcp.f32 %v3271_v39 }
 0x5a7   : > { %6786 = vrcp.f32 %v3265_v26  ;;  %v3274_v55 = vpop.xlane.xlu0 %3273  ;;  %v3504_v13 = vpack.c.bf16 %v3452_v32, %v3451_v25 }
 0x5a8   : > { %v6779_v54 = vpop.eup %6778  ;;  %6788 = vrcp.f32 %v3274_v55 }
 0x5a9   : > { %v3280_v38 = vpop.xlane.xlu1 %3279  ;;  %6349 = vmatmul.mubr.msk.bf16.vlgmr.msra.gmra.mrb[116].mxu1 %vm1150_vm2, %v3504_v13  ;;  %v6781_v62 = vpop.eup %6780  ;;  %v3456_v59 = vmul.f32 %v6779_v54, %v8536_v57  ;;  %v9559_v57 = vld [vmem:[#allocation48_spill] sm:$0xff]  ;;  %v9560_v13 = vld [vmem:[#allocation55_spill] sm:$0xff]  ;;  %v9561_v54 = vld [vmem:[#allocation50_spill] sm:$0xff] }
 0x5aa   : > { %6359 = vmatpush3.bf16.msra.mxu1 %v9558_v58  ;;  %6360 = vmatprep.mubr.msk.bf16.mxu1 %vm6859_vm1, %v9515_v51  ;;  %v3455_v36 = vmul.f32 %v6781_v62, %v8526_v60  ;;  %6790 = vrcp.f32 %v3280_v38 }
 0x5ab   : > { %v3289_v22 = vpop.xlane.xlu0 %3288  ;;  %6370 = vmatprep.subr.bf16.mxu1 %v9515_v51 }
 0x5ac   : > { %v6783_v42 = vpop.eup %6782  ;;  %v3506_v28 = vpack.c.bf16 %v3456_v59, %v3455_v36 }
 0x5ad   : > { %v3283_v46 = vpop.xlane.xlu1 %3282  ;;  %v3460_v60 = vmul.f32 %v6783_v42, %v8546_v23 }
 0x5ae   : > { %6792 = vrcp.f32 %v3283_v46 }
 0x5af   : > { %6794 = vrcp.f32 %v3277_v12  ;;  %v3286_v47 = vpop.xlane.xlu0 %3285 }
 0x5b0   : > { %v6785_v2 = vpop.eup %6784  ;;  %6796 = vrcp.f32 %v3286_v47 }
 0x5b1   : > { %v6787_v45 = vpop.eup %6786  ;;  %v3292_v15 = vpop.xlane.xlu1 %3291  ;;  %6361 = vmatmul.mubr.msk.bf16.vlgmr.msra.gmra.mrb[120].mxu1 %vm1150_vm2, %v3506_v28  ;;  %v3461_v3 = vmul.f32 %v6785_v2, %v8564_v41  ;;  %v9562_v2 = vld [vmem:[#allocation60_spill] sm:$0xff] }
 0x5b2   : > { %v6789_v26 = vpop.eup %6788  ;;  %6371 = vmatpush3.bf16.msra.mxu1 %v9559_v57  ;;  %6372 = vmatprep.mubr.msk.bf16.mxu1 %vm6859_vm1, %v9515_v51  ;;  %v3459_v9 = vmul.f32 %v6787_v45, %v8540_v14  ;;  %6798 = vrcp.f32 %v3292_v15  ;;  %v9563_v45 = vld [vmem:[#allocation51_spill] sm:$0xff] }
 0x5b3   : > { %v3462_v20 = vmul.f32 %v6789_v26, %v8577_v6  ;;  %v3301_v12 = vpop.xlane.xlu0 %3300  ;;  %6382 = vmatprep.subr.bf16.mxu1 %v9515_v51 }
 0x5b4   : > { %v6791_v32 = vpop.eup %6790  ;;  %v3508_v55 = vpack.c.bf16 %v3460_v60, %v3459_v9 }
 0x5b5   : > { %v3295_v61 = vpop.xlane.xlu1 %3294  ;;  %v3509_v25 = vpack.c.bf16 %v3462_v20, %v3461_v3  ;;  %v3464_v38 = vmul.f32 %v6791_v32, %v8589_v4  ;;  %v9564_v32 = vld [vmem:[#allocation69_spill] sm:$0xff] }
 0x5b6   : > { %6800 = vrcp.f32 %v3295_v61 }
 0x5b7   : > { %6802 = vrcp.f32 %v3289_v22  ;;  %6379 = vmatmul.mubr.msk.bf16.vlgmr.msra.gmra.mrb[96].mxu0 %vm1150_vm2, %v3509_v25  ;;  %v3298_v39 = vpop.xlane.xlu0 %3297 }
 0x5b8   : > { %v6793_v23 = vpop.eup %6792  ;;  %6389 = vmatpush3.bf16.msra.mxu0 %v9560_v13  ;;  %6804 = vrcp.f32 %v3298_v39  ;;  %6390 = vmatprep.mubr.msk.bf16.mxu0 %vm6859_vm1, %v9515_v51  ;;  %v9565_v39 = vld [vmem:[#allocation53_spill] sm:$0xff] }
 0x5b9   : > { %v6795_v41 = vpop.eup %6794  ;;  %v3304_v6 = vpop.xlane.xlu1 %3303  ;;  %6373 = vmatmul.mubr.msk.bf16.vlgmr.msra.gmra.mrb[124].mxu1 %vm1150_vm2, %v3508_v55  ;;  %6400 = vmatprep.subr.bf16.mxu0 %v9515_v51  ;;  %v3465_v62 = vmul.f32 %v6793_v23, %v8605_v37 }
 0x5ba   : > { %v6797_v14 = vpop.eup %6796  ;;  %6383 = vmatpush3.bf16.msra.mxu1 %v9561_v54  ;;  %6384 = vmatprep.mubr.msk.bf16.mxu1 %vm6859_vm1, %v9515_v51  ;;  %v3463_v22 = vmul.f32 %v6795_v41, %v8558_v63  ;;  %6806 = vrcp.f32 %v3304_v6 }
 0x5bb   : > { %v3466_v58 = vmul.f32 %v6797_v14, %v8607_v1  ;;  %v3313_v59 = vpop.xlane.xlu0 %3312  ;;  %6394 = vmatprep.subr.bf16.mxu1 %v9515_v51 }
 0x5bc   : > { %v6799_v42 = vpop.eup %6798  ;;  %v3510_v28 = vpack.c.bf16 %v3464_v38, %v3463_v22  ;;  %v9567_v22 = vld [vmem:[#allocation56_spill] sm:$0xff] }
 0x5bd   : > { %v3307_v36 = vpop.xlane.xlu1 %3306  ;;  %v3511_v46 = vpack.c.bf16 %v3466_v58, %v3465_v62  ;;  %v3468_v15 = vmul.f32 %v6799_v42, %v8599_v16 }
 0x5be   : > { %6808 = vrcp.f32 %v3307_v36 }
 0x5bf   : > { %6810 = vrcp.f32 %v3301_v12  ;;  %6391 = vmatmul.mubr.msk.bf16.vlgmr.msra.gmra.mrb[100].mxu0 %vm1150_vm2, %v3511_v46  ;;  %v3310_v47 = vpop.xlane.xlu0 %3309 }
 0x5c0   : > { %v6801_v4 = vpop.eup %6800  ;;  %6401 = vmatpush3.bf16.msra.mxu0 %v9562_v2  ;;  %6812 = vrcp.f32 %v3310_v47  ;;  %6402 = vmatprep.mubr.msk.bf16.mxu0 %vm6859_vm1, %v9515_v51 }
 0x5c1   : > { %v6803_v37 = vpop.eup %6802  ;;  %v3316_v1 = vpop.xlane.xlu1 %3315  ;;  %6385 = vmatmul.mubr.msk.bf16.vlgmr.msra.gmra.mrb[128].mxu1 %vm1150_vm2, %v3510_v28  ;;  %6412 = vmatprep.subr.bf16.mxu0 %v9515_v51  ;;  %v3469_v26 = vmul.f32 %v6801_v4, %v8631_v53 }
 0x5c2   : > { %v6805_v63 = vpop.eup %6804  ;;  %6395 = vmatpush3.bf16.msra.mxu1 %v9563_v45  ;;  %6396 = vmatprep.mubr.msk.bf16.mxu1 %vm6859_vm1, %v9515_v51  ;;  %v3467_v3 = vmul.f32 %v6803_v37, %v8595_v44  ;;  %6814 = vrcp.f32 %v3316_v1  ;;  %v9568_v45 = vld [vmem:[#allocation67_spill] sm:$0xff] }
 0x5c3   : > { %v3470_v57 = vmul.f32 %v6805_v63, %v8645_v56  ;;  %v3325_v60 = vpop.xlane.xlu0 %3324  ;;  %6406 = vmatprep.subr.bf16.mxu1 %v9515_v51 }
 0x5c4   : > { %v6807_v9 = vpop.eup %6806  ;;  %v3512_v25 = vpack.c.bf16 %v3468_v15, %v3467_v3  ;;  %v9569_v15 = vld [vmem:[#allocation62_spill] sm:$0xff] }
 0x5c5   : > { %v3319_v20 = vpop.xlane.xlu1 %3318  ;;  %v3513_v12 = vpack.c.bf16 %v3470_v57, %v3469_v26  ;;  %v3472_v55 = vmul.f32 %v6807_v9, %v8653_v8 }
 0x5c6   : > { %6816 = vrcp.f32 %v3319_v20 }
 0x5c7   : > { %6818 = vrcp.f32 %v3313_v59  ;;  %6403 = vmatmul.mubr.msk.bf16.vlgmr.msra.gmra.mrb[104].mxu0 %vm1150_vm2, %v3513_v12  ;;  %v3322_v61 = vpop.xlane.xlu0 %3321  ;;  %v9566_v59 = vld [vmem:[#allocation65_spill] sm:$0xff] }
 0x5c8   : > { %v6809_v16 = vpop.eup %6808  ;;  %6413 = vmatpush3.bf16.msra.mxu0 %v9564_v32  ;;  %6820 = vrcp.f32 %v3322_v61  ;;  %6414 = vmatprep.mubr.msk.bf16.mxu0 %vm6859_vm1, %v9515_v51 }
 0x5c9   : > { %v6811_v53 = vpop.eup %6810  ;;  %v3328_v56 = vpop.xlane.xlu1 %3327  ;;  %6397 = vmatmul.mubr.msk.bf16.vlgmr.msra.gmra.mrb[132].mxu1 %vm1150_vm2, %v3512_v25  ;;  %6424 = vmatprep.subr.bf16.mxu0 %v9515_v51  ;;  %v3473_v23 = vmul.f32 %v6809_v16, %v8672_v33 }
 0x5ca   : > { %v6813_v44 = vpop.eup %6812  ;;  %6407 = vmatpush3.bf16.msra.mxu1 %v9565_v39  ;;  %6408 = vmatprep.mubr.msk.bf16.mxu1 %vm6859_vm1, %v9515_v51  ;;  %v3471_v6 = vmul.f32 %v6811_v53, %v8619_v18  ;;  %6822 = vrcp.f32 %v3328_v56 }
 0x5cb   : > { %v3474_v13 = vmul.f32 %v6813_v44, %v8676_v17  ;;  %v3337_v41 = vpop.xlane.xlu0 %3336  ;;  %6418 = vmatprep.subr.bf16.mxu1 %v9515_v51 }
 0x5cc   : > { %v6815_v38 = vpop.eup %6814  ;;  %v3514_v58 = vpack.c.bf16 %v3472_v55, %v3471_v6 }
 0x5cd   : > { %v3331_v14 = vpop.xlane.xlu1 %3330  ;;  %v3515_v54 = vpack.c.bf16 %v3474_v13, %v3473_v23  ;;  %v3476_v36 = vmul.f32 %v6815_v38, %v8686_v21 }
 0x5ce   : > { %6824 = vrcp.f32 %v3331_v14 }
 0x5cf   : > { %6826 = vrcp.f32 %v3325_v60  ;;  %6415 = vmatmul.mubr.msk.bf16.vlgmr.msra.gmra.mrb[108].mxu0 %vm1150_vm2, %v3515_v54  ;;  %v3334_v62 = vpop.xlane.xlu0 %3333 }
 0x5d0   : > { %v6817_v8 = vpop.eup %6816  ;;  %6425 = vmatpush3.bf16.msra.mxu0 %v9566_v59  ;;  %6828 = vrcp.f32 %v3334_v62  ;;  %6426 = vmatprep.mubr.msk.bf16.mxu0 %vm6859_vm1, %v9515_v51 }
 0x5d1   : > { %v6819_v33 = vpop.eup %6818  ;;  %v3340_v17 = vpop.xlane.xlu1 %3339  ;;  %6409 = vmatmul.mubr.msk.bf16.vlgmr.msra.gmra.mrb[136].mxu1 %vm1150_vm2, %v3514_v58  ;;  %6436 = vmatprep.subr.bf16.mxu0 %v9515_v51  ;;  %v3477_v46 = vmul.f32 %v6817_v8, %v8698_v19 }
 0x5d2   : > { %v6821_v18 = vpop.eup %6820  ;;  %6419 = vmatpush3.bf16.msra.mxu1 %v9567_v22  ;;  %6420 = vmatprep.mubr.msk.bf16.mxu1 %vm6859_vm1, %v9515_v51  ;;  %v3475_v28 = vmul.f32 %v6819_v33, %v8667_v43  ;;  %6830 = vrcp.f32 %v3340_v17 }
 0x5d3   : > { %v3478_v42 = vmul.f32 %v6821_v18, %v8704_v24  ;;  %v3349_v47 = vpop.xlane.xlu0 %3348  ;;  %6430 = vmatprep.subr.bf16.mxu1 %v9515_v51 }
 0x5d4   : > { %v6823_v37 = vpop.eup %6822  ;;  %v3516_v63 = vpack.c.bf16 %v3476_v36, %v3475_v28 }
 0x5d5   : > { %v3343_v4 = vpop.xlane.xlu1 %3342  ;;  %v3517_v2 = vpack.c.bf16 %v3478_v42, %v3477_v46  ;;  %v3480_v26 = vmul.f32 %v6823_v37, %v8710_v34 }
 0x5d6   : > { %6832 = vrcp.f32 %v3343_v4 }
 0x5d7   : > { %6834 = vrcp.f32 %v3337_v41  ;;  %6427 = vmatmul.mubr.msk.bf16.vlgmr.msra.gmra.mrb[112].mxu0 %vm1150_vm2, %v3517_v2  ;;  %v3346_v1 = vpop.xlane.xlu0 %3345 }
 0x5d8   : > { %v6825_v21 = vpop.eup %6824  ;;  %6437 = vmatpush3.bf16.msra.mxu0 %v9568_v45  ;;  %6836 = vrcp.f32 %v3346_v1  ;;  %6438 = vmatprep.mubr.msk.bf16.mxu0 %vm6859_vm1, %v9515_v51 }
 0x5d9   : > { %v6827_v19 = vpop.eup %6826  ;;  %v3352_v24 = vpop.xlane.xlu1 %3351  ;;  %6421 = vmatmul.mubr.msk.bf16.vlgmr.msra.gmra.mrb[140].mxu1 %vm1150_vm2, %v3516_v63  ;;  %6448 = vmatprep.subr.bf16.mxu0 %v9515_v51  ;;  %v3481_v57 = vmul.f32 %v6825_v21, %v8720_v0 }
 0x5da   : > { %v6829_v43 = vpop.eup %6828  ;;  %6431 = vmatpush3.bf16.msra.mxu1 %v9569_v15  ;;  %6432 = vmatprep.mubr.msk.bf16.mxu1 %vm6859_vm1, %v9515_v51  ;;  %v3479_v20 = vmul.f32 %v6827_v19, %v8692_v11  ;;  %6838 = vrcp.f32 %v3352_v24 }
 0x5db   : > { %v3482_v60 = vmul.f32 %v6829_v43, %v8730_v5  ;;  %v3361_v3 = vpop.xlane.xlu0 %3360  ;;  %6442 = vmatprep.subr.bf16.mxu1 %v9515_v51  ;;  %v9570_v5 = vld [vmem:[#allocation71_spill] sm:$0xff] }
 0x5dc   : > { %v6831_v61 = vpop.eup %6830  ;;  %v3518_v16 = vpack.c.bf16 %v3480_v26, %v3479_v20 }
 0x5dd   : > { %v3355_v12 = vpop.xlane.xlu1 %3354  ;;  %v3519_v9 = vpack.c.bf16 %v3482_v60, %v3481_v57  ;;  %v3484_v32 = vmul.f32 %v6831_v61, %v8736_v52 }
 0x5de   : > { %6840 = vrcp.f32 %v3355_v12 }
 0x5df   : > { %6842 = vrcp.f32 %v3349_v47  ;;  %6439 = vmatmul.mubr.msk.bf16.vlgmr.msra.gmra.mrb[116].mxu0 %vm1150_vm2, %v3519_v9  ;;  %v3358_v25 = vpop.xlane.xlu0 %3357 }
 0x5e0   : > { %v6833_v34 = vpop.eup %6832  ;;  %6449 = vmatpush3.bf16.msra.mxu0 %v8867_v49  ;;  %6844 = vrcp.f32 %v3358_v25  ;;  %6450 = vmatprep.mubr.msk.bf16.mxu0 %vm6859_vm1, %v9515_v51 }
 0x5e1   : > { %v6835_v0 = vpop.eup %6834  ;;  %6433 = vmatmul.mubr.msk.bf16.vlgmr.msra.gmra.mrb[144].mxu1 %vm1150_vm2, %v3518_v16  ;;  %6460 = vmatprep.subr.bf16.mxu0 %v9515_v51  ;;  %v3485_v53 = vmul.f32 %v6833_v34, %v8749_v48  ;;  %v3364_v56 = vpop.xlane.xlu1 %3363 }
 0x5e2   : > { %v6837_v11 = vpop.eup %6836  ;;  %6443 = vmatpush3.bf16.msra.mxu1 %v9570_v5  ;;  %6444 = vmatprep.mubr.msk.bf16.mxu1 %vm6859_vm1, %v9515_v51  ;;  %v3483_v44 = vmul.f32 %v6835_v0, %v8714_v35  ;;  %6846 = vrcp.f32 %v3364_v56 }
 0x5e3   : > { %v3486_v49 = vmul.f32 %v6837_v11, %v8755_v31  ;;  %6454 = vmatprep.subr.bf16.mxu1 %v9515_v51  ;;  %v4936_v23 = vpop.permute.xlu0 %4935  ;;  %6848 = vrcp.f32 %v3361_v3 }
 0x5e4   : > { %v6839_v55 = vpop.eup %6838  ;;  %v3520_v13 = vpack.c.bf16 %v3484_v32, %v3483_v44 }
 0x5e5   : > { %v3521_v39 = vpack.c.bf16 %v3486_v49, %v3485_v53  ;;  %v3488_v14 = vmul.f32 %v6839_v55, %v8759_v7  ;;  %v4983_v17 = vpop.permute.xlu1 %4982 }
 0x5e7   : > { %6451 = vmatmul.mubr.msk.bf16.vlgmr.msra.gmra.mrb[120].mxu0 %vm1150_vm2, %v3521_v39  ;;  %v8972_v6 = vpop.f32.mrb[64].mxu0 }
 0x5e8   : > { %v6841_v41 = vpop.eup %6840  ;;  %6461 = vmatpush3.bf16.msra.mxu0 %v4936_v23  ;;  %6462 = vmatprep.mubr.msk.bf16.mxu0 %vm6859_vm1, %v9515_v51  ;;  %v6284_v48 = vpop.f32.mrb[65].mxu0 }
 0x5e9   : > { %v6843_v52 = vpop.eup %6842  ;;  %6445 = vmatmul.mubr.msk.bf16.vlgmr.msra.gmra.mrb[148].mxu1 %vm1150_vm2, %v3520_v13  ;;  %v8977_v31 = vpop.f32.mrb[66].mxu0  ;;  %v3489_v54 = vmul.f32 %v6841_v41, %v8767_v40 }
 0x5ea   : > { %v6845_v35 = vpop.eup %6844  ;;  %6455 = vmatpush3.bf16.msra.mxu1 %v8865_v10  ;;  %6456 = vmatprep.mubr.msk.bf16.mxu1 %vm6859_vm1, %v9515_v51  ;;  %v5029_v62 = vpack.c.bf16 %v8977_v31, %v8972_v6  ;;  %v6285_v58 = vpop.f32.mrb[67].mxu0  ;;  %v3487_v8 = vmul.f32 %v6843_v52, %v8741_v30 }
 0x5eb   : > { %v3490_v38 = vmul.f32 %v6845_v35, %v8773_v50  ;;  %6466 = vmatprep.subr.bf16.mxu1 %v9515_v51 }
 0x5ec   : > { %v3522_v10 = vpack.c.bf16 %v3488_v14, %v3487_v8  ;;  %v6847_v33 = vpop.eup %6846 }
 0x5ed   : > { %v3523_v59 = vpack.c.bf16 %v3490_v38, %v3489_v54  ;;  %v6849_v7 = vpop.eup %6848  ;;  %v3492_v40 = vmul.f32 %v6847_v33, %v8779_v29 }
 0x5ee   : > { %v3491_v50 = vmul.f32 %v6849_v7, %v8763_v27 }
 0x5ef   : > { %6463 = vmatmul.mubr.msk.bf16.vlgmr.msra.gmra.mrb[124].mxu0 %vm1150_vm2, %v3523_v59 }
 0x5f0   : > { %v3524_v18 = vpack.c.bf16 %v3492_v40, %v3491_v50 }
 0x5f1   : > { %6457 = vmatmul.mubr.msk.bf16.vlgmr.msra.gmra.mrb[152].mxu1 %vm1150_vm2, %v3522_v10 }
 0x5f2   : > { %6467 = vmatpush3.bf16.msra.mxu1 %v4983_v17  ;;  %6468 = vmatprep.mubr.msk.bf16.mxu1 %vm6859_vm1, %v9515_v51 }
 0x5f9   : > { %6469 = vmatmul.mubr.msk.bf16.vlgmr.msra.gmra.mrb[156].mxu1 %vm1150_vm2, %v3524_v18 }
 0x5fb   : > { %v8996_v30 = vpop.f32.mrb[96].mxu1 }
 0x5fc   : > { %v6290_v22 = vpop.f32.mrb[97].mxu1 }
 0x5fd   : > { %v8998_v36 = vpop.f32.mrb[98].mxu1 }
 0x5fe   : > { %v5030_v46 = vpack.c.bf16 %v8998_v36, %v8996_v30  ;;  %v6291_v42 = vpop.f32.mrb[99].mxu1 }
 0x614   : > { %v9002_v47 = vpop.f32.mrb[68].mxu0 }
 0x615   : > { %v6296_v28 = vpop.f32.mrb[69].mxu0 }
 0x616   : > { %v9004_v51 = vpop.f32.mrb[70].mxu0 }
 0x617   : > { %v5031_v27 = vpack.c.bf16 %v9004_v51, %v9002_v47  ;;  %v6297_v29 = vpop.f32.mrb[71].mxu0 }
 0x633   : > { %v9008_v4 = vpop.f32.mrb[100].mxu1 }
 0x634   : > { %v6302_v2 = vpop.f32.mrb[101].mxu1 }
 0x635   : > { %v9010_v37 = vpop.f32.mrb[102].mxu1  ;;  %v6528_v2 = vld [vmem:[%s9336_s5] sm:$0xff]  }
 0x636   : > { %v5032_v1 = vpack.c.bf16 %v9010_v37, %v9008_v4  ;;  %v6303_v63 = vpop.f32.mrb[103].mxu1  ;;  %6472 = vmatprep.subr.bf16.mxu0 %v6528_v2 }
 0x637   : > { %v9014_v21 = vpop.f32.mrb[72].mxu0  ;;  %v6529_v63 = vld [vmem:[%s9336_s5 + $0x8] sm:$0xff]   ;;  %6473 = vmatpush3.bf16.msra.mxu0 %v6528_v2 }
 0x638   : > { %v6308_v45 = vpop.f32.mrb[73].mxu0  ;;  %6474 = vmatprep.subr.bf16.mxu0 %v6529_v63 }
 0x639   : > { %v9016_v19 = vpop.f32.mrb[74].mxu0 }
 0x63a   : > { %v5033_v24 = vpack.c.bf16 %v9016_v19, %v9014_v21  ;;  %v6309_v43 = vpop.f32.mrb[75].mxu0 }
 0x63b   : > { %v9020_v15 = vpop.f32.mrb[104].mxu1  ;;  %6475 = vmatpush3.bf16.msra.mxu0 %v6529_v63 }
 0x63c   : > { %v6314_v26 = vpop.f32.mrb[105].mxu1 }
 0x63d   : > { %v9022_v57 = vpop.f32.mrb[106].mxu1 }
 0x63e   : > { %v5034_v60 = vpack.c.bf16 %v9022_v57, %v9020_v15  ;;  %v6315_v3 = vpop.f32.mrb[107].mxu1 }
 0x63f   : > { %v9026_v20 = vpop.f32.mrb[76].mxu0 }
 0x640   : > { %v6320_v12 = vpop.f32.mrb[77].mxu0 }
 0x641   : > { %v9028_v9 = vpop.f32.mrb[78].mxu0 }
 0x642   : > { %v5035_v61 = vpack.c.bf16 %v9028_v9, %v9026_v20  ;;  %v6321_v25 = vpop.f32.mrb[79].mxu0 }
 0x643   : > { %v9032_v16 = vpop.f32.mrb[108].mxu1 }
 0x644   : > { %v6326_v34 = vpop.f32.mrb[109].mxu1 }
 0x645   : > { %v9034_v0 = vpop.f32.mrb[110].mxu1 }
 0x646   : > { %v5036_v11 = vpack.c.bf16 %v9034_v0, %v9032_v16  ;;  %v6327_v5 = vpop.f32.mrb[111].mxu1 }
 0x647   : > { %v9038_v32 = vpop.f32.mrb[80].mxu0 }
 0x648   : > { %v6332_v53 = vpop.f32.mrb[81].mxu0 }
 0x649   : > { %v9040_v49 = vpop.f32.mrb[82].mxu0 }
 0x64a   : > { %v5037_v56 = vpack.c.bf16 %v9040_v49, %v9038_v32  ;;  %v6333_v44 = vpop.f32.mrb[83].mxu0 }
 0x64b   : > { %v9044_v39 = vpop.f32.mrb[112].mxu1 }
 0x64c   : > { %v6338_v55 = vpop.f32.mrb[113].mxu1 }
 0x64d   : > { %v9046_v23 = vpop.f32.mrb[114].mxu1 }
 0x64e   : > { %v5038_v13 = vpack.c.bf16 %v9046_v23, %v9044_v39  ;;  %v6339_v41 = vpop.f32.mrb[115].mxu1 }
 0x64f   : > { %v9050_v52 = vpop.f32.mrb[84].mxu0 }
 0x650   : > { %v6344_v48 = vpop.f32.mrb[85].mxu0 }
 0x651   : > { %v9052_v35 = vpop.f32.mrb[86].mxu0 }
 0x652   : > { %v5039_v14 = vpack.c.bf16 %v9052_v35, %v9050_v52  ;;  %v6345_v54 = vpop.f32.mrb[87].mxu0 }
 0x657   : > { %v9056_v38 = vpop.f32.mrb[88].mxu0 }
 0x658   : > { %v6356_v58 = vpop.f32.mrb[89].mxu0 }
 0x659   : > { %v9058_v8 = vpop.f32.mrb[90].mxu0 }
 0x65a   : > { %v5041_v59 = vpack.c.bf16 %v9058_v8, %v9056_v38  ;;  %v6357_v10 = vpop.f32.mrb[91].mxu0 }
 0x65f   : > { %v9062_v33 = vpop.f32.mrb[92].mxu0 }
 0x660   : > { %v6368_v17 = vpop.f32.mrb[93].mxu0 }
 0x661   : > { %v9064_v7 = vpop.f32.mrb[94].mxu0 }
 0x662   : > { %v6369_v50 = vpop.f32.mrb[95].mxu0  ;;  %v9572_v32 = vpack.c.bf16 %v9064_v7, %v9062_v33 }
 0x67c   : > { %v9068_v18 = vpop.f32.mrb[116].mxu1 }
 0x67d   : > { %v6350_v22 = vpop.f32.mrb[117].mxu1 }
 0x67e   : > { %v9070_v42 = vpop.f32.mrb[118].mxu1 }
 0x67f   : > { %v5040_v28 = vpack.c.bf16 %v9070_v42, %v9068_v18  ;;  %v6351_v29 = vpop.f32.mrb[119].mxu1  ;;  %v9575_v42 = vld [vmem:[#allocation2_spill] sm:$0xff] }
 0x684   : > { %v9080_v45 = vpop.f32.mrb[120].mxu1 }
 0x685   : > { %v6362_v43 = vpop.f32.mrb[121].mxu1 }
 0x686   : > { %v9082_v26 = vpop.f32.mrb[122].mxu1 }
 0x687   : > { %v6363_v12 = vpop.f32.mrb[123].mxu1  ;;  %v9571_v0 = vpack.c.bf16 %v9082_v26, %v9080_v45 }
 0x68a   : > { %v4317_v25 = vpop.f32.mrb[96].mxu0 }
 0x68b   : > { %v6380_v34 = vpop.f32.mrb[97].mxu0 }
 0x68c   : > { %v9086_v5 = vpop.f32.mrb[124].mxu1  ;;  %v4320_v53 = vpop.f32.mrb[98].mxu0 }
 0x68d   : > { %v5045_v44 = vpack.c.bf16 %v4320_v53, %v4317_v25  ;;  %v6374_v55 = vpop.f32.mrb[125].mxu1  ;;  %v6381_v41 = vpop.f32.mrb[99].mxu0 }
 0x68e   : > { %v9088_v48 = vpop.f32.mrb[126].mxu1 }
 0x68f   : > { %v6375_v58 = vpop.f32.mrb[127].mxu1  ;;  %5077 = vrot.lane.b32.xlu0 %v5045_v44, %s6863_s30  ;;  %v9573_v39 = vpack.c.bf16 %v9088_v48, %v9086_v5  ;;  %v9576_v5 = vld [vmem:[#allocation5_spill] sm:$0xff] }
 0x692   : > { %v4411_v10 = vpop.f32.mrb[100].mxu0 }
 0x693   : > { %v6392_v17 = vpop.f32.mrb[101].mxu0 }
 0x694   : > { %v4364_v50 = vpop.f32.mrb[128].mxu1  ;;  %v4414_v22 = vpop.f32.mrb[102].mxu0 }
 0x695   : > { %v5047_v29 = vpack.c.bf16 %v4414_v22, %v4411_v10  ;;  %v6386_v2 = vpop.f32.mrb[129].mxu1  ;;  %v6393_v63 = vpop.f32.mrb[103].mxu0 }
 0x696   : > { %v4367_v43 = vpop.f32.mrb[130].mxu1 }
 0x697   : > { %v5046_v12 = vpack.c.bf16 %v4367_v43, %v4364_v50  ;;  %v6387_v25 = vpop.f32.mrb[131].mxu1  ;;  %5081 = vrot.lane.b32.xlu0 %v5047_v29, %s6863_s30 }
 0x699   : > { %5079 = vrot.lane.b32.xlu1 %v5046_v12, %s6863_s30 }
 0x69a   : > { %v4505_v34 = vpop.f32.mrb[104].mxu0 }
 0x69b   : > { %v6404_v53 = vpop.f32.mrb[105].mxu0 }
 0x69c   : > { %v4458_v55 = vpop.f32.mrb[132].mxu1  ;;  %v4508_v41 = vpop.f32.mrb[106].mxu0 }
 0x69d   : > { %v5049_v58 = vpack.c.bf16 %v4508_v41, %v4505_v34  ;;  %v6398_v44 = vpop.f32.mrb[133].mxu1  ;;  %v6405_v54 = vpop.f32.mrb[107].mxu0 }
 0x69e   : > { %v4461_v17 = vpop.f32.mrb[134].mxu1 }
 0x69f   : > { %v5048_v40 = vpack.c.bf16 %v4461_v17, %v4458_v55  ;;  %v6399_v3 = vpop.f32.mrb[135].mxu1  ;;  %5085 = vrot.lane.b32.xlu0 %v5049_v58, %s6863_s30 }
 0x6a1   : > { %5083 = vrot.lane.b32.xlu1 %v5048_v40, %s6863_s30 }
 0x6a2   : > { %v4599_v10 = vpop.f32.mrb[108].mxu0 }
 0x6a3   : > { %v6416_v50 = vpop.f32.mrb[109].mxu0 }
 0x6a4   : > { %v4552_v22 = vpop.f32.mrb[136].mxu1  ;;  %v4602_v29 = vpop.f32.mrb[110].mxu0 }
 0x6a5   : > { %v5051_v2 = vpack.c.bf16 %v4602_v29, %v4599_v10  ;;  %v6410_v63 = vpop.f32.mrb[137].mxu1  ;;  %v6417_v43 = vpop.f32.mrb[111].mxu0 }
 0x6a6   : > { %v4555_v12 = vpop.f32.mrb[138].mxu1 }
 0x6a7   : > { %v5050_v25 = vpack.c.bf16 %v4555_v12, %v4552_v22  ;;  %v6411_v53 = vpop.f32.mrb[139].mxu1  ;;  %5089 = vrot.lane.b32.xlu0 %v5051_v2, %s6863_s30 }
 0x6a9   : > { %5087 = vrot.lane.b32.xlu1 %v5050_v25, %s6863_s30 }
 0x6aa   : > { %v4693_v54 = vpop.f32.mrb[112].mxu0 }
 0x6ab   : > { %v6428_v3 = vpop.f32.mrb[113].mxu0 }
 0x6ac   : > { %v4646_v34 = vpop.f32.mrb[140].mxu1  ;;  %v4696_v55 = vpop.f32.mrb[114].mxu0 }
 0x6ad   : > { %v5053_v41 = vpack.c.bf16 %v4696_v55, %v4693_v54  ;;  %v6422_v40 = vpop.f32.mrb[141].mxu1  ;;  %v6429_v58 = vpop.f32.mrb[115].mxu0 }
 0x6ae   : > { %v4649_v44 = vpop.f32.mrb[142].mxu1 }
 0x6af   : > { %v5052_v17 = vpack.c.bf16 %v4649_v44, %v4646_v34  ;;  %v6423_v50 = vpop.f32.mrb[143].mxu1  ;;  %5093 = vrot.lane.b32.xlu0 %v5053_v41, %s6863_s30 }
 0x6b1   : > { %5091 = vrot.lane.b32.xlu1 %v5052_v17, %s6863_s30 }
 0x6b2   : > { %v4787_v10 = vpop.f32.mrb[116].mxu0 }
 0x6b3   : > { %v6440_v22 = vpop.f32.mrb[117].mxu0 }
 0x6b4   : > { %v4740_v29 = vpop.f32.mrb[144].mxu1  ;;  %v4790_v2 = vpop.f32.mrb[118].mxu0 }
 0x6b5   : > { %v5055_v63 = vpack.c.bf16 %v4790_v2, %v4787_v10  ;;  %v6434_v43 = vpop.f32.mrb[145].mxu1  ;;  %v6441_v12 = vpop.f32.mrb[119].mxu0 }
 0x6b6   : > { %v4743_v25 = vpop.f32.mrb[146].mxu1 }
 0x6b7   : > { %v5054_v53 = vpack.c.bf16 %v4743_v25, %v4740_v29  ;;  %v6435_v3 = vpop.f32.mrb[147].mxu1  ;;  %5097 = vrot.lane.b32.xlu0 %v5055_v63, %s6863_s30 }
 0x6b9   : > { %5095 = vrot.lane.b32.xlu1 %v5054_v53, %s6863_s30 }
 0x6ba   : > { %v4881_v54 = vpop.f32.mrb[120].mxu0 }
 0x6bb   : > { %v6452_v34 = vpop.f32.mrb[121].mxu0 }
 0x6bc   : > { %v4834_v55 = vpop.f32.mrb[148].mxu1  ;;  %v4884_v41 = vpop.f32.mrb[122].mxu0 }
 0x6bd   : > { %v5057_v40 = vpack.c.bf16 %v4884_v41, %v4881_v54  ;;  %v6446_v58 = vpop.f32.mrb[149].mxu1  ;;  %v6453_v44 = vpop.f32.mrb[123].mxu0 }
 0x6be   : > { %v4837_v17 = vpop.f32.mrb[150].mxu1 }
 0x6bf   : > { %v5056_v50 = vpack.c.bf16 %v4837_v17, %v4834_v55  ;;  %v6447_v22 = vpop.f32.mrb[151].mxu1  ;;  %5101 = vrot.lane.b32.xlu0 %v5057_v40, %s6863_s30 }
 0x6c1   : > { %5099 = vrot.lane.b32.xlu1 %v5056_v50, %s6863_s30 }
 0x6c2   : > { %v4975_v10 = vpop.f32.mrb[124].mxu0 }
 0x6c3   : > { %v6464_v29 = vpop.f32.mrb[125].mxu0 }
 0x6c4   : > { %v4928_v2 = vpop.f32.mrb[152].mxu1  ;;  %v4978_v63 = vpop.f32.mrb[126].mxu0 }
 0x6c5   : > { %v5059_v43 = vpack.c.bf16 %v4978_v63, %v4975_v10  ;;  %v6458_v12 = vpop.f32.mrb[153].mxu1  ;;  %v6465_v25 = vpop.f32.mrb[127].mxu0  ;;  %v9577_v63 = vld [vmem:[#allocation4_spill] sm:$0xff] }
 0x6c6   : > { %v4931_v53 = vpop.f32.mrb[154].mxu1 }
 0x6c7   : > { %v5058_v3 = vpack.c.bf16 %v4931_v53, %v4928_v2  ;;  %v6459_v34 = vpop.f32.mrb[155].mxu1  ;;  %5105 = vrot.lane.b32.xlu0 %v5059_v43, %s6863_s30 }
 0x6c9   : > { %5103 = vrot.lane.b32.xlu1 %v5058_v3, %s6863_s30 }
 0x6cc   : > { %v5022_v54 = vpop.f32.mrb[156].mxu1 }
 0x6cd   : > { %v6470_v55 = vpop.f32.mrb[157].mxu1 }
 0x6ce   : > { %v5025_v41 = vpop.f32.mrb[158].mxu1 }
 0x6cf   : > { %v5060_v40 = vpack.c.bf16 %v5025_v41, %v5022_v54  ;;  %v6471_v58 = vpop.f32.mrb[159].mxu1  ;;  %v9578_v41 = vld [vmem:[#allocation8_spill] sm:$0xff] }
 0x6d1   : > { %5107 = vrot.lane.b32.xlu1 %v5060_v40, %s6863_s30 }
 0x701   : > { %v5078_v44 = vpop.permute.xlu0 %5077 }
 0x702   : > { %v5111_v17 = vsel %vm1150_vm2, %v5029_v62, %v5078_v44 }
 0x703   : > { %6476 = vmatprep.mubr.msk.bf16.mxu0 %vm347_vm0, %v5111_v17  ;;  %v9579_v17 = vld [vmem:[#allocation6_spill] sm:$0xff] }
 0x709   : > { %v5082_v50 = vpop.permute.xlu0 %5081 }
 0x70a   : > { %v5117_v29 = vsel %vm1150_vm2, %v5031_v27, %v5082_v50 }
 0x70b   : > { %v5080_v22 = vpop.permute.xlu1 %5079 }
 0x70c   : > { %v5114_v10 = vsel %vm1150_vm2, %v5030_v46, %v5080_v22 }
 0x70d   : > { %6477 = vmatmul.mubr.msk.bf16.vlgmr.msra.gmra.mrb[128].mxu0 %vm347_vm0, %v5114_v10 }
 0x70e   : > { %6480 = vmatprep.mubr.msk.bf16.mxu0 %vm347_vm0, %v5117_v29  ;;  %v9580_v29 = vld [vmem:[#allocation9_spill] sm:$0xff] }
 0x711   : > { %v5086_v6 = vpop.permute.xlu0 %5085 }
 0x712   : > { %v5123_v30 = vsel %vm1150_vm2, %v5033_v24, %v5086_v6 }
 0x713   : > { %v5084_v31 = vpop.permute.xlu1 %5083 }
 0x714   : > { %v5120_v62 = vsel %vm1150_vm2, %v5032_v1, %v5084_v31 }
 0x715   : > { %6481 = vmatmul.mubr.msk.bf16.gmra.mrb[132].mxu0 %vm347_vm0, %v5120_v62  ;;  %v9581_v62 = vld [vmem:[#allocation7_spill] sm:$0xff] }
 0x716   : > { %6484 = vmatprep.mubr.msk.bf16.mxu0 %vm347_vm0, %v5123_v30 }
 0x719   : > { %v5090_v36 = vpop.permute.xlu0 %5089 }
 0x71a   : > { %v5129_v51 = vsel %vm1150_vm2, %v5035_v61, %v5090_v36 }
 0x71b   : > { %v5088_v46 = vpop.permute.xlu1 %5087 }
 0x71c   : > { %v5126_v47 = vsel %vm1150_vm2, %v5034_v60, %v5088_v46 }
 0x71d   : > { %6485 = vmatmul.mubr.msk.bf16.gmra.mrb[136].mxu0 %vm347_vm0, %v5126_v47 }
 0x71e   : > { %6488 = vmatprep.mubr.msk.bf16.mxu0 %vm347_vm0, %v5129_v51 }
 0x721   : > { %v5094_v27 = vpop.permute.xlu0 %5093 }
 0x722   : > { %v5135_v1 = vsel %vm1150_vm2, %v5037_v56, %v5094_v27 }
 0x723   : > { %v5092_v4 = vpop.permute.xlu1 %5091 }
 0x724   : > { %v5132_v37 = vsel %vm1150_vm2, %v5036_v11, %v5092_v4 }
 0x725   : > { %6489 = vmatmul.mubr.msk.bf16.gmra.mrb[140].mxu0 %vm347_vm0, %v5132_v37 }
 0x726   : > { %6492 = vmatprep.mubr.msk.bf16.mxu0 %vm347_vm0, %v5135_v1  ;;  %v9582_v1 = vld [vmem:[#allocation12_spill] sm:$0xff] }
 0x729   : > { %v5098_v21 = vpop.permute.xlu0 %5097 }
 0x72a   : > { %v5141_v15 = vsel %vm1150_vm2, %v5039_v14, %v5098_v21 }
 0x72b   : > { %v5096_v19 = vpop.permute.xlu1 %5095 }
 0x72c   : > { %v5138_v24 = vsel %vm1150_vm2, %v5038_v13, %v5096_v19  ;;  %v9191_v13 = vld [vmem:[%s9337_s6] ss:$0 sm:$0xff] }
 0x72d   : > { %6493 = vmatmul.mubr.msk.bf16.gmra.mrb[144].mxu0 %vm347_vm0, %v5138_v24 }
 0x72e   : > { %6496 = vmatprep.mubr.msk.bf16.mxu0 %vm347_vm0, %v5141_v15  ;;  %v9583_v15 = vld [vmem:[#allocation10_spill] sm:$0xff] }
 0x731   : > { %v5102_v57 = vpop.permute.xlu0 %5101 }
 0x732   : > { %v5147_v9 = vsel %vm1150_vm2, %v5041_v59, %v5102_v57  ;;  %v9574_v59 = vld [vmem:[#allocation3_spill] sm:$0xff] }
 0x733   : > { %v5100_v60 = vpop.permute.xlu1 %5099 }
 0x734   : > { %v5144_v20 = vsel %vm1150_vm2, %v5040_v28, %v5100_v60 }
 0x735   : > { %6497 = vmatmul.mubr.msk.bf16.gmra.mrb[148].mxu0 %vm347_vm0, %v5144_v20 }
 0x736   : > { %6500 = vmatprep.mubr.msk.bf16.mxu0 %vm347_vm0, %v5147_v9  ;;  %v9584_v9 = vld [vmem:[#allocation13_spill] sm:$0xff] }
 0x739   : > { %v5106_v61 = vpop.permute.xlu0 %5105 }
 0x73a   : > { %v5153_v49 = vsel %vm1150_vm2, %v9572_v32, %v5106_v61 }
 0x73b   : > { %v5104_v16 = vpop.permute.xlu1 %5103 }
 0x73c   : > { %v5150_v11 = vsel %vm1150_vm2, %v9571_v0, %v5104_v16  ;;  %v9585_v0 = vld [vmem:[#allocation11_spill] sm:$0xff] }
 0x73d   : > { %6501 = vmatmul.mubr.msk.bf16.gmra.mrb[152].mxu0 %vm347_vm0, %v5150_v11 }
 0x73e   : > { %6504 = vmatprep.mubr.msk.bf16.mxu0 %vm347_vm0, %v5153_v49 }
 0x743   : > { %v5108_v56 = vpop.permute.xlu1 %5107 }
 0x744   : > { %v5156_v23 = vsel %vm1150_vm2, %v9573_v39, %v5108_v56 }
 0x745   : > { %6505 = vmatmul.mubr.msk.bf16.gmra.mrb[156].mxu0 %vm347_vm0, %v5156_v23 }
 0x7e0   : > { %v6478_v52 = vpop.f32.mrb[128].mxu0 }
 0x7e1   : > { %v5255_v35 = vadd.f32 %v6478_v52, %v9191_v13  ;;  %v5246_v14 = vpop.f32.mrb[129].mxu0 }
 0x7e2   : > { %v5247_v38 = vadd.f32 %v9191_v13, %v5246_v14  ;;  %v6479_v8 = vpop.f32.mrb[130].mxu0  ;;  %v9586_v14 = vld [vmem:[#allocation16_spill] sm:$0xff] }
 0x7e3   : > { %v5375_v33 = vadd.f32 %v9574_v59, %v5255_v35  ;;  %v5258_v7 = vadd.f32 %v6479_v8, %v9191_v13  ;;  %v5249_v18 = vpop.f32.mrb[131].mxu0 }
 0x7e4   : > { %v5373_v28 = vadd.f32 %v9575_v42, %v5247_v38  ;;  %v5250_v45 = vadd.f32 %v9191_v13, %v5249_v18 }
 0x7e5   : > { %v5770_v26 = vpack.c.bf16 %v5375_v33, %v5375_v33  ;;  %v5376_v48 = vadd.f32 %v9576_v5, %v5258_v7  ;;  %v9587_v33 = vld [vmem:[#allocation14_spill] sm:$0xff]  ;;  %v9589_v5 = vld [vmem:[#allocation15_spill] sm:$0xff] }
 0x7e6   : > { %v5768_v2 = vpack.c.bf16 %v5373_v28, %v5373_v28  ;;  %v5374_v43 = vadd.f32 %v9577_v63, %v5250_v45  ;;  %v9588_v28 = vld [vmem:[#allocation17_spill] sm:$0xff] }
 0x7e7   : > { %5536 = vst.msk [vmem:[%s9202_s12 + $0x8] sm:$0xf] %vm5533_vm3, %v5770_v26  ;;  %v5771_v12 = vpack.c.bf16 %v5376_v48, %v5376_v48 }
 0x7e8   : > { %5534 = vst.msk [vmem:[%s9202_s12] sm:$0xf] %vm5533_vm3, %v5768_v2  ;;  %v5769_v25 = vpack.c.bf16 %v5374_v43, %v5374_v43  ;;  %v6482_v53 = vpop.f32.mrb[132].mxu0 }
 0x7e9   : > { %5537 = vst.msk [vmem:[%s9202_s12 + $0xc] sm:$0xf] %vm5533_vm3, %v5771_v12  ;;  %v5271_v3 = vadd.f32 %v6482_v53, %v9191_v13  ;;  %v5262_v34 = vpop.f32.mrb[133].mxu0 }
 0x7ea   : > { %5535 = vst.msk [vmem:[%s9202_s12 + $0x4] sm:$0xf] %vm5533_vm3, %v5769_v25  ;;  %v5263_v54 = vadd.f32 %v9191_v13, %v5262_v34  ;;  %v6483_v55 = vpop.f32.mrb[134].mxu0  ;;  %v9590_v34 = vld [vmem:[#allocation20_spill] sm:$0xff] }
 0x7eb   : > { %v5379_v40 = vadd.f32 %v9578_v41, %v5271_v3  ;;  %v5274_v58 = vadd.f32 %v6483_v55, %v9191_v13  ;;  %v5265_v44 = vpop.f32.mrb[135].mxu0 }
 0x7ec   : > { %v5377_v50 = vadd.f32 %v9579_v17, %v5263_v54  ;;  %v5266_v22 = vadd.f32 %v9191_v13, %v5265_v44 }
 0x7ed   : > { %v5774_v10 = vpack.c.bf16 %v5379_v40, %v5379_v40  ;;  %v5380_v6 = vadd.f32 %v9580_v29, %v5274_v58  ;;  %v9591_v40 = vld [vmem:[#allocation18_spill] sm:$0xff]  ;;  %v9593_v29 = vld [vmem:[#allocation19_spill] sm:$0xff] }
 0x7ee   : > { %v5772_v31 = vpack.c.bf16 %v5377_v50, %v5377_v50  ;;  %v5378_v30 = vadd.f32 %v9581_v62, %v5266_v22  ;;  %v9592_v50 = vld [vmem:[#allocation21_spill] sm:$0xff] }
 0x7ef   : > { %5540 = vst.msk [vmem:[%s9202_s12 + $0x18] sm:$0xf] %vm5533_vm3, %v5774_v10  ;;  %v5775_v36 = vpack.c.bf16 %v5380_v6, %v5380_v6 }
 0x7f0   : > { %5538 = vst.msk [vmem:[%s9202_s12 + $0x10] sm:$0xf] %vm5533_vm3, %v5772_v31  ;;  %v5773_v46 = vpack.c.bf16 %v5378_v30, %v5378_v30  ;;  %v6486_v47 = vpop.f32.mrb[136].mxu0 }
 0x7f1   : > { %5541 = vst.msk [vmem:[%s9202_s12 + $0x1c] sm:$0xf] %vm5533_vm3, %v5775_v36  ;;  %v5287_v51 = vadd.f32 %v6486_v47, %v9191_v13  ;;  %v5278_v27 = vpop.f32.mrb[137].mxu0 }
 0x7f2   : > { %5539 = vst.msk [vmem:[%s9202_s12 + $0x14] sm:$0xf] %vm5533_vm3, %v5773_v46  ;;  %v5279_v4 = vadd.f32 %v9191_v13, %v5278_v27  ;;  %v6487_v37 = vpop.f32.mrb[138].mxu0  ;;  %v9594_v27 = vld [vmem:[#allocation24_spill] sm:$0xff] }
 0x7f3   : > { %v5383_v21 = vadd.f32 %v9582_v1, %v5287_v51  ;;  %v5290_v19 = vadd.f32 %v6487_v37, %v9191_v13  ;;  %v5281_v24 = vpop.f32.mrb[139].mxu0 }
 0x7f4   : > { %v5381_v57 = vadd.f32 %v9583_v15, %v5279_v4  ;;  %v5282_v60 = vadd.f32 %v9191_v13, %v5281_v24 }
 0x7f5   : > { %v5778_v20 = vpack.c.bf16 %v5383_v21, %v5383_v21  ;;  %v5384_v61 = vadd.f32 %v9584_v9, %v5290_v19  ;;  %v9595_v21 = vld [vmem:[#allocation22_spill] sm:$0xff]  ;;  %v9597_v9 = vld [vmem:[#allocation23_spill] sm:$0xff] }
 0x7f6   : > { %v5776_v16 = vpack.c.bf16 %v5381_v57, %v5381_v57  ;;  %v5382_v11 = vadd.f32 %v9585_v0, %v5282_v60  ;;  %v9596_v57 = vld [vmem:[#allocation25_spill] sm:$0xff] }
 0x7f7   : > { %5544 = vst.msk [vmem:[%s9202_s12 + $0x28] sm:$0xf] %vm5533_vm3, %v5778_v20  ;;  %v5779_v32 = vpack.c.bf16 %v5384_v61, %v5384_v61 }
 0x7f8   : > { %5542 = vst.msk [vmem:[%s9202_s12 + $0x20] sm:$0xf] %vm5533_vm3, %v5776_v16  ;;  %v5777_v49 = vpack.c.bf16 %v5382_v11, %v5382_v11  ;;  %v6490_v56 = vpop.f32.mrb[140].mxu0 }
 0x7f9   : > { %5545 = vst.msk [vmem:[%s9202_s12 + $0x2c] sm:$0xf] %vm5533_vm3, %v5779_v32  ;;  %v5303_v39 = vadd.f32 %v6490_v56, %v9191_v13  ;;  %v5294_v23 = vpop.f32.mrb[141].mxu0 }
 0x7fa   : > { %5543 = vst.msk [vmem:[%s9202_s12 + $0x24] sm:$0xf] %vm5533_vm3, %v5777_v49  ;;  %v5295_v52 = vadd.f32 %v9191_v13, %v5294_v23  ;;  %v6491_v35 = vpop.f32.mrb[142].mxu0  ;;  %v9598_v23 = vld [vmem:[#allocation28_spill] sm:$0xff] }
 0x7fb   : > { %v5387_v38 = vadd.f32 %v9586_v14, %v5303_v39  ;;  %v5306_v8 = vadd.f32 %v6491_v35, %v9191_v13  ;;  %v5297_v59 = vpop.f32.mrb[143].mxu0 }
 0x7fc   : > { %v5385_v7 = vadd.f32 %v9587_v33, %v5295_v52  ;;  %v5298_v18 = vadd.f32 %v9191_v13, %v5297_v59 }
 0x7fd   : > { %v5782_v42 = vpack.c.bf16 %v5387_v38, %v5387_v38  ;;  %v5388_v45 = vadd.f32 %v9588_v28, %v5306_v8  ;;  %v9599_v38 = vld [vmem:[#allocation26_spill] sm:$0xff]  ;;  %v9601_v28 = vld [vmem:[#allocation27_spill] sm:$0xff] }
 0x7fe   : > { %v5780_v26 = vpack.c.bf16 %v5385_v7, %v5385_v7  ;;  %v5386_v48 = vadd.f32 %v9589_v5, %v5298_v18  ;;  %v9600_v7 = vld [vmem:[#allocation29_spill] sm:$0xff] }
 0x7ff   : > { %5548 = vst.msk [vmem:[%s9202_s12 + $0x38] sm:$0xf] %vm5533_vm3, %v5782_v42  ;;  %v5783_v2 = vpack.c.bf16 %v5388_v45, %v5388_v45 }
 0x800   : > { %5546 = vst.msk [vmem:[%s9202_s12 + $0x30] sm:$0xf] %vm5533_vm3, %v5780_v26  ;;  %v5781_v63 = vpack.c.bf16 %v5386_v48, %v5386_v48  ;;  %v6494_v43 = vpop.f32.mrb[144].mxu0 }
 0x801   : > { %5549 = vst.msk [vmem:[%s9202_s12 + $0x3c] sm:$0xf] %vm5533_vm3, %v5783_v2  ;;  %v5319_v12 = vadd.f32 %v6494_v43, %v9191_v13  ;;  %v5310_v25 = vpop.f32.mrb[145].mxu0 }
 0x802   : > { %5547 = vst.msk [vmem:[%s9202_s12 + $0x34] sm:$0xf] %vm5533_vm3, %v5781_v63  ;;  %v5311_v53 = vadd.f32 %v9191_v13, %v5310_v25  ;;  %v6495_v3 = vpop.f32.mrb[146].mxu0  ;;  %v9602_v25 = vld [vmem:[#allocation31_spill] sm:$0xff] }
 0x803   : > { %v5391_v54 = vadd.f32 %v9590_v34, %v5319_v12  ;;  %v5322_v55 = vadd.f32 %v6495_v3, %v9191_v13  ;;  %v5313_v41 = vpop.f32.mrb[147].mxu0 }
 0x804   : > { %v5389_v58 = vadd.f32 %v9591_v40, %v5311_v53  ;;  %v5314_v44 = vadd.f32 %v9191_v13, %v5313_v41 }
 0x805   : > { %v5786_v17 = vpack.c.bf16 %v5391_v54, %v5391_v54  ;;  %v5392_v22 = vadd.f32 %v9592_v50, %v5322_v55  ;;  %v9603_v54 = vld [vmem:[#allocation30_spill] sm:$0xff]  ;;  %v9605_v50 = vld [vmem:[#allocation32_spill] sm:$0xff] }
 0x806   : > { %v5784_v10 = vpack.c.bf16 %v5389_v58, %v5389_v58  ;;  %v5390_v6 = vadd.f32 %v9593_v29, %v5314_v44  ;;  %v9604_v58 = vld [vmem:[#allocation33_spill] sm:$0xff] }
 0x807   : > { %5552 = vst.msk [vmem:[%s9202_s12 + $0x48] sm:$0xf] %vm5533_vm3, %v5786_v17  ;;  %v5787_v31 = vpack.c.bf16 %v5392_v22, %v5392_v22 }
 0x808   : > { %5550 = vst.msk [vmem:[%s9202_s12 + $0x40] sm:$0xf] %vm5533_vm3, %v5784_v10  ;;  %v5785_v62 = vpack.c.bf16 %v5390_v6, %v5390_v6  ;;  %v6498_v30 = vpop.f32.mrb[148].mxu0 }
 0x809   : > { %5553 = vst.msk [vmem:[%s9202_s12 + $0x4c] sm:$0xf] %vm5533_vm3, %v5787_v31  ;;  %v5335_v36 = vadd.f32 %v6498_v30, %v9191_v13  ;;  %v5326_v46 = vpop.f32.mrb[149].mxu0 }
 0x80a   : > { %5551 = vst.msk [vmem:[%s9202_s12 + $0x44] sm:$0xf] %vm5533_vm3, %v5785_v62  ;;  %v5327_v47 = vadd.f32 %v9191_v13, %v5326_v46  ;;  %v6499_v51 = vpop.f32.mrb[150].mxu0 }
 0x80b   : > { %v5395_v4 = vadd.f32 %v9594_v27, %v5335_v36  ;;  %v5338_v37 = vadd.f32 %v6499_v51, %v9191_v13  ;;  %v5329_v1 = vpop.f32.mrb[151].mxu0 }
 0x80c   : > { %v5393_v19 = vadd.f32 %v9595_v21, %v5327_v47  ;;  %v5330_v24 = vadd.f32 %v9191_v13, %v5329_v1 }
 0x80d   : > { %v5790_v15 = vpack.c.bf16 %v5395_v4, %v5395_v4  ;;  %v5396_v60 = vadd.f32 %v9596_v57, %v5338_v37 }
 0x80e   : > { %v5788_v20 = vpack.c.bf16 %v5393_v19, %v5393_v19  ;;  %v5394_v61 = vadd.f32 %v9597_v9, %v5330_v24 }
 0x80f   : > { %5556 = vst.msk [vmem:[%s9202_s12 + $0x58] sm:$0xf] %vm5533_vm3, %v5790_v15  ;;  %v5791_v16 = vpack.c.bf16 %v5396_v60, %v5396_v60 }
 0x810   : > { %5554 = vst.msk [vmem:[%s9202_s12 + $0x50] sm:$0xf] %vm5533_vm3, %v5788_v20  ;;  %v5789_v0 = vpack.c.bf16 %v5394_v61, %v5394_v61  ;;  %v6502_v11 = vpop.f32.mrb[152].mxu0 }
 0x811   : > { %5557 = vst.msk [vmem:[%s9202_s12 + $0x5c] sm:$0xf] %vm5533_vm3, %v5791_v16  ;;  %v5351_v32 = vadd.f32 %v6502_v11, %v9191_v13  ;;  %v5342_v49 = vpop.f32.mrb[153].mxu0 }
 0x812   : > { %5555 = vst.msk [vmem:[%s9202_s12 + $0x54] sm:$0xf] %vm5533_vm3, %v5789_v0  ;;  %v5343_v56 = vadd.f32 %v9191_v13, %v5342_v49  ;;  %v6503_v39 = vpop.f32.mrb[154].mxu0 }
 0x813   : > { %v5399_v52 = vadd.f32 %v9598_v23, %v5351_v32  ;;  %v5354_v35 = vadd.f32 %v6503_v39, %v9191_v13  ;;  %v5345_v14 = vpop.f32.mrb[155].mxu0 }
 0x814   : > { %v5397_v8 = vadd.f32 %v9599_v38, %v5343_v56  ;;  %v5346_v59 = vadd.f32 %v9191_v13, %v5345_v14 }
 0x815   : > { %v5794_v33 = vpack.c.bf16 %v5399_v52, %v5399_v52  ;;  %v5400_v18 = vadd.f32 %v9600_v7, %v5354_v35 }
 0x816   : > { %v5792_v42 = vpack.c.bf16 %v5397_v8, %v5397_v8  ;;  %v5398_v45 = vadd.f32 %v9601_v28, %v5346_v59 }
 0x817   : > { %5560 = vst.msk [vmem:[%s9202_s12 + $0x68] sm:$0xf] %vm5533_vm3, %v5794_v33  ;;  %v5795_v26 = vpack.c.bf16 %v5400_v18, %v5400_v18 }
 0x818   : > { %5558 = vst.msk [vmem:[%s9202_s12 + $0x60] sm:$0xf] %vm5533_vm3, %v5792_v42  ;;  %v5793_v5 = vpack.c.bf16 %v5398_v45, %v5398_v45  ;;  %v6506_v48 = vpop.f32.mrb[156].mxu0 }
 0x819   : > { %5561 = vst.msk [vmem:[%s9202_s12 + $0x6c] sm:$0xf] %vm5533_vm3, %v5795_v26  ;;  %v5367_v2 = vadd.f32 %v6506_v48, %v9191_v13  ;;  %v5358_v63 = vpop.f32.mrb[157].mxu0 }
 0x81a   : > { %5559 = vst.msk [vmem:[%s9202_s12 + $0x64] sm:$0xf] %vm5533_vm3, %v5793_v5  ;;  %v5359_v43 = vadd.f32 %v9191_v13, %v5358_v63  ;;  %v6507_v12 = vpop.f32.mrb[158].mxu0 }
 0x81b   : > { %v5403_v53 = vadd.f32 %v9602_v25, %v5367_v2  ;;  %v5370_v3 = vadd.f32 %v6507_v12, %v9191_v13  ;;  %v5361_v34 = vpop.f32.mrb[159].mxu0 }
 0x81c   : > { %v5401_v55 = vadd.f32 %v9603_v54, %v5359_v43  ;;  %v5362_v41 = vadd.f32 %v9191_v13, %v5361_v34 }
 0x81d   : > { %v5798_v40 = vpack.c.bf16 %v5403_v53, %v5403_v53  ;;  %v5404_v44 = vadd.f32 %v9604_v58, %v5370_v3 }
 0x81e   : > { %v5796_v17 = vpack.c.bf16 %v5401_v55, %v5401_v55  ;;  %v5402_v22 = vadd.f32 %v9605_v50, %v5362_v41 }
 0x81f   : > { %5564 = vst.msk [vmem:[%s9202_s12 + $0x78] sm:$0xf] %vm5533_vm3, %v5798_v40  ;;  %v5799_v10 = vpack.c.bf16 %v5404_v44, %v5404_v44 }
 0x820   : > { %5562 = vst.msk [vmem:[%s9202_s12 + $0x70] sm:$0xf] %vm5533_vm3, %v5796_v17  ;;  %v5797_v29 = vpack.c.bf16 %v5402_v22, %v5402_v22 }
 0x821   : > { %5565 = vst.msk [vmem:[%s9202_s12 + $0x7c] sm:$0xf] %vm5533_vm3, %v5799_v10 }
 0x822   : > { %5563 = vst.msk [vmem:[%s9202_s12 + $0x74] sm:$0xf] %vm5533_vm3, %v5797_v29 }
 0x823 PF: > { %s17_s24 = sadd.s32 1, %s6856_s24  }
 0x824   : > { %p14_p4 = scmp.ge.s32.totalorder %s17_s24, 4  }
 0x826   :  { %16 = sbr.rel (!%p14_p4) target bundleno = 1 (0x1), region = 78 }

</bundles_post_ra>
